<compile_context>
chip_gen: v7x
topology: tpu7x:2x2x1
jax: 0.10.0
libtpu: 0.0.40
codegen_flags: <defaults>
</compile_context>

<pallas_src>
import jax
import jax.numpy as jnp
import numpy as np
from jax import lax
from jax.experimental import pallas as pl
from jax.experimental.pallas import tpu as pltpu

_VMEM_LIMIT = 48 * 1024 * 1024  # leave headroom on v7x's 64 MiB physical VMEM


# ---------------------------- small helpers ----------------------------

def _round_up(n, m):
    return ((n + m - 1) // m) * m


def _pad_last(a, target):
    pad = target - a.shape[-1]
    if pad == 0:
        return a
    cfg = [(0, 0)] * (a.ndim - 1) + [(0, pad)]
    return jnp.pad(a, cfg)


def _prep_w3x3(w_hwio, cin_pad, cout_pad):
    # (3,3,Cin,Cout) -> (9, cin_pad, cout_pad) bf16, tap-major (dy*3+dx).
    kh, kw, ci, co = w_hwio.shape
    w = jnp.pad(w_hwio, ((0, 0), (0, 0), (0, cin_pad - ci), (0, cout_pad - co)))
    return w.reshape(kh * kw, cin_pad, cout_pad).astype(jnp.bfloat16)


def _cout_tiles(cout_pad):
    # Single full-dim block up to 256 lanes (feeds the 256-wide MXU on
    # v6e/v7x); 256- or 128-wide tiles beyond that.
    if cout_pad <= 256:
        return cout_pad
    return 256 if cout_pad % 256 == 0 else 128


# ---------------------------- Pallas kernels ----------------------------

def _make_bn_stats_kernel(M, TM):
    """Per-block masked sum and centered sum-of-squares over a (TM, C) block."""
    def kernel(x_ref, sum_ref, ssq_ref):
        i = pl.program_id(0)
        rows = lax.broadcasted_iota(jnp.int32, (TM, 1), 0) + i * TM
        valid = rows < M
        cnt = jnp.minimum(TM, M - i * TM).astype(jnp.float32)
        xv = x_ref[...].astype(jnp.float32)
        x = jnp.where(valid, xv, 0.0)
        s = jnp.sum(x, axis=0, keepdims=True)                 # (1, C)
        mu = s / cnt
        d = jnp.where(valid, xv - mu, 0.0)
        q = jnp.sum(d * d, axis=0, keepdims=True)             # (1, C)
        sum_ref[...] = jnp.broadcast_to(s[None], sum_ref.shape)
        ssq_ref[...] = jnp.broadcast_to(q[None], ssq_ref.shape)
    return kernel


def normalize_relu_kernel(x_ref, scale_ref, shift_ref, o_ref):
    y = x_ref[...].astype(jnp.float32) * scale_ref[...] + shift_ref[...]
    o_ref[...] = jnp.maximum(y, 0.0).astype(o_ref.dtype)


def _make_conv3x3_s1_kernel(H, W, Cin, TCO, has_res, emit_stats):
    """Fused BN-normalize + ReLU + 3x3/stride-1 conv (+bias, +optional residual,
    +optional BN2 partial statistics).

    The normalized activation is written once per image (co == 0) into a FLAT
    zero-padded bf16 scratch of shape ((H+3)*(W+2), Cin); every tap is then a
    contiguous row-range slice -> 9 plain 2-D bf16 MXU matmuls into an f32
    accumulator, no per-tap strided reshape copies.
    """
    Wp = W + 2
    O = H * Wp                # full-width (incl. 2 junk columns) output rows
    R = (H + 3) * Wp          # flat scratch rows (padded image + margin)
    HW = float(H * W)

    def kernel(*refs):
        it = iter(refs)
        x_ref = next(it)
        scale_ref = next(it)
        shift_ref = next(it)
        w_ref = next(it)
        b_ref = next(it)
        r_ref = next(it) if has_res else None
        o_ref = next(it)
        sum_ref = next(it) if emit_stats else None
        ssq_ref = next(it) if emit_stats else None
        abuf = next(it)       # (R, Cin) bf16 flat padded-activation scratch

        co = pl.program_id(1)

        @pl.when(co == 0)
        def _fill():
            xv = x_ref[...].astype(jnp.float32)                       # (H, W, Cin)
            a = jnp.maximum(xv * scale_ref[...] + shift_ref[...], 0.0)
            a = a.astype(jnp.bfloat16)
            zc = jnp.zeros((H, 1, Cin), jnp.bfloat16)
            interior = jnp.concatenate([zc, a, zc], axis=1).reshape(O, Cin)
            # zero rim: top padded row, bottom padded row + margin rows
            abuf[0:Wp, :] = jnp.zeros((Wp, Cin), jnp.bfloat16)
            abuf[(H + 1) * Wp:R, :] = jnp.zeros((2 * Wp, Cin), jnp.bfloat16)
            abuf[Wp:(H + 1) * Wp, :] = interior

        acc = jnp.zeros((O, TCO), jnp.float32)
        for t in range(9):
            dy, dx = divmod(t, 3)
            off = dy * Wp + dx
            acc = acc + jnp.dot(abuf[off:off + O, :], w_ref[t],
                                preferred_element_type=jnp.float32)

        out = acc.reshape(H, Wp, TCO)[:, :W, :] + b_ref[...]          # (H, W, TCO) f32
        if has_res:
            out = out + r_ref[...].astype(jnp.float32)
        if emit_stats:
            s = jnp.sum(jnp.sum(out, axis=0), axis=0, keepdims=True)  # (1, TCO)
            mu = s / HW
            d = out - mu
            q = jnp.sum(jnp.sum(d * d, axis=0), axis=0, keepdims=True)
            sum_ref[...] = jnp.broadcast_to(s[None], sum_ref.shape)
            ssq_ref[...] = jnp.broadcast_to(q[None], ssq_ref.shape)
        o_ref[...] = out.astype(o_ref.dtype)

    return kernel


def _make_conv3x3_s2_kernel(Ho, Wo, Wp2, Cin, Cm, TCO):
    """3x3 / stride-2 conv over flattened parity planes of the padded
    activation, with the 1x1/stride-2 projection residual (conv3) fused in.
    Each tap is a contiguous row-range slice of one parity plane."""
    O2 = Ho * Wp2

    def kernel(ap_ref, w_ref, b_ref, xs_ref, w3_ref, b3_ref, o_ref):
        acc = jnp.zeros((O2, TCO), jnp.float32)
        for t in range(9):
            dy, dx = divmod(t, 3)
            off = (dy // 2) * Wp2 + (dx // 2)
            tap = ap_ref[dy % 2, dx % 2, off:off + O2, :]              # (O2, Cm) bf16
            acc = acc + jnp.dot(tap, w_ref[t], preferred_element_type=jnp.float32)
        out = acc.reshape(Ho, Wp2, TCO)[:, :Wo, :] + b_ref[...]        # drop junk col
        # fused 1x1 stride-2 projection residual: xs @ w3 + b3
        xs = xs_ref[...].astype(jnp.bfloat16).reshape(Ho * Wo, Cin)
        proj = jnp.dot(xs, w3_ref[...], preferred_element_type=jnp.float32)
        o_ref[...] = (out + proj.reshape(Ho, Wo, TCO) + b3_ref[...]).astype(o_ref.dtype)

    return kernel


# ---------------------------- Pallas wrappers ----------------------------

def bn_scale_shift(x2d, gamma, beta):
    """Training-mode BatchNorm2d batch stats over the rows of x2d (M, C)
    -> per-channel (scale, shift):  y = x * scale + shift."""
    M, C = x2d.shape
    TM = min(1024, _round_up(M, 8))
    G = pl.cdiv(M, TM)

    psum, pssq = pl.pallas_call(
        _make_bn_stats_kernel(M, TM),
        grid=(G,),
        in_specs=[pl.BlockSpec((TM, C), lambda i: (i, 0))],
        out_specs=(pl.BlockSpec((1, 8, C), lambda i: (i, 0, 0)),
                   pl.BlockSpec((1, 8, C), lambda i: (i, 0, 0))),
        out_shape=(jax.ShapeDtypeStruct((G, 8, C), jnp.float32),
                   jax.ShapeDtypeStruct((G, 8, C), jnp.float32)),
        compiler_params=pltpu.CompilerParams(dimension_semantics=("parallel",)),
    )(x2d)

    bsum = psum[:, 0, :]                                     # (G, C)
    bssq = pssq[:, 0, :]
    counts = jnp.minimum(TM, M - jnp.arange(G) * TM).astype(jnp.float32)[:, None]
    bmean = bsum / counts
    mean = jnp.sum(bsum, axis=0) / M
    # Chan's parallel combine (stable, biased variance as in PyTorch training).
    var = (jnp.sum(bssq, axis=0)
           + jnp.sum(counts * (bmean - mean) ** 2, axis=0)) / M
    inv = lax.rsqrt(var + 1e-5)
    scale = gamma * inv
    shift = beta - mean * scale
    return scale.reshape(1, C), shift.reshape(1, C)


def _combine_fused_stats(bsum, bssq, per_block, total, gamma, beta):
    """Combine the per-image (sum, centered SSQ) partials emitted by the conv1
    kernel into BN2 scale/shift (Chan's formula, biased variance)."""
    bmean = bsum / per_block
    mean = jnp.sum(bsum, axis=0) / total
    var = (jnp.sum(bssq, axis=0)
           + per_block * jnp.sum((bmean - mean) ** 2, axis=0)) / total
    inv = lax.rsqrt(var + 1e-5)
    scale = gamma * inv
    shift = beta - mean * scale
    C = scale.shape[-1]
    return scale.reshape(1, C), shift.reshape(1, C)


def normalize_relu(x_nhwc, scale, shift):
    N, H, W, C = x_nhwc.shape
    M = N * H * W
    TM = min(1024, _round_up(M, 8))
    G = pl.cdiv(M, TM)
    out = pl.pallas_call(
        normalize_relu_kernel,
        grid=(G,),
        in_specs=[pl.BlockSpec((TM, C), lambda i: (i, 0)),
                  pl.BlockSpec((1, C), lambda i: (0, 0)),
                  pl.BlockSpec((1, C), lambda i: (0, 0))],
        out_specs=pl.BlockSpec((TM, C), lambda i: (i, 0)),
        out_shape=jax.ShapeDtypeStruct((M, C), jnp.bfloat16),
        compiler_params=pltpu.CompilerParams(dimension_semantics=("parallel",)),
    )(x_nhwc.reshape(M, C), scale, shift)
    return out.reshape(N, H, W, C)


def conv3x3_s1_fused(x, scale, shift, w9, b, residual=None,
                     emit_stats=False, out_dtype=jnp.float32):
    # x: (N, H, W, Cin) pre-BN activation; w9: (9, Cin, Cop) bf16; b: (1, Cop) f32
    # residual: optional (N, H, W, Cop) added in f32 to the conv output.
    N, H, W, Cin = x.shape
    Cop = w9.shape[-1]
    TCO = _cout_tiles(Cop)
    n_co = Cop // TCO
    Wp = W + 2
    R = (H + 3) * Wp
    has_res = residual is not None

    in_specs = [
        pl.BlockSpec((None, H, W, Cin), lambda n, co: (n, 0, 0, 0)),
        pl.BlockSpec((1, Cin), lambda n, co: (0, 0)),
        pl.BlockSpec((1, Cin), lambda n, co: (0, 0)),
        pl.BlockSpec((9, Cin, TCO), lambda n, co: (0, 0, co)),
        pl.BlockSpec((1, TCO), lambda n, co: (0, co)),
    ]
    args = [x, scale, shift, w9, b]
    if has_res:
        in_specs.append(pl.BlockSpec((None, H, W, TCO), lambda n, co: (n, 0, 0, co)))
        args.append(residual)

    out_specs = [pl.BlockSpec((None, H, W, TCO), lambda n, co: (n, 0, 0, co))]
    out_shapes = [jax.ShapeDtypeStruct((N, H, W, Cop), out_dtype)]
    if emit_stats:
        out_specs += [pl.BlockSpec((1, 8, TCO), lambda n, co: (n, 0, co))] * 2
        out_shapes += [jax.ShapeDtypeStruct((N, 8, Cop), jnp.float32)] * 2

    return pl.pallas_call(
        _make_conv3x3_s1_kernel(H, W, Cin, TCO, has_res, emit_stats),
        grid=(N, n_co),
        in_specs=in_specs,
        out_specs=tuple(out_specs) if len(out_specs) > 1 else out_specs[0],
        out_shape=tuple(out_shapes) if len(out_shapes) > 1 else out_shapes[0],
        scratch_shapes=[pltpu.VMEM((R, Cin), jnp.bfloat16)],
        compiler_params=pltpu.CompilerParams(
            # co axis "arbitrary": the scratch filled at co == 0 is reused by the
            # later Cout blocks of the same image, so it must stay on one core.
            dimension_semantics=("parallel", "arbitrary"),
            vmem_limit_bytes=_VMEM_LIMIT),
    )(*args)


def conv3x3_s2_proj(planes, Ho, Wo, Wp2, w9, b, xs, w3, b3):
    # planes: (N, 2, 2, Rp, Cm) bf16 flattened parity planes of the padded activation
    # xs:     (N, Ho, Wo, Cin) f32 stride-2-subsampled raw input (fused 1x1 proj)
    N = planes.shape[0]
    Rp, Cm = planes.shape[3], planes.shape[4]
    Cin = xs.shape[-1]
    Cop = w9.shape[-1]
    TCO = _cout_tiles(Cop)
    n_co = Cop // TCO

    return pl.pallas_call(
        _make_conv3x3_s2_kernel(Ho, Wo, Wp2, Cin, Cm, TCO),
        grid=(N, n_co),
        in_specs=[
            pl.BlockSpec((None, 2, 2, Rp, Cm), lambda n, co: (n, 0, 0, 0, 0)),
            pl.BlockSpec((9, Cm, TCO), lambda n, co: (0, 0, co)),
            pl.BlockSpec((1, TCO), lambda n, co: (0, co)),
            pl.BlockSpec((None, Ho, Wo, Cin), lambda n, co: (n, 0, 0, 0)),
            pl.BlockSpec((Cin, TCO), lambda n, co: (0, co)),
            pl.BlockSpec((1, TCO), lambda n, co: (0, co)),
        ],
        out_specs=pl.BlockSpec((None, Ho, Wo, TCO), lambda n, co: (n, 0, 0, co)),
        out_shape=jax.ShapeDtypeStruct((N, Ho, Wo, Cop), jnp.float32),
        compiler_params=pltpu.CompilerParams(
            dimension_semantics=("parallel", "arbitrary"),
            vmem_limit_bytes=_VMEM_LIMIT),
    )(planes, w9, b, xs, w3, b3)


# ---------------------------- ResConv2d module ----------------------------

def init_resconv2d_params(key, dimin, dimout, stride=1):
    ks = jax.random.split(key, 10)
    p = {
        "bn1_gamma": jax.random.uniform(ks[0], (dimin,), jnp.float32, 0.5, 1.5),
        "bn1_beta":  jax.random.normal(ks[1], (dimin,), jnp.float32) * 0.1,
        "w1": jax.random.normal(ks[2], (3, 3, dimin, dimout), jnp.float32) * 0.1,
        "b1": jax.random.normal(ks[3], (dimout,), jnp.float32) * 0.1,
        "bn2_gamma": jax.random.uniform(ks[4], (dimout,), jnp.float32, 0.5, 1.5),
        "bn2_beta":  jax.random.normal(ks[5], (dimout,), jnp.float32) * 0.1,
        "w2": jax.random.normal(ks[6], (3, 3, dimout, dimout), jnp.float32) * 0.1,
        "b2": jax.random.normal(ks[7], (dimout,), jnp.float32) * 0.1,
    }
    if stride == 2:
        p["w3"] = jax.random.normal(ks[8], (dimin, dimout), jnp.float32) * 0.1
        p["b3"] = jax.random.normal(ks[9], (dimout,), jnp.float32) * 0.1
    return p


def resconv2d_forward(x_nchw, p, stride=1):
    # x + conv2(conv1(x))   (1x1/stride-2 projection of x when stride == 2)
    x = jnp.transpose(x_nchw, (0, 2, 3, 1)).astype(jnp.float32)   # NCHW -> NHWC
    N, H, W, Cin = x.shape
    Cout = p["b1"].shape[0]
    # channels live unpadded in HBM; only pad/tile Cout when it exceeds 256
    Cout_pad = Cout if Cout <= 256 else _round_up(Cout, 128)

    # conv1 = BnRelu(dimin) -> Conv3x3(stride=1): BN1+ReLU+conv fused, bf16 out,
    # and the kernel also emits the BN2 per-image partial statistics.
    s1, t1 = bn_scale_shift(x.reshape(N * H * W, Cin), p["bn1_gamma"], p["bn1_beta"])
    w1 = _prep_w3x3(p["w1"], Cin, Cout_pad)
    b1 = _pad_last(p["b1"], Cout_pad).reshape(1, Cout_pad)
    c1, c1_sum, c1_ssq = conv3x3_s1_fused(x, s1, t1, w1, b1,
                                          emit_stats=True, out_dtype=jnp.bfloat16)

    # BN2 scale/shift from the fused partials (no extra pass over c1).
    g2 = _pad_last(p["bn2_gamma"], Cout_pad)
    be2 = _pad_last(p["bn2_beta"], Cout_pad)
    sc2, sh2 = _combine_fused_stats(c1_sum[:, 0, :], c1_ssq[:, 0, :],
                                    float(H * W), float(N * H * W), g2, be2)

    w2 = _prep_w3x3(p["w2"], Cout_pad, Cout_pad)
    b2 = _pad_last(p["b2"], Cout_pad).reshape(1, Cout_pad)

    if stride == 1:
        assert Cin == Cout, "identity skip requires dimin == dimout (as in PyTorch module)"
        res = x if Cout_pad == Cin else _pad_last(x, Cout_pad)
        y = conv3x3_s1_fused(c1, sc2, sh2, w2, b2, residual=res)
    elif stride == 2:
        a2 = normalize_relu(c1, sc2, sh2)                         # (N, H, W, Cout_pad) bf16
        Hp = H + 2 + (H % 2)                                      # even padded height
        Wp = W + 2 + (W % 2)
        Hp2, Wp2 = Hp // 2, Wp // 2
        a2p = jnp.pad(a2, ((0, 0), (1, Hp - H - 1), (1, Wp - W - 1), (0, 0)))
        # parity split so the stride-2 taps become contiguous slices in-kernel
        planes = a2p.reshape(N, Hp2, 2, Wp2, 2, Cout_pad).transpose(0, 2, 4, 1, 3, 5)
        planes = jnp.pad(planes, ((0, 0), (0, 0), (0, 0), (0, 1), (0, 0), (0, 0)))
        planes = planes.reshape(N, 2, 2, (Hp2 + 1) * Wp2, Cout_pad)
        Ho = (H - 1) // 2 + 1
        Wo = (W - 1) // 2 + 1
        xs = x[:, ::2, ::2, :]                                    # (N, Ho, Wo, Cin) f32
        w3 = jnp.pad(p["w3"], ((0, 0), (0, Cout_pad - Cout))).astype(jnp.bfloat16)
        b3 = _pad_last(p["b3"], Cout_pad).reshape(1, Cout_pad)
        y = conv3x3_s2_proj(planes, Ho, Wo, Wp2, w2, b2, xs, w3, b3)
    else:
        raise Exception("Stride not support")

    return jnp.transpose(y[..., :Cout], (0, 3, 1, 2))             # NHWC -> NCHW


# ---------------------------- pure-JAX reference ----------------------------

def _bn_relu_ref(x_nhwc, gamma, beta):
    mean = jnp.mean(x_nhwc, axis=(0, 1, 2), keepdims=True)
    var = jnp.mean((x_nhwc - mean) ** 2, axis=(0, 1, 2), keepdims=True)
    return jnp.maximum((x_nhwc - mean) * lax.rsqrt(var + 1e-5) * gamma + beta, 0.0)


def _conv_ref(x, w, b, stride, padding):
    out = lax.conv_general_dilated(x, w, (stride, stride), padding,
                                   dimension_numbers=("NHWC", "HWIO", "NHWC"))
    return out + b


def resconv2d_ref(x_nchw, p, stride=1):
    x = jnp.transpose(x_nchw, (0, 2, 3, 1)).astype(jnp.float32)
    a1 = _bn_relu_ref(x, p["bn1_gamma"], p["bn1_beta"])
    c1 = _conv_ref(a1, p["w1"], p["b1"], 1, ((1, 1), (1, 1)))
    a2 = _bn_relu_ref(c1, p["bn2_gamma"], p["bn2_beta"])
    y = _conv_ref(a2, p["w2"], p["b2"], stride, ((1, 1), (1, 1)))
    if stride == 2:
        x = _conv_ref(x, p["w3"].reshape(1, 1, *p["w3"].shape), p["b3"], 2, ((0, 0), (0, 0)))
    return jnp.transpose(x + y, (0, 3, 1, 2))


# ---------------------------- main ----------------------------

if __name__ == "__main__":
    key = jax.random.PRNGKey(0)
    kx, kp1, kp2 = jax.random.split(key, 3)

    # PyTorch-style NCHW input: batch=2, channels=8, spatial=16x16
    x = jax.random.normal(kx, (2, 8, 16, 16), jnp.float32)

    fwd1 = jax.jit(lambda a, pp: resconv2d_forward(a, pp, stride=1))
    fwd2 = jax.jit(lambda a, pp: resconv2d_forward(a, pp, stride=2))

    # bf16 MXU operands + bf16 inter-layer activation storage (f32 accumulation,
    # bias and residual in f32) -> bf16-level tolerance.
    TOL = 3e-2

    # stride = 1 (identity residual; dimin == dimout)
    p1 = init_resconv2d_params(kp1, 8, 8, stride=1)
    out1 = jax.block_until_ready(fwd1(x, p1))
    ref1 = jax.block_until_ready(resconv2d_ref(x, p1, stride=1))
    np.testing.assert_allclose(np.asarray(out1), np.asarray(ref1), rtol=TOL, atol=TOL)

    # stride = 2 (fused 1x1 stride-2 projection residual; dimin=8 -> dimout=16)
    p2 = init_resconv2d_params(kp2, 8, 16, stride=2)
    out2 = jax.block_until_ready(fwd2(x, p2))
    ref2 = jax.block_until_ready(resconv2d_ref(x, p2, stride=2))
    np.testing.assert_allclose(np.asarray(out2), np.asarray(ref2), rtol=TOL, atol=TOL)

    print("KERNEL_OK")
</pallas_src>

<mosaic_0001>
module attributes {stable_mosaic.version = 11 : i64} {
  func.func @kernel(%arg0: i32, %arg1: memref<512x8xf32, #tpu.memory_space<vmem>>, %arg2: memref<1x8x8xf32, #tpu.memory_space<vmem>>, %arg3: memref<1x8x8xf32, #tpu.memory_space<vmem>>) attributes {dimension_semantics = [#tpu.dimension_semantics<parallel>], iteration_bounds = array<i64: 1>, scalar_prefetch = 0 : i64, scratch_operands = 0 : i64, tpu.core_type = #tpu.core_type<tc>, window_params = [{transform_indices = @transform_0, window_bounds = array<i64: 512, 8>}, {transform_indices = @transform_1, window_bounds = array<i64: 1, 8, 8>}, {transform_indices = @transform_2, window_bounds = array<i64: 1, 8, 8>}]} {
    %0 = tpu.iota {dimensions = array<i32: 0>} : vector<512x1xi32>
    %c512_i32 = arith.constant 512 : i32
    %1 = arith.muli %arg0, %c512_i32 : i32
    %2 = vector.broadcast %1 : i32 to vector<512x1xi32>
    %3 = arith.addi %0, %2 : vector<512x1xi32>
    %c512_i32_0 = arith.constant 512 : i32
    %4 = vector.broadcast %c512_i32_0 : i32 to vector<512x1xi32>
    %5 = arith.cmpi slt, %3, %4 : vector<512x1xi32>
    %c512_i32_1 = arith.constant 512 : i32
    %6 = arith.muli %arg0, %c512_i32_1 : i32
    %c512_i32_2 = arith.constant 512 : i32
    %7 = arith.subi %c512_i32_2, %6 : i32
    %c512_i32_3 = arith.constant 512 : i32
    %8 = arith.minsi %c512_i32_3, %7 : i32
    %9 = arith.sitofp %8 : i32 to f32
    %c0 = arith.constant 0 : index
    %c0_4 = arith.constant 0 : index
    %10 = vector.load %arg1[%c0, %c0_4] : memref<512x8xf32, #tpu.memory_space<vmem>>, vector<512x8xf32>
    %cst = arith.constant 0.000000e+00 : f32
    %11 = vector.shape_cast %5 : vector<512x1xi1> to vector<512x1xi1>
    %12 = vector.broadcast %11 : vector<512x1xi1> to vector<512x8xi1>
    %13 = vector.broadcast %cst : f32 to vector<512x8xf32>
    %14 = arith.select %12, %10, %13 : vector<512x8xi1>, vector<512x8xf32>
    %cst_5 = arith.constant dense<0.000000e+00> : vector<8xf32>
    %15 = vector.multi_reduction <add>, %14, %cst_5 [0] : vector<512x8xf32> to vector<8xf32>
    %16 = vector.shape_cast %15 : vector<8xf32> to vector<1x8xf32>
    %17 = vector.broadcast %9 : f32 to vector<1x8xf32>
    %18 = arith.divf %16, %17 : vector<1x8xf32>
    %19 = vector.broadcast %18 : vector<1x8xf32> to vector<512x8xf32>
    %20 = arith.subf %10, %19 : vector<512x8xf32>
    %cst_6 = arith.constant 0.000000e+00 : f32
    %21 = vector.shape_cast %5 : vector<512x1xi1> to vector<512x1xi1>
    %22 = vector.broadcast %21 : vector<512x1xi1> to vector<512x8xi1>
    %23 = vector.broadcast %cst_6 : f32 to vector<512x8xf32>
    %24 = arith.select %22, %20, %23 : vector<512x8xi1>, vector<512x8xf32>
    %25 = arith.mulf %24, %24 : vector<512x8xf32>
    %cst_7 = arith.constant dense<0.000000e+00> : vector<8xf32>
    %26 = vector.multi_reduction <add>, %25, %cst_7 [0] : vector<512x8xf32> to vector<8xf32>
    %27 = vector.shape_cast %26 : vector<8xf32> to vector<1x8xf32>
    %28 = vector.shape_cast %16 : vector<1x8xf32> to vector<1x1x8xf32>
    %29 = vector.shape_cast %28 : vector<1x1x8xf32> to vector<1x1x8xf32>
    %30 = vector.broadcast %29 : vector<1x1x8xf32> to vector<1x8x8xf32>
    %c0_8 = arith.constant 0 : index
    %c0_9 = arith.constant 0 : index
    %c0_10 = arith.constant 0 : index
    %31 = vector.load %arg2[%c0_8, %c0_9, %c0_10] : memref<1x8x8xf32, #tpu.memory_space<vmem>>, vector<1x8x8xf32>
    tpu.vector_store %arg2[%c0_8, %c0_9, %c0_10], %30 {strides = array<i32>} : memref<1x8x8xf32, #tpu.memory_space<vmem>>, vector<1x8x8xf32>,
    %32 = vector.shape_cast %27 : vector<1x8xf32> to vector<1x1x8xf32>
    %33 = vector.shape_cast %32 : vector<1x1x8xf32> to vector<1x1x8xf32>
    %34 = vector.broadcast %33 : vector<1x1x8xf32> to vector<1x8x8xf32>
    %c0_11 = arith.constant 0 : index
    %c0_12 = arith.constant 0 : index
    %c0_13 = arith.constant 0 : index
    %35 = vector.load %arg3[%c0_11, %c0_12, %c0_13] : memref<1x8x8xf32, #tpu.memory_space<vmem>>, vector<1x8x8xf32>
    tpu.vector_store %arg3[%c0_11, %c0_12, %c0_13], %34 {strides = array<i32>} : memref<1x8x8xf32, #tpu.memory_space<vmem>>, vector<1x8x8xf32>,
    return
  }
  func.func @transform_0(%arg0: i32) -> (i32, i32) {
    %c0_i32 = arith.constant 0 : i32
    %c0_i32_0 = arith.constant 0 : i32
    return %arg0, %c0_i32 : i32, i32
  }
  func.func @transform_1(%arg0: i32) -> (i32, i32, i32) {
    %c0_i32 = arith.constant 0 : i32
    %c0_i32_0 = arith.constant 0 : i32
    %c0_i32_1 = arith.constant 0 : i32
    return %arg0, %c0_i32, %c0_i32_0 : i32, i32, i32
  }
  func.func @transform_2(%arg0: i32) -> (i32, i32, i32) {
    %c0_i32 = arith.constant 0 : i32
    %c0_i32_0 = arith.constant 0 : i32
    %c0_i32_1 = arith.constant 0 : i32
    return %arg0, %c0_i32, %c0_i32_0 : i32, i32, i32
  }
}

module attributes {stable_mosaic.version = 11 : i64} {
  func.func @kernel(%arg0: i32, %arg1: i32, %arg2: memref<1x16x16x8xf32, #tpu.memory_space<vmem>>, %arg3: memref<1x8xf32, #tpu.memory_space<vmem>>, %arg4: memref<1x8xf32, #tpu.memory_space<vmem>>, %arg5: memref<9x8x8xbf16, #tpu.memory_space<vmem>>, %arg6: memref<1x8xf32, #tpu.memory_space<vmem>>, %arg7: memref<1x16x16x8xbf16, #tpu.memory_space<vmem>>, %arg8: memref<1x8x8xf32, #tpu.memory_space<vmem>>, %arg9: memref<1x8x8xf32, #tpu.memory_space<vmem>>, %arg10: memref<342x8xbf16, #tpu.memory_space<vmem>>) attributes {dimension_semantics = [#tpu.dimension_semantics<parallel>, #tpu.dimension_semantics<arbitrary>], iteration_bounds = array<i64: 2, 1>, scalar_prefetch = 0 : i64, scratch_operands = 1 : i64, tpu.core_type = #tpu.core_type<tc>, window_params = [{transform_indices = @transform_0, window_bounds = array<i64: 1, 16, 16, 8>}, {pipeline_mode = #tpu.pipeline_mode<synchronous>, transform_indices = @transform_1, window_bounds = array<i64: 1, 8>}, {pipeline_mode = #tpu.pipeline_mode<synchronous>, transform_indices = @transform_2, window_bounds = array<i64: 1, 8>}, {transform_indices = @transform_3, window_bounds = array<i64: 9, 8, 8>}, {transform_indices = @transform_4, window_bounds = array<i64: 1, 8>}, {transform_indices = @transform_5, window_bounds = array<i64: 1, 16, 16, 8>}, {transform_indices = @transform_6, window_bounds = array<i64: 1, 8, 8>}, {transform_indices = @transform_7, window_bounds = array<i64: 1, 8, 8>}]} {
    %c0_i32 = arith.constant 0 : i32
    %0 = arith.cmpi eq, %arg1, %c0_i32 : i32
    %1 = arith.extui %0 : i1 to i32
    %c0_i32_0 = arith.constant 0 : i32
    %2 = arith.cmpi ne, %1, %c0_i32_0 : i32
    scf.if %2 {
      %c0_57 = arith.constant 0 : index
      %c0_58 = arith.constant 0 : index
      %c0_59 = arith.constant 0 : index
      %c0_60 = arith.constant 0 : index
      %79 = vector.load %arg2[%c0_57, %c0_58, %c0_59, %c0_60] : memref<1x16x16x8xf32, #tpu.memory_space<vmem>>, vector<1x16x16x8xf32>
      %80 = vector.shape_cast %79 : vector<1x16x16x8xf32> to vector<16x16x8xf32>
      %c0_61 = arith.constant 0 : index
      %c0_62 = arith.constant 0 : index
      %81 = vector.load %arg3[%c0_61, %c0_62] : memref<1x8xf32, #tpu.memory_space<vmem>>, vector<1x8xf32>
      %82 = vector.shape_cast %81 : vector<1x8xf32> to vector<1x1x8xf32>
      %83 = vector.broadcast %82 : vector<1x1x8xf32> to vector<16x16x8xf32>
      %84 = arith.mulf %80, %83 : vector<16x16x8xf32>
      %c0_63 = arith.constant 0 : index
      %c0_64 = arith.constant 0 : index
      %85 = vector.load %arg4[%c0_63, %c0_64] : memref<1x8xf32, #tpu.memory_space<vmem>>, vector<1x8xf32>
      %86 = vector.shape_cast %85 : vector<1x8xf32> to vector<1x1x8xf32>
      %87 = vector.broadcast %86 : vector<1x1x8xf32> to vector<16x16x8xf32>
      %88 = arith.addf %84, %87 : vector<16x16x8xf32>
      %cst_65 = arith.constant 0.000000e+00 : f32
      %89 = vector.broadcast %cst_65 : f32 to vector<16x16x8xf32>
      %90 = arith.maximumf %88, %89 : vector<16x16x8xf32>
      %91 = arith.truncf %90 : vector<16x16x8xf32> to vector<16x16x8xbf16>
      %cst_66 = arith.constant 0.000000e+00 : bf16
      %92 = vector.broadcast %cst_66 : bf16 to vector<16x1x8xbf16>
      %93 = tpu.concatenate %92, %91, %92 in 1 : vector<16x1x8xbf16>, vector<16x16x8xbf16>, vector<16x1x8xbf16> -> vector<16x18x8xbf16>
      %94 = vector.shape_cast %93 : vector<16x18x8xbf16> to vector<288x8xbf16>
      %cst_67 = arith.constant 0.000000e+00 : bf16
      %95 = vector.broadcast %cst_67 : bf16 to vector<18x8xbf16>
      %c0_68 = arith.constant 0 : index
      %c0_69 = arith.constant 0 : index
      %96 = vector.load %arg10[%c0_68, %c0_69] : memref<342x8xbf16, #tpu.memory_space<vmem>>, vector<18x8xbf16>
      tpu.vector_store %arg10[%c0_68, %c0_69], %95 {strides = array<i32>} : memref<342x8xbf16, #tpu.memory_space<vmem>>, vector<18x8xbf16>,
      %cst_70 = arith.constant 0.000000e+00 : bf16
      %97 = vector.broadcast %cst_70 : bf16 to vector<36x8xbf16>
      %c306 = arith.constant 306 : index
      %c0_71 = arith.constant 0 : index
      %98 = vector.load %arg10[%c306, %c0_71] : memref<342x8xbf16, #tpu.memory_space<vmem>>, vector<36x8xbf16>
      tpu.vector_store %arg10[%c306, %c0_71], %97 {strides = array<i32>} : memref<342x8xbf16, #tpu.memory_space<vmem>>, vector<36x8xbf16>,
      %c18_72 = arith.constant 18 : index
      %c0_73 = arith.constant 0 : index
      %99 = vector.load %arg10[%c18_72, %c0_73] : memref<342x8xbf16, #tpu.memory_space<vmem>>, vector<288x8xbf16>
      tpu.vector_store %arg10[%c18_72, %c0_73], %94 {strides = array<i32>} : memref<342x8xbf16, #tpu.memory_space<vmem>>, vector<288x8xbf16>,
    } else {
    }
    %cst = arith.constant 0.000000e+00 : f32
    %3 = vector.broadcast %cst : f32 to vector<288x8xf32>
    %c0 = arith.constant 0 : index
    %c0_1 = arith.constant 0 : index
    %4 = vector.load %arg10[%c0, %c0_1] : memref<342x8xbf16, #tpu.memory_space<vmem>>, vector<288x8xbf16>
    %c0_2 = arith.constant 0 : index
    %c0_3 = arith.constant 0 : index
    %c0_4 = arith.constant 0 : index
    %5 = vector.load %arg5[%c0_2, %c0_3, %c0_4] : memref<9x8x8xbf16, #tpu.memory_space<vmem>>, vector<1x8x8xbf16>
    %6 = vector.shape_cast %5 : vector<1x8x8xbf16> to vector<8x8xbf16>
    %cst_5 = arith.constant dense<0.000000e+00> : vector<288x8xf32>
    %7 = tpu.matmul %4, %6, %cst_5 {dimension_numbers = #tpu.dot_dimension_numbers<[1], [0], [0], [1], [0, 0, 1, 1], [], []>} : vector<288x8xbf16>, vector<8x8xbf16>, vector<288x8xf32> -> vector<288x8xf32>
    %8 = arith.addf %3, %7 : vector<288x8xf32>
    %c1 = arith.constant 1 : index
    %c0_6 = arith.constant 0 : index
    %9 = vector.load %arg10[%c1, %c0_6] : memref<342x8xbf16, #tpu.memory_space<vmem>>, vector<288x8xbf16>
    %c1_7 = arith.constant 1 : index
    %c0_8 = arith.constant 0 : index
    %c0_9 = arith.constant 0 : index
    %10 = vector.load %arg5[%c1_7, %c0_8, %c0_9] : memref<9x8x8xbf16, #tpu.memory_space<vmem>>, vector<1x8x8xbf16>
    %11 = vector.shape_cast %10 : vector<1x8x8xbf16> to vector<8x8xbf16>
    %cst_10 = arith.constant dense<0.000000e+00> : vector<288x8xf32>
    %12 = tpu.matmul %9, %11, %cst_10 {dimension_numbers = #tpu.dot_dimension_numbers<[1], [0], [0], [1], [0, 0, 1, 1], [], []>} : vector<288x8xbf16>, vector<8x8xbf16>, vector<288x8xf32> -> vector<288x8xf32>
    %13 = arith.addf %8, %12 : vector<288x8xf32>
    %c2 = arith.constant 2 : index
    %c0_11 = arith.constant 0 : index
    %14 = vector.load %arg10[%c2, %c0_11] : memref<342x8xbf16, #tpu.memory_space<vmem>>, vector<288x8xbf16>
    %c2_12 = arith.constant 2 : index
    %c0_13 = arith.constant 0 : index
    %c0_14 = arith.constant 0 : index
    %15 = vector.load %arg5[%c2_12, %c0_13, %c0_14] : memref<9x8x8xbf16, #tpu.memory_space<vmem>>, vector<1x8x8xbf16>
    %16 = vector.shape_cast %15 : vector<1x8x8xbf16> to vector<8x8xbf16>
    %cst_15 = arith.constant dense<0.000000e+00> : vector<288x8xf32>
    %17 = tpu.matmul %14, %16, %cst_15 {dimension_numbers = #tpu.dot_dimension_numbers<[1], [0], [0], [1], [0, 0, 1, 1], [], []>} : vector<288x8xbf16>, vector<8x8xbf16>, vector<288x8xf32> -> vector<288x8xf32>
    %18 = arith.addf %13, %17 : vector<288x8xf32>
    %c18 = arith.constant 18 : index
    %c0_16 = arith.constant 0 : index
    %19 = vector.load %arg10[%c18, %c0_16] : memref<342x8xbf16, #tpu.memory_space<vmem>>, vector<288x8xbf16>
    %c3 = arith.constant 3 : index
    %c0_17 = arith.constant 0 : index
    %c0_18 = arith.constant 0 : index
    %20 = vector.load %arg5[%c3, %c0_17, %c0_18] : memref<9x8x8xbf16, #tpu.memory_space<vmem>>, vector<1x8x8xbf16>
    %21 = vector.shape_cast %20 : vector<1x8x8xbf16> to vector<8x8xbf16>
    %cst_19 = arith.constant dense<0.000000e+00> : vector<288x8xf32>
    %22 = tpu.matmul %19, %21, %cst_19 {dimension_numbers = #tpu.dot_dimension_numbers<[1], [0], [0], [1], [0, 0, 1, 1], [], []>} : vector<288x8xbf16>, vector<8x8xbf16>, vector<288x8xf32> -> vector<288x8xf32>
    %23 = arith.addf %18, %22 : vector<288x8xf32>
    %c19 = arith.constant 19 : index
    %c0_20 = arith.constant 0 : index
    %24 = vector.load %arg10[%c19, %c0_20] : memref<342x8xbf16, #tpu.memory_space<vmem>>, vector<288x8xbf16>
    %c4 = arith.constant 4 : index
    %c0_21 = arith.constant 0 : index
    %c0_22 = arith.constant 0 : index
    %25 = vector.load %arg5[%c4, %c0_21, %c0_22] : memref<9x8x8xbf16, #tpu.memory_space<vmem>>, vector<1x8x8xbf16>
    %26 = vector.shape_cast %25 : vector<1x8x8xbf16> to vector<8x8xbf16>
    %cst_23 = arith.constant dense<0.000000e+00> : vector<288x8xf32>
    %27 = tpu.matmul %24, %26, %cst_23 {dimension_numbers = #tpu.dot_dimension_numbers<[1], [0], [0], [1], [0, 0, 1, 1], [], []>} : vector<288x8xbf16>, vector<8x8xbf16>, vector<288x8xf32> -> vector<288x8xf32>
    %28 = arith.addf %23, %27 : vector<288x8xf32>
    %c20 = arith.constant 20 : index
    %c0_24 = arith.constant 0 : index
    %29 = vector.load %arg10[%c20, %c0_24] : memref<342x8xbf16, #tpu.memory_space<vmem>>, vector<288x8xbf16>
    %c5 = arith.constant 5 : index
    %c0_25 = arith.constant 0 : index
    %c0_26 = arith.constant 0 : index
    %30 = vector.load %arg5[%c5, %c0_25, %c0_26] : memref<9x8x8xbf16, #tpu.memory_space<vmem>>, vector<1x8x8xbf16>
    %31 = vector.shape_cast %30 : vector<1x8x8xbf16> to vector<8x8xbf16>
    %cst_27 = arith.constant dense<0.000000e+00> : vector<288x8xf32>
    %32 = tpu.matmul %29, %31, %cst_27 {dimension_numbers = #tpu.dot_dimension_numbers<[1], [0], [0], [1], [0, 0, 1, 1], [], []>} : vector<288x8xbf16>, vector<8x8xbf16>, vector<288x8xf32> -> vector<288x8xf32>
    %33 = arith.addf %28, %32 : vector<288x8xf32>
    %c36 = arith.constant 36 : index
    %c0_28 = arith.constant 0 : index
    %34 = vector.load %arg10[%c36, %c0_28] : memref<342x8xbf16, #tpu.memory_space<vmem>>, vector<288x8xbf16>
    %c6 = arith.constant 6 : index
    %c0_29 = arith.constant 0 : index
    %c0_30 = arith.constant 0 : index
    %35 = vector.load %arg5[%c6, %c0_29, %c0_30] : memref<9x8x8xbf16, #tpu.memory_space<vmem>>, vector<1x8x8xbf16>
    %36 = vector.shape_cast %35 : vector<1x8x8xbf16> to vector<8x8xbf16>
    %cst_31 = arith.constant dense<0.000000e+00> : vector<288x8xf32>
    %37 = tpu.matmul %34, %36, %cst_31 {dimension_numbers = #tpu.dot_dimension_numbers<[1], [0], [0], [1], [0, 0, 1, 1], [], []>} : vector<288x8xbf16>, vector<8x8xbf16>, vector<288x8xf32> -> vector<288x8xf32>
    %38 = arith.addf %33, %37 : vector<288x8xf32>
    %c37 = arith.constant 37 : index
    %c0_32 = arith.constant 0 : index
    %39 = vector.load %arg10[%c37, %c0_32] : memref<342x8xbf16, #tpu.memory_space<vmem>>, vector<288x8xbf16>
    %c7 = arith.constant 7 : index
    %c0_33 = arith.constant 0 : index
    %c0_34 = arith.constant 0 : index
    %40 = vector.load %arg5[%c7, %c0_33, %c0_34] : memref<9x8x8xbf16, #tpu.memory_space<vmem>>, vector<1x8x8xbf16>
    %41 = vector.shape_cast %40 : vector<1x8x8xbf16> to vector<8x8xbf16>
    %cst_35 = arith.constant dense<0.000000e+00> : vector<288x8xf32>
    %42 = tpu.matmul %39, %41, %cst_35 {dimension_numbers = #tpu.dot_dimension_numbers<[1], [0], [0], [1], [0, 0, 1, 1], [], []>} : vector<288x8xbf16>, vector<8x8xbf16>, vector<288x8xf32> -> vector<288x8xf32>
    %43 = arith.addf %38, %42 : vector<288x8xf32>
    %c38 = arith.constant 38 : index
    %c0_36 = arith.constant 0 : index
    %44 = vector.load %arg10[%c38, %c0_36] : memref<342x8xbf16, #tpu.memory_space<vmem>>, vector<288x8xbf16>
    %c8 = arith.constant 8 : index
    %c0_37 = arith.constant 0 : index
    %c0_38 = arith.constant 0 : index
    %45 = vector.load %arg5[%c8, %c0_37, %c0_38] : memref<9x8x8xbf16, #tpu.memory_space<vmem>>, vector<1x8x8xbf16>
    %46 = vector.shape_cast %45 : vector<1x8x8xbf16> to vector<8x8xbf16>
    %cst_39 = arith.constant dense<0.000000e+00> : vector<288x8xf32>
    %47 = tpu.matmul %44, %46, %cst_39 {dimension_numbers = #tpu.dot_dimension_numbers<[1], [0], [0], [1], [0, 0, 1, 1], [], []>} : vector<288x8xbf16>, vector<8x8xbf16>, vector<288x8xf32> -> vector<288x8xf32>
    %48 = arith.addf %43, %47 : vector<288x8xf32>
    %49 = vector.shape_cast %48 : vector<288x8xf32> to vector<16x18x8xf32>
    %50 = vector.extract_strided_slice %49 {offsets = [0, 0, 0], sizes = [16, 16, 8], strides = [1, 1, 1]} : vector<16x18x8xf32> to vector<16x16x8xf32>
    %c0_40 = arith.constant 0 : index
    %c0_41 = arith.constant 0 : index
    %51 = vector.load %arg6[%c0_40, %c0_41] : memref<1x8xf32, #tpu.memory_space<vmem>>, vector<1x8xf32>
    %52 = vector.shape_cast %51 : vector<1x8xf32> to vector<1x1x8xf32>
    %53 = vector.broadcast %52 : vector<1x1x8xf32> to vector<16x16x8xf32>
    %54 = arith.addf %50, %53 : vector<16x16x8xf32>
    %cst_42 = arith.constant dense<0.000000e+00> : vector<16x8xf32>
    %55 = vector.multi_reduction <add>, %54, %cst_42 [0] : vector<16x16x8xf32> to vector<16x8xf32>
    %cst_43 = arith.constant dense<0.000000e+00> : vector<8xf32>
    %56 = vector.multi_reduction <add>, %55, %cst_43 [0] : vector<16x8xf32> to vector<8xf32>
    %57 = vector.shape_cast %56 : vector<8xf32> to vector<1x8xf32>
    %cst_44 = arith.constant 2.560000e+02 : f32
    %58 = vector.broadcast %cst_44 : f32 to vector<1x8xf32>
    %59 = arith.divf %57, %58 : vector<1x8xf32>
    %60 = vector.shape_cast %59 : vector<1x8xf32> to vector<1x1x8xf32>
    %61 = vector.broadcast %60 : vector<1x1x8xf32> to vector<16x16x8xf32>
    %62 = arith.subf %54, %61 : vector<16x16x8xf32>
    %63 = arith.mulf %62, %62 : vector<16x16x8xf32>
    %cst_45 = arith.constant dense<0.000000e+00> : vector<16x8xf32>
    %64 = vector.multi_reduction <add>, %63, %cst_45 [0] : vector<16x16x8xf32> to vector<16x8xf32>
    %cst_46 = arith.constant dense<0.000000e+00> : vector<8xf32>
    %65 = vector.multi_reduction <add>, %64, %cst_46 [0] : vector<16x8xf32> to vector<8xf32>
    %66 = vector.shape_cast %65 : vector<8xf32> to vector<1x8xf32>
    %67 = vector.shape_cast %57 : vector<1x8xf32> to vector<1x1x8xf32>
    %68 = vector.shape_cast %67 : vector<1x1x8xf32> to vector<1x1x8xf32>
    %69 = vector.broadcast %68 : vector<1x1x8xf32> to vector<1x8x8xf32>
    %c0_47 = arith.constant 0 : index
    %c0_48 = arith.constant 0 : index
    %c0_49 = arith.constant 0 : index
    %70 = vector.load %arg8[%c0_47, %c0_48, %c0_49] : memref<1x8x8xf32, #tpu.memory_space<vmem>>, vector<1x8x8xf32>
    tpu.vector_store %arg8[%c0_47, %c0_48, %c0_49], %69 {strides = array<i32>} : memref<1x8x8xf32, #tpu.memory_space<vmem>>, vector<1x8x8xf32>,
    %71 = vector.shape_cast %66 : vector<1x8xf32> to vector<1x1x8xf32>
    %72 = vector.shape_cast %71 : vector<1x1x8xf32> to vector<1x1x8xf32>
    %73 = vector.broadcast %72 : vector<1x1x8xf32> to vector<1x8x8xf32>
    %c0_50 = arith.constant 0 : index
    %c0_51 = arith.constant 0 : index
    %c0_52 = arith.constant 0 : index
    %74 = vector.load %arg9[%c0_50, %c0_51, %c0_52] : memref<1x8x8xf32, #tpu.memory_space<vmem>>, vector<1x8x8xf32>
    tpu.vector_store %arg9[%c0_50, %c0_51, %c0_52], %73 {strides = array<i32>} : memref<1x8x8xf32, #tpu.memory_space<vmem>>, vector<1x8x8xf32>,
    %75 = arith.truncf %54 : vector<16x16x8xf32> to vector<16x16x8xbf16>
    %c0_53 = arith.constant 0 : index
    %c0_54 = arith.constant 0 : index
    %c0_55 = arith.constant 0 : index
    %c0_56 = arith.constant 0 : index
    %76 = vector.load %arg7[%c0_53, %c0_54, %c0_55, %c0_56] : memref<1x16x16x8xbf16, #tpu.memory_space<vmem>>, vector<1x16x16x8xbf16>
    %77 = vector.shape_cast %76 : vector<1x16x16x8xbf16> to vector<16x16x8xbf16>
    %78 = vector.shape_cast %75 : vector<16x16x8xbf16> to vector<1x16x16x8xbf16>
    tpu.vector_store %arg7[%c0_53, %c0_54, %c0_55, %c0_56], %78 {strides = array<i32>} : memref<1x16x16x8xbf16, #tpu.memory_space<vmem>>, vector<1x16x16x8xbf16>,
    return
  }
  func.func @transform_0(%arg0: i32, %arg1: i32) -> (i32, i32, i32, i32) {
    %c0_i32 = arith.constant 0 : i32
    %c0_i32_0 = arith.constant 0 : i32
    %c0_i32_1 = arith.constant 0 : i32
    %c0_i32_2 = arith.constant 0 : i32
    return %arg0, %c0_i32, %c0_i32_0, %c0_i32_1 : i32, i32, i32, i32
  }
  func.func @transform_1(%arg0: i32, %arg1: i32) -> (i32, i32) {
    %c0_i32 = arith.constant 0 : i32
    %c0_i32_0 = arith.constant 0 : i32
    %c0_i32_1 = arith.constant 0 : i32
    return %c0_i32, %c0_i32_0 : i32, i32
  }
  func.func @transform_2(%arg0: i32, %arg1: i32) -> (i32, i32) {
    %c0_i32 = arith.constant 0 : i32
    %c0_i32_0 = arith.constant 0 : i32
    %c0_i32_1 = arith.constant 0 : i32
    return %c0_i32, %c0_i32_0 : i32, i32
  }
  func.func @transform_3(%arg0: i32, %arg1: i32) -> (i32, i32, i32) {
    %c0_i32 = arith.constant 0 : i32
    %c0_i32_0 = arith.constant 0 : i32
    %c0_i32_1 = arith.constant 0 : i32
    return %c0_i32, %c0_i32_0, %arg1 : i32, i32, i32
  }
  func.func @transform_4(%arg0: i32, %arg1: i32) -> (i32, i32) {
    %c0_i32 = arith.constant 0 : i32
    %c0_i32_0 = arith.constant 0 : i32
    return %c0_i32, %arg1 : i32, i32
  }
  func.func @transform_5(%arg0: i32, %arg1: i32) -> (i32, i32, i32, i32) {
    %c0_i32 = arith.constant 0 : i32
    %c0_i32_0 = arith.constant 0 : i32
    %c0_i32_1 = arith.constant 0 : i32
    return %arg0, %c0_i32, %c0_i32_0, %arg1 : i32, i32, i32, i32
  }
  func.func @transform_6(%arg0: i32, %arg1: i32) -> (i32, i32, i32) {
    %c0_i32 = arith.constant 0 : i32
    %c0_i32_0 = arith.constant 0 : i32
    return %arg0, %c0_i32, %arg1 : i32, i32, i32
  }
  func.func @transform_7(%arg0: i32, %arg1: i32) -> (i32, i32, i32) {
    %c0_i32 = arith.constant 0 : i32
    %c0_i32_0 = arith.constant 0 : i32
    return %arg0, %c0_i32, %arg1 : i32, i32, i32
  }
}

module attributes {stable_mosaic.version = 11 : i64} {
  func.func @kernel(%arg0: i32, %arg1: i32, %arg2: memref<1x16x16x8xbf16, #tpu.memory_space<vmem>>, %arg3: memref<1x8xf32, #tpu.memory_space<vmem>>, %arg4: memref<1x8xf32, #tpu.memory_space<vmem>>, %arg5: memref<9x8x8xbf16, #tpu.memory_space<vmem>>, %arg6: memref<1x8xf32, #tpu.memory_space<vmem>>, %arg7: memref<1x16x16x8xf32, #tpu.memory_space<vmem>>, %arg8: memref<1x16x16x8xf32, #tpu.memory_space<vmem>>, %arg9: memref<342x8xbf16, #tpu.memory_space<vmem>>) attributes {dimension_semantics = [#tpu.dimension_semantics<parallel>, #tpu.dimension_semantics<arbitrary>], iteration_bounds = array<i64: 2, 1>, scalar_prefetch = 0 : i64, scratch_operands = 1 : i64, tpu.core_type = #tpu.core_type<tc>, window_params = [{transform_indices = @transform_0, window_bounds = array<i64: 1, 16, 16, 8>}, {pipeline_mode = #tpu.pipeline_mode<synchronous>, transform_indices = @transform_1, window_bounds = array<i64: 1, 8>}, {pipeline_mode = #tpu.pipeline_mode<synchronous>, transform_indices = @transform_2, window_bounds = array<i64: 1, 8>}, {transform_indices = @transform_3, window_bounds = array<i64: 9, 8, 8>}, {transform_indices = @transform_4, window_bounds = array<i64: 1, 8>}, {transform_indices = @transform_5, window_bounds = array<i64: 1, 16, 16, 8>}, {transform_indices = @transform_6, window_bounds = array<i64: 1, 16, 16, 8>}]} {
    %c0_i32 = arith.constant 0 : i32
    %0 = arith.cmpi eq, %arg1, %c0_i32 : i32
    %1 = arith.extui %0 : i1 to i32
    %c0_i32_0 = arith.constant 0 : i32
    %2 = arith.cmpi ne, %1, %c0_i32_0 : i32
    scf.if %2 {
      %c0_50 = arith.constant 0 : index
      %c0_51 = arith.constant 0 : index
      %c0_52 = arith.constant 0 : index
      %c0_53 = arith.constant 0 : index
      %61 = vector.load %arg2[%c0_50, %c0_51, %c0_52, %c0_53] : memref<1x16x16x8xbf16, #tpu.memory_space<vmem>>, vector<1x16x16x8xbf16>
      %62 = vector.shape_cast %61 : vector<1x16x16x8xbf16> to vector<16x16x8xbf16>
      %63 = arith.extf %62 : vector<16x16x8xbf16> to vector<16x16x8xf32>
      %c0_54 = arith.constant 0 : index
      %c0_55 = arith.constant 0 : index
      %64 = vector.load %arg3[%c0_54, %c0_55] : memref<1x8xf32, #tpu.memory_space<vmem>>, vector<1x8xf32>
      %65 = vector.shape_cast %64 : vector<1x8xf32> to vector<1x1x8xf32>
      %66 = vector.broadcast %65 : vector<1x1x8xf32> to vector<16x16x8xf32>
      %67 = arith.mulf %63, %66 : vector<16x16x8xf32>
      %c0_56 = arith.constant 0 : index
      %c0_57 = arith.constant 0 : index
      %68 = vector.load %arg4[%c0_56, %c0_57] : memref<1x8xf32, #tpu.memory_space<vmem>>, vector<1x8xf32>
      %69 = vector.shape_cast %68 : vector<1x8xf32> to vector<1x1x8xf32>
      %70 = vector.broadcast %69 : vector<1x1x8xf32> to vector<16x16x8xf32>
      %71 = arith.addf %67, %70 : vector<16x16x8xf32>
      %cst_58 = arith.constant 0.000000e+00 : f32
      %72 = vector.broadcast %cst_58 : f32 to vector<16x16x8xf32>
      %73 = arith.maximumf %71, %72 : vector<16x16x8xf32>
      %74 = arith.truncf %73 : vector<16x16x8xf32> to vector<16x16x8xbf16>
      %cst_59 = arith.constant 0.000000e+00 : bf16
      %75 = vector.broadcast %cst_59 : bf16 to vector<16x1x8xbf16>
      %76 = tpu.concatenate %75, %74, %75 in 1 : vector<16x1x8xbf16>, vector<16x16x8xbf16>, vector<16x1x8xbf16> -> vector<16x18x8xbf16>
      %77 = vector.shape_cast %76 : vector<16x18x8xbf16> to vector<288x8xbf16>
      %cst_60 = arith.constant 0.000000e+00 : bf16
      %78 = vector.broadcast %cst_60 : bf16 to vector<18x8xbf16>
      %c0_61 = arith.constant 0 : index
      %c0_62 = arith.constant 0 : index
      %79 = vector.load %arg9[%c0_61, %c0_62] : memref<342x8xbf16, #tpu.memory_space<vmem>>, vector<18x8xbf16>
      tpu.vector_store %arg9[%c0_61, %c0_62], %78 {strides = array<i32>} : memref<342x8xbf16, #tpu.memory_space<vmem>>, vector<18x8xbf16>,
      %cst_63 = arith.constant 0.000000e+00 : bf16
      %80 = vector.broadcast %cst_63 : bf16 to vector<36x8xbf16>
      %c306 = arith.constant 306 : index
      %c0_64 = arith.constant 0 : index
      %81 = vector.load %arg9[%c306, %c0_64] : memref<342x8xbf16, #tpu.memory_space<vmem>>, vector<36x8xbf16>
      tpu.vector_store %arg9[%c306, %c0_64], %80 {strides = array<i32>} : memref<342x8xbf16, #tpu.memory_space<vmem>>, vector<36x8xbf16>,
      %c18_65 = arith.constant 18 : index
      %c0_66 = arith.constant 0 : index
      %82 = vector.load %arg9[%c18_65, %c0_66] : memref<342x8xbf16, #tpu.memory_space<vmem>>, vector<288x8xbf16>
      tpu.vector_store %arg9[%c18_65, %c0_66], %77 {strides = array<i32>} : memref<342x8xbf16, #tpu.memory_space<vmem>>, vector<288x8xbf16>,
    } else {
    }
    %cst = arith.constant 0.000000e+00 : f32
    %3 = vector.broadcast %cst : f32 to vector<288x8xf32>
    %c0 = arith.constant 0 : index
    %c0_1 = arith.constant 0 : index
    %4 = vector.load %arg9[%c0, %c0_1] : memref<342x8xbf16, #tpu.memory_space<vmem>>, vector<288x8xbf16>
    %c0_2 = arith.constant 0 : index
    %c0_3 = arith.constant 0 : index
    %c0_4 = arith.constant 0 : index
    %5 = vector.load %arg5[%c0_2, %c0_3, %c0_4] : memref<9x8x8xbf16, #tpu.memory_space<vmem>>, vector<1x8x8xbf16>
    %6 = vector.shape_cast %5 : vector<1x8x8xbf16> to vector<8x8xbf16>
    %cst_5 = arith.constant dense<0.000000e+00> : vector<288x8xf32>
    %7 = tpu.matmul %4, %6, %cst_5 {dimension_numbers = #tpu.dot_dimension_numbers<[1], [0], [0], [1], [0, 0, 1, 1], [], []>} : vector<288x8xbf16>, vector<8x8xbf16>, vector<288x8xf32> -> vector<288x8xf32>
    %8 = arith.addf %3, %7 : vector<288x8xf32>
    %c1 = arith.constant 1 : index
    %c0_6 = arith.constant 0 : index
    %9 = vector.load %arg9[%c1, %c0_6] : memref<342x8xbf16, #tpu.memory_space<vmem>>, vector<288x8xbf16>
    %c1_7 = arith.constant 1 : index
    %c0_8 = arith.constant 0 : index
    %c0_9 = arith.constant 0 : index
    %10 = vector.load %arg5[%c1_7, %c0_8, %c0_9] : memref<9x8x8xbf16, #tpu.memory_space<vmem>>, vector<1x8x8xbf16>
    %11 = vector.shape_cast %10 : vector<1x8x8xbf16> to vector<8x8xbf16>
    %cst_10 = arith.constant dense<0.000000e+00> : vector<288x8xf32>
    %12 = tpu.matmul %9, %11, %cst_10 {dimension_numbers = #tpu.dot_dimension_numbers<[1], [0], [0], [1], [0, 0, 1, 1], [], []>} : vector<288x8xbf16>, vector<8x8xbf16>, vector<288x8xf32> -> vector<288x8xf32>
    %13 = arith.addf %8, %12 : vector<288x8xf32>
    %c2 = arith.constant 2 : index
    %c0_11 = arith.constant 0 : index
    %14 = vector.load %arg9[%c2, %c0_11] : memref<342x8xbf16, #tpu.memory_space<vmem>>, vector<288x8xbf16>
    %c2_12 = arith.constant 2 : index
    %c0_13 = arith.constant 0 : index
    %c0_14 = arith.constant 0 : index
    %15 = vector.load %arg5[%c2_12, %c0_13, %c0_14] : memref<9x8x8xbf16, #tpu.memory_space<vmem>>, vector<1x8x8xbf16>
    %16 = vector.shape_cast %15 : vector<1x8x8xbf16> to vector<8x8xbf16>
    %cst_15 = arith.constant dense<0.000000e+00> : vector<288x8xf32>
    %17 = tpu.matmul %14, %16, %cst_15 {dimension_numbers = #tpu.dot_dimension_numbers<[1], [0], [0], [1], [0, 0, 1, 1], [], []>} : vector<288x8xbf16>, vector<8x8xbf16>, vector<288x8xf32> -> vector<288x8xf32>
    %18 = arith.addf %13, %17 : vector<288x8xf32>
    %c18 = arith.constant 18 : index
    %c0_16 = arith.constant 0 : index
    %19 = vector.load %arg9[%c18, %c0_16] : memref<342x8xbf16, #tpu.memory_space<vmem>>, vector<288x8xbf16>
    %c3 = arith.constant 3 : index
    %c0_17 = arith.constant 0 : index
    %c0_18 = arith.constant 0 : index
    %20 = vector.load %arg5[%c3, %c0_17, %c0_18] : memref<9x8x8xbf16, #tpu.memory_space<vmem>>, vector<1x8x8xbf16>
    %21 = vector.shape_cast %20 : vector<1x8x8xbf16> to vector<8x8xbf16>
    %cst_19 = arith.constant dense<0.000000e+00> : vector<288x8xf32>
    %22 = tpu.matmul %19, %21, %cst_19 {dimension_numbers = #tpu.dot_dimension_numbers<[1], [0], [0], [1], [0, 0, 1, 1], [], []>} : vector<288x8xbf16>, vector<8x8xbf16>, vector<288x8xf32> -> vector<288x8xf32>
    %23 = arith.addf %18, %22 : vector<288x8xf32>
    %c19 = arith.constant 19 : index
    %c0_20 = arith.constant 0 : index
    %24 = vector.load %arg9[%c19, %c0_20] : memref<342x8xbf16, #tpu.memory_space<vmem>>, vector<288x8xbf16>
    %c4 = arith.constant 4 : index
    %c0_21 = arith.constant 0 : index
    %c0_22 = arith.constant 0 : index
    %25 = vector.load %arg5[%c4, %c0_21, %c0_22] : memref<9x8x8xbf16, #tpu.memory_space<vmem>>, vector<1x8x8xbf16>
    %26 = vector.shape_cast %25 : vector<1x8x8xbf16> to vector<8x8xbf16>
    %cst_23 = arith.constant dense<0.000000e+00> : vector<288x8xf32>
    %27 = tpu.matmul %24, %26, %cst_23 {dimension_numbers = #tpu.dot_dimension_numbers<[1], [0], [0], [1], [0, 0, 1, 1], [], []>} : vector<288x8xbf16>, vector<8x8xbf16>, vector<288x8xf32> -> vector<288x8xf32>
    %28 = arith.addf %23, %27 : vector<288x8xf32>
    %c20 = arith.constant 20 : index
    %c0_24 = arith.constant 0 : index
    %29 = vector.load %arg9[%c20, %c0_24] : memref<342x8xbf16, #tpu.memory_space<vmem>>, vector<288x8xbf16>
    %c5 = arith.constant 5 : index
    %c0_25 = arith.constant 0 : index
    %c0_26 = arith.constant 0 : index
    %30 = vector.load %arg5[%c5, %c0_25, %c0_26] : memref<9x8x8xbf16, #tpu.memory_space<vmem>>, vector<1x8x8xbf16>
    %31 = vector.shape_cast %30 : vector<1x8x8xbf16> to vector<8x8xbf16>
    %cst_27 = arith.constant dense<0.000000e+00> : vector<288x8xf32>
    %32 = tpu.matmul %29, %31, %cst_27 {dimension_numbers = #tpu.dot_dimension_numbers<[1], [0], [0], [1], [0, 0, 1, 1], [], []>} : vector<288x8xbf16>, vector<8x8xbf16>, vector<288x8xf32> -> vector<288x8xf32>
    %33 = arith.addf %28, %32 : vector<288x8xf32>
    %c36 = arith.constant 36 : index
    %c0_28 = arith.constant 0 : index
    %34 = vector.load %arg9[%c36, %c0_28] : memref<342x8xbf16, #tpu.memory_space<vmem>>, vector<288x8xbf16>
    %c6 = arith.constant 6 : index
    %c0_29 = arith.constant 0 : index
    %c0_30 = arith.constant 0 : index
    %35 = vector.load %arg5[%c6, %c0_29, %c0_30] : memref<9x8x8xbf16, #tpu.memory_space<vmem>>, vector<1x8x8xbf16>
    %36 = vector.shape_cast %35 : vector<1x8x8xbf16> to vector<8x8xbf16>
    %cst_31 = arith.constant dense<0.000000e+00> : vector<288x8xf32>
    %37 = tpu.matmul %34, %36, %cst_31 {dimension_numbers = #tpu.dot_dimension_numbers<[1], [0], [0], [1], [0, 0, 1, 1], [], []>} : vector<288x8xbf16>, vector<8x8xbf16>, vector<288x8xf32> -> vector<288x8xf32>
    %38 = arith.addf %33, %37 : vector<288x8xf32>
    %c37 = arith.constant 37 : index
    %c0_32 = arith.constant 0 : index
    %39 = vector.load %arg9[%c37, %c0_32] : memref<342x8xbf16, #tpu.memory_space<vmem>>, vector<288x8xbf16>
    %c7 = arith.constant 7 : index
    %c0_33 = arith.constant 0 : index
    %c0_34 = arith.constant 0 : index
    %40 = vector.load %arg5[%c7, %c0_33, %c0_34] : memref<9x8x8xbf16, #tpu.memory_space<vmem>>, vector<1x8x8xbf16>
    %41 = vector.shape_cast %40 : vector<1x8x8xbf16> to vector<8x8xbf16>
    %cst_35 = arith.constant dense<0.000000e+00> : vector<288x8xf32>
    %42 = tpu.matmul %39, %41, %cst_35 {dimension_numbers = #tpu.dot_dimension_numbers<[1], [0], [0], [1], [0, 0, 1, 1], [], []>} : vector<288x8xbf16>, vector<8x8xbf16>, vector<288x8xf32> -> vector<288x8xf32>
    %43 = arith.addf %38, %42 : vector<288x8xf32>
    %c38 = arith.constant 38 : index
    %c0_36 = arith.constant 0 : index
    %44 = vector.load %arg9[%c38, %c0_36] : memref<342x8xbf16, #tpu.memory_space<vmem>>, vector<288x8xbf16>
    %c8 = arith.constant 8 : index
    %c0_37 = arith.constant 0 : index
    %c0_38 = arith.constant 0 : index
    %45 = vector.load %arg5[%c8, %c0_37, %c0_38] : memref<9x8x8xbf16, #tpu.memory_space<vmem>>, vector<1x8x8xbf16>
    %46 = vector.shape_cast %45 : vector<1x8x8xbf16> to vector<8x8xbf16>
    %cst_39 = arith.constant dense<0.000000e+00> : vector<288x8xf32>
    %47 = tpu.matmul %44, %46, %cst_39 {dimension_numbers = #tpu.dot_dimension_numbers<[1], [0], [0], [1], [0, 0, 1, 1], [], []>} : vector<288x8xbf16>, vector<8x8xbf16>, vector<288x8xf32> -> vector<288x8xf32>
    %48 = arith.addf %43, %47 : vector<288x8xf32>
    %49 = vector.shape_cast %48 : vector<288x8xf32> to vector<16x18x8xf32>
    %50 = vector.extract_strided_slice %49 {offsets = [0, 0, 0], sizes = [16, 16, 8], strides = [1, 1, 1]} : vector<16x18x8xf32> to vector<16x16x8xf32>
    %c0_40 = arith.constant 0 : index
    %c0_41 = arith.constant 0 : index
    %51 = vector.load %arg6[%c0_40, %c0_41] : memref<1x8xf32, #tpu.memory_space<vmem>>, vector<1x8xf32>
    %52 = vector.shape_cast %51 : vector<1x8xf32> to vector<1x1x8xf32>
    %53 = vector.broadcast %52 : vector<1x1x8xf32> to vector<16x16x8xf32>
    %54 = arith.addf %50, %53 : vector<16x16x8xf32>
    %c0_42 = arith.constant 0 : index
    %c0_43 = arith.constant 0 : index
    %c0_44 = arith.constant 0 : index
    %c0_45 = arith.constant 0 : index
    %55 = vector.load %arg7[%c0_42, %c0_43, %c0_44, %c0_45] : memref<1x16x16x8xf32, #tpu.memory_space<vmem>>, vector<1x16x16x8xf32>
    %56 = vector.shape_cast %55 : vector<1x16x16x8xf32> to vector<16x16x8xf32>
    %57 = arith.addf %54, %56 : vector<16x16x8xf32>
    %c0_46 = arith.constant 0 : index
    %c0_47 = arith.constant 0 : index
    %c0_48 = arith.constant 0 : index
    %c0_49 = arith.constant 0 : index
    %58 = vector.load %arg8[%c0_46, %c0_47, %c0_48, %c0_49] : memref<1x16x16x8xf32, #tpu.memory_space<vmem>>, vector<1x16x16x8xf32>
    %59 = vector.shape_cast %58 : vector<1x16x16x8xf32> to vector<16x16x8xf32>
    %60 = vector.shape_cast %57 : vector<16x16x8xf32> to vector<1x16x16x8xf32>
    tpu.vector_store %arg8[%c0_46, %c0_47, %c0_48, %c0_49], %60 {strides = array<i32>} : memref<1x16x16x8xf32, #tpu.memory_space<vmem>>, vector<1x16x16x8xf32>,
    return
  }
  func.func @transform_0(%arg0: i32, %arg1: i32) -> (i32, i32, i32, i32) {
    %c0_i32 = arith.constant 0 : i32
    %c0_i32_0 = arith.constant 0 : i32
    %c0_i32_1 = arith.constant 0 : i32
    %c0_i32_2 = arith.constant 0 : i32
    return %arg0, %c0_i32, %c0_i32_0, %c0_i32_1 : i32, i32, i32, i32
  }
  func.func @transform_1(%arg0: i32, %arg1: i32) -> (i32, i32) {
    %c0_i32 = arith.constant 0 : i32
    %c0_i32_0 = arith.constant 0 : i32
    %c0_i32_1 = arith.constant 0 : i32
    return %c0_i32, %c0_i32_0 : i32, i32
  }
  func.func @transform_2(%arg0: i32, %arg1: i32) -> (i32, i32) {
    %c0_i32 = arith.constant 0 : i32
    %c0_i32_0 = arith.constant 0 : i32
    %c0_i32_1 = arith.constant 0 : i32
    return %c0_i32, %c0_i32_0 : i32, i32
  }
  func.func @transform_3(%arg0: i32, %arg1: i32) -> (i32, i32, i32) {
    %c0_i32 = arith.constant 0 : i32
    %c0_i32_0 = arith.constant 0 : i32
    %c0_i32_1 = arith.constant 0 : i32
    return %c0_i32, %c0_i32_0, %arg1 : i32, i32, i32
  }
  func.func @transform_4(%arg0: i32, %arg1: i32) -> (i32, i32) {
    %c0_i32 = arith.constant 0 : i32
    %c0_i32_0 = arith.constant 0 : i32
    return %c0_i32, %arg1 : i32, i32
  }
  func.func @transform_5(%arg0: i32, %arg1: i32) -> (i32, i32, i32, i32) {
    %c0_i32 = arith.constant 0 : i32
    %c0_i32_0 = arith.constant 0 : i32
    %c0_i32_1 = arith.constant 0 : i32
    return %arg0, %c0_i32, %c0_i32_0, %arg1 : i32, i32, i32, i32
  }
  func.func @transform_6(%arg0: i32, %arg1: i32) -> (i32, i32, i32, i32) {
    %c0_i32 = arith.constant 0 : i32
    %c0_i32_0 = arith.constant 0 : i32
    %c0_i32_1 = arith.constant 0 : i32
    return %arg0, %c0_i32, %c0_i32_0, %arg1 : i32, i32, i32, i32
  }
}

</mosaic_0001>

<bundles_post_ra>
// kernel: _lambda_.3
= control target key start
LH: loop header
LB: loop body
LE: loop exit
PB: predicated region body
PF: predicated region fallthrough
CT: control target
= control target key end

     0   :  { %vm465_vm0 = vcmask 64512   ;;  %s1602_s0 = inlined_call_operand.vmem [shape: f32[512,8], index: 0, kind: input, shape index: {}]   ;;  %s1603_s1 = inlined_call_operand.vmem [shape: f32[1,8,8], index: 1, kind: output, shape index: {0}]   ;;  %s1604_s2 = inlined_call_operand.vmem [shape: f32[1,8,8], index: 2, kind: output, shape index: {1}]  }
   0x1   :  { %v955_v0 = vld [vmem:[%s1602_s0] sm:$0xff]  ;;  %v960_v1 = vld [vmem:[%s1602_s0 + $0x8] sm:$0xff]  ;;  %v965_v2 = vld [vmem:[%s1602_s0 + $0x10] sm:$0xff] }
   0x2   :  { %v970_v3 = vld [vmem:[%s1602_s0 + $0x18] sm:$0xff]  ;;  %v466_v4 = vsel %vm465_vm0, %v955_v0, 0.0  ;;  %v467_v5 = vsel %vm465_vm0, %v960_v1, 0.0  ;;  %v469_v6 = vsel %vm465_vm0, %v965_v2, 0.0  ;;  %v981_v7 = vld [vmem:[%s1602_s0 + $0x20] sm:$0xff]  ;;  %v988_v10 = vld [vmem:[%s1602_s0 + $0x28] sm:$0xff] }
   0x3   :  { %v468_v8 = vadd.f32 %v467_v5, %v466_v4  ;;  %v471_v9 = vsel %vm465_vm0, %v970_v3, 0.0  ;;  %v473_v12 = vsel %vm465_vm0, %v981_v7, 0.0  ;;  %v995_v13 = vld [vmem:[%s1602_s0 + $0x30] sm:$0xff]  ;;  %v475_v15 = vsel %vm465_vm0, %v988_v10, 0.0  ;;  %v1002_v16 = vld [vmem:[%s1602_s0 + $0x38] sm:$0xff]  ;;  %v1009_v19 = vld [vmem:[%s1602_s0 + $0x40] sm:$0xff] }
   0x4   :  { %v477_v18 = vsel %vm465_vm0, %v995_v13, 0.0  ;;  %v479_v21 = vsel %vm465_vm0, %v1002_v16, 0.0  ;;  %v1016_v22 = vld [vmem:[%s1602_s0 + $0x48] sm:$0xff]  ;;  %v481_v24 = vsel %vm465_vm0, %v1009_v19, 0.0  ;;  %v1023_v25 = vld [vmem:[%s1602_s0 + $0x50] sm:$0xff]  ;;  %v1030_v28 = vld [vmem:[%s1602_s0 + $0x58] sm:$0xff] }
   0x5   :  { %v470_v11 = vadd.f32 %v469_v6, %v468_v8  ;;  %v483_v27 = vsel %vm465_vm0, %v1016_v22, 0.0  ;;  %v485_v30 = vsel %vm465_vm0, %v1023_v25, 0.0  ;;  %v1037_v31 = vld [vmem:[%s1602_s0 + $0x60] sm:$0xff]  ;;  %v487_v33 = vsel %vm465_vm0, %v1030_v28, 0.0  ;;  %v1044_v34 = vld [vmem:[%s1602_s0 + $0x68] sm:$0xff]  ;;  %v1051_v37 = vld [vmem:[%s1602_s0 + $0x70] sm:$0xff] }
   0x6   :  { %v489_v36 = vsel %vm465_vm0, %v1037_v31, 0.0  ;;  %v491_v39 = vsel %vm465_vm0, %v1044_v34, 0.0  ;;  %v1058_v40 = vld [vmem:[%s1602_s0 + $0x78] sm:$0xff]  ;;  %v493_v42 = vsel %vm465_vm0, %v1051_v37, 0.0  ;;  %v1065_v43 = vld [vmem:[%s1602_s0 + $0x80] sm:$0xff]  ;;  %v1072_v46 = vld [vmem:[%s1602_s0 + $0x88] sm:$0xff] }
   0x7   :  { %v472_v14 = vadd.f32 %v471_v9, %v470_v11  ;;  %v495_v45 = vsel %vm465_vm0, %v1058_v40, 0.0  ;;  %v497_v48 = vsel %vm465_vm0, %v1065_v43, 0.0  ;;  %v1079_v49 = vld [vmem:[%s1602_s0 + $0x90] sm:$0xff]  ;;  %v499_v51 = vsel %vm465_vm0, %v1072_v46, 0.0  ;;  %v1086_v52 = vld [vmem:[%s1602_s0 + $0x98] sm:$0xff]  ;;  %v1093_v55 = vld [vmem:[%s1602_s0 + $0xa0] sm:$0xff] }
   0x8   :  { %v501_v54 = vsel %vm465_vm0, %v1079_v49, 0.0  ;;  %v503_v57 = vsel %vm465_vm0, %v1086_v52, 0.0  ;;  %v1100_v58 = vld [vmem:[%s1602_s0 + $0xa8] sm:$0xff]  ;;  %v505_v60 = vsel %vm465_vm0, %v1093_v55, 0.0  ;;  %v1107_v61 = vld [vmem:[%s1602_s0 + $0xb0] sm:$0xff]  ;;  %v1114_v4 = vld [vmem:[%s1602_s0 + $0xb8] sm:$0xff] }
   0x9   :  { %v474_v17 = vadd.f32 %v473_v12, %v472_v14  ;;  %v507_v63 = vsel %vm465_vm0, %v1100_v58, 0.0  ;;  %v509_v6 = vsel %vm465_vm0, %v1107_v61, 0.0  ;;  %v1121_v8 = vld [vmem:[%s1602_s0 + $0xc0] sm:$0xff]  ;;  %v511_v11 = vsel %vm465_vm0, %v1114_v4, 0.0  ;;  %v1128_v12 = vld [vmem:[%s1602_s0 + $0xc8] sm:$0xff] }
   0xb   :  { %v476_v20 = vadd.f32 %v475_v15, %v474_v17  ;;  %v513_v15 = vsel %vm465_vm0, %v1121_v8, 0.0  ;;  %v1135_v17 = vld [vmem:[%s1602_s0 + $0xd0] sm:$0xff] }
   0xd   :  { %v478_v23 = vadd.f32 %v477_v18, %v476_v20  ;;  %v515_v20 = vsel %vm465_vm0, %v1128_v12, 0.0 }
   0xf   :  { %v480_v26 = vadd.f32 %v479_v21, %v478_v23  ;;  %v1142_v21 = vld [vmem:[%s1602_s0 + $0xd8] sm:$0xff] }
  0x11   :  { %v482_v29 = vadd.f32 %v481_v24, %v480_v26  ;;  %v517_v24 = vsel %vm465_vm0, %v1135_v17, 0.0  ;;  %v1149_v26 = vld [vmem:[%s1602_s0 + $0xe0] sm:$0xff] }
  0x13   :  { %v484_v32 = vadd.f32 %v483_v27, %v482_v29  ;;  %v519_v29 = vsel %vm465_vm0, %v1142_v21, 0.0 }
  0x15   :  { %v486_v35 = vadd.f32 %v485_v30, %v484_v32  ;;  %v1156_v30 = vld [vmem:[%s1602_s0 + $0xe8] sm:$0xff] }
  0x17   :  { %v488_v38 = vadd.f32 %v487_v33, %v486_v35  ;;  %v521_v33 = vsel %vm465_vm0, %v1149_v26, 0.0  ;;  %v1163_v35 = vld [vmem:[%s1602_s0 + $0xf0] sm:$0xff] }
  0x19   :  { %v490_v41 = vadd.f32 %v489_v36, %v488_v38  ;;  %v523_v38 = vsel %vm465_vm0, %v1156_v30, 0.0 }
  0x1b   :  { %v492_v44 = vadd.f32 %v491_v39, %v490_v41  ;;  %v1170_v39 = vld [vmem:[%s1602_s0 + $0xf8] sm:$0xff] }
  0x1d   :  { %v494_v47 = vadd.f32 %v493_v42, %v492_v44  ;;  %v525_v42 = vsel %vm465_vm0, %v1163_v35, 0.0  ;;  %v1177_v44 = vld [vmem:[%s1602_s0 + $0x100] sm:$0xff] }
  0x1f   :  { %v496_v50 = vadd.f32 %v495_v45, %v494_v47  ;;  %v527_v47 = vsel %vm465_vm0, %v1170_v39, 0.0 }
  0x21   :  { %v498_v53 = vadd.f32 %v497_v48, %v496_v50  ;;  %v1184_v48 = vld [vmem:[%s1602_s0 + $0x108] sm:$0xff] }
  0x23   :  { %v500_v56 = vadd.f32 %v499_v51, %v498_v53  ;;  %v529_v51 = vsel %vm465_vm0, %v1177_v44, 0.0  ;;  %v1191_v53 = vld [vmem:[%s1602_s0 + $0x110] sm:$0xff] }
  0x25   :  { %v502_v59 = vadd.f32 %v501_v54, %v500_v56  ;;  %v531_v56 = vsel %vm465_vm0, %v1184_v48, 0.0 }
  0x27   :  { %v504_v62 = vadd.f32 %v503_v57, %v502_v59  ;;  %v1198_v57 = vld [vmem:[%s1602_s0 + $0x118] sm:$0xff] }
  0x29   :  { %v506_v5 = vadd.f32 %v505_v60, %v504_v62  ;;  %v533_v60 = vsel %vm465_vm0, %v1191_v53, 0.0  ;;  %v1205_v62 = vld [vmem:[%s1602_s0 + $0x120] sm:$0xff] }
  0x2b   :  { %v508_v9 = vadd.f32 %v507_v63, %v506_v5  ;;  %v535_v5 = vsel %vm465_vm0, %v1198_v57, 0.0 }
  0x2d   :  { %v510_v14 = vadd.f32 %v509_v6, %v508_v9  ;;  %v1212_v6 = vld [vmem:[%s1602_s0 + $0x128] sm:$0xff] }
  0x2f   :  { %v512_v18 = vadd.f32 %v511_v11, %v510_v14  ;;  %v537_v11 = vsel %vm465_vm0, %v1205_v62, 0.0  ;;  %v1219_v14 = vld [vmem:[%s1602_s0 + $0x130] sm:$0xff] }
  0x31   :  { %v514_v23 = vadd.f32 %v513_v15, %v512_v18  ;;  %v539_v18 = vsel %vm465_vm0, %v1212_v6, 0.0 }
  0x33   :  { %v516_v27 = vadd.f32 %v515_v20, %v514_v23  ;;  %v1226_v20 = vld [vmem:[%s1602_s0 + $0x138] sm:$0xff] }
  0x35   :  { %v518_v32 = vadd.f32 %v517_v24, %v516_v27  ;;  %v541_v24 = vsel %vm465_vm0, %v1219_v14, 0.0  ;;  %v1233_v27 = vld [vmem:[%s1602_s0 + $0x140] sm:$0xff] }
  0x37   :  { %v520_v36 = vadd.f32 %v519_v29, %v518_v32  ;;  %v543_v32 = vsel %vm465_vm0, %v1226_v20, 0.0 }
  0x39   :  { %v522_v41 = vadd.f32 %v521_v33, %v520_v36  ;;  %v1240_v33 = vld [vmem:[%s1602_s0 + $0x148] sm:$0xff] }
  0x3b   :  { %v524_v45 = vadd.f32 %v523_v38, %v522_v41  ;;  %v545_v38 = vsel %vm465_vm0, %v1233_v27, 0.0  ;;  %v1247_v41 = vld [vmem:[%s1602_s0 + $0x150] sm:$0xff] }
  0x3d   :  { %v526_v50 = vadd.f32 %v525_v42, %v524_v45  ;;  %v547_v45 = vsel %vm465_vm0, %v1240_v33, 0.0 }
  0x3f   :  { %v528_v54 = vadd.f32 %v527_v47, %v526_v50  ;;  %v1254_v47 = vld [vmem:[%s1602_s0 + $0x158] sm:$0xff] }
  0x41   :  { %v530_v59 = vadd.f32 %v529_v51, %v528_v54  ;;  %v549_v51 = vsel %vm465_vm0, %v1247_v41, 0.0  ;;  %v1261_v54 = vld [vmem:[%s1602_s0 + $0x160] sm:$0xff] }
  0x43   :  { %v532_v63 = vadd.f32 %v531_v56, %v530_v59  ;;  %v551_v59 = vsel %vm465_vm0, %v1254_v47, 0.0 }
  0x45   :  { %v534_v9 = vadd.f32 %v533_v60, %v532_v63  ;;  %v1268_v60 = vld [vmem:[%s1602_s0 + $0x168] sm:$0xff] }
  0x47   :  { %v536_v15 = vadd.f32 %v535_v5, %v534_v9  ;;  %v553_v5 = vsel %vm465_vm0, %v1261_v54, 0.0  ;;  %v1275_v9 = vld [vmem:[%s1602_s0 + $0x170] sm:$0xff] }
  0x49   :  { %v538_v23 = vadd.f32 %v537_v11, %v536_v15  ;;  %v555_v15 = vsel %vm465_vm0, %v1268_v60, 0.0 }
  0x4b   :  { %v540_v29 = vadd.f32 %v539_v18, %v538_v23  ;;  %v1282_v18 = vld [vmem:[%s1602_s0 + $0x178] sm:$0xff] }
  0x4c   :  { %1620 = vst [vmem:[#allocation2_spill] sm:$0xff] %v1282_v18 }
  0x4d   :  { %v542_v36 = vadd.f32 %v541_v24, %v540_v29  ;;  %v557_v24 = vsel %vm465_vm0, %v1275_v9, 0.0  ;;  %v1289_v29 = vld [vmem:[%s1602_s0 + $0x180] sm:$0xff] }
  0x4e   :  { %1621 = vst [vmem:[#allocation3_spill] sm:$0xff] %v1289_v29 }
  0x4f   :  { %v544_v42 = vadd.f32 %v543_v32, %v542_v36  ;;  %v559_v36 = vsel %vm465_vm0, %v1282_v18, 0.0 }
  0x51   :  { %v546_v50 = vadd.f32 %v545_v38, %v544_v42  ;;  %v1296_v38 = vld [vmem:[%s1602_s0 + $0x188] sm:$0xff] }
  0x52   :  { %1622 = vst [vmem:[#allocation4_spill] sm:$0xff] %v1296_v38 }
  0x53   :  { %v548_v56 = vadd.f32 %v547_v45, %v546_v50  ;;  %v561_v45 = vsel %vm465_vm0, %v1289_v29, 0.0  ;;  %v1303_v50 = vld [vmem:[%s1602_s0 + $0x190] sm:$0xff] }
  0x54   :  { %1623 = vst [vmem:[#allocation5_spill] sm:$0xff] %v1303_v50 }
  0x55   :  { %v550_v63 = vadd.f32 %v549_v51, %v548_v56  ;;  %v563_v56 = vsel %vm465_vm0, %v1296_v38, 0.0 }
  0x57   :  { %v552_v11 = vadd.f32 %v551_v59, %v550_v63  ;;  %v1310_v59 = vld [vmem:[%s1602_s0 + $0x198] sm:$0xff] }
  0x58   :  { %1624 = vst [vmem:[#allocation6_spill] sm:$0xff] %v1310_v59 }
  0x59   :  { %v554_v23 = vadd.f32 %v553_v5, %v552_v11  ;;  %v565_v5 = vsel %vm465_vm0, %v1303_v50, 0.0  ;;  %v1317_v11 = vld [vmem:[%s1602_s0 + $0x1a0] sm:$0xff] }
  0x5a   :  { %1625 = vst [vmem:[#allocation7_spill] sm:$0xff] %v1317_v11 }
  0x5b   :  { %v556_v32 = vadd.f32 %v555_v15, %v554_v23  ;;  %v567_v23 = vsel %vm465_vm0, %v1310_v59, 0.0 }
  0x5d   :  { %v558_v42 = vadd.f32 %v557_v24, %v556_v32  ;;  %v1324_v24 = vld [vmem:[%s1602_s0 + $0x1a8] sm:$0xff] }
  0x5e   :  { %1626 = vst [vmem:[#allocation8_spill] sm:$0xff] %v1324_v24 }
  0x5f   :  { %v560_v51 = vadd.f32 %v559_v36, %v558_v42  ;;  %v569_v36 = vsel %vm465_vm0, %v1317_v11, 0.0  ;;  %v1331_v42 = vld [vmem:[%s1602_s0 + $0x1b0] sm:$0xff] }
  0x60   :  { %1627 = vst [vmem:[#allocation9_spill] sm:$0xff] %v1331_v42 }
  0x61   :  { %v562_v63 = vadd.f32 %v561_v45, %v560_v51  ;;  %v571_v51 = vsel %vm465_vm0, %v1324_v24, 0.0 }
  0x63   :  { %v564_v15 = vadd.f32 %v563_v56, %v562_v63  ;;  %v1338_v56 = vld [vmem:[%s1602_s0 + $0x1b8] sm:$0xff] }
  0x64   :  { %1628 = vst [vmem:[#allocation10_spill] sm:$0xff] %v1338_v56 }
  0x65   :  { %v566_v32 = vadd.f32 %v565_v5, %v564_v15  ;;  %v573_v5 = vsel %vm465_vm0, %v1331_v42, 0.0  ;;  %v1345_v15 = vld [vmem:[%s1602_s0 + $0x1c0] sm:$0xff] }
  0x66   :  { %1629 = vst [vmem:[#allocation11_spill] sm:$0xff] %v1345_v15 }
  0x67   :  { %v568_v45 = vadd.f32 %v567_v23, %v566_v32  ;;  %v575_v23 = vsel %vm465_vm0, %v1338_v56, 0.0  ;;  %v1352_v32 = vld [vmem:[%s1602_s0 + $0x1c8] sm:$0xff] }
  0x68   :  { %1630 = vst [vmem:[#allocation12_spill] sm:$0xff] %v1352_v32 }
  0x69   :  { %v570_v63 = vadd.f32 %v569_v36, %v568_v45  ;;  %v577_v36 = vsel %vm465_vm0, %v1345_v15, 0.0  ;;  %v1359_v45 = vld [vmem:[%s1602_s0 + $0x1d0] sm:$0xff] }
  0x6a   :  { %1631 = vst [vmem:[#allocation13_spill] sm:$0xff] %v1359_v45 }
  0x6b   :  { %v572_v11 = vadd.f32 %v571_v51, %v570_v63  ;;  %v579_v51 = vsel %vm465_vm0, %v1352_v32, 0.0  ;;  %v1366_v63 = vld [vmem:[%s1602_s0 + $0x1d8] sm:$0xff] }
  0x6c   :  { %1632 = vst [vmem:[#allocation14_spill] sm:$0xff] %v1366_v63 }
  0x6d   :  { %v574_v24 = vadd.f32 %v573_v5, %v572_v11  ;;  %v581_v11 = vsel %vm465_vm0, %v1359_v45, 0.0  ;;  %v1373_v5 = vld [vmem:[%s1602_s0 + $0x1e0] sm:$0xff] }
  0x6e   :  { %1633 = vst [vmem:[#allocation15_spill] sm:$0xff] %v1373_v5 }
  0x6f   :  { %v576_v42 = vadd.f32 %v575_v23, %v574_v24  ;;  %v583_v24 = vsel %vm465_vm0, %v1366_v63, 0.0  ;;  %v1380_v23 = vld [vmem:[%s1602_s0 + $0x1e8] sm:$0xff] }
  0x70   :  { %1634 = vst [vmem:[#allocation16_spill] sm:$0xff] %v1380_v23 }
  0x71   :  { %v578_v56 = vadd.f32 %v577_v36, %v576_v42  ;;  %v585_v42 = vsel %vm465_vm0, %v1373_v5, 0.0  ;;  %v1387_v36 = vld [vmem:[%s1602_s0 + $0x1f0] sm:$0xff] }
  0x73   :  { %v580_v15 = vadd.f32 %v579_v51, %v578_v56  ;;  %v587_v56 = vsel %vm465_vm0, %v1380_v23, 0.0  ;;  %v1394_v51 = vld [vmem:[%s1602_s0 + $0x1f8] sm:$0xff] }
  0x74   :  { %v591_v5 = vsel %vm465_vm0, %v1394_v51, 0.0 }
  0x75   :  { %v582_v32 = vadd.f32 %v581_v11, %v580_v15  ;;  %v589_v15 = vsel %vm465_vm0, %v1387_v36, 0.0 }
  0x77   :  { %v584_v45 = vadd.f32 %v583_v24, %v582_v32 }
  0x79   :  { %v586_v63 = vadd.f32 %v585_v42, %v584_v45 }
  0x7b   :  { %v588_v11 = vadd.f32 %v587_v56, %v586_v63 }
  0x7d   :  { %v590_v59 = vadd.f32 %v589_v15, %v588_v11 }
  0x7f   :  { %v592_v50 = vadd.f32 %v591_v5, %v590_v59 }
  0x81   :  { %v593_v38 = vrot.slane %v592_v50, 4 }
  0x83   :  { %v594_v32 = vadd.f32 %v593_v38, %v592_v50 }
  0x85   :  { %v595_v24 = vrot.slane %v594_v32, 2 }
  0x87   :  { %v596_v29 = vadd.f32 %v595_v24, %v594_v32 }
  0x89   :  { %v597_v23 = vrot.slane %v596_v29, 1 }
  0x8b   :  { %v598_v18 = vadd.f32 %v597_v23, %v596_v29 }
  0x8d   :  { %927 = vst.msk [vmem:[%s1603_s1] sm:$0xff] %vm465_vm0, %v598_v18  ;;  %v1404_v45 = vmul.f32 0.001953125, %v598_v18 }
  0x8f   :  { %v602_v63 = vsub.f32 %v955_v0, %v1404_v45  ;;  %v603_v42 = vsub.f32 %v960_v1, %v1404_v45  ;;  %v604_v38 = vsub.f32 %v965_v2, %v1404_v45  ;;  %v605_v50 = vsub.f32 %v970_v3, %v1404_v45 }
  0x90   :  { %v606_v29 = vsub.f32 %v981_v7, %v1404_v45  ;;  %v607_v18 = vsub.f32 %v988_v10, %v1404_v45  ;;  %v608_v0 = vsub.f32 %v995_v13, %v1404_v45  ;;  %v609_v7 = vsub.f32 %v1002_v16, %v1404_v45 }
  0x91   :  { %v730_v59 = vmul.f32 %v602_v63, %v602_v63  ;;  %v731_v5 = vmul.f32 %v603_v42, %v603_v42  ;;  %v732_v23 = vmul.f32 %v604_v38, %v604_v38  ;;  %v733_v56 = vmul.f32 %v605_v50, %v605_v50 }
  0x92   :  { %v734_v1 = vmul.f32 %v606_v29, %v606_v29  ;;  %v735_v32 = vmul.f32 %v607_v18, %v607_v18  ;;  %v610_v10 = vsub.f32 %v1009_v19, %v1404_v45  ;;  %v736_v42 = vmul.f32 %v608_v0, %v608_v0 }
  0x93   :  { %v794_v15 = vsel %vm465_vm0, %v730_v59, 0.0  ;;  %v795_v2 = vsel %vm465_vm0, %v731_v5, 0.0  ;;  %v797_v3 = vsel %vm465_vm0, %v732_v23, 0.0  ;;  %v799_v24 = vsel %vm465_vm0, %v733_v56, 0.0 }
  0x94   :  { %v796_v11 = vadd.f32 %v795_v2, %v794_v15  ;;  %v801_v13 = vsel %vm465_vm0, %v734_v1, 0.0  ;;  %v611_v50 = vsub.f32 %v1016_v22, %v1404_v45  ;;  %v737_v29 = vmul.f32 %v609_v7, %v609_v7 }
  0x95   :  { %v803_v59 = vsel %vm465_vm0, %v735_v32, 0.0  ;;  %v612_v16 = vsub.f32 %v1023_v25, %v1404_v45  ;;  %v738_v23 = vmul.f32 %v610_v10, %v610_v10  ;;  %v805_v18 = vsel %vm465_vm0, %v736_v42, 0.0 }
  0x96   :  { %v798_v63 = vadd.f32 %v797_v3, %v796_v11  ;;  %v613_v19 = vsub.f32 %v1030_v28, %v1404_v45  ;;  %v739_v0 = vmul.f32 %v611_v50, %v611_v50  ;;  %v807_v1 = vsel %vm465_vm0, %v737_v29, 0.0 }
  0x97   :  { %v614_v22 = vsub.f32 %v1037_v31, %v1404_v45  ;;  %v740_v2 = vmul.f32 %v612_v16, %v612_v16  ;;  %v809_v3 = vsel %vm465_vm0, %v738_v23, 0.0  ;;  %v615_v25 = vsub.f32 %v1044_v34, %v1404_v45 }
  0x98   :  { %v800_v38 = vadd.f32 %v799_v24, %v798_v63  ;;  %v741_v7 = vmul.f32 %v613_v19, %v613_v19  ;;  %v811_v32 = vsel %vm465_vm0, %v739_v0, 0.0  ;;  %v616_v28 = vsub.f32 %v1051_v37, %v1404_v45 }
  0x99   :  { %v742_v63 = vmul.f32 %v614_v22, %v614_v22  ;;  %v813_v10 = vsel %vm465_vm0, %v740_v2, 0.0  ;;  %v617_v31 = vsub.f32 %v1058_v40, %v1404_v45  ;;  %v618_v34 = vsub.f32 %v1065_v43, %v1404_v45 }
  0x9a   :  { %v802_v5 = vadd.f32 %v801_v13, %v800_v38  ;;  %v743_v13 = vmul.f32 %v615_v25, %v615_v25  ;;  %v815_v38 = vsel %vm465_vm0, %v741_v7, 0.0  ;;  %v744_v29 = vmul.f32 %v616_v28, %v616_v28 }
  0x9b   :  { %v619_v37 = vsub.f32 %v1072_v46, %v1404_v45  ;;  %v745_v16 = vmul.f32 %v617_v31, %v617_v31  ;;  %v620_v40 = vsub.f32 %v1079_v49, %v1404_v45  ;;  %v621_v43 = vsub.f32 %v1086_v52, %v1404_v45 }
  0x9c   :  { %v804_v56 = vadd.f32 %v803_v59, %v802_v5  ;;  %v817_v59 = vsel %vm465_vm0, %v742_v63, 0.0  ;;  %v819_v23 = vsel %vm465_vm0, %v743_v13, 0.0  ;;  %v821_v19 = vsel %vm465_vm0, %v744_v29, 0.0 }
  0x9d   :  { %v622_v46 = vsub.f32 %v1093_v55, %v1404_v45  ;;  %v748_v2 = vmul.f32 %v620_v40, %v620_v40  ;;  %v623_v49 = vsub.f32 %v1100_v58, %v1404_v45  ;;  %v749_v25 = vmul.f32 %v621_v43, %v621_v43 }
  0x9e   :  { %v806_v15 = vadd.f32 %v805_v18, %v804_v56  ;;  %v746_v56 = vmul.f32 %v618_v34, %v618_v34  ;;  %v624_v52 = vsub.f32 %v1107_v61, %v1404_v45  ;;  %v625_v55 = vsub.f32 %v1114_v4, %v1404_v45 }
  0x9f   :  { %v829_v28 = vsel %vm465_vm0, %v748_v2, 0.0  ;;  %v626_v58 = vsub.f32 %v1121_v8, %v1404_v45  ;;  %v627_v61 = vsub.f32 %v1128_v12, %v1404_v45  ;;  %v628_v4 = vsub.f32 %v1135_v17, %v1404_v45 }
  0xa0   :  { %v808_v11 = vadd.f32 %v807_v1, %v806_v15  ;;  %v747_v1 = vmul.f32 %v619_v37, %v619_v37  ;;  %v823_v15 = vsel %vm465_vm0, %v745_v16, 0.0  ;;  %v752_v13 = vmul.f32 %v624_v52, %v624_v52 }
  0xa1   :  { %v753_v34 = vmul.f32 %v625_v55, %v625_v55  ;;  %v629_v8 = vsub.f32 %v1142_v21, %v1404_v45  ;;  %v630_v12 = vsub.f32 %v1149_v26, %v1404_v45  ;;  %v631_v17 = vsub.f32 %v1156_v30, %v1404_v45 }
  0xa2   :  { %v810_v24 = vadd.f32 %v809_v3, %v808_v11  ;;  %v825_v3 = vsel %vm465_vm0, %v746_v56, 0.0  ;;  %v827_v7 = vsel %vm465_vm0, %v747_v1, 0.0  ;;  %v837_v37 = vsel %vm465_vm0, %v752_v13, 0.0 }
  0xa3   :  { %v756_v56 = vmul.f32 %v628_v4, %v628_v4  ;;  %v757_v43 = vmul.f32 %v629_v8, %v629_v8  ;;  %v632_v21 = vsub.f32 %v1163_v35, %v1404_v45  ;;  %v633_v26 = vsub.f32 %v1170_v39, %v1404_v45 }
  0xa4   :  { %v812_v42 = vadd.f32 %v811_v32, %v810_v24  ;;  %v750_v24 = vmul.f32 %v622_v46, %v622_v46  ;;  %v634_v30 = vsub.f32 %v1177_v44, %v1404_v45  ;;  %v635_v35 = vsub.f32 %v1184_v48, %v1404_v45 }
  0xa5   :  { %v845_v46 = vsel %vm465_vm0, %v756_v56, 0.0  ;;  %v761_v52 = vmul.f32 %v633_v26, %v633_v26  ;;  %v636_v39 = vsub.f32 %v1191_v53, %v1404_v45  ;;  %v637_v44 = vsub.f32 %v1198_v57, %v1404_v45 }
  0xa6   :  { %v814_v50 = vadd.f32 %v813_v10, %v812_v42  ;;  %v751_v10 = vmul.f32 %v623_v49, %v623_v49  ;;  %v831_v42 = vsel %vm465_vm0, %v749_v25, 0.0  ;;  %v760_v25 = vmul.f32 %v632_v21, %v632_v21 }
  0xa7   :  { %v638_v48 = vsub.f32 %v1205_v62, %v1404_v45  ;;  %v764_v13 = vmul.f32 %v636_v39, %v636_v39  ;;  %v639_v53 = vsub.f32 %v1212_v6, %v1404_v45  ;;  %v640_v57 = vsub.f32 %v1219_v14, %v1404_v45 }
  0xa8   :  { %v816_v5 = vadd.f32 %v815_v38, %v814_v50  ;;  %v833_v38 = vsel %vm465_vm0, %v750_v24, 0.0  ;;  %v835_v29 = vsel %vm465_vm0, %v751_v10, 0.0  ;;  %v853_v55 = vsel %vm465_vm0, %v760_v25, 0.0 }
  0xa9   :  { %v861_v4 = vsel %vm465_vm0, %v764_v13, 0.0  ;;  %v641_v62 = vsub.f32 %v1226_v20, %v1404_v45  ;;  %v642_v6 = vsub.f32 %v1233_v27, %v1404_v45  ;;  %v643_v14 = vsub.f32 %v1240_v33, %v1404_v45 }
  0xaa   :  { %v818_v18 = vadd.f32 %v817_v59, %v816_v5  ;;  %v754_v5 = vmul.f32 %v626_v58, %v626_v58  ;;  %v644_v20 = vsub.f32 %v1247_v41, %v1404_v45  ;;  %v645_v27 = vsub.f32 %v1254_v47, %v1404_v45 }
  0xab   :  { %v646_v33 = vsub.f32 %v1261_v54, %v1404_v45  ;;  %v647_v41 = vsub.f32 %v1268_v60, %v1404_v45  ;;  %v648_v47 = vsub.f32 %v1275_v9, %v1404_v45  ;;  %v1635_v54 = vld [vmem:[#allocation2_spill] sm:$0xff]  ;;  %v1636_v60 = vld [vmem:[#allocation3_spill] sm:$0xff]  ;;  %v1637_v9 = vld [vmem:[#allocation4_spill] sm:$0xff] }
  0xac   :  { %v820_v0 = vadd.f32 %v819_v23, %v818_v18  ;;  %v755_v23 = vmul.f32 %v627_v61, %v627_v61  ;;  %v839_v18 = vsel %vm465_vm0, %v753_v34, 0.0  ;;  %v765_v61 = vmul.f32 %v637_v44, %v637_v44 }
  0xad   :  { %v773_v26 = vmul.f32 %v645_v27, %v645_v27  ;;  %v1644_v27 = vld [vmem:[#allocation11_spill] sm:$0xff] }
  0xae   :  { %v822_v22 = vadd.f32 %v821_v19, %v820_v0  ;;  %v841_v19 = vsel %vm465_vm0, %v754_v5, 0.0  ;;  %v843_v1 = vsel %vm465_vm0, %v755_v23, 0.0  ;;  %v768_v23 = vmul.f32 %v640_v57, %v640_v57  ;;  %v1640_v57 = vld [vmem:[#allocation7_spill] sm:$0xff] }
  0xb0   :  { %v824_v11 = vadd.f32 %v823_v15, %v822_v22  ;;  %v758_v22 = vmul.f32 %v630_v12, %v630_v12  ;;  %v769_v12 = vmul.f32 %v641_v62, %v641_v62 }
  0xb2   :  { %v826_v32 = vadd.f32 %v825_v3, %v824_v11  ;;  %v759_v3 = vmul.f32 %v631_v17, %v631_v17  ;;  %v847_v11 = vsel %vm465_vm0, %v757_v43, 0.0  ;;  %v869_v17 = vsel %vm465_vm0, %v768_v23, 0.0 }
  0xb4   :  { %v828_v63 = vadd.f32 %v827_v7, %v826_v32  ;;  %v849_v7 = vsel %vm465_vm0, %v758_v22, 0.0  ;;  %v851_v24 = vsel %vm465_vm0, %v759_v3, 0.0  ;;  %v772_v22 = vmul.f32 %v644_v20, %v644_v20 }
  0xb6   :  { %v830_v31 = vadd.f32 %v829_v28, %v828_v63  ;;  %v762_v63 = vmul.f32 %v634_v30, %v634_v30  ;;  %v877_v30 = vsel %vm465_vm0, %v772_v22, 0.0  ;;  %v1645_v22 = vld [vmem:[#allocation12_spill] sm:$0xff] }
  0xb8   :  { %v832_v50 = vadd.f32 %v831_v42, %v830_v31  ;;  %v763_v42 = vmul.f32 %v635_v35, %v635_v35  ;;  %v855_v31 = vsel %vm465_vm0, %v761_v52, 0.0  ;;  %v879_v35 = vsel %vm465_vm0, %v773_v26, 0.0 }
  0xba   :  { %v834_v59 = vadd.f32 %v833_v38, %v832_v50  ;;  %v857_v38 = vsel %vm465_vm0, %v762_v63, 0.0  ;;  %v859_v34 = vsel %vm465_vm0, %v763_v42, 0.0 }
  0xbc   :  { %v836_v16 = vadd.f32 %v835_v29, %v834_v59  ;;  %v766_v59 = vmul.f32 %v638_v48, %v638_v48 }
  0xbe   :  { %v838_v40 = vadd.f32 %v837_v37, %v836_v16  ;;  %v767_v37 = vmul.f32 %v639_v53, %v639_v53  ;;  %v863_v16 = vsel %vm465_vm0, %v765_v61, 0.0 }
  0xc0   :  { %v840_v0 = vadd.f32 %v839_v18, %v838_v40  ;;  %v865_v18 = vsel %vm465_vm0, %v766_v59, 0.0  ;;  %v867_v56 = vsel %vm465_vm0, %v767_v37, 0.0  ;;  %v654_v59 = vsub.f32 %v1640_v57, %v1404_v45  ;;  %v1641_v37 = vld [vmem:[#allocation8_spill] sm:$0xff] }
  0xc2   :  { %v842_v15 = vadd.f32 %v841_v19, %v840_v0  ;;  %v770_v0 = vmul.f32 %v642_v6, %v642_v6 }
  0xc4   :  { %v844_v2 = vadd.f32 %v843_v1, %v842_v15  ;;  %v771_v1 = vmul.f32 %v643_v14, %v643_v14  ;;  %v871_v15 = vsel %vm465_vm0, %v769_v12, 0.0  ;;  %v782_v14 = vmul.f32 %v654_v59, %v654_v59 }
  0xc6   :  { %v846_v49 = vadd.f32 %v845_v46, %v844_v2  ;;  %v873_v46 = vsel %vm465_vm0, %v770_v0, 0.0  ;;  %v875_v3 = vsel %vm465_vm0, %v771_v1, 0.0  ;;  %v658_v1 = vsub.f32 %v1644_v27, %v1404_v45 }
  0xc8   :  { %v848_v32 = vadd.f32 %v847_v11, %v846_v49  ;;  %v774_v49 = vmul.f32 %v646_v33, %v646_v33 }
  0xca   :  { %v850_v28 = vadd.f32 %v849_v7, %v848_v32  ;;  %v649_v7 = vsub.f32 %v1635_v54, %v1404_v45  ;;  %v775_v32 = vmul.f32 %v647_v41, %v647_v41  ;;  %v881_v39 = vsel %vm465_vm0, %v774_v49, 0.0 }
  0xcc   :  { %v852_v10 = vadd.f32 %v851_v24, %v850_v28  ;;  %v650_v24 = vsub.f32 %v1636_v60, %v1404_v45  ;;  %v776_v28 = vmul.f32 %v648_v47, %v648_v47  ;;  %v883_v44 = vsel %vm465_vm0, %v775_v32, 0.0 }
  0xcd   :  { %v786_v47 = vmul.f32 %v658_v1, %v658_v1 }
  0xce   :  { %v854_v58 = vadd.f32 %v853_v55, %v852_v10  ;;  %v651_v55 = vsub.f32 %v1637_v9, %v1404_v45  ;;  %v777_v10 = vmul.f32 %v649_v7, %v649_v7  ;;  %v778_v48 = vmul.f32 %v650_v24, %v650_v24 }
  0xcf   :  { %v885_v13 = vsel %vm465_vm0, %v776_v28, 0.0  ;;  %v905_v28 = vsel %vm465_vm0, %v786_v47, 0.0 }
  0xd0   :  { %v856_v50 = vadd.f32 %v855_v31, %v854_v58  ;;  %v1638_v31 = vld [vmem:[#allocation5_spill] sm:$0xff]  ;;  %v779_v61 = vmul.f32 %v651_v55, %v651_v55 }
  0xd1   :  { %v652_v58 = vsub.f32 %v1638_v31, %v1404_v45 }
  0xd2   :  { %v858_v29 = vadd.f32 %v857_v38, %v856_v50  ;;  %v1639_v50 = vld [vmem:[#allocation6_spill] sm:$0xff]  ;;  %v891_v6 = vsel %vm465_vm0, %v779_v61, 0.0 }
  0xd3   :  { %v653_v53 = vsub.f32 %v1639_v50, %v1404_v45 }
  0xd4   :  { %v860_v5 = vadd.f32 %v859_v34, %v858_v29  ;;  %v887_v34 = vsel %vm465_vm0, %v777_v10, 0.0 }
  0xd6   :  { %v862_v8 = vadd.f32 %v861_v4, %v860_v5  ;;  %v780_v4 = vmul.f32 %v652_v58, %v652_v58  ;;  %v889_v5 = vsel %vm465_vm0, %v778_v48, 0.0 }
  0xd8   :  { %v864_v40 = vadd.f32 %v863_v16, %v862_v8  ;;  %v655_v16 = vsub.f32 %v1641_v37, %v1404_v45  ;;  %v781_v8 = vmul.f32 %v653_v53, %v653_v53  ;;  %v893_v12 = vsel %vm465_vm0, %v780_v4, 0.0 }
  0xda   :  { %v866_v19 = vadd.f32 %v865_v18, %v864_v40  ;;  %v1642_v18 = vld [vmem:[#allocation9_spill] sm:$0xff]  ;;  %v783_v0 = vmul.f32 %v655_v16, %v655_v16 }
  0xdb   :  { %v656_v40 = vsub.f32 %v1642_v18, %v1404_v45 }
  0xdc   :  { %v868_v43 = vadd.f32 %v867_v56, %v866_v19  ;;  %v1643_v19 = vld [vmem:[#allocation10_spill] sm:$0xff]  ;;  %v899_v41 = vsel %vm465_vm0, %v783_v0, 0.0 }
  0xdd   :  { %v657_v20 = vsub.f32 %v1643_v19, %v1404_v45 }
  0xde   :  { %v870_v21 = vadd.f32 %v869_v17, %v868_v43  ;;  %v895_v17 = vsel %vm465_vm0, %v781_v8, 0.0 }
  0xe0   :  { %v872_v2 = vadd.f32 %v871_v15, %v870_v21  ;;  %v784_v15 = vmul.f32 %v656_v40, %v656_v40  ;;  %v897_v21 = vsel %vm465_vm0, %v782_v14, 0.0 }
  0xe2   :  { %v874_v11 = vadd.f32 %v873_v46, %v872_v2  ;;  %v659_v46 = vsub.f32 %v1645_v22, %v1404_v45  ;;  %v785_v2 = vmul.f32 %v657_v20, %v657_v20  ;;  %v901_v49 = vsel %vm465_vm0, %v784_v15, 0.0 }
  0xe4   :  { %v876_v25 = vadd.f32 %v875_v3, %v874_v11  ;;  %v1646_v3 = vld [vmem:[#allocation13_spill] sm:$0xff]  ;;  %v787_v7 = vmul.f32 %v659_v46, %v659_v46  ;;  %v903_v32 = vsel %vm465_vm0, %v785_v2, 0.0 }
  0xe5   :  { %v660_v11 = vsub.f32 %v1646_v3, %v1404_v45 }
  0xe6   :  { %v878_v52 = vadd.f32 %v877_v30, %v876_v25  ;;  %v1647_v25 = vld [vmem:[#allocation14_spill] sm:$0xff]  ;;  %v907_v10 = vsel %vm465_vm0, %v787_v7, 0.0 }
  0xe7   :  { %v661_v54 = vsub.f32 %v1647_v25, %v1404_v45  ;;  %v788_v24 = vmul.f32 %v660_v11, %v660_v11 }
  0xe8   :  { %v880_v63 = vadd.f32 %v879_v35, %v878_v52  ;;  %v1648_v52 = vld [vmem:[#allocation15_spill] sm:$0xff] }
  0xe9   :  { %v662_v60 = vsub.f32 %v1648_v52, %v1404_v45  ;;  %v789_v55 = vmul.f32 %v661_v54, %v661_v54  ;;  %v909_v58 = vsel %vm465_vm0, %v788_v24, 0.0 }
  0xea   :  { %v882_v42 = vadd.f32 %v881_v39, %v880_v63  ;;  %v1649_v63 = vld [vmem:[#allocation16_spill] sm:$0xff] }
  0xeb   :  { %v663_v9 = vsub.f32 %v1649_v63, %v1404_v45  ;;  %v790_v31 = vmul.f32 %v662_v60, %v662_v60  ;;  %v911_v50 = vsel %vm465_vm0, %v789_v55, 0.0 }
  0xec   :  { %v884_v38 = vadd.f32 %v883_v44, %v882_v42  ;;  %v664_v42 = vsub.f32 %v1387_v36, %v1404_v45 }
  0xee   :  { %v886_v29 = vadd.f32 %v885_v13, %v884_v38  ;;  %v665_v13 = vsub.f32 %v1394_v51, %v1404_v45  ;;  %v791_v38 = vmul.f32 %v663_v9, %v663_v9  ;;  %v792_v61 = vmul.f32 %v664_v42, %v664_v42 }
  0xf0   :  { %v888_v62 = vadd.f32 %v887_v34, %v886_v29  ;;  %v913_v34 = vsel %vm465_vm0, %v790_v31, 0.0  ;;  %v793_v57 = vmul.f32 %v665_v13, %v665_v13  ;;  %v915_v59 = vsel %vm465_vm0, %v791_v38, 0.0 }
  0xf1   :  { %v917_v36 = vsel %vm465_vm0, %v792_v61, 0.0 }
  0xf2   :  { %v890_v23 = vadd.f32 %v889_v5, %v888_v62  ;;  %v919_v62 = vsel %vm465_vm0, %v793_v57, 0.0 }
  0xf4   :  { %v892_v56 = vadd.f32 %v891_v6, %v890_v23 }
  0xf6   :  { %v894_v43 = vadd.f32 %v893_v12, %v892_v56 }
  0xf8   :  { %v896_v33 = vadd.f32 %v895_v17, %v894_v43 }
  0xfa   :  { %v898_v26 = vadd.f32 %v897_v21, %v896_v33 }
  0xfc   :  { %v900_v30 = vadd.f32 %v899_v41, %v898_v26 }
  0xfe   :  { %v902_v35 = vadd.f32 %v901_v49, %v900_v30 }
 0x100   :  { %v904_v39 = vadd.f32 %v903_v32, %v902_v35 }
 0x102   :  { %v906_v44 = vadd.f32 %v905_v28, %v904_v39 }
 0x104   :  { %v908_v48 = vadd.f32 %v907_v10, %v906_v44 }
 0x106   :  { %v910_v53 = vadd.f32 %v909_v58, %v908_v48 }
 0x108   :  { %v912_v29 = vadd.f32 %v911_v50, %v910_v53 }
 0x10a   :  { %v914_v4 = vadd.f32 %v913_v34, %v912_v29 }
 0x10c   :  { %v916_v5 = vadd.f32 %v915_v59, %v914_v4 }
 0x10e   :  { %v918_v37 = vadd.f32 %v917_v36, %v916_v5 }
 0x110   :  { %v920_v16 = vadd.f32 %v919_v62, %v918_v37 }
 0x112   :  { %v921_v51 = vrot.slane %v920_v16, 4 }
 0x114   :  { %v922_v45 = vadd.f32 %v921_v51, %v920_v16 }
 0x116   :  { %v923_v8 = vrot.slane %v922_v45, 2 }
 0x118   :  { %v924_v6 = vadd.f32 %v923_v8, %v922_v45 }
 0x11a   :  { %v925_v23 = vrot.slane %v924_v6, 1 }
 0x11c   :  { %v926_v18 = vadd.f32 %v925_v23, %v924_v6 }
 0x11e   :  { %928 = vst.msk [vmem:[%s1604_s2] sm:$0xff] %vm465_vm0, %v926_v18 }

// kernel: _lambda_.5
= control target key start
LH: loop header
LB: loop body
LE: loop exit
PB: predicated region body
PF: predicated region fallthrough
CT: control target
= control target key end

     0   :  { %s10155_s21 = smov 0   ;;  %s10157_s22 = smov 0   ;;  %s12605_s0 = inlined_call_operand.vmem [shape: bf16[2,16,16,8], index: 0, kind: input, shape index: {}]   ;;  %s12606_s1 = inlined_call_operand.vmem [shape: f32[1,8], index: 1, kind: input, shape index: {}]   ;;  %s12607_s2 = inlined_call_operand.vmem [shape: f32[1,8], index: 2, kind: input, shape index: {}]   ;;  %s12608_s3 = inlined_call_operand.vmem [shape: bf16[9,8,8], index: 3, kind: input, shape index: {}]   ;;  %s12609_s4 = inlined_call_operand.vmem [shape: f32[1,8], index: 4, kind: input, shape index: {}]   ;;  %s12610_s5 = inlined_call_operand.vmem [shape: f32[2,16,16,8], index: 5, kind: input, shape index: {}]   ;;  %s12611_s6 = inlined_call_operand.vmem [shape: f32[2,16,16,8], index: 6, kind: output, shape index: {}]  }
   0x1   :  { %s10159_s23 = smov 0  }
   0x2 LB: > { %s28_s24 = sadd.s32 1, %s10110_s22  ;;  %p8812_p0 = scmp.ge.s32.totalorder %s10114_s23, 1  ;;  %s10114_s23 = sphi %s10159_s23, %s16_s23   ;;  %s10110_s22 = sphi %s10157_s22, %s12794_s22   ;;  %s10106_s21 = sphi %s10155_s21, %s12793_s21  }
   0x3   : > { %p30_p1 = scmp.ge.s32.totalorder %s28_s24, 2  ;;  %p258_p2 = scmp.lt.s32.totalorder %s10114_s23, 3 }
   0x5   : > { %s12796_s24 = smov (%p30_p1, %s28_s24), 0  ;;  %p259_p3 = pnand %p8812_p0, %p258_p2 }
   0x7   : > { %262 = sbr.rel (%p259_p3) target bundleno = 819 (0x333), region = 44 }
   0xe   : > { %v8821_v0 = vld [vmem:[%s12608_s3 + $0x4] sm:$0xf]  ;;  %vm3049_vm0 = vcmask 1043456   ;;  %v8935_v1 = vld [vmem:[%s12608_s3 + $0x10] sm:$0xf]  ;;  %p306_p4 = scmp.lt.s32.totalorder %s10106_s21, 1  ;;  %v744_v3 = vlaneseq }
   0xf   : > { %9941 = vmatprep.subr.msk.bf16.mxu1 %vm3049_vm0, %v8821_v0  ;;  %v3051_v2 = vsel %vm3049_vm0, %v8821_v0, 0  ;;  %9945 = vmatprep.subr.msk.bf16.mxu0 %vm3049_vm0, %v8935_v1  ;;  %v10116_v4 = vmov 1966171168   ;;  %vm1748_vm1 = vcmask 60416   ;;  %vm1751_vm2 = vcmask 57344  }
  0x10   : > { %9310 = vmatpush3.bf16.msra.mxu1 %v3051_v2  ;;  %s12798_s21 = smov (!%p306_p4, %s10106_s21), 1  ;;  %v742_v5 = vunpack.c.l.s4 %v10116_v4  ;;  %v10117_v6 = vmov 0   ;;  %vm1753_vm3 = vcmask 60417   ;;  %v10198_v7 = vld [vmem:[%s12606_s1] ss:$0 sm:$0xff]  ;;  %v10209_v13 = vsel %vm3049_vm0, %v8935_v1, 0 }
  0x11   : > { %s9056_s29 = sshll.u32 %s12798_s21, 7  ;;  %1749 = vst.msk [vmem:[#allocation2] sm:$0xf] %vm1748_vm1, %v10117_v6  ;;  %1750 = vst.msk [vmem:[#allocation2 + $0x4] sm:$0xf] %vm1748_vm1, %v10117_v6  ;;  %v10214_v19 = vshrl.u32 %v744_v3, 7  ;;  %9462 = vmatpush3.bf16.msra.mxu0 %v10209_v13 }
  0x12   : > { %1752 = vst.msk [vmem:[#allocation2 + $0x8] sm:$0x1] %vm1751_vm2, %v10117_v6  ;;  %s10193_s8 = scalar_lea.vmem %s12605_s0, %s9056_s29  ;;  %v10118_v8 = vmov 1935823168   ;;  %v8955_v10 = vld [vmem:[%s12608_s3 + $0x14] sm:$0xf]  ;;  %v743_v18 = vunpack.c.0.s8 %v742_v5 }
  0x13   : > { %1755 = vst.msk [vmem:[#allocation2 + $0x9c] sm:$0xf] %vm1748_vm1, %v10117_v6  ;;  %1756 = vst.msk [vmem:[#allocation2 + $0xa0] sm:$0xf] %vm1748_vm1, %v10117_v6  ;;  %v1763_v9 = vunpack.c.l.s4 %v10118_v8  ;;  %v2748_v11 = vld [vmem:[%s12608_s3] sm:$0xf]  ;;  %9947 = vmatprep.subr.msk.bf16.mxu0 %vm3049_vm0, %v8955_v10 }
  0x14   : > { %1754 = vst.msk [vmem:[#allocation2 + $0x98] sm:$0xe] %vm1753_vm3, %v10117_v6  ;;  %v9060_v12 = vld [vmem:[%s10193_s8] sm:$0xff]   ;;  %v9123_v14 = vld [vmem:[%s10193_s8 + $0x8] sm:$0xff]   ;;  %v9124_v15 = vld [vmem:[%s10193_s8 + $0x10] sm:$0xff]   ;;  %9942 = vmatprep.subr.msk.bf16.mxu1 %vm3049_vm0, %v2748_v11  ;;  %vm673_vm4 = vcmask 1040384   ;;  %v10230_v32 = vsub.s32 %v743_v18, %v10214_v19 }
  0x15   : > { %v9061_v16 = vunpack.c.l.bf16 %v9060_v12  ;;  %v9062_v17 = vunpack.c.h.bf16 %v9060_v12  ;;  %12670 = vst [vmem:[#allocation3_spill] sm:$0xff] %v10214_v19  ;;  %v10220_v20 = vld [vmem:[%s12607_s2] ss:$0 sm:$0xff]  ;;  %v1764_v21 = vunpack.c.0.s8 %v1763_v9  ;;  %v9065_v22 = vunpack.c.l.bf16 %v9123_v14  ;;  %v9125_v36 = vld [vmem:[%s10193_s8 + $0x18] sm:$0xff]   ;;  %s9057_s15 = sshll.u32 %s12798_s21, 8 }
  0x16   : > { %v9066_v23 = vunpack.c.h.bf16 %v9123_v14  ;;  %v9069_v26 = vunpack.c.l.bf16 %v9124_v15  ;;  %vm674_vm5 = vsmask.f32 256  ;;  %v9070_v29 = vunpack.c.h.bf16 %v9124_v15  ;;  %v10251_v61 = vld [vmem:[%s10193_s8 + $0x20] sm:$0xff]   ;;  %s11484_s18 = scalar_lea.vmem %s12610_s5, %s9057_s15  ;;  %s11871_s27 = scalar_lea.vmem %s12611_s6, %s9057_s15 }
  0x17   : > { %v410_v24 = vmul.f32 %v9061_v16, %v10198_v7  ;;  %v411_v25 = vmul.f32 %v9062_v17, %v10198_v7  ;;  %v412_v27 = vmul.f32 %v9065_v22, %v10198_v7  ;;  %v10235_v37 = vsub.s32 %v1764_v21, %v10214_v19  ;;  %vm10262_vm6 = vmand %vm673_vm4, %vm674_vm5 }
  0x18   : > { %v413_v28 = vmul.f32 %v9066_v23, %v10198_v7  ;;  %v2712_v33 = vld [vmem:[#allocation2] sm:$0xf]  ;;  %v2713_v34 = vld [vmem:[#allocation2 + $0x4] sm:$0xf]  ;;  %v414_v35 = vmul.f32 %v9069_v26, %v10198_v7  ;;  %v415_v43 = vmul.f32 %v9070_v29, %v10198_v7  ;;  %v9073_v52 = vunpack.c.l.bf16 %v9125_v36 }
  0x19   : > { %v449_v30 = vadd.f32 %v10220_v20, %v410_v24  ;;  %v450_v31 = vadd.f32 %v10220_v20, %v411_v25  ;;  %v10237_v38 = vcombine.low %v2712_v33, %v2713_v34  ;;  %v451_v39 = vadd.f32 %v10220_v20, %v412_v27 }
  0x1a   : > { %v452_v40 = vadd.f32 %v10220_v20, %v413_v28  ;;  %v453_v44 = vadd.f32 %v10220_v20, %v414_v35  ;;  %v454_v50 = vadd.f32 %v10220_v20, %v415_v43  ;;  %v10247_v55 = vsel %vm3049_vm0, %v8955_v10, 0 }
  0x1b   : > { %v481_v41 = vmax.f32 %v449_v30, 0.0  ;;  %v482_v42 = vmax.f32 %v450_v31, 0.0  ;;  %v2847_v45 = vshrl.u32 %v10237_v38, 16  ;;  %v2849_v46 = vshll.u32 %v10237_v38, 16 }
  0x1c   : > { %v483_v47 = vmax.f32 %v451_v39, 0.0  ;;  %v484_v48 = vmax.f32 %v452_v40, 0.0  ;;  %v485_v51 = vmax.f32 %v453_v44, 0.0  ;;  %v9074_v56 = vunpack.c.h.bf16 %v9125_v36 }
  0x1d   : > { %v513_v49 = vpack.c.bf16 %v482_v42, %v481_v41  ;;  %v2851_v53 = vrot.slane %v2849_v46, 1  ;;  %v486_v59 = vmax.f32 %v454_v50, 0.0  ;;  %v416_v60 = vmul.f32 %v9073_v52, %v10198_v7 }
  0x1e   : > { %v514_v54 = vpack.c.bf16 %v484_v48, %v483_v47  ;;  %v417_v0 = vmul.f32 %v9074_v56, %v10198_v7  ;;  %v10255_v1 = vsel %vm3049_vm0, %v2748_v11, 0  ;;  %v9077_v10 = vunpack.c.l.bf16 %v10251_v61 }
  0x1f   : > { %v530_v57 = vshrl.u32 %v513_v49, 16  ;;  %v533_v58 = vshll.u32 %v513_v49, 16  ;;  %v10257_v3 = vor.u32 %v2851_v53, %v2847_v45  ;;  %v515_v4 = vpack.c.bf16 %v486_v59, %v485_v51 }
  0x20   : > { %v537_v62 = vshrl.u32 %v514_v54, 16  ;;  %v540_v63 = vshll.u32 %v514_v54, 16  ;;  %v455_v5 = vadd.f32 %v10220_v20, %v416_v60  ;;  %v456_v9 = vadd.f32 %v10220_v20, %v417_v0 }
  0x21   : > { %v532_v2 = vrot.slane %v530_v57, 7  ;;  %v9078_v11 = vunpack.c.h.bf16 %v10251_v61  ;;  %v544_v15 = vshrl.u32 %v515_v4, 16  ;;  %v547_v16 = vshll.u32 %v515_v4, 16 }
  0x22   : > { %v539_v8 = vrot.slane %v537_v62, 7  ;;  %v487_v22 = vmax.f32 %v455_v5, 0.0  ;;  %v488_v26 = vmax.f32 %v456_v9, 0.0  ;;  %vm2845_vm7 = vsmask.f32 7424 }
  0x23   : > { %v535_v12 = vor.u32 %v533_v58, %v532_v2  ;;  %v692_v14 = vsel %vm10262_vm6, %v532_v2, 0  ;;  %v10276_v24 = vrot.slane %v544_v15, 7  ;;  %vm2994_vm8 = vcmask 64512  }
  0x24   : > { %v542_v17 = vor.u32 %v540_v63, %v539_v8  ;;  %v795_v18 = vrot.slane %v692_v14, %v10230_v32  ;;  %v693_v21 = vsel %vm10262_vm6, %v539_v8, 0  ;;  %v10288_v41 = vpack.c.bf16 %v488_v26, %v487_v22 }
  0x25   : > { %v676_v23 = vsel %vm10262_vm6, 0, %v535_v12  ;;  %v858_v25 = vrot.slane %v693_v21, %v10230_v32  ;;  %v549_v34 = vor.u32 %v547_v16, %v10276_v24  ;;  %vm4205_vm9 = vsmask.f32 6400 }
  0x26   : > { %v740_v27 = vcombine.high %v676_v23, %v676_v23  ;;  %v747_v28 = vrot.slane %v676_v23, %v10230_v32  ;;  %v677_v29 = vsel %vm10262_vm6, 0, %v542_v17  ;;  %v802_v30 = vrot.slane %v795_v18, %v10230_v32 }
  0x27   : > { %v803_v31 = vcombine.high %v677_v29, %v677_v29  ;;  %v810_v33 = vrot.slane %v677_v29, %v10230_v32  ;;  %v865_v35 = vrot.slane %v858_v25, %v10230_v32  ;;  %v678_v45 = vsel %vm10262_vm6, 0, %v549_v34 }
  0x28   : > { %v754_v36 = vrot.slane %v740_v27, %v10230_v32  ;;  %v755_v39 = vcombine.high %v747_v28, %v747_v28  ;;  %v763_v40 = vrot.slane %v747_v28, %v10230_v32  ;;  %v866_v28 = vcombine.high %v678_v45, %v678_v45 }
  0x29   : > { %v817_v42 = vrot.slane %v803_v31, %v10230_v32  ;;  %v818_v43 = vcombine.high %v810_v33, %v810_v33  ;;  %v826_v44 = vrot.slane %v810_v33, %v10230_v32  ;;  %v873_v29 = vrot.slane %v678_v45, %v10230_v32 }
  0x2a   : > { %v756_v46 = vcombine.high %v754_v36, %v754_v36  ;;  %v770_v47 = vrot.slane %v754_v36, %v10230_v32  ;;  %v777_v48 = vrot.slane %v755_v39, %v10230_v32  ;;  %v785_v49 = vcombine.high %v763_v40, %v763_v40 }
  0x2b   : > { %v819_v50 = vcombine.high %v817_v42, %v817_v42  ;;  %v833_v51 = vrot.slane %v817_v42, %v10230_v32  ;;  %v840_v52 = vrot.slane %v818_v43, %v10230_v32  ;;  %v848_v53 = vcombine.high %v826_v44, %v826_v44 }
  0x2c   : > { %v784_v54 = vrot.slane %v756_v46, %v10230_v32  ;;  %v786_v56 = vcombine.high %v770_v47, %v770_v47  ;;  %v787_v57 = vcombine.high %v777_v48, %v777_v48  ;;  %v1760_v58 = vcombine.low %v777_v48, %v777_v48 }
  0x2d   : > { %v1761_v59 = vcombine.low %v763_v40, %v785_v49  ;;  %v847_v60 = vrot.slane %v819_v50, %v10230_v32  ;;  %v850_v62 = vcombine.high %v840_v52, %v840_v52  ;;  %v1809_v63 = vcombine.low %v802_v30, %v840_v52 }
  0x2e   : > { %v788_v0 = vcombine.high %v784_v54, %v784_v54  ;;  %v1768_v2 = vrot.slane %v1760_v58, %v10235_v37  ;;  %v1784_v4 = vcombine.low %v787_v57, %v784_v54  ;;  %v1785_v5 = vcombine.low %v770_v47, %v786_v56 }
  0x2f   : > { %v1775_v8 = vrot.slane %v1761_v59, %v10235_v37  ;;  %v1823_v9 = vrot.slane %v1809_v63, %v10235_v37  ;;  %v1832_v12 = vcombine.low %v848_v53, %v833_v51  ;;  %v1833_v14 = vcombine.low %v850_v62, %v847_v60  ;;  %v10332_v59 = vld [vmem:[%s10193_s8 + $0x28] sm:$0xff]  }
  0x30   : > { %v1792_v15 = vrot.slane %v1784_v4, %v10235_v37  ;;  %v1799_v16 = vrot.slane %v1785_v5, %v10235_v37  ;;  %v1808_v17 = vcombine.low %v788_v0, %v826_v44  ;;  %v849_v18 = vcombine.high %v833_v51, %v833_v51 }
  0x31   : > { %v1776_v21 = vcombine.low %v1768_v2, %v1775_v8  ;;  %v1840_v22 = vrot.slane %v1832_v12, %v10235_v37  ;;  %v1847_v23 = vrot.slane %v1833_v14, %v10235_v37  ;;  %v851_v25 = vcombine.high %v847_v60, %v847_v60 }
  0x32   : > { %v1800_v26 = vcombine.low %v1792_v15, %v1799_v16  ;;  %v1816_v27 = vrot.slane %v1808_v17, %v10235_v37  ;;  %v1856_v33 = vcombine.low %v849_v18, %v865_v35  ;;  %v551_v34 = vshrl.u32 %v10288_v41, 16 }
  0x33   : > { %v1783_v30 = vrot.slane %v1776_v21, %v10235_v37  ;;  %v1848_v31 = vcombine.low %v1840_v22, %v1847_v23  ;;  %v880_v40 = vrot.slane %v866_v28, %v10230_v32  ;;  %v881_v42 = vcombine.high %v873_v29, %v873_v29 }
  0x34   : > { %v1807_v36 = vrot.slane %v1800_v26, %v10235_v37  ;;  %v1824_v39 = vcombine.low %v1816_v27, %v1823_v9  ;;  %v889_v44 = vrot.slane %v873_v29, %v10230_v32  ;;  %v1864_v45 = vrot.slane %v1856_v33, %v10235_v37 }
  0x35   : > { %2675 = vst.msk [vmem:[#allocation2 + $0x8] sm:$0xe] %vm1753_vm3, %v1783_v30  ;;  %v1855_v43 = vrot.slane %v1848_v31, %v10235_v37  ;;  %v10317_v46 = vrot.slane %v551_v34, 7  ;;  %v896_v47 = vrot.slane %v880_v40, %v10230_v32  ;;  %v903_v48 = vrot.slane %v881_v42, %v10230_v32 }
  0x36   : > { %2676 = vst.msk [vmem:[#allocation2 + $0xc] sm:$0xf] %vm1748_vm1, %v1807_v36  ;;  %v1831_v35 = vrot.slane %v1824_v39, %v10235_v37  ;;  %v554_v49 = vshll.u32 %v10288_v41, 16  ;;  %v911_v50 = vcombine.high %v889_v44, %v889_v44  ;;  %v1857_v51 = vcombine.low %v851_v25, %v889_v44 }
  0x37   : > { %2678 = vst.msk [vmem:[#allocation2 + $0x14] sm:$0xf] %vm1748_vm1, %v1855_v43  ;;  %v694_v52 = vsel %vm10262_vm6, %v10276_v24, 0  ;;  %v882_v53 = vcombine.high %v880_v40, %v880_v40  ;;  %v913_v54 = vcombine.high %v903_v48, %v903_v48  ;;  %v912_v57 = vcombine.high %v896_v47, %v896_v47 }
  0x38   : > { %2677 = vst.msk [vmem:[#allocation2 + $0x10] sm:$0xf] %vm1748_vm1, %v1831_v35  ;;  %v556_v56 = vor.u32 %v554_v49, %v10317_v46  ;;  %v921_v58 = vrot.slane %v694_v52, %v10230_v32  ;;  %v1871_v41 = vrot.slane %v1857_v51, %v10235_v37  ;;  %v1881_v60 = vcombine.low %v911_v50, %v896_v47 }
  0x39   : > { %v910_v62 = vrot.slane %v882_v53, %v10230_v32  ;;  %v418_v24 = vmul.f32 %v9077_v10, %v10198_v7  ;;  %v1880_v63 = vcombine.low %v903_v48, %v913_v54  ;;  %v419_v4 = vmul.f32 %v9078_v11, %v10198_v7 }
  0x3a   : > { %v10341_v0 = vsel %vm10262_vm6, 0, %v556_v56  ;;  %v928_v2 = vrot.slane %v921_v58, %v10230_v32  ;;  %v1872_v5 = vcombine.low %v1864_v45, %v1871_v41  ;;  %v1895_v8 = vrot.slane %v1881_v60, %v10235_v37 }
  0x3b   : > { %v914_v9 = vcombine.high %v910_v62, %v910_v62  ;;  %v9081_v12 = vunpack.c.l.bf16 %v10332_v59  ;;  %v1888_v10 = vrot.slane %v1880_v63, %v10235_v37  ;;  %v929_v15 = vcombine.high %v10341_v0, %v10341_v0 }
  0x3c   : > { %v3760_v14 = vld [vmem:[#allocation2 + $0x8] sm:$0xe]  ;;  %v936_v16 = vrot.slane %v10341_v0, %v10230_v32  ;;  %v1905_v17 = vcombine.low %v912_v57, %v928_v2  ;;  %v1879_v61 = vrot.slane %v1872_v5, %v10235_v37  ;;  %v457_v22 = vadd.f32 %v10220_v20, %v418_v24 }
  0x3d   : > { %v9980_v18 = vld [vmem:[#allocation2 + $0x8] sm:$0xff]   ;;  %v1904_v11 = vcombine.low %v910_v62, %v914_v9  ;;  %v458_v23 = vadd.f32 %v10220_v20, %v419_v4  ;;  %v1896_v26 = vcombine.low %v1888_v10, %v1895_v8  ;;  %v695_v51 = vsel %vm10262_vm6, %v10317_v46, 0 }
  0x3e   : > { %v10354_v21 = vld [vmem:[#allocation2 + $0xc] sm:$0xf]  ;;  %v944_v27 = vcombine.high %v936_v16, %v936_v16  ;;  %v952_v28 = vrot.slane %v936_v16, %v10230_v32  ;;  %v2854_v29 = vshll.u32 %v9980_v18, 16  ;;  %v2858_v30 = vshrl.u32 %v9980_v18, 16  ;;  %2679 = vst.msk [vmem:[#allocation2 + $0x18] sm:$0xf] %vm1748_vm1, %v1879_v61 }
  0x3f   : > { %v10360_v25 = vcombine.low %v3760_v14, %v10354_v21  ;;  %v9981_v31 = vld [vmem:[#allocation2 + $0x10] sm:$0xff]   ;;  %v1912_v34 = vrot.slane %v1904_v11, %v10235_v37  ;;  %v1919_v36 = vrot.slane %v1905_v17, %v10235_v37  ;;  %v1903_v42 = vrot.slane %v1896_v26, %v10235_v37 }
  0x40   : > { %v10363_v33 = vld [vmem:[#allocation2 + $0x10] sm:$0xff]   ;;  %v966_v43 = vrot.slane %v944_v27, %v10230_v32  ;;  %v2856_v44 = vrot.slane %v2854_v29, 1  ;;  %v2862_v45 = vshll.u32 %v9981_v31, 16  ;;  %v974_v50 = vcombine.high %v952_v28, %v952_v28 }
  0x41   : > { %v4207_v39 = vshrl.u32 %v10360_v25, 16  ;;  %v4210_v40 = vshll.u32 %v10360_v25, 16  ;;  %v4215_v35 = vshrl.u32 %v10363_v33, 16  ;;  %v4218_v47 = vshll.u32 %v10363_v33, 16  ;;  %2680 = vst.msk [vmem:[#allocation2 + $0x1c] sm:$0xf] %vm1748_vm1, %v1903_v42 }
  0x42   : > { %v2857_v52 = vsel %vm2845_vm7, %v10257_v3, %v2856_v44  ;;  %v2860_v53 = vor.u32 %v2858_v30, %v2856_v44  ;;  %v2864_v54 = vrot.slane %v2862_v45, 1  ;;  %v976_v41 = vcombine.high %v966_v43, %v966_v43 }
  0x43   : > { %v4209_v48 = vrot.slane %v4207_v39, 1  ;;  %v4212_v49 = vrot.slane %v4210_v40, 2  ;;  %v4217_v56 = vrot.slane %v4215_v35, 1  ;;  %9311 = vmatprep.mubr.msk.bf16.mxu1 %vm2994_vm8, %v2857_v52  ;;  %v4220_v58 = vrot.slane %v4218_v47, 2 }
  0x44   : > { %v1920_v60 = vcombine.low %v1912_v34, %v1919_v36  ;;  %v2865_v62 = vsel %vm2845_vm7, %v2860_v53, %v2864_v54  ;;  %v2866_v24 = vshrl.u32 %v9981_v31, 16  ;;  %v1928_v63 = vcombine.low %v952_v28, %v974_v50 }
  0x45   : > { %v4213_v57 = vor.u32 %v4212_v49, %v4209_v48  ;;  %v489_v0 = vmax.f32 %v457_v22, 0.0  ;;  %9312 = vmatmul.mubr.msk.bf16.vlgmr.msra.gmra.mrb[0].mxu1 %vm2994_vm8, %v2865_v62  ;;  %v4221_v46 = vor.u32 %v4220_v58, %v4217_v56  ;;  %v1929_v3 = vcombine.low %v966_v43, %v976_v41 }
  0x46   : > { %v1927_v2 = vrot.slane %v1920_v60, %v10235_v37  ;;  %v490_v4 = vmax.f32 %v458_v23, 0.0  ;;  %v1936_v5 = vrot.slane %v1928_v63, %v10235_v37  ;;  %9348 = vmatpush3.bf16.msra.mxu1 %v10255_v1  ;;  %v943_v8 = vrot.slane %v929_v15, %v10230_v32 }
  0x47   : > { %v10388_v9 = vrot.slane %v695_v51, %v10230_v32  ;;  %v9082_v14 = vunpack.c.h.bf16 %v10332_v59  ;;  %v4222_v10 = vsel %vm4205_vm9, %v4213_v57, %v4221_v46  ;;  %v1943_v16 = vrot.slane %v1929_v3, %v10235_v37 }
  0x48   : > { %2681 = vst.msk [vmem:[#allocation2 + $0x20] sm:$0xf] %vm1748_vm1, %v1927_v2  ;;  %v517_v17 = vpack.c.bf16 %v490_v4, %v489_v0  ;;  %v420_v18 = vmul.f32 %v9081_v12, %v10198_v7  ;;  %9463 = vmatprep.mubr.msk.bf16.mxu0 %vm2994_vm8, %v4222_v10  ;;  %v10398_v1 = vld [vmem:[#allocation2 + $0x18] sm:$0xff]   ;;  %v2868_v15 = vor.u32 %v2866_v24, %v2864_v54  ;;  %v9128_v54 = vld [vmem:[%s10193_s8 + $0x30] sm:$0xff]   ;;  %vm4652_vm10 = vcmask 1045504  }
  0x49   : > { %v945_v61 = vcombine.high %v943_v8, %v943_v8  ;;  %v959_v11 = vrot.slane %v943_v8, %v10230_v32  ;;  %v421_v22 = vmul.f32 %v9082_v14, %v10198_v7  ;;  %v9985_v23 = vld [vmem:[#allocation2 + $0x18] sm:$0xff]   ;;  %v1944_v26 = vcombine.low %v1936_v5, %v1943_v16 }
  0x4a   : > { %v558_v27 = vshrl.u32 %v517_v17, 16  ;;  %v561_v28 = vshll.u32 %v517_v17, 16  ;;  %v459_v29 = vadd.f32 %v10220_v20, %v420_v18  ;;  %v4224_v30 = vshrl.u32 %v10398_v1, 16  ;;  %v10428_v0 = vld [vmem:[%s12608_s3 + $0x18] sm:$0xf] }
  0x4b   : > { %v4227_v59 = vshll.u32 %v10398_v1, 16  ;;  %v973_v12 = vrot.slane %v945_v61, %v10230_v32  ;;  %v975_v31 = vcombine.high %v959_v11, %v959_v11  ;;  %v2870_v34 = vshll.u32 %v9985_v23, 16 }
  0x4c   : > { %v1951_v36 = vrot.slane %v1944_v26, %v10235_v37  ;;  %v560_v39 = vrot.slane %v558_v27, 7  ;;  %v991_v40 = vrot.slane %v10388_v9, %v10230_v32  ;;  %v4226_v42 = vrot.slane %v4224_v30, 1 }
  0x4d   : > { %v4229_v43 = vrot.slane %v4227_v59, 2  ;;  %v977_v44 = vcombine.high %v973_v12, %v973_v12  ;;  %v1952_v45 = vcombine.low %v959_v11, %v975_v31  ;;  %v2872_v35 = vrot.slane %v2870_v34, 1 }
  0x4e   : > { %2682 = vst.msk [vmem:[#allocation2 + $0x24] sm:$0xf] %vm1748_vm1, %v1951_v36  ;;  %v563_v47 = vor.u32 %v561_v28, %v560_v39  ;;  %v460_v48 = vadd.f32 %v10220_v20, %v421_v22  ;;  %v491_v49 = vmax.f32 %v459_v29, 0.0  ;;  %v696_v53 = vsel %vm10262_vm6, %v560_v39, 0 }
  0x4f   : > { %v10411_v50 = vor.u32 %v4229_v43, %v4226_v42  ;;  %v1953_v51 = vcombine.low %v973_v12, %v977_v44  ;;  %v1960_v52 = vrot.slane %v1952_v45, %v10235_v37  ;;  %v2873_v56 = vsel %vm2845_vm7, %v2868_v15, %v2872_v35 }
  0x50   : > { %v2874_v57 = vshrl.u32 %v9985_v23, 16  ;;  %v680_v58 = vsel %vm10262_vm6, 0, %v563_v47  ;;  %v492_v41 = vmax.f32 %v460_v48, 0.0  ;;  %9315 = vmatprep.mubr.msk.bf16.mxu1 %vm2994_vm8, %v2873_v56  ;;  %v10432_v3 = vrot.slane %v696_v53, %v10230_v32 }
  0x51   : > { %v4231_v60 = vsel %vm4205_vm9, %v4221_v46, %v10411_v50  ;;  %v999_v62 = vrot.slane %v680_v58, %v10230_v32  ;;  %v1967_v24 = vrot.slane %v1953_v51, %v10235_v37  ;;  %v992_v63 = vcombine.high %v680_v58, %v680_v58 }
  0x52   : > { %9464 = vmatmul.mubr.msk.bf16.vlgmr.msra.gmra.mrb[0].mxu0 %vm2994_vm8, %v4231_v60  ;;  %v518_v2 = vpack.c.bf16 %v492_v41, %v491_v49  ;;  %v9085_v4 = vunpack.c.l.bf16 %v9128_v54  ;;  %v9086_v46 = vunpack.c.h.bf16 %v9128_v54  ;;  %v2876_v10 = vor.u32 %v2874_v57, %v2872_v35 }
  0x53   : > { %9500 = vmatpush3.bf16.msra.mxu0 %v10247_v55  ;;  %v1007_v5 = vcombine.high %v999_v62, %v999_v62  ;;  %v1015_v8 = vrot.slane %v999_v62, %v10230_v32  ;;  %v1968_v9 = vcombine.low %v1960_v52, %v1967_v24  ;;  %v1006_v14 = vrot.slane %v992_v63, %v10230_v32 }
  0x54   : > { %v565_v16 = vshrl.u32 %v518_v2, 16  ;;  %v568_v17 = vshll.u32 %v518_v2, 16  ;;  %v422_v18 = vmul.f32 %v9085_v4, %v10198_v7  ;;  %9948 = vmatprep.subr.msk.bf16.mxu0 %vm3049_vm0, %v10428_v0  ;;  %v1054_v28 = vrot.slane %v10432_v3, %v10230_v32 }
  0x55   : > { %v10440_v15 = vld [vmem:[#allocation2 + $0x20] sm:$0xff]   ;;  %v1029_v61 = vrot.slane %v1007_v5, %v10230_v32  ;;  %v1037_v11 = vcombine.high %v1015_v8, %v1015_v8  ;;  %v1975_v55 = vrot.slane %v1968_v9, %v10235_v37  ;;  %v1008_v22 = vcombine.high %v1006_v14, %v1006_v14 }
  0x56   : > { %v10444_v23 = vld [vmem:[#allocation2 + $0x20] sm:$0xff]   ;;  %v567_v26 = vrot.slane %v565_v16, 7  ;;  %v1022_v27 = vrot.slane %v1006_v14, %v10230_v32  ;;  %v423_v29 = vmul.f32 %v9086_v46, %v10198_v7  ;;  %v2878_v30 = vshll.u32 %v10440_v15, 16 }
  0x57   : > { %v1976_v59 = vcombine.low %v991_v40, %v1029_v61  ;;  %v1977_v12 = vcombine.low %v1015_v8, %v1037_v11  ;;  %2683 = vst.msk [vmem:[#allocation2 + $0x28] sm:$0xf] %vm1748_vm1, %v1975_v55  ;;  %v461_v31 = vadd.f32 %v10220_v20, %v422_v18  ;;  %v4233_v34 = vshrl.u32 %v10444_v23, 16  ;;  %v9129_v55 = vld [vmem:[%s10193_s8 + $0x38] sm:$0xff]  }
  0x58   : > { %v4236_v36 = vshll.u32 %v10444_v23, 16  ;;  %v570_v39 = vor.u32 %v568_v17, %v567_v26  ;;  %v1036_v42 = vrot.slane %v1008_v22, %v10230_v32  ;;  %v2880_v43 = vrot.slane %v2878_v30, 1 }
  0x59   : > { %v1984_v44 = vrot.slane %v1976_v59, %v10235_v37  ;;  %v1991_v45 = vrot.slane %v1977_v12, %v10235_v37  ;;  %v1038_v35 = vcombine.high %v1022_v27, %v1022_v27  ;;  %v4235_v47 = vrot.slane %v4233_v34, 1 }
  0x5a   : > { %v4238_v40 = vrot.slane %v4236_v36, 2  ;;  %v681_v48 = vsel %vm10262_vm6, 0, %v570_v39  ;;  %v1039_v49 = vcombine.high %v1029_v61, %v1029_v61  ;;  %v2881_v51 = vsel %vm2845_vm7, %v2876_v10, %v2880_v43 }
  0x5b   : > { %v1992_v52 = vcombine.low %v1984_v44, %v1991_v45  ;;  %v2882_v53 = vshrl.u32 %v10440_v15, 16  ;;  %v1040_v54 = vcombine.high %v1036_v42, %v1036_v42  ;;  %9316 = vmatmul.mubr.msk.bf16.gmra.mrb[4].mxu1 %vm2994_vm8, %v2881_v51  ;;  %v1055_v57 = vcombine.high %v681_v48, %v681_v48 }
  0x5c   : > { %v10463_v56 = vor.u32 %v4238_v40, %v4235_v47  ;;  %v1062_v58 = vrot.slane %v681_v48, %v10230_v32  ;;  %v2000_v41 = vcombine.low %v1039_v49, %v1036_v42  ;;  %v2001_v62 = vcombine.low %v1022_v27, %v1038_v35 }
  0x5d   : > { %v1999_v60 = vrot.slane %v1992_v52, %v10235_v37  ;;  %v462_v24 = vadd.f32 %v10220_v20, %v423_v29  ;;  %v493_v63 = vmax.f32 %v461_v31, 0.0  ;;  %v697_v9 = vsel %vm10262_vm6, %v567_v26, 0 }
  0x5e   : > { %v4240_v2 = vsel %vm4205_vm9, %v10411_v50, %v10463_v56  ;;  %v1070_v3 = vcombine.high %v1062_v58, %v1062_v58  ;;  %v1078_v4 = vrot.slane %v1062_v58, %v10230_v32  ;;  %v2008_v46 = vrot.slane %v2000_v41, %v10235_v37 }
  0x5f   : > { %9467 = vmatprep.mubr.msk.bf16.mxu0 %vm2994_vm8, %v4240_v2  ;;  %2684 = vst.msk [vmem:[#allocation2 + $0x2c] sm:$0xf] %vm1748_vm1, %v1999_v60  ;;  %v2015_v5 = vrot.slane %v2001_v62, %v10235_v37  ;;  %v494_v8 = vmax.f32 %v462_v24, 0.0  ;;  %v1069_v14 = vrot.slane %v1055_v57, %v10230_v32  ;;  %v1110_v17 = vrot.slane %v697_v9, %v10230_v32 }
  0x60   : > { %v1092_v50 = vrot.slane %v1070_v3, %v10230_v32  ;;  %v2024_v10 = vcombine.low %v1040_v54, %v1078_v4  ;;  %v1100_v16 = vcombine.high %v1078_v4, %v1078_v4  ;;  %v9089_v42 = vunpack.c.l.bf16 %v9129_v55 }
  0x61   : > { %v2016_v18 = vcombine.low %v2008_v46, %v2015_v5  ;;  %v519_v15 = vpack.c.bf16 %v494_v8, %v493_v63  ;;  %v1071_v61 = vcombine.high %v1069_v14, %v1069_v14  ;;  %v1085_v11 = vrot.slane %v1069_v14, %v10230_v32 }
  0x62   : > { %v2025_v22 = vcombine.low %v1054_v28, %v1092_v50  ;;  %v2032_v27 = vrot.slane %v2024_v10, %v10235_v37  ;;  %v1102_v29 = vcombine.high %v1092_v50, %v1092_v50  ;;  %v1117_v26 = vrot.slane %v1110_v17, %v10230_v32 }
  0x63   : > { %v2023_v30 = vrot.slane %v2016_v18, %v10235_v37  ;;  %v572_v59 = vshrl.u32 %v519_v15, 16  ;;  %v575_v12 = vshll.u32 %v519_v15, 16  ;;  %v1099_v31 = vrot.slane %v1071_v61, %v10230_v32 }
  0x64   : > { %v2039_v34 = vrot.slane %v2025_v22, %v10235_v37  ;;  %v1101_v36 = vcombine.high %v1085_v11, %v1085_v11  ;;  %v2048_v39 = vcombine.low %v1100_v16, %v1085_v11  ;;  %v2884_v44 = vor.u32 %v2882_v53, %v2880_v43 }
  0x65   : > { %2685 = vst.msk [vmem:[#allocation2 + $0x30] sm:$0xf] %vm1748_vm1, %v2023_v30  ;;  %v574_v28 = vrot.slane %v572_v59, 7  ;;  %v2049_v45 = vcombine.low %v1102_v29, %v1099_v31  ;;  %v9090_v35 = vunpack.c.h.bf16 %v9129_v55  ;;  %v1103_v48 = vcombine.high %v1099_v31, %v1099_v31 }
  0x66   : > { %v10489_v47 = vld [vmem:[#allocation2 + $0x28] sm:$0xff]   ;;  %v2040_v40 = vcombine.low %v2032_v27, %v2039_v34  ;;  %v2056_v49 = vrot.slane %v2048_v39, %v10235_v37  ;;  %v2072_v51 = vcombine.low %v1101_v36, %v1117_v26  ;;  %v424_v43 = vmul.f32 %v9089_v42, %v10198_v7  ;;  %v9130_v27 = vld [vmem:[%s10193_s8 + $0x40] sm:$0xff]  }
  0x67   : > { %v9989_v52 = vld [vmem:[#allocation2 + $0x28] sm:$0xff]   ;;  %v577_v54 = vor.u32 %v575_v12, %v574_v28  ;;  %v2063_v57 = vrot.slane %v2049_v45, %v10235_v37  ;;  %v698_v58 = vsel %vm10262_vm6, %v574_v28, 0  ;;  %v4242_v53 = vshrl.u32 %v10489_v47, 16 }
  0x68   : > { %v4245_v41 = vshll.u32 %v10489_v47, 16  ;;  %v2047_v60 = vrot.slane %v2040_v40, %v10235_v37  ;;  %v425_v62 = vmul.f32 %v9090_v35, %v10198_v7  ;;  %v2886_v24 = vshll.u32 %v9989_v52, 16 }
  0x69   : > { %v682_v63 = vsel %vm10262_vm6, 0, %v577_v54  ;;  %v2064_v2 = vcombine.low %v2056_v49, %v2063_v57  ;;  %v2080_v3 = vrot.slane %v2072_v51, %v10235_v37  ;;  %v4244_v4 = vrot.slane %v4242_v53, 1 }
  0x6a   : > { %v4247_v46 = vrot.slane %v4245_v41, 2  ;;  %2686 = vst.msk [vmem:[#allocation2 + $0x34] sm:$0xf] %vm1748_vm1, %v2047_v60  ;;  %v1125_v5 = vrot.slane %v682_v63, %v10230_v32  ;;  %v1118_v8 = vcombine.high %v682_v63, %v682_v63  ;;  %v2888_v9 = vrot.slane %v2886_v24, 1 }
  0x6b   : > { %v2071_v14 = vrot.slane %v2064_v2, %v10235_v37  ;;  %v1173_v50 = vrot.slane %v698_v58, %v10230_v32  ;;  %v463_v10 = vadd.f32 %v10220_v20, %v424_v43  ;;  %v2890_v11 = vshrl.u32 %v9989_v52, 16 }
  0x6c   : > { %v10508_v16 = vor.u32 %v4247_v46, %v4244_v4  ;;  %v1141_v17 = vrot.slane %v1125_v5, %v10230_v32  ;;  %v1132_v18 = vrot.slane %v1118_v8, %v10230_v32  ;;  %v1133_v15 = vcombine.high %v1125_v5, %v1125_v5 }
  0x6d   : > { %v2889_v61 = vsel %vm2845_vm7, %v2884_v44, %v2888_v9  ;;  %2687 = vst.msk [vmem:[#allocation2 + $0x38] sm:$0xf] %vm1748_vm1, %v2071_v14  ;;  %v1180_v55 = vrot.slane %v1173_v50, %v10230_v32  ;;  %v464_v22 = vadd.f32 %v10220_v20, %v425_v62  ;;  %v495_v34 = vmax.f32 %v463_v10, 0.0  ;;  %v9131_v50 = vld [vmem:[%s10193_s8 + $0x48] sm:$0xff]  }
  0x6e   : > { %v4249_v29 = vsel %vm4205_vm9, %v10463_v56, %v10508_v16  ;;  %9319 = vmatprep.mubr.msk.bf16.mxu1 %vm2994_vm8, %v2889_v61  ;;  %v2073_v26 = vcombine.low %v1103_v48, %v1141_v17  ;;  %v1134_v30 = vcombine.high %v1132_v18, %v1132_v18  ;;  %v1148_v59 = vrot.slane %v1132_v18, %v10230_v32 }
  0x6f   : > { %9468 = vmatmul.mubr.msk.bf16.gmra.mrb[4].mxu0 %vm2994_vm8, %v4249_v29  ;;  %v1155_v12 = vrot.slane %v1133_v15, %v10230_v32  ;;  %v1163_v31 = vcombine.high %v1141_v17, %v1141_v17  ;;  %v496_v36 = vmax.f32 %v464_v22, 0.0  ;;  %v9093_v28 = vunpack.c.l.bf16 %v9130_v27 }
  0x70   : > { %v2087_v39 = vrot.slane %v2073_v26, %v10235_v37  ;;  %v1162_v42 = vrot.slane %v1134_v30, %v10230_v32  ;;  %v1164_v44 = vcombine.high %v1148_v59, %v1148_v59  ;;  %v2892_v45 = vor.u32 %v2890_v11, %v2888_v9 }
  0x71   : > { %v9990_v56 = vld [vmem:[#allocation2 + $0x30] sm:$0xff]   ;;  %v1165_v35 = vcombine.high %v1155_v12, %v1155_v12  ;;  %v2097_v40 = vcombine.low %v1163_v31, %v1148_v59  ;;  %v520_v48 = vpack.c.bf16 %v496_v36, %v495_v34  ;;  %v9094_v57 = vunpack.c.h.bf16 %v9130_v27 }
  0x72   : > { %v10526_v49 = vld [vmem:[#allocation2 + $0x30] sm:$0xff]   ;;  %v2088_v51 = vcombine.low %v2080_v3, %v2087_v39  ;;  %v1166_v52 = vcombine.high %v1162_v42, %v1162_v42  ;;  %v2121_v54 = vcombine.low %v1164_v44, %v1180_v55  ;;  %v2894_v58 = vshll.u32 %v9990_v56, 16 }
  0x73   : > { %v2096_v43 = vcombine.low %v1155_v12, %v1165_v35  ;;  %v2111_v53 = vrot.slane %v2097_v40, %v10235_v37  ;;  %v426_v41 = vmul.f32 %v9093_v28, %v10198_v7  ;;  %v4251_v60 = vshrl.u32 %v10526_v49, 16  ;;  %v10553_v36 = vld [vmem:[%s10193_s8 + $0x50] sm:$0xff]  }
  0x74   : > { %v4254_v62 = vshll.u32 %v10526_v49, 16  ;;  %v2095_v24 = vrot.slane %v2088_v51, %v10235_v37  ;;  %v2120_v63 = vcombine.low %v1162_v42, %v1166_v52  ;;  %v2896_v2 = vrot.slane %v2894_v58, 1  ;;  %v10578_v51 = vld [vmem:[%s12607_s2] ss:$0 sm:$0xff] }
  0x75   : > { %v2104_v3 = vrot.slane %v2096_v43, %v10235_v37  ;;  %v2135_v4 = vrot.slane %v2121_v54, %v10235_v37  ;;  %v579_v46 = vshrl.u32 %v520_v48, 16  ;;  %v4253_v5 = vrot.slane %v4251_v60, 1 }
  0x76   : > { %v4256_v8 = vrot.slane %v4254_v62, 2  ;;  %2688 = vst.msk [vmem:[#allocation2 + $0x3c] sm:$0xf] %vm1748_vm1, %v2095_v24  ;;  %v2128_v9 = vrot.slane %v2120_v63, %v10235_v37  ;;  %v582_v14 = vshll.u32 %v520_v48, 16  ;;  %v2897_v10 = vsel %vm2845_vm7, %v2892_v45, %v2896_v2 }
  0x77   : > { %v2898_v17 = vshrl.u32 %v9990_v56, 16  ;;  %v2112_v18 = vcombine.low %v2104_v3, %v2111_v53  ;;  %v581_v15 = vrot.slane %v579_v46, 7  ;;  %9320 = vmatmul.mubr.msk.bf16.gmra.mrb[8].mxu1 %vm2994_vm8, %v2897_v10  ;;  %v427_v55 = vmul.f32 %v9094_v57, %v10198_v7 }
  0x78   : > { %v10540_v61 = vor.u32 %v4256_v8, %v4253_v5  ;;  %v2136_v11 = vcombine.low %v2128_v9, %v2135_v4  ;;  %v465_v22 = vadd.f32 %v10220_v20, %v426_v41  ;;  %v9097_v30 = vunpack.c.l.bf16 %v9131_v50 }
  0x79   : > { %v2119_v27 = vrot.slane %v2112_v18, %v10235_v37  ;;  %v584_v29 = vor.u32 %v582_v14, %v581_v15  ;;  %v699_v26 = vsel %vm10262_vm6, %v581_v15, 0  ;;  %v466_v31 = vadd.f32 %v10220_v20, %v427_v55 }
  0x7a   : > { %v4258_v59 = vsel %vm4205_vm9, %v10508_v16, %v10540_v61  ;;  %v2143_v12 = vrot.slane %v2136_v11, %v10235_v37  ;;  %v497_v34 = vmax.f32 %v465_v22, 0.0  ;;  %v10560_v39 = vrot.slane %v699_v26, %v10230_v32  ;;  %v10565_v16 = vld [vmem:[%s12606_s1] ss:$0 sm:$0xff] }
  0x7b   : > { %9471 = vmatprep.mubr.msk.bf16.mxu0 %vm2994_vm8, %v4258_v59  ;;  %2689 = vst.msk [vmem:[#allocation2 + $0x40] sm:$0xf] %vm1748_vm1, %v2119_v27  ;;  %v683_v7 = vsel %vm10262_vm6, 0, %v584_v29  ;;  %v9098_v42 = vunpack.c.h.bf16 %v9131_v50  ;;  %v428_v20 = vmul.f32 %v10565_v16, %v9097_v30  ;;  %v2900_v44 = vor.u32 %v2898_v17, %v2896_v2 }
  0x7c   : > { %2690 = vst.msk [vmem:[#allocation2 + $0x44] sm:$0xf] %vm1748_vm1, %v2143_v12  ;;  %v1181_v28 = vcombine.high %v683_v7, %v683_v7  ;;  %v1188_v56 = vrot.slane %v683_v7, %v10230_v32  ;;  %v498_v45 = vmax.f32 %v466_v31, 0.0  ;;  %v1243_v40 = vrot.slane %v10560_v39, %v10230_v32 }
  0x7d   : > { %v10570_v35 = vld [vmem:[#allocation2 + $0x38] sm:$0xff]   ;;  %v429_v48 = vmul.f32 %v10565_v16, %v9098_v42  ;;  %v467_v52 = vadd.f32 %v10578_v51, %v428_v20  ;;  %v9101_v54 = vunpack.c.l.bf16 %v10553_v36  ;;  %vm3452_vm11 = vcmask 1046528  }
  0x7e   : > { %v9993_v57 = vld [vmem:[#allocation2 + $0x38] sm:$0xff]   ;;  %v1195_v58 = vrot.slane %v1181_v28, %v10230_v32  ;;  %v1196_v43 = vcombine.high %v1188_v56, %v1188_v56  ;;  %v1204_v53 = vrot.slane %v1188_v56, %v10230_v32  ;;  %v521_v41 = vpack.c.bf16 %v498_v45, %v497_v34 }
  0x7f   : > { %v4260_v60 = vshrl.u32 %v10570_v35, 16  ;;  %v4263_v62 = vshll.u32 %v10570_v35, 16  ;;  %v468_v24 = vadd.f32 %v10578_v51, %v429_v48  ;;  %v499_v63 = vmax.f32 %v467_v52, 0.0 }
  0x80   : > { %v2902_v2 = vshll.u32 %v9993_v57, 16  ;;  %v2906_v3 = vshrl.u32 %v9993_v57, 16  ;;  %v1197_v4 = vcombine.high %v1195_v58, %v1195_v58  ;;  %v1211_v46 = vrot.slane %v1195_v58, %v10230_v32 }
  0x81   : > { %v4262_v5 = vrot.slane %v4260_v60, 1  ;;  %v4265_v8 = vrot.slane %v4263_v62, 2  ;;  %v1218_v9 = vrot.slane %v1196_v43, %v10230_v32  ;;  %v1226_v14 = vcombine.high %v1204_v53, %v1204_v53 }
  0x82   : > { %v2904_v50 = vrot.slane %v2902_v2, 1  ;;  %v1225_v10 = vrot.slane %v1197_v4, %v10230_v32  ;;  %v1227_v17 = vcombine.high %v1211_v46, %v1211_v46  ;;  %v586_v18 = vshrl.u32 %v521_v41, 16 }
  0x83   : > { %v4266_v15 = vor.u32 %v4265_v8, %v4262_v5  ;;  %v9994_v11 = vld [vmem:[#allocation2 + $0x40] sm:$0xff]   ;;  %v1228_v55 = vcombine.high %v1218_v9, %v1218_v9  ;;  %v2144_v22 = vcombine.low %v1204_v53, %v1226_v14  ;;  %v589_v27 = vshll.u32 %v521_v41, 16 }
  0x84   : > { %v2905_v29 = vsel %vm2845_vm7, %v2900_v44, %v2904_v50  ;;  %v2908_v26 = vor.u32 %v2906_v3, %v2904_v50  ;;  %v10591_v30 = vld [vmem:[#allocation2 + $0x40] sm:$0xff]   ;;  %v1229_v59 = vcombine.high %v1225_v10, %v1225_v10  ;;  %v2168_v12 = vcombine.low %v1211_v46, %v1227_v17  ;;  %v10621_v17 = vld [vmem:[#allocation2 + $0x8] sm:$0xc] }
  0x85   : > { %v4267_v31 = vsel %vm4205_vm9, %v10540_v61, %v4266_v15  ;;  %9323 = vmatprep.mubr.msk.bf16.mxu1 %vm2994_vm8, %v2905_v29  ;;  %v2910_v34 = vshll.u32 %v9994_v11, 16  ;;  %v2145_v7 = vcombine.low %v1218_v9, %v1228_v55  ;;  %v2152_v42 = vrot.slane %v2144_v22, %v10235_v37 }
  0x86   : > { %9472 = vmatmul.mubr.msk.bf16.gmra.mrb[8].mxu0 %vm2994_vm8, %v4267_v31  ;;  %v4269_v20 = vshrl.u32 %v10591_v30, 16  ;;  %v4272_v44 = vshll.u32 %v10591_v30, 16  ;;  %v2169_v28 = vcombine.low %v1225_v10, %v1229_v59  ;;  %v2176_v56 = vrot.slane %v2168_v12, %v10235_v37 }
  0x87   : > { %v2912_v45 = vrot.slane %v2910_v34, 1  ;;  %v2159_v48 = vrot.slane %v2145_v7, %v10235_v37  ;;  %v588_v52 = vrot.slane %v586_v18, 7  ;;  %v9102_v61 = vunpack.c.h.bf16 %v10553_v36 }
  0x88   : > { %v4271_v57 = vrot.slane %v4269_v20, 1  ;;  %v4274_v58 = vrot.slane %v4272_v44, 2  ;;  %v2183_v43 = vrot.slane %v2169_v28, %v10235_v37  ;;  %v500_v53 = vmax.f32 %v468_v24, 0.0 }
  0x89   : > { %v2913_v41 = vsel %vm2845_vm7, %v2908_v26, %v2912_v45  ;;  %v2160_v60 = vcombine.low %v2152_v42, %v2159_v48  ;;  %v2914_v62 = vshrl.u32 %v9994_v11, 16  ;;  %v591_v2 = vor.u32 %v589_v27, %v588_v52 }
  0x8a   : > { %9324 = vmatmul.mubr.msk.bf16.gmra.mrb[12].mxu1 %vm2994_vm8, %v2913_v41  ;;  %v10606_v3 = vor.u32 %v4274_v58, %v4271_v57  ;;  %v2184_v4 = vcombine.low %v2176_v56, %v2183_v43  ;;  %v522_v46 = vpack.c.bf16 %v500_v53, %v499_v63  ;;  %v700_v5 = vsel %vm10262_vm6, %v588_v52, 0 }
  0x8b   : > { %v2167_v36 = vrot.slane %v2160_v60, %v10235_v37  ;;  %v684_v8 = vsel %vm10262_vm6, 0, %v591_v2  ;;  %v10614_v24 = vrot.slane %v700_v5, %v10230_v32  ;;  %v430_v9 = vmul.f32 %v10565_v16, %v9101_v54 }
  0x8c   : > { %v4276_v14 = vsel %vm4205_vm9, %v4266_v15, %v10606_v3  ;;  %v2191_v50 = vrot.slane %v2184_v4, %v10235_v37  ;;  %v1244_v10 = vcombine.high %v684_v8, %v684_v8  ;;  %v1251_v63 = vrot.slane %v684_v8, %v10230_v32 }
  0x8d   : > { %9475 = vmatprep.mubr.msk.bf16.mxu0 %vm2994_vm8, %v4276_v14  ;;  %2691 = vst.msk [vmem:[#allocation2 + $0x48] sm:$0xf] %vm1748_vm1, %v2167_v36  ;;  %v10625_v18 = vor.u32 %v2914_v62, %v2912_v45  ;;  %v593_v11 = vshrl.u32 %v522_v46, 16  ;;  %v596_v55 = vshll.u32 %v522_v46, 16  ;;  %v431_v54 = vmul.f32 %v10565_v16, %v9102_v61 }
  0x8e   : > { %2692 = vst.msk [vmem:[#allocation2 + $0x4c] sm:$0xf] %vm1748_vm1, %v2191_v50  ;;  %v1258_v15 = vrot.slane %v1244_v10, %v10230_v32  ;;  %v1259_v22 = vcombine.high %v1251_v63, %v1251_v63  ;;  %v1267_v27 = vrot.slane %v1251_v63, %v10230_v32  ;;  %v469_v29 = vadd.f32 %v10578_v51, %v430_v9 }
  0x8f   : > { %v595_v26 = vrot.slane %v593_v11, 7  ;;  %v1306_v59 = vrot.slane %v10614_v24, %v10230_v32  ;;  %v470_v12 = vadd.f32 %v10578_v51, %v431_v54  ;;  %v8956_v31 = vcombine.low %v10621_v17, %v10354_v21 }
  0x90   : > { %v1260_v34 = vcombine.high %v1258_v15, %v1258_v15  ;;  %v1274_v7 = vrot.slane %v1258_v15, %v10230_v32  ;;  %v1281_v42 = vrot.slane %v1259_v22, %v10230_v32  ;;  %v1289_v20 = vcombine.high %v1267_v27, %v1267_v27 }
  0x91   : > { %v598_v44 = vor.u32 %v596_v55, %v595_v26  ;;  %v501_v28 = vmax.f32 %v469_v29, 0.0  ;;  %v502_v56 = vmax.f32 %v470_v12, 0.0  ;;  %v701_v45 = vsel %vm10262_vm6, %v595_v26, 0 }
  0x92   : > { %v1288_v48 = vrot.slane %v1260_v34, %v10230_v32  ;;  %v1290_v52 = vcombine.high %v1274_v7, %v1274_v7  ;;  %v1291_v61 = vcombine.high %v1281_v42, %v1281_v42  ;;  %v2192_v57 = vcombine.low %v1243_v40, %v1281_v42 }
  0x93   : > { %v2193_v58 = vcombine.low %v1267_v27, %v1289_v20  ;;  %v685_v43 = vsel %vm10262_vm6, 0, %v598_v44  ;;  %v523_v53 = vpack.c.bf16 %v502_v56, %v501_v28  ;;  %v1362_v41 = vrot.slane %v701_v45, %v10230_v32 }
  0x94   : > { %v2200_v60 = vrot.slane %v2192_v57, %v10235_v37  ;;  %v2216_v62 = vcombine.low %v1291_v61, %v1288_v48  ;;  %v2217_v2 = vcombine.low %v1274_v7, %v1290_v52  ;;  %v1292_v4 = vcombine.high %v1288_v48, %v1288_v48  ;;  %v8877_v61 = vld [vmem:[%s12608_s3 + $0x8] sm:$0xf] }
  0x95   : > { %v10649_v46 = vld [vmem:[#allocation2 + $0x48] sm:$0xff]   ;;  %v2207_v5 = vrot.slane %v2193_v58, %v10235_v37  ;;  %v1307_v36 = vcombine.high %v685_v43, %v685_v43  ;;  %v1314_v39 = vrot.slane %v685_v43, %v10230_v32  ;;  %v600_v40 = vshrl.u32 %v523_v53, 16  ;;  %9943 = vmatprep.subr.msk.bf16.mxu1 %vm3049_vm0, %v8877_v61 }
  0x96   : > { %v9997_v8 = vld [vmem:[#allocation2 + $0x48] sm:$0xff]   ;;  %v2224_v9 = vrot.slane %v2216_v62, %v10235_v37  ;;  %v2231_v14 = vrot.slane %v2217_v2, %v10235_v37  ;;  %v603_v50 = vshll.u32 %v523_v53, 16  ;;  %v1369_v10 = vrot.slane %v1362_v41, %v10230_v32 }
  0x97   : > { %v4278_v63 = vshrl.u32 %v10649_v46, 16  ;;  %v4281_v11 = vshll.u32 %v10649_v46, 16  ;;  %v2208_v55 = vcombine.low %v2200_v60, %v2207_v5  ;;  %v1321_v54 = vrot.slane %v1307_v36, %v10230_v32 }
  0x98   : > { %v2918_v15 = vshll.u32 %v9997_v8, 16  ;;  %v2232_v22 = vcombine.low %v2224_v9, %v2231_v14  ;;  %v2922_v27 = vshrl.u32 %v9997_v8, 16  ;;  %v1322_v29 = vcombine.high %v1314_v39, %v1314_v39 }
  0x99   : > { %v4280_v26 = vrot.slane %v4278_v63, 1  ;;  %v4283_v12 = vrot.slane %v4281_v11, 2  ;;  %v2215_v34 = vrot.slane %v2208_v55, %v10235_v37  ;;  %v1323_v7 = vcombine.high %v1321_v54, %v1321_v54 }
  0x9a   : > { %v2920_v42 = vrot.slane %v2918_v15, 1  ;;  %v2239_v20 = vrot.slane %v2232_v22, %v10235_v37  ;;  %v1330_v44 = vrot.slane %v1314_v39, %v10230_v32  ;;  %v1337_v28 = vrot.slane %v1321_v54, %v10230_v32 }
  0x9b   : > { %v10663_v56 = vor.u32 %v4283_v12, %v4280_v26  ;;  %2693 = vst.msk [vmem:[#allocation2 + $0x50] sm:$0xf] %vm1748_vm1, %v2215_v34  ;;  %v1344_v45 = vrot.slane %v1322_v29, %v10230_v32  ;;  %v1351_v48 = vrot.slane %v1323_v7, %v10230_v32  ;;  %v10668_v52 = vrot.slane %v600_v40, 7 }
  0x9c   : > { %v2921_v57 = vsel %vm2845_vm7, %v10625_v18, %v2920_v42  ;;  %2694 = vst.msk [vmem:[#allocation2 + $0x54] sm:$0xf] %vm1748_vm1, %v2239_v20  ;;  %v2924_v58 = vor.u32 %v2922_v27, %v2920_v42  ;;  %v1352_v43 = vcombine.high %v1330_v44, %v1330_v44  ;;  %v2240_v53 = vcombine.low %v1292_v4, %v1330_v44  ;;  %v9133_v42 = vld [vmem:[%s10193_s8 + $0x58] sm:$0xff]  }
  0x9d   : > { %v4285_v41 = vsel %vm4205_vm9, %v10606_v3, %v10663_v56  ;;  %9327 = vmatprep.mubr.msk.bf16.mxu1 %vm2994_vm8, %v2921_v57  ;;  %v1354_v60 = vcombine.high %v1344_v45, %v1344_v45  ;;  %v2241_v62 = vcombine.low %v1306_v59, %v1344_v45  ;;  %v605_v18 = vor.u32 %v603_v50, %v10668_v52 }
  0x9e   : > { %9476 = vmatmul.mubr.msk.bf16.gmra.mrb[12].mxu0 %vm2994_vm8, %v4285_v41  ;;  %v2248_v2 = vrot.slane %v2240_v53, %v10235_v37  ;;  %v2264_v4 = vcombine.low %v1352_v43, %v1337_v28  ;;  %v1353_v5 = vcombine.high %v1337_v28, %v1337_v28  ;;  %v1355_v36 = vcombine.high %v1351_v48, %v1351_v48 }
  0x9f   : > { %v2255_v39 = vrot.slane %v2241_v62, %v10235_v37  ;;  %v2265_v40 = vcombine.low %v1354_v60, %v1351_v48  ;;  %v686_v3 = vsel %vm10262_vm6, 0, %v605_v18  ;;  %v4653_v24 = vrot.slane %v8956_v31, 2 }
  0xa0   : > { %v2272_v59 = vrot.slane %v2264_v4, %v10235_v37  ;;  %v1370_v8 = vcombine.high %v686_v3, %v686_v3  ;;  %v1377_v9 = vrot.slane %v686_v3, %v10230_v32  ;;  %v2288_v14 = vcombine.low %v1353_v5, %v1369_v10 }
  0xa1   : > { %v2256_v50 = vcombine.low %v2248_v2, %v2255_v39  ;;  %v2279_v63 = vrot.slane %v2265_v40, %v10235_v37  ;;  %v4654_v11 = vrot.slane %v10363_v33, 2  ;;  %v4656_v55 = vrot.slane %v10398_v1, 2 }
  0xa2   : > { %v1384_v54 = vrot.slane %v1370_v8, %v10230_v32  ;;  %v1385_v15 = vcombine.high %v1377_v9, %v1377_v9  ;;  %v1393_v21 = vrot.slane %v1377_v9, %v10230_v32  ;;  %v2296_v17 = vrot.slane %v2288_v14, %v10235_v37  ;;  %v9134_v9 = vld [vmem:[%s10193_s8 + $0x60] sm:$0xff]  }
  0xa3   : > { %v9998_v31 = vld [vmem:[#allocation2 + $0x50] sm:$0xff]   ;;  %v2263_v22 = vrot.slane %v2256_v50, %v10235_v37  ;;  %v2280_v27 = vcombine.low %v2272_v59, %v2279_v63  ;;  %v10703_v10 = vsel %vm4652_vm10, %v4653_v24, %v4654_v11  ;;  %v10708_v33 = vsel %vm4652_vm10, %v4654_v11, %v4656_v55  ;;  %v10743_v11 = vld [vmem:[%s10193_s8 + $0x68] sm:$0xff]  }
  0xa4   : > { %v10710_v29 = vld [vmem:[#allocation2 + $0x50] sm:$0xff]   ;;  %v10713_v26 = vrot.slane %v1384_v54, %v10230_v32  ;;  %v1407_v12 = vrot.slane %v1385_v15, %v10230_v32  ;;  %v1415_v34 = vcombine.high %v1393_v21, %v1393_v21  ;;  %v2289_v7 = vcombine.low %v1355_v36, %v1393_v21 }
  0xa5   : > { %v2926_v20 = vshll.u32 %v9998_v31, 16  ;;  %v2287_v44 = vrot.slane %v2280_v27, %v10235_v37  ;;  %2695 = vst.msk [vmem:[#allocation2 + $0x58] sm:$0xf] %vm1748_vm1, %v2263_v22  ;;  %v2930_v28 = vshrl.u32 %v9998_v31, 16  ;;  %v10721_v45 = vsel %vm3049_vm0, %v10428_v0, 0 }
  0xa6   : > { %v4287_v48 = vshrl.u32 %v10710_v29, 16  ;;  %v4290_v61 = vshll.u32 %v10710_v29, 16  ;;  %v1417_v57 = vcombine.high %v1407_v12, %v1407_v12  ;;  %v2303_v43 = vrot.slane %v2289_v7, %v10235_v37 }
  0xa7   : > { %v2928_v53 = vrot.slane %v2926_v20, 1  ;;  %2696 = vst.msk [vmem:[#allocation2 + $0x5c] sm:$0xf] %vm1748_vm1, %v2287_v44  ;;  %v2313_v41 = vcombine.low %v1415_v34, %v10713_v26  ;;  %v9105_v60 = vunpack.c.l.bf16 %v9133_v42  ;;  %v9106_v62 = vunpack.c.h.bf16 %v9133_v42 }
  0xa8   : > { %v4289_v18 = vrot.slane %v4287_v48, 1  ;;  %v4292_v2 = vrot.slane %v4290_v61, 2  ;;  %v2304_v4 = vcombine.low %v2296_v17, %v2303_v43  ;;  %v2312_v0 = vcombine.low %v1407_v12, %v1417_v57 }
  0xa9   : > { %v2929_v5 = vsel %vm2845_vm7, %v2924_v58, %v2928_v53  ;;  %v2932_v36 = vor.u32 %v2930_v28, %v2928_v53  ;;  %v2327_v39 = vrot.slane %v2313_v41, %v10235_v37  ;;  %v432_v40 = vmul.f32 %v10565_v16, %v9105_v60 }
  0xaa   : > { %9328 = vmatmul.mubr.msk.bf16.gmra.mrb[16].mxu1 %vm2994_vm8, %v2929_v5  ;;  %v4293_v3 = vor.u32 %v4292_v2, %v4289_v18  ;;  %v2311_v24 = vrot.slane %v2304_v4, %v10235_v37  ;;  %v2320_v59 = vrot.slane %v2312_v0, %v10235_v37  ;;  %v433_v8 = vmul.f32 %v10565_v16, %v9106_v62 }
  0xab   : > { %v471_v14 = vadd.f32 %v10578_v51, %v432_v40  ;;  %v702_v58 = vsel %vm10262_vm6, %v10668_v52, 0  ;;  %v1386_v50 = vcombine.high %v1384_v54, %v1384_v54  ;;  %v1416_v63 = vcombine.high %v10713_v26, %v10713_v26 }
  0xac   : > { %v4294_v15 = vsel %vm4205_vm9, %v10663_v56, %v4293_v3  ;;  %v2328_v21 = vcombine.low %v2320_v59, %v2327_v39  ;;  %2697 = vst.msk [vmem:[#allocation2 + $0x60] sm:$0xf] %vm1748_vm1, %v2311_v24  ;;  %v472_v17 = vadd.f32 %v10578_v51, %v433_v8  ;;  %v1425_v31 = vrot.slane %v702_v58, %v10230_v32 }
  0xad   : > { %9479 = vmatprep.mubr.msk.bf16.mxu0 %vm2994_vm8, %v4294_v15  ;;  %v503_v22 = vmax.f32 %v471_v14, 0.0  ;;  %v1414_v52 = vrot.slane %v1386_v50, %v10230_v32  ;;  %v9109_v54 = vunpack.c.l.bf16 %v9134_v9  ;;  %v9110_v27 = vunpack.c.h.bf16 %v9134_v9 }
  0xae   : > { %v10752_v26 = vld [vmem:[#allocation2 + $0x58] sm:$0xff]   ;;  %v2335_v12 = vrot.slane %v2328_v21, %v10235_v37  ;;  %v504_v34 = vmax.f32 %v472_v17, 0.0  ;;  %v1432_v56 = vrot.slane %v1425_v31, %v10230_v32  ;;  %v9113_v7 = vunpack.c.l.bf16 %v10743_v11  ;;  %v10778_v21 = vld [vmem:[%s10193_s8 + $0x70] sm:$0xff]  }
  0xaf   : > { %v10757_v42 = vld [vmem:[#allocation2 + $0x58] sm:$0xff]   ;;  %v1418_v20 = vcombine.high %v1414_v52, %v1414_v52  ;;  %v434_v44 = vmul.f32 %v10565_v16, %v9109_v54  ;;  %v435_v28 = vmul.f32 %v10565_v16, %v9110_v27  ;;  %v4658_v48 = vrot.slane %v10444_v23, 2 }
  0xb0   : > { %v4296_v61 = vshrl.u32 %v10752_v26, 16  ;;  %v4299_v57 = vshll.u32 %v10752_v26, 16  ;;  %2698 = vst.msk [vmem:[#allocation2 + $0x64] sm:$0xf] %vm1748_vm1, %v2335_v12  ;;  %v524_v43 = vpack.c.bf16 %v504_v34, %v503_v22  ;;  %v2337_v53 = vcombine.low %v1416_v63, %v1432_v56 }
  0xb1   : > { %v2934_v41 = vshll.u32 %v10757_v42, 16  ;;  %v2938_v60 = vshrl.u32 %v10757_v42, 16  ;;  %v2336_v62 = vcombine.low %v1414_v52, %v1418_v20  ;;  %v473_v18 = vadd.f32 %v10578_v51, %v434_v44 }
  0xb2   : > { %v4298_v2 = vrot.slane %v4296_v61, 1  ;;  %v4301_v4 = vrot.slane %v4299_v57, 2  ;;  %v607_v0 = vshrl.u32 %v524_v43, 16  ;;  %v610_v23 = vshll.u32 %v524_v43, 16 }
  0xb3   : > { %v2936_v5 = vrot.slane %v2934_v41, 1  ;;  %v2344_v39 = vrot.slane %v2336_v62, %v10235_v37  ;;  %v2351_v40 = vrot.slane %v2337_v53, %v10235_v37  ;;  %v474_v24 = vadd.f32 %v10578_v51, %v435_v28 }
  0xb4   : > { %v10771_v59 = vor.u32 %v4301_v4, %v4298_v2  ;;  %v609_v8 = vrot.slane %v607_v0, 7  ;;  %v505_v9 = vmax.f32 %v473_v18, 0.0  ;;  %v4659_v14 = vsel %vm4652_vm10, %v4656_v55, %v4658_v48 }
  0xb5   : > { %v2937_v58 = vsel %vm2845_vm7, %v2932_v36, %v2936_v5  ;;  %v2940_v50 = vor.u32 %v2938_v60, %v2936_v5  ;;  %v2352_v63 = vcombine.low %v2344_v39, %v2351_v40  ;;  %v506_v15 = vmax.f32 %v474_v24, 0.0 }
  0xb6   : > { %12673 = vst [vmem:[#allocation4_spill] sm:$0xff] %v10771_v59  ;;  %v4303_v17 = vsel %vm4205_vm9, %v4293_v3, %v10771_v59  ;;  %9331 = vmatprep.mubr.msk.bf16.mxu1 %vm2994_vm8, %v2937_v58  ;;  %v612_v31 = vor.u32 %v610_v23, %v609_v8  ;;  %v703_v22 = vsel %vm10262_vm6, %v609_v8, 0  ;;  %v4660_v1 = vrot.slane %v10489_v47, 2 }
  0xb7   : > { %9480 = vmatmul.mubr.msk.bf16.gmra.mrb[16].mxu0 %vm2994_vm8, %v4303_v17  ;;  %v10787_v55 = vld [vmem:[#allocation2 + $0x60] sm:$0xff]   ;;  %v2359_v36 = vrot.slane %v2352_v63, %v10235_v37  ;;  %v525_v52 = vpack.c.bf16 %v506_v15, %v505_v9  ;;  %v10791_v54 = vrot.slane %v703_v22, %v10230_v32  ;;  %v9114_v3 = vunpack.c.h.bf16 %v10743_v11  ;;  %v10826_v9 = vld [vmem:[%s12608_s3 + $0x1c] sm:$0xf] }
  0xb8   : > { %9501 = vmatprep.mubr.msk.bf16.mxu0 %vm2994_vm8, %v10703_v10  ;;  %v687_v27 = vsel %vm10262_vm6, 0, %v612_v31  ;;  %v10801_v12 = vsel %vm4652_vm10, %v4658_v48, %v4660_v1  ;;  %v436_v34 = vmul.f32 %v10565_v16, %v9113_v7  ;;  %v9117_v56 = vunpack.c.l.bf16 %v10778_v21 }
  0xb9   : > { %v2942_v20 = vshll.u32 %v10787_v55, 16  ;;  %v1440_v44 = vrot.slane %v687_v27, %v10230_v32  ;;  %2699 = vst.msk [vmem:[#allocation2 + $0x68] sm:$0xf] %vm1748_vm1, %v2359_v36  ;;  %v2946_v10 = vshrl.u32 %v10787_v55, 16  ;;  %v614_v11 = vshrl.u32 %v525_v52, 16 }
  0xba   : > { %v617_v28 = vshll.u32 %v525_v52, 16  ;;  %v1433_v61 = vcombine.high %v687_v27, %v687_v27  ;;  %v1495_v57 = vrot.slane %v10791_v54, %v10230_v32  ;;  %v437_v48 = vmul.f32 %v10565_v16, %v9114_v3 }
  0xbb   : > { %v2944_v43 = vrot.slane %v2942_v20, 1  ;;  %v1448_v7 = vcombine.high %v1440_v44, %v1440_v44  ;;  %v1456_v53 = vrot.slane %v1440_v44, %v10230_v32  ;;  %v616_v41 = vrot.slane %v614_v11, 7 }
  0xbc   : > { %v1447_v60 = vrot.slane %v1433_v61, %v10230_v32  ;;  %v475_v62 = vadd.f32 %v10578_v51, %v436_v34  ;;  %v476_v18 = vadd.f32 %v10578_v51, %v437_v48  ;;  %v9118_v2 = vunpack.c.h.bf16 %v10778_v21 }
  0xbd   : > { %v2945_v4 = vsel %vm2845_vm7, %v2940_v50, %v2944_v43  ;;  %v1470_v0 = vrot.slane %v1448_v7, %v10230_v32  ;;  %v1478_v23 = vcombine.high %v1456_v53, %v1456_v53  ;;  %v10819_v5 = vor.u32 %v2946_v10, %v2944_v43 }
  0xbe   : > { %9332 = vmatmul.mubr.msk.bf16.gmra.mrb[20].mxu1 %vm2994_vm8, %v2945_v4  ;;  %v619_v39 = vor.u32 %v617_v28, %v616_v41  ;;  %v1449_v40 = vcombine.high %v1447_v60, %v1447_v60  ;;  %v1463_v24 = vrot.slane %v1447_v60, %v10230_v32  ;;  %v507_v8 = vmax.f32 %v475_v62, 0.0 }
  0xbf   : > { %9502 = vmatmul.mubr.msk.bf16.vlgmr.msra.gmra.mrb[0].mxu0 %vm2994_vm8, %v10708_v33  ;;  %v1480_v58 = vcombine.high %v1470_v0, %v1470_v0  ;;  %v2360_v50 = vcombine.low %v1456_v53, %v1478_v23  ;;  %v508_v63 = vmax.f32 %v476_v18, 0.0  ;;  %v704_v15 = vsel %vm10262_vm6, %v616_v41, 0 }
  0xc0   : > { %9538 = vmatpush3.bf16.msra.mxu0 %v10721_v45  ;;  %v688_v17 = vsel %vm10262_vm6, 0, %v619_v39  ;;  %v1477_v31 = vrot.slane %v1449_v40, %v10230_v32  ;;  %v1479_v22 = vcombine.high %v1463_v24, %v1463_v24  ;;  %9505 = vmatprep.mubr.msk.bf16.mxu0 %vm2994_vm8, %v4659_v14  ;;  %v10838_v36 = vrot.slane %v704_v15, %v10230_v32 }
  0xc1   : > { %v2361_v33 = vcombine.low %v1470_v0, %v1480_v58  ;;  %v2368_v52 = vrot.slane %v2360_v50, %v10235_v37  ;;  %v1503_v54 = vrot.slane %v688_v17, %v10230_v32  ;;  %v526_v3 = vpack.c.bf16 %v508_v63, %v507_v8  ;;  %9949 = vmatprep.subr.msk.bf16.mxu0 %vm3049_vm0, %v10826_v9 }
  0xc2   : > { %v1481_v45 = vcombine.high %v1477_v31, %v1477_v31  ;;  %v2384_v27 = vcombine.low %v1463_v24, %v1479_v22  ;;  %v1496_v34 = vcombine.high %v688_v17, %v688_v17  ;;  %v1558_v20 = vrot.slane %v10838_v36, %v10230_v32 }
  0xc3   : > { %v2375_v14 = vrot.slane %v2361_v33, %v10235_v37  ;;  %v1511_v44 = vcombine.high %v1503_v54, %v1503_v54  ;;  %v1519_v10 = vrot.slane %v1503_v54, %v10230_v32  ;;  %v621_v11 = vshrl.u32 %v526_v3, 16 }
  0xc4   : > { %v2385_v28 = vcombine.low %v1477_v31, %v1481_v45  ;;  %v2392_v61 = vrot.slane %v2384_v27, %v10235_v37  ;;  %v624_v48 = vshll.u32 %v526_v3, 16  ;;  %v1510_v43 = vrot.slane %v1496_v34, %v10230_v32 }
  0xc5   : > { %v2376_v7 = vcombine.low %v2368_v52, %v2375_v14  ;;  %v1533_v53 = vrot.slane %v1511_v44, %v10230_v32  ;;  %v1541_v41 = vcombine.high %v1519_v10, %v1519_v10  ;;  %v623_v60 = vrot.slane %v621_v11, 7 }
  0xc6   : > { %v2399_v62 = vrot.slane %v2385_v28, %v10235_v37  ;;  %v1512_v18 = vcombine.high %v1510_v43, %v1510_v43  ;;  %v1526_v4 = vrot.slane %v1510_v43, %v10230_v32  ;;  %v438_v0 = vmul.f32 %v10565_v16, %v9117_v56 }
  0xc7   : > { %v2383_v23 = vrot.slane %v2376_v7, %v10235_v37  ;;  %v2408_v39 = vcombine.low %v1495_v57, %v1533_v53  ;;  %v2409_v40 = vcombine.low %v1519_v10, %v1541_v41  ;;  %9506 = vmatmul.mubr.msk.bf16.gmra.mrb[4].mxu0 %vm2994_vm8, %v10801_v12  ;;  %v626_v24 = vor.u32 %v624_v48, %v623_v60 }
  0xc8   : > { %v2400_v8 = vcombine.low %v2392_v61, %v2399_v62  ;;  %v1540_v58 = vrot.slane %v1512_v18, %v10230_v32  ;;  %v1542_v50 = vcombine.high %v1526_v4, %v1526_v4  ;;  %v1543_v63 = vcombine.high %v1533_v53, %v1533_v53 }
  0xc9   : > { %2700 = vst.msk [vmem:[#allocation2 + $0x6c] sm:$0xf] %vm1748_vm1, %v2383_v23  ;;  %v2416_v15 = vrot.slane %v2408_v39, %v10235_v37  ;;  %v2423_v21 = vrot.slane %v2409_v40, %v10235_v37  ;;  %v689_v56 = vsel %vm10262_vm6, 0, %v626_v24  ;;  %v439_v57 = vmul.f32 %v10565_v16, %v9118_v2 }
  0xca   : > { %v2407_v17 = vrot.slane %v2400_v8, %v10235_v37  ;;  %v1544_v12 = vcombine.high %v1540_v58, %v1540_v58  ;;  %v1566_v31 = vrot.slane %v689_v56, %v10230_v32  ;;  %v2432_v22 = vcombine.low %v1543_v63, %v1540_v58  ;;  %v9137_v63 = vld [vmem:[%s10193_s8 + $0x78] sm:$0xff]  }
  0xcb   : > { %v2424_v36 = vcombine.low %v2416_v15, %v2423_v21  ;;  %v2433_v33 = vcombine.low %v1526_v4, %v1542_v50  ;;  %v477_v52 = vadd.f32 %v10578_v51, %v438_v0  ;;  %v478_v54 = vadd.f32 %v10578_v51, %v439_v57 }
  0xcc   : > { %2701 = vst.msk [vmem:[#allocation2 + $0x70] sm:$0xf] %vm1748_vm1, %v2407_v17  ;;  %v1574_v3 = vcombine.high %v1566_v31, %v1566_v31  ;;  %v1582_v45 = vrot.slane %v1566_v31, %v10230_v32  ;;  %v2440_v27 = vrot.slane %v2432_v22, %v10235_v37  ;;  %v705_v2 = vsel %vm10262_vm6, %v623_v60, 0 }
  0xcd   : > { %v2431_v34 = vrot.slane %v2424_v36, %v10235_v37  ;;  %v2447_v14 = vrot.slane %v2433_v33, %v10235_v37  ;;  %v509_v44 = vmax.f32 %v477_v52, 0.0  ;;  %v510_v10 = vmax.f32 %v478_v54, 0.0 }
  0xce   : > { %v1596_v11 = vrot.slane %v1574_v3, %v10230_v32  ;;  %v2456_v28 = vcombine.low %v1544_v12, %v1582_v45  ;;  %v1559_v61 = vcombine.high %v689_v56, %v689_v56  ;;  %v1604_v48 = vcombine.high %v1582_v45, %v1582_v45 }
  0xcf   : > { %2702 = vst.msk [vmem:[#allocation2 + $0x74] sm:$0xf] %vm1748_vm1, %v2431_v34  ;;  %v2448_v43 = vcombine.low %v2440_v27, %v2447_v14  ;;  %v527_v7 = vpack.c.bf16 %v510_v10, %v509_v44  ;;  %v1614_v53 = vrot.slane %v705_v2, %v10230_v32  ;;  %v4662_v41 = vrot.slane %v10526_v49, 2 }
  0xd0   : > { %v10881_v60 = vld [vmem:[#allocation2 + $0x68] sm:$0xff]   ;;  %v2457_v62 = vcombine.low %v1558_v20, %v1596_v11  ;;  %v2464_v18 = vrot.slane %v2456_v28, %v10235_v37  ;;  %v1573_v4 = vrot.slane %v1559_v61, %v10230_v32  ;;  %v1606_v0 = vcombine.high %v1596_v11, %v1596_v11 }
  0xd1   : > { %v2455_v23 = vrot.slane %v2448_v43, %v10235_v37  ;;  %v628_v39 = vshrl.u32 %v527_v7, 16  ;;  %v631_v40 = vshll.u32 %v527_v7, 16  ;;  %v1621_v24 = vrot.slane %v1614_v53, %v10230_v32 }
  0xd2   : > { %v2950_v8 = vshll.u32 %v10881_v60, 16  ;;  %v2954_v58 = vshrl.u32 %v10881_v60, 16  ;;  %v2471_v49 = vrot.slane %v2457_v62, %v10235_v37  ;;  %v1575_v50 = vcombine.high %v1573_v4, %v1573_v4 }
  0xd3   : > { %2703 = vst.msk [vmem:[#allocation2 + $0x78] sm:$0xf] %vm1748_vm1, %v2455_v23  ;;  %v630_v20 = vrot.slane %v628_v39, 7  ;;  %v1589_v15 = vrot.slane %v1573_v4, %v10230_v32  ;;  %v4663_v21 = vsel %vm4652_vm10, %v4660_v1, %v4662_v41  ;;  %v4664_v56 = vrot.slane %v10570_v35, 2 }
  0xd4   : > { %v2952_v57 = vrot.slane %v2950_v8, 1  ;;  %v2472_v17 = vcombine.low %v2464_v18, %v2471_v49  ;;  %v1603_v12 = vrot.slane %v1575_v50, %v10230_v32  ;;  %9509 = vmatprep.mubr.msk.bf16.mxu0 %vm2994_vm8, %v4663_v21  ;;  %v9121_v3 = vunpack.c.l.bf16 %v9137_v63 }
  0xd5   : > { %v633_v31 = vor.u32 %v631_v40, %v630_v20  ;;  %v1605_v22 = vcombine.high %v1589_v15, %v1589_v15  ;;  %v2480_v36 = vcombine.low %v1604_v48, %v1589_v15  ;;  %v4665_v33 = vsel %vm4652_vm10, %v4662_v41, %v4664_v56 }
  0xd6   : > { %v2953_v47 = vsel %vm2845_vm7, %v10819_v5, %v2952_v57  ;;  %v10904_v52 = vld [vmem:[#allocation2 + $0x70] sm:$0xff]   ;;  %v2956_v1 = vor.u32 %v2954_v58, %v2952_v57  ;;  %v2479_v54 = vrot.slane %v2472_v17, %v10235_v37  ;;  %9510 = vmatmul.mubr.msk.bf16.gmra.mrb[8].mxu0 %vm2994_vm8, %v4665_v33  ;;  %v2481_v27 = vcombine.low %v1606_v0, %v1603_v12 }
  0xd7   : > { %9335 = vmatprep.mubr.msk.bf16.mxu1 %vm2994_vm8, %v2953_v47  ;;  %v690_v45 = vsel %vm10262_vm6, 0, %v633_v31  ;;  %v2488_v2 = vrot.slane %v2480_v36, %v10235_v37  ;;  %v2504_v34 = vcombine.low %v1605_v22, %v1621_v24  ;;  %v2958_v14 = vshll.u32 %v10904_v52, 16 }
  0xd8   : > { %2704 = vst.msk [vmem:[#allocation2 + $0x7c] sm:$0xf] %vm1748_vm1, %v2479_v54  ;;  %v1607_v5 = vcombine.high %v1603_v12, %v1603_v12  ;;  %v1629_v44 = vrot.slane %v690_v45, %v10230_v32  ;;  %v706_v10 = vsel %vm10262_vm6, %v630_v20, 0  ;;  %v2962_v11 = vshrl.u32 %v10904_v52, 16 }
  0xd9   : > { %v2495_v28 = vrot.slane %v2481_v27, %v10235_v37  ;;  %v1622_v61 = vcombine.high %v690_v45, %v690_v45  ;;  %v1677_v48 = vrot.slane %v706_v10, %v10230_v32  ;;  %v2960_v43 = vrot.slane %v2958_v14, 1 }
  0xda   : > { %v1645_v7 = vrot.slane %v1629_v44, %v10230_v32  ;;  %v1637_v53 = vcombine.high %v1629_v44, %v1629_v44  ;;  %v9122_v41 = vunpack.c.h.bf16 %v9137_v63  ;;  %v2512_v18 = vrot.slane %v2504_v34, %v10235_v37 }
  0xdb   : > { %v2496_v62 = vcombine.low %v2488_v2, %v2495_v28  ;;  %v1636_v4 = vrot.slane %v1622_v61, %v10230_v32  ;;  %v440_v0 = vmul.f32 %v10565_v16, %v9121_v3  ;;  %v2961_v23 = vsel %vm2845_vm7, %v2956_v1, %v2960_v43 }
  0xdc   : > { %v2505_v39 = vcombine.low %v1607_v5, %v1645_v7  ;;  %v1659_v40 = vrot.slane %v1637_v53, %v10230_v32  ;;  %v1684_v24 = vrot.slane %v1677_v48, %v10230_v32  ;;  %9336 = vmatmul.mubr.msk.bf16.gmra.mrb[24].mxu1 %vm2994_vm8, %v2961_v23  ;;  %v1667_v50 = vcombine.high %v1645_v7, %v1645_v7  ;;  %v10951_v48 = vld [vmem:[#allocation2 + $0x60] sm:$0xff]  }
  0xdd   : > { %v2503_v8 = vrot.slane %v2496_v62, %v10235_v37  ;;  %v1638_v58 = vcombine.high %v1636_v4, %v1636_v4  ;;  %v1652_v49 = vrot.slane %v1636_v4, %v10230_v32  ;;  %v441_v15 = vmul.f32 %v10565_v16, %v9122_v41 }
  0xde   : > { %v2519_v63 = vrot.slane %v2505_v39, %v10235_v37  ;;  %v1669_v20 = vcombine.high %v1659_v40, %v1659_v40  ;;  %v479_v21 = vadd.f32 %v10578_v51, %v440_v0  ;;  %v4666_v22 = vrot.slane %v10591_v30, 2 }
  0xdf   : > { %v10933_v57 = vld [vmem:[#allocation2 + $0x78] sm:$0xff]   ;;  %2705 = vst.msk [vmem:[#allocation2 + $0x80] sm:$0xf] %vm1748_vm1, %v2503_v8  ;;  %v1666_v17 = vrot.slane %v1638_v58, %v10230_v32  ;;  %v1668_v12 = vcombine.high %v1652_v49, %v1652_v49  ;;  %v2529_v31 = vcombine.low %v1667_v50, %v1652_v49  ;;  %v480_v47 = vadd.f32 %v10578_v51, %v441_v15 }
  0xe0   : > { %v2520_v36 = vcombine.low %v2512_v18, %v2519_v63  ;;  %v2528_v33 = vcombine.low %v1659_v40, %v1669_v20  ;;  %v511_v1 = vmax.f32 %v479_v21, 0.0  ;;  %v2964_v54 = vor.u32 %v2962_v11, %v2960_v43  ;;  %v10966_v40 = vld [vmem:[#allocation2 + $0x68] sm:$0xff]  }
  0xe1   : > { %v2966_v16 = vshll.u32 %v10933_v57, 16  ;;  %v1670_v3 = vcombine.high %v1666_v17, %v1666_v17  ;;  %v2543_v45 = vrot.slane %v2529_v31, %v10235_v37  ;;  %v2553_v34 = vcombine.low %v1668_v12, %v1684_v24  ;;  %v10968_v24 = vld [vmem:[#allocation2 + $0x70] sm:$0xff]  }
  0xe2   : > { %v2527_v27 = vrot.slane %v2520_v36, %v10235_v37  ;;  %v2536_v2 = vrot.slane %v2528_v33, %v10235_v37  ;;  %v512_v14 = vmax.f32 %v480_v47, 0.0  ;;  %v4667_v30 = vsel %vm4652_vm10, %v4664_v56, %v4666_v22 }
  0xe3   : > { %v2968_v5 = vrot.slane %v2966_v16, 1  ;;  %v2552_v44 = vcombine.low %v1666_v17, %v1670_v3  ;;  %v4668_v51 = vrot.slane %v10649_v46, 2  ;;  %v2567_v11 = vrot.slane %v2553_v34, %v10235_v37  ;;  %9513 = vmatprep.mubr.msk.bf16.mxu0 %vm2994_vm8, %v4667_v30 }
  0xe4   : > { %2706 = vst.msk [vmem:[#allocation2 + $0x84] sm:$0xf] %vm1748_vm1, %v2527_v27  ;;  %v2544_v10 = vcombine.low %v2536_v2, %v2543_v45  ;;  %v528_v28 = vpack.c.bf16 %v512_v14, %v511_v1  ;;  %v4670_v61 = vrot.slane %v10710_v29, 2  ;;  %v4672_v29 = vrot.slane %v10752_v26, 2 }
  0xe5   : > { %v2969_v43 = vsel %vm2845_vm7, %v2964_v54, %v2968_v5  ;;  %v2560_v35 = vrot.slane %v2552_v44, %v10235_v37  ;;  %v4669_v56 = vsel %vm4652_vm10, %v4666_v22, %v4668_v51  ;;  %v4674_v4 = vrot.slane %v10951_v48, 2 }
  0xe6   : > { %9339 = vmatprep.mubr.msk.bf16.mxu1 %vm2994_vm8, %v2969_v43  ;;  %v2551_v46 = vrot.slane %v2544_v10, %v10235_v37  ;;  %v635_v7 = vshrl.u32 %v528_v28, 16  ;;  %v638_v53 = vshll.u32 %v528_v28, 16  ;;  %9514 = vmatmul.mubr.msk.bf16.gmra.mrb[12].mxu0 %vm2994_vm8, %v4669_v56  ;;  %v4671_v41 = vsel %vm4652_vm10, %v4668_v51, %v4670_v61  ;;  %v11000_v51 = vld [vmem:[#allocation2 + $0x78] sm:$0xff]  }
  0xe7   : > { %v2568_v62 = vcombine.low %v2560_v35, %v2567_v11  ;;  %9517 = vmatprep.mubr.msk.bf16.mxu0 %vm2994_vm8, %v4671_v41  ;;  %v2970_v0 = vshrl.u32 %v10933_v57, 16  ;;  %v4673_v26 = vsel %vm4652_vm10, %v4670_v61, %v4672_v29  ;;  %v4675_v50 = vsel %vm4652_vm10, %v4672_v29, %v4674_v4 }
  0xe8   : > { %2707 = vst.msk [vmem:[#allocation2 + $0x88] sm:$0xf] %vm1748_vm1, %v2551_v46  ;;  %v637_v18 = vrot.slane %v635_v7, 7  ;;  %v4676_v12 = vrot.slane %v10966_v40, 2  ;;  %v4678_v31 = vrot.slane %v10968_v24, 2  ;;  %vm5852_vm13 = vcmask 1044480  }
  0xe9   : > { %v2575_v23 = vrot.slane %v2568_v62, %v10235_v37  ;;  %v2972_v20 = vor.u32 %v2970_v0, %v2968_v5  ;;  %vm5405_vm12 = vsmask.f32 5376 }
  0xea   : > { %v640_v39 = vor.u32 %v638_v53, %v637_v18  ;;  %v707_v58 = vsel %vm10262_vm6, %v637_v18, 0  ;;  %v4677_v44 = vsel %vm4652_vm10, %v4674_v4, %v4676_v12  ;;  %v4679_v30 = vsel %vm4652_vm10, %v4676_v12, %v4678_v31 }
  0xeb   : > { %v10970_v8 = vld [vmem:[#allocation2 + $0x80] sm:$0xff]   ;;  %2708 = vst.msk [vmem:[#allocation2 + $0x8c] sm:$0xf] %vm1748_vm1, %v2575_v23  ;;  %v1740_v63 = vrot.slane %v707_v58, %v10230_v32 }
  0xec   : > { %v691_v49 = vsel %vm10262_vm6, 0, %v640_v39  ;;  %v2974_v15 = vshll.u32 %v10970_v8, 16  ;;  %v2978_v1 = vshrl.u32 %v10970_v8, 16  ;;  %v11004_v43 = vld [vmem:[#allocation2 + $0x80] sm:$0xff]  }
  0xed   : > { %v1685_v21 = vcombine.high %v691_v49, %v691_v49  ;;  %v1692_v17 = vrot.slane %v691_v49, %v10230_v32  ;;  %v1747_v22 = vrot.slane %v1740_v63, %v10230_v32  ;;  %v4682_v4 = vrot.slane %v11004_v43, 2 }
  0xee   : > { %9518 = vmatmul.mubr.msk.bf16.gmra.mrb[16].mxu0 %vm2994_vm8, %v4673_v26  ;;  %v2976_v6 = vrot.slane %v2974_v15, 1 }
  0xef   : > { %v1699_v36 = vrot.slane %v1685_v21, %v10230_v32  ;;  %v1700_v33 = vcombine.high %v1692_v17, %v1692_v17  ;;  %v1708_v47 = vrot.slane %v1692_v17, %v10230_v32  ;;  %9521 = vmatprep.mubr.msk.bf16.mxu0 %vm2994_vm8, %v4675_v50  ;;  %v2630_v54 = vrot.slane %v1747_v22, %v10235_v37  ;;  %v4960_v21 = vld [vmem:[#allocation2 + $0x10] sm:$0xc]  ;;  %v11028_v17 = vld [vmem:[#allocation2 + $0x14] sm:$0xf] }
  0xf0   : > { %v2977_v16 = vsel %vm2845_vm7, %v2972_v20, %v2976_v6  ;;  %v2980_v11 = vor.u32 %v2978_v1, %v2976_v6 }
  0xf1   : > { %v1701_v3 = vcombine.high %v1699_v36, %v1699_v36  ;;  %v1722_v45 = vrot.slane %v1700_v33, %v10230_v32  ;;  %9340 = vmatmul.mubr.msk.bf16.gmra.mrb[28].mxu1 %vm2994_vm8, %v2977_v16  ;;  %v1730_v2 = vcombine.high %v1708_v47, %v1708_v47  ;;  %v1715_v34 = vrot.slane %v1699_v36, %v10230_v32  ;;  %v11039_v36 = vld [vmem:[#allocation2 + $0x18] sm:$0xff]  }
  0xf2   : > { %v10994_v27 = vld [vmem:[#allocation2 + $0x88] sm:$0xff]   ;;  %v2637_v14 = vrot.slane %v2630_v54, %v10235_v37 }
  0xf3   : > { %v1732_v5 = vcombine.high %v1722_v45, %v1722_v45  ;;  %v1729_v10 = vrot.slane %v1701_v3, %v10230_v32  ;;  %v2982_v28 = vshll.u32 %v10994_v27, 16  ;;  %v2576_v61 = vcombine.low %v1708_v47, %v1730_v2  ;;  %v11019_v49 = vld [vmem:[#allocation2 + $0x88] sm:$0xff]  }
  0xf4   : > { %v1731_v35 = vcombine.high %v1715_v34, %v1715_v34  ;;  %2711 = vst.msk [vmem:[#allocation2 + $0x98] sm:$0x1] %vm1751_vm2, %v2637_v14  ;;  %v4680_v32 = vrot.slane %v11000_v51, 2  ;;  %v4684_v15 = vrot.slane %v11019_v49, 2  ;;  %v2986_v12 = vshrl.u32 %v10994_v27, 16 }
  0xf5   : > { %v2577_v56 = vcombine.low %v1722_v45, %v1732_v5  ;;  %v1733_v46 = vcombine.high %v1729_v10, %v1729_v10  ;;  %v2984_v7 = vrot.slane %v2982_v28, 1  ;;  %v2584_v53 = vrot.slane %v2576_v61, %v10235_v37  ;;  %v10062_v61 = vld [vmem:[%s12608_s3 + $0x8] sm:$0xf] }
  0xf6   : > { %9522 = vmatmul.mubr.msk.bf16.gmra.mrb[20].mxu0 %vm2994_vm8, %v4677_v44  ;;  %v2600_v41 = vcombine.low %v1715_v34, %v1731_v35  ;;  %v4681_v58 = vsel %vm4652_vm10, %v4678_v31, %v4680_v32  ;;  %v4683_v63 = vsel %vm4652_vm10, %v4680_v32, %v4682_v4  ;;  %v4685_v31 = vsel %vm4652_vm10, %v4682_v4, %v4684_v15  ;;  %v11054_v44 = vld [vmem:[#allocation2 + $0x20] sm:$0xff]   ;;  %v11088_v32 = vld [vmem:[#allocation2 + $0x38] sm:$0xff]  }
  0xf7   : > { %v2591_v62 = vrot.slane %v2577_v56, %v10235_v37  ;;  %9525 = vmatprep.mubr.msk.bf16.mxu0 %vm2994_vm8, %v4679_v30  ;;  %v2601_v29 = vcombine.low %v1729_v10, %v1733_v46  ;;  %v2985_v18 = vsel %vm2845_vm7, %v2980_v11, %v2984_v7  ;;  %v2988_v33 = vor.u32 %v2986_v12, %v2984_v7  ;;  %v11059_v10 = vld [vmem:[#allocation2 + $0x28] sm:$0xff]   ;;  %v11079_v7 = vld [vmem:[#allocation2 + $0x30] sm:$0xff]   ;;  %v11103_v4 = vld [vmem:[#allocation2 + $0x18] sm:$0xff]  }
  0xf8   : > { %v2608_v0 = vrot.slane %v2600_v41, %v10235_v37  ;;  %9343 = vmatprep.mubr.msk.bf16.mxu1 %vm2994_vm8, %v2985_v18  ;;  %v5093_v2 = vrot.slane %v11039_v36, 2  ;;  %v5095_v11 = vrot.slane %v11054_v44, 2  ;;  %v5097_v28 = vrot.slane %v11059_v10, 2  ;;  %v11074_v56 = vld [vmem:[#allocation2 + $0x8] sm:$0xff]   ;;  %v11128_v12 = vld [vmem:[#allocation2 + $0x30] sm:$0xff]  }
  0xf9   : > { %v2592_v23 = vcombine.low %v2584_v53, %v2591_v62  ;;  %v2615_v39 = vrot.slane %v2601_v29, %v10235_v37  ;;  %v3545_v35 = vsel %vm3049_vm0, %v10062_v61, 0  ;;  %v11081_v53 = vld [vmem:[#allocation2 + $0x10] sm:$0xff]   ;;  %v5631_v41 = vsel %vm3049_vm0, %v10826_v9, 0  ;;  %v11095_v29 = vld [vmem:[%s12608_s3 + $0x20] sm:$0xf] }
  0xfa   : > { %v5096_v46 = vsel %vm4652_vm10, %v5093_v2, %v5095_v11  ;;  %v5098_v62 = vsel %vm4652_vm10, %v5095_v11, %v5097_v28  ;;  %v5099_v18 = vrot.slane %v11079_v7, 2  ;;  %v5101_v9 = vrot.slane %v11088_v32, 2  ;;  %v11157_v11 = vld [vmem:[#allocation2 + $0x48] sm:$0xff]   ;;  %v11162_v61 = vld [vmem:[#allocation2 + $0x70] sm:$0xff]  }
  0xfb   : > { %v2599_v26 = vrot.slane %v2592_v23, %v10235_v37  ;;  %v2616_v50 = vcombine.low %v2608_v0, %v2615_v39  ;;  %v11032_v22 = vld [vmem:[#allocation2 + $0x98] ss:$0 sps:$4 sm:$0x33]   ;;  %v11108_v23 = vld [vmem:[#allocation2 + $0x40] sm:$0xff]   ;;  %v3454_v59 = vrot.slane %v11074_v56, 1 }
  0xfc   : > { %12674 = vst [vmem:[#allocation5_spill] sm:$0xff] %v11032_v22  ;;  %v4688_v54 = vrot.slane %v11032_v22, 2  ;;  %v5100_v0 = vsel %vm4652_vm10, %v5097_v28, %v5099_v18  ;;  %v11110_v39 = vld [vmem:[#allocation2 + $0x20] sm:$0xff]  }
  0xfd   : > { %2709 = vst.msk [vmem:[#allocation2 + $0x90] sm:$0xf] %vm1748_vm1, %v2599_v26  ;;  %v2623_v20 = vrot.slane %v2616_v50, %v10235_v37  ;;  %v11037_v37 = vcombine.low %v4960_v21, %v11028_v17  ;;  %v5102_v26 = vsel %vm4652_vm10, %v5099_v18, %v5101_v9  ;;  %v5103_v50 = vrot.slane %v11108_v23, 2  ;;  %v11126_v21 = vld [vmem:[#allocation2 + $0x50] sm:$0xff]  }
  0xfe   : > { %9526 = vmatmul.mubr.msk.bf16.gmra.mrb[24].mxu0 %vm2994_vm8, %v4681_v58  ;;  %v11115_v58 = vld [vmem:[#allocation2 + $0x48] sm:$0xff]  }
  0xff   : > { %9529 = vmatprep.mubr.msk.bf16.mxu0 %vm2994_vm8, %v4683_v63  ;;  %2710 = vst.msk [vmem:[#allocation2 + $0x94] sm:$0xf] %vm1748_vm1, %v2623_v20  ;;  %v5092_v45 = vrot.slane %v11037_v37, 2  ;;  %v5105_v63 = vrot.slane %v11115_v58, 2  ;;  %v11121_v20 = vld [vmem:[#allocation2 + $0x28] sm:$0xff]  }
 0x101   : > { %v5094_v30 = vsel %vm4652_vm10, %v5092_v45, %v5093_v2  ;;  %v11144_v45 = vld [vmem:[#allocation2 + $0x60] sm:$0xff]  }
 0x102   : > { %v11146_v2 = vld [vmem:[#allocation2 + $0x40] sm:$0xff]  }
 0x104   : > { %v11034_v6 = vld [vmem:[#allocation2 + $0x90] ss:$0 sps:$4 sm:$0x11]  }
 0x105   : > { %v2990_v47 = vshll.u32 %v11034_v6, 16 }
 0x106   : > { %9530 = vmatmul.mubr.msk.bf16.gmra.mrb[28].mxu0 %vm2994_vm8, %v4685_v31  ;;  %v11043_v1 = vld [vmem:[#allocation2 + $0x90] sm:$0xff]   ;;  %v5106_v31 = vsel %vm4652_vm10, %v5103_v50, %v5105_v63 }
 0x107   : > { %12675 = vst [vmem:[#allocation6_spill] sm:$0xff] %v11043_v1  ;;  %v2992_v16 = vrot.slane %v2990_v47, 1  ;;  %v4686_v3 = vrot.slane %v11043_v1, 2  ;;  %v5107_v47 = vrot.slane %v11126_v21, 2 }
 0x109   : > { %v2993_v34 = vsel %vm2845_vm7, %v2988_v33, %v2992_v16  ;;  %v4687_v14 = vsel %vm4652_vm10, %v4684_v15, %v4686_v3  ;;  %v4689_v5 = vsel %vm4652_vm10, %v4686_v3, %v4688_v54  ;;  %v5104_v15 = vsel %vm4652_vm10, %v5101_v9, %v5103_v50  ;;  %v11133_v33 = vld [vmem:[#allocation2 + $0x58] sm:$0xff]   ;;  %v11183_v50 = vld [vmem:[#allocation2 + $0x88] sm:$0xff]  }
 0x10a   : > { %9344 = vmatmul.mubr.msk.bf16.gmra.mrb[32].mxu1 %vm2994_vm8, %v2993_v34  ;;  %9533 = vmatprep.mubr.msk.bf16.mxu0 %vm2994_vm8, %v4687_v14  ;;  %v5109_v54 = vrot.slane %v11133_v33, 2  ;;  %v11139_v16 = vld [vmem:[#allocation2 + $0x38] sm:$0xff]   ;;  %v5108_v3 = vsel %vm4652_vm10, %v5105_v63, %v5107_v47  ;;  %v11151_v14 = vld [vmem:[#allocation2 + $0x68] sm:$0xff]  }
 0x10b   : > { %9349 = vmatprep.mubr.msk.bf16.mxu1 %vm2994_vm8, %v10237_v38  ;;  %v11072_v38 = vld [vmem:[%s12608_s3 + $0xc] sm:$0xf] }
 0x10c   : > { %v5110_v34 = vsel %vm4652_vm10, %v5107_v47, %v5109_v54  ;;  %v11197_v47 = vld [vmem:[#allocation2 + $0x98] sm:$0xff]  }
 0x10e   : > { %9534 = vmatmul.mubr.msk.bf16.gmra.mrb[32].mxu0 %vm2994_vm8, %v4689_v5  ;;  %v5111_v5 = vrot.slane %v11144_v45, 2 }
 0x10f   : > { %9539 = vmatprep.mubr.msk.bf16.mxu0 %vm2994_vm8, %v5094_v30  ;;  %v5113_v30 = vrot.slane %v11151_v14, 2 }
 0x110   : > { %v5112_v28 = vsel %vm4652_vm10, %v5109_v54, %v5111_v5  ;;  %v3446_v54 = vld [vmem:[#allocation2] sm:$0xe] }
 0x112   : > { %9350 = vmatmul.mubr.msk.bf16.vlgmr.msra.gmra.mrb[0].mxu1 %vm2994_vm8, %v11074_v56 }
 0x113   : > { %9353 = vmatprep.mubr.msk.bf16.mxu1 %vm2994_vm8, %v11081_v53  ;;  %9386 = vmatpush3.bf16.msra.mxu1 %v3545_v35  ;;  %v11164_v35 = vld [vmem:[#allocation2 + $0x50] sm:$0xff]  }
 0x114   : > { %9944 = vmatprep.subr.msk.bf16.mxu1 %vm3049_vm0, %v11072_v38 }
 0x116   : > { %9540 = vmatmul.mubr.msk.bf16.vlgmr.msra.gmra.mrb[0].mxu0 %vm2994_vm8, %v5096_v46  ;;  %v5114_v46 = vsel %vm4652_vm10, %v5111_v5, %v5113_v30  ;;  %v5125_v5 = vrot.slane %v11197_v47, 2 }
 0x117   : > { %9576 = vmatpush3.bf16.msra.mxu0 %v5631_v41  ;;  %9543 = vmatprep.mubr.msk.bf16.mxu0 %vm2994_vm8, %v5098_v62  ;;  %v11169_v41 = vld [vmem:[#allocation2 + $0x78] sm:$0xff]   ;;  %v5115_v62 = vrot.slane %v11162_v61, 2 }
 0x118   : > { %9950 = vmatprep.subr.msk.bf16.mxu0 %vm3049_vm0, %v11095_v29  ;;  %v5117_v18 = vrot.slane %v11169_v41, 2 }
 0x119   : > { %v5116_v9 = vsel %vm4652_vm10, %v5113_v30, %v5115_v62  ;;  %v5410_v30 = vshll.u32 %v11037_v37, 16 }
 0x11a   : > { %9354 = vmatmul.mubr.msk.bf16.gmra.mrb[4].mxu1 %vm2994_vm8, %v11103_v4 }
 0x11b   : > { %9357 = vmatprep.mubr.msk.bf16.mxu1 %vm2994_vm8, %v11110_v39 }
 0x11e   : > { %9544 = vmatmul.mubr.msk.bf16.gmra.mrb[4].mxu0 %vm2994_vm8, %v5100_v0  ;;  %v11178_v0 = vld [vmem:[#allocation2 + $0x80] sm:$0xff]  }
 0x11f   : > { %9547 = vmatprep.mubr.msk.bf16.mxu0 %vm2994_vm8, %v5102_v26  ;;  %v5118_v26 = vsel %vm4652_vm10, %v5115_v62, %v5117_v18  ;;  %v5119_v63 = vrot.slane %v11178_v0, 2  ;;  %v10073_v62 = vld [vmem:[#allocation2 + $0x4] sm:$0xf] }
 0x122   : > { %9358 = vmatmul.mubr.msk.bf16.gmra.mrb[8].mxu1 %vm2994_vm8, %v11121_v20 }
 0x123   : > { %9361 = vmatprep.mubr.msk.bf16.mxu1 %vm2994_vm8, %v11128_v12 }
 0x126   : > { %9548 = vmatmul.mubr.msk.bf16.gmra.mrb[8].mxu0 %vm2994_vm8, %v5104_v15  ;;  %v5121_v15 = vrot.slane %v11183_v50, 2 }
 0x127   : > { %9551 = vmatprep.mubr.msk.bf16.mxu0 %vm2994_vm8, %v5106_v31  ;;  %v11192_v31 = vld [vmem:[#allocation2 + $0x90] sm:$0xff]  }
 0x12a   : > { %9362 = vmatmul.mubr.msk.bf16.gmra.mrb[12].mxu1 %vm2994_vm8, %v11139_v16 }
 0x12b   : > { %9365 = vmatprep.mubr.msk.bf16.mxu1 %vm2994_vm8, %v11146_v2 }
 0x12e   : > { %9552 = vmatmul.mubr.msk.bf16.gmra.mrb[12].mxu0 %vm2994_vm8, %v5108_v3  ;;  %v5123_v3 = vrot.slane %v11192_v31, 2 }
 0x12f   : > { %9555 = vmatprep.mubr.msk.bf16.mxu0 %vm2994_vm8, %v5110_v34  ;;  %v5407_v34 = vshrl.u32 %v11037_v37, 16 }
 0x132   : > { %9366 = vmatmul.mubr.msk.bf16.gmra.mrb[16].mxu1 %vm2994_vm8, %v11157_v11 }
 0x133   : > { %9369 = vmatprep.mubr.msk.bf16.mxu1 %vm2994_vm8, %v11164_v35 }
 0x136   : > { %9556 = vmatmul.mubr.msk.bf16.gmra.mrb[16].mxu0 %vm2994_vm8, %v5112_v28  ;;  %v5415_v28 = vshrl.u32 %v11039_v36, 16 }
 0x137   : > { %9559 = vmatprep.mubr.msk.bf16.mxu0 %vm2994_vm8, %v5114_v46  ;;  %v5418_v46 = vshll.u32 %v11039_v36, 16 }
 0x138   : > { %v5417_v37 = vrot.slane %v5415_v28, 2 }
 0x139   : > { %v5420_v19 = vrot.slane %v5418_v46, 3 }
 0x13a   : > { %9370 = vmatmul.mubr.msk.bf16.gmra.mrb[20].mxu1 %vm2994_vm8, %v10757_v42  ;;  %v5120_v42 = vsel %vm4652_vm10, %v5117_v18, %v5119_v63  ;;  %v8878_v18 = vcombine.low %v3446_v54, %v10073_v62 }
 0x13b   : > { %9373 = vmatprep.mubr.msk.bf16.mxu1 %vm2994_vm8, %v10787_v55  ;;  %v5122_v55 = vsel %vm4652_vm10, %v5119_v63, %v5121_v15  ;;  %v5409_v63 = vrot.slane %v5407_v34, 2  ;;  %v5427_v34 = vshll.u32 %v11054_v44, 16  ;;  %v5421_v1 = vor.u32 %v5420_v19, %v5417_v37 }
 0x13c   : > { %v3453_v22 = vrot.slane %v8878_v18, 1 }
 0x13d   : > { %v5429_v18 = vrot.slane %v5427_v34, 3 }
 0x13e   : > { %9560 = vmatmul.mubr.msk.bf16.gmra.mrb[20].mxu0 %vm2994_vm8, %v5116_v9  ;;  %v5124_v9 = vsel %vm4652_vm10, %v5121_v15, %v5123_v3  ;;  %v5424_v15 = vshrl.u32 %v11054_v44, 16  ;;  %v3455_v28 = vsel %vm3452_vm11, %v3453_v22, %v3454_v59 }
 0x13f   : > { %9563 = vmatprep.mubr.msk.bf16.mxu0 %vm2994_vm8, %v5118_v26  ;;  %v10035_v26 = vld [vmem:[#allocation2 + $0xa0] ss:$0 sps:$4 sm:$0x33]  }
 0x140   : > { %v5127_v54 = vrot.slane %v10035_v26, 2  ;;  %v5426_v46 = vrot.slane %v5424_v15, 2  ;;  %v5454_v15 = vshll.u32 %v11088_v32, 16 }
 0x142   : > { %9374 = vmatmul.mubr.msk.bf16.gmra.mrb[24].mxu1 %vm2994_vm8, %v10881_v60  ;;  %v5128_v56 = vsel %vm4652_vm10, %v5125_v5, %v5127_v54  ;;  %v5430_v22 = vor.u32 %v5429_v18, %v5426_v46  ;;  %v5456_v18 = vrot.slane %v5454_v15, 3 }
 0x143   : > { %9377 = vmatprep.mubr.msk.bf16.mxu1 %vm2994_vm8, %v10904_v52 }
 0x146   : > { %9564 = vmatmul.mubr.msk.bf16.gmra.mrb[24].mxu0 %vm2994_vm8, %v5120_v42  ;;  %v5126_v42 = vsel %vm4652_vm10, %v5123_v3, %v5125_v5  ;;  %v5433_v3 = vshrl.u32 %v11059_v10, 16  ;;  %v5445_v5 = vshll.u32 %v11079_v7, 16 }
 0x147   : > { %9567 = vmatprep.mubr.msk.bf16.mxu0 %vm2994_vm8, %v5122_v55  ;;  %v5412_v55 = vrot.slane %v5410_v30, 3  ;;  %v5436_v30 = vshll.u32 %v11059_v10, 16 }
 0x148   : > { %v5435_v26 = vrot.slane %v5433_v3, 2  ;;  %v5431_v3 = vsel %vm5405_vm12, %v5421_v1, %v5430_v22 }
 0x149   : > { %v5413_v62 = vor.u32 %v5412_v55, %v5409_v63  ;;  %v5438_v63 = vrot.slane %v5436_v30, 3  ;;  %v5442_v55 = vshrl.u32 %v11079_v7, 16 }
 0x14a   : > { %9378 = vmatmul.mubr.msk.bf16.gmra.mrb[28].mxu1 %vm2994_vm8, %v10933_v57 }
 0x14b   : > { %9381 = vmatprep.mubr.msk.bf16.mxu1 %vm2994_vm8, %v10970_v8  ;;  %v5422_v19 = vsel %vm5405_vm12, %v5413_v62, %v5421_v1  ;;  %v5439_v54 = vor.u32 %v5438_v63, %v5435_v26  ;;  %v3460_v62 = vrot.slane %v11110_v39, 1  ;;  %v5444_v30 = vrot.slane %v5442_v55, 2  ;;  %v10074_v39 = vld [vmem:[%s12608_s3 + $0x10] sm:$0xf] }
 0x14c   : > { %v5472_v63 = vshll.u32 %v11115_v58, 16 }
 0x14e   : > { %9568 = vmatmul.mubr.msk.bf16.gmra.mrb[28].mxu0 %vm2994_vm8, %v5124_v9  ;;  %v3456_v9 = vrot.slane %v11081_v53, 1  ;;  %v5451_v53 = vshrl.u32 %v11088_v32, 16 }
 0x14f   : > { %9571 = vmatprep.mubr.msk.bf16.mxu0 %vm2994_vm8, %v5126_v42  ;;  %v3458_v42 = vrot.slane %v11103_v4, 1  ;;  %v3984_v4 = vsel %vm3049_vm0, %v11072_v38, 0  ;;  %v3462_v38 = vrot.slane %v11121_v20, 1  ;;  %v5469_v20 = vshrl.u32 %v11115_v58, 16 }
 0x150   : > { %v3457_v37 = vsel %vm3452_vm11, %v3454_v59, %v3456_v9  ;;  %v5945_v59 = vsel %vm3049_vm0, %v11095_v29, 0  ;;  %v5453_v46 = vrot.slane %v5451_v53, 2  ;;  %v5460_v29 = vshrl.u32 %v11108_v23, 16 }
 0x151   : > { %v3459_v34 = vsel %vm3452_vm11, %v3456_v9, %v3458_v42  ;;  %v5463_v9 = vshll.u32 %v11108_v23, 16  ;;  %v3464_v53 = vrot.slane %v11128_v12, 1  ;;  %v5487_v12 = vshrl.u32 %v11133_v33, 16 }
 0x152   : > { %9382 = vmatmul.mubr.msk.bf16.gmra.mrb[32].mxu1 %vm2994_vm8, %v10994_v27  ;;  %v5457_v26 = vor.u32 %v5456_v18, %v5453_v46 }
 0x153   : > { %9387 = vmatprep.mubr.msk.bf16.mxu1 %vm2994_vm8, %v3455_v28  ;;  %v5447_v28 = vrot.slane %v5445_v5, 3  ;;  %v5462_v5 = vrot.slane %v5460_v29, 2 }
 0x155   : > { %v5448_v1 = vor.u32 %v5447_v28, %v5444_v30  ;;  %v3465_v30 = vsel %vm3452_vm11, %v3462_v38, %v3464_v53 }
 0x156   : > { %9572 = vmatmul.mubr.msk.bf16.gmra.mrb[32].mxu0 %vm2994_vm8, %v5128_v56  ;;  %v5440_v56 = vsel %vm5405_vm12, %v5430_v22, %v5439_v54  ;;  %v3463_v22 = vsel %vm3452_vm11, %v3460_v62, %v3462_v38  ;;  %v5489_v38 = vrot.slane %v5487_v12, 2 }
 0x157   : > { %9577 = vmatprep.mubr.msk.bf16.mxu0 %vm2994_vm8, %v5422_v19  ;;  %v3461_v19 = vsel %vm3452_vm11, %v3458_v42, %v3460_v62  ;;  %v5449_v55 = vsel %vm5405_vm12, %v5439_v54, %v5448_v1  ;;  %v5458_v15 = vsel %vm5405_vm12, %v5448_v1, %v5457_v26  ;;  %v5471_v42 = vrot.slane %v5469_v20, 2 }
 0x158   : > { %v5481_v54 = vshll.u32 %v11126_v21, 16  ;;  %v5496_v20 = vshrl.u32 %v11144_v45, 16 }
 0x15a   : > { %9388 = vmatmul.mubr.msk.bf16.vlgmr.msra.gmra.mrb[0].mxu1 %vm2994_vm8, %v3457_v37  ;;  %v5465_v37 = vrot.slane %v5463_v9, 3  ;;  %v5483_v18 = vrot.slane %v5481_v54, 3  ;;  %v3470_v9 = vrot.slane %v11157_v11, 1 }
 0x15b   : > { %9391 = vmatprep.mubr.msk.bf16.mxu1 %vm2994_vm8, %v3459_v34  ;;  %9424 = vmatpush3.bf16.msra.mxu1 %v3984_v4  ;;  %v5474_v34 = vrot.slane %v5472_v63, 3  ;;  %v3466_v4 = vrot.slane %v11139_v16, 1 }
 0x15c   : > { %9946 = vmatprep.subr.msk.bf16.mxu1 %vm3049_vm0, %v10074_v39  ;;  %v5466_v62 = vor.u32 %v5465_v37, %v5462_v5  ;;  %v3468_v39 = vrot.slane %v11146_v2, 1  ;;  %v5505_v2 = vshrl.u32 %v11151_v14, 16  ;;  %v5498_v37 = vrot.slane %v5496_v20, 2 }
 0x15d   : > { %v5475_v28 = vor.u32 %v5474_v34, %v5471_v42  ;;  %v3478_v20 = vrot.slane %v10881_v60, 1 }
 0x15e   : > { %9578 = vmatmul.mubr.msk.bf16.vlgmr.msra.gmra.mrb[0].mxu0 %vm2994_vm8, %v5431_v3  ;;  %v5478_v3 = vshrl.u32 %v11126_v21, 16  ;;  %v5467_v16 = vsel %vm5405_vm12, %v5457_v26, %v5466_v62  ;;  %v5499_v26 = vshll.u32 %v11144_v45, 16  ;;  %v3469_v63 = vsel %vm3452_vm11, %v3466_v4, %v3468_v39 }
 0x15f   : > { %9614 = vmatpush3.bf16.msra.mxu0 %v5945_v59  ;;  %9581 = vmatprep.mubr.msk.bf16.mxu0 %vm2994_vm8, %v5440_v56  ;;  %v5490_v59 = vshll.u32 %v11133_v33, 16  ;;  %v3467_v56 = vsel %vm3452_vm11, %v3464_v53, %v3466_v4  ;;  %v5476_v1 = vsel %vm5405_vm12, %v5466_v62, %v5475_v28  ;;  %v3471_v5 = vsel %vm3452_vm11, %v3468_v39, %v3470_v9  ;;  %v10075_v62 = vld [vmem:[#allocation2 + $0x58] sm:$0xff]  }
 0x160   : > { %v5480_v46 = vrot.slane %v5478_v3, 2  ;;  %v5501_v53 = vrot.slane %v5499_v26, 3  ;;  %v5507_v34 = vrot.slane %v5505_v2, 2  ;;  %v3474_v3 = vrot.slane %v10075_v62, 1 }
 0x161   : > { %v5492_v29 = vrot.slane %v5490_v59, 3 }
 0x162   : > { %9392 = vmatmul.mubr.msk.bf16.gmra.mrb[4].mxu1 %vm2994_vm8, %v3461_v19  ;;  %v5484_v19 = vor.u32 %v5483_v18, %v5480_v46  ;;  %v5502_v54 = vor.u32 %v5501_v53, %v5498_v37 }
 0x163   : > { %9395 = vmatprep.mubr.msk.bf16.mxu1 %vm2994_vm8, %v3463_v22  ;;  %v5493_v22 = vor.u32 %v5492_v29, %v5489_v38 }
 0x164   : > { %v5485_v11 = vsel %vm5405_vm12, %v5475_v28, %v5484_v19  ;;  %v5517_v28 = vshll.u32 %v11162_v61, 16 }
 0x165   : > { %v5494_v42 = vsel %vm5405_vm12, %v5484_v19, %v5493_v22  ;;  %v5503_v46 = vsel %vm5405_vm12, %v5493_v22, %v5502_v54  ;;  %v5535_v22 = vshll.u32 %v11178_v0, 16 }
 0x166   : > { %9582 = vmatmul.mubr.msk.bf16.gmra.mrb[4].mxu0 %vm2994_vm8, %v5449_v55  ;;  %v5508_v55 = vshll.u32 %v11151_v14, 16  ;;  %v5519_v39 = vrot.slane %v5517_v28, 3  ;;  %v5553_v28 = vshll.u32 %v11192_v31, 16 }
 0x167   : > { %9585 = vmatprep.mubr.msk.bf16.mxu0 %vm2994_vm8, %v5458_v15  ;;  %v3472_v15 = vrot.slane %v11164_v35, 1  ;;  %v5523_v35 = vshrl.u32 %v11169_v41, 16 }
 0x168   : > { %v5510_v4 = vrot.slane %v5508_v55, 3 }
 0x169   : > { %v3473_v12 = vsel %vm3452_vm11, %v3470_v9, %v3472_v15  ;;  %v5525_v9 = vrot.slane %v5523_v35, 2  ;;  %v5562_v35 = vshll.u32 %v11197_v47, 16 }
 0x16a   : > { %9396 = vmatmul.mubr.msk.bf16.gmra.mrb[8].mxu1 %vm2994_vm8, %v3465_v30  ;;  %v5514_v30 = vshrl.u32 %v11162_v61, 16  ;;  %v5511_v59 = vor.u32 %v5510_v4, %v5507_v34 }
 0x16b   : > { %9399 = vmatprep.mubr.msk.bf16.mxu1 %vm2994_vm8, %v3467_v56  ;;  %v5526_v56 = vshll.u32 %v11169_v41, 16 }
 0x16c   : > { %v5516_v18 = vrot.slane %v5514_v30, 2  ;;  %v5512_v29 = vsel %vm5405_vm12, %v5502_v54, %v5511_v59  ;;  %v5550_v30 = vshrl.u32 %v11192_v31, 16 }
 0x16d   : > { %v5528_v19 = vrot.slane %v5526_v56, 3 }
 0x16e   : > { %9586 = vmatmul.mubr.msk.bf16.gmra.mrb[8].mxu0 %vm2994_vm8, %v5467_v16  ;;  %v3475_v16 = vsel %vm3452_vm11, %v3472_v15, %v3474_v3  ;;  %v5520_v26 = vor.u32 %v5519_v39, %v5516_v18  ;;  %v5537_v15 = vrot.slane %v5535_v22, 3  ;;  %v11328_v18 = vld [vmem:[#allocation2 + $0xa0] ss:$0 sps:$4 sm:$0x77]   ;;  %v3484_v39 = vrot.slane %v10970_v8, 1 }
 0x16f   : > { %9589 = vmatprep.mubr.msk.bf16.mxu0 %vm2994_vm8, %v5476_v1  ;;  %v10076_v1 = vld [vmem:[#allocation2 + $0x60] sm:$0xff]   ;;  %v5529_v55 = vor.u32 %v5528_v19, %v5525_v9  ;;  %v3486_v9 = vrot.slane %v10994_v27, 1 }
 0x170   : > { %v3476_v38 = vrot.slane %v10076_v1, 1  ;;  %v5521_v60 = vsel %vm5405_vm12, %v5511_v59, %v5520_v26 }
 0x171   : > { %v5530_v34 = vsel %vm5405_vm12, %v5520_v26, %v5529_v55  ;;  %v5571_v26 = vshll.u32 %v11328_v18, 16  ;;  %v3487_v8 = vsel %vm3452_vm11, %v3484_v39, %v3486_v9 }
 0x172   : > { %9400 = vmatmul.mubr.msk.bf16.gmra.mrb[12].mxu1 %vm2994_vm8, %v3469_v63  ;;  %v5532_v63 = vshrl.u32 %v11178_v0, 16  ;;  %v3477_v2 = vsel %vm3452_vm11, %v3474_v3, %v3476_v38  ;;  %v3479_v37 = vsel %vm3452_vm11, %v3476_v38, %v3478_v20  ;;  %v3482_v3 = vrot.slane %v10933_v57, 1 }
 0x173   : > { %9403 = vmatprep.mubr.msk.bf16.mxu1 %vm2994_vm8, %v3471_v5  ;;  %v5541_v5 = vshrl.u32 %v11183_v50, 16 }
 0x174   : > { %v5534_v53 = vrot.slane %v5532_v63, 2  ;;  %v3485_v63 = vsel %vm3452_vm11, %v3482_v3, %v3484_v39  ;;  %v10081_v39 = vld [vmem:[#allocation2 + $0x30] sm:$0xff]  }
 0x175   : > { %v5543_v4 = vrot.slane %v5541_v5, 2  ;;  %v5573_v5 = vrot.slane %v5571_v26, 3  ;;  %v10083_v26 = vld [vmem:[#allocation2 + $0x40] sm:$0xff]  }
 0x176   : > { %9590 = vmatmul.mubr.msk.bf16.gmra.mrb[12].mxu0 %vm2994_vm8, %v5485_v11  ;;  %v5544_v11 = vshll.u32 %v11183_v50, 16  ;;  %v5538_v54 = vor.u32 %v5537_v15, %v5534_v53  ;;  %v3892_v53 = vrot.slane %v10360_v25, 1  ;;  %v10077_v15 = vld [vmem:[#allocation2 + $0x10] sm:$0xff]   ;;  %v10078_v25 = vld [vmem:[#allocation2 + $0x18] sm:$0xff]  }
 0x177   : > { %9593 = vmatprep.mubr.msk.bf16.mxu0 %vm2994_vm8, %v5494_v42  ;;  %v3480_v42 = vrot.slane %v10904_v52, 1  ;;  %v5559_v52 = vshrl.u32 %v11197_v47, 16 }
 0x178   : > { %v5546_v62 = vrot.slane %v5544_v11, 3  ;;  %v5539_v57 = vsel %vm5405_vm12, %v5529_v55, %v5538_v54  ;;  %v3488_v11 = vrot.slane %v11034_v6, 1 }
 0x179   : > { %v3483_v56 = vsel %vm3452_vm11, %v3480_v42, %v3482_v3  ;;  %v5561_v38 = vrot.slane %v5559_v52, 2  ;;  %v5854_v3 = vrot.slane %v11039_v36, 3  ;;  %v5856_v36 = vrot.slane %v11054_v44, 3 }
 0x17a   : > { %9404 = vmatmul.mubr.msk.bf16.gmra.mrb[16].mxu1 %vm2994_vm8, %v3473_v12  ;;  %v3481_v12 = vsel %vm3452_vm11, %v3478_v20, %v3480_v42  ;;  %v5547_v59 = vor.u32 %v5546_v62, %v5543_v4  ;;  %v5568_v20 = vshrl.u32 %v11328_v18, 16  ;;  %v3893_v42 = vrot.slane %v10077_v15, 1 }
 0x17b   : > { %9407 = vmatprep.mubr.msk.bf16.mxu1 %vm2994_vm8, %v3475_v16  ;;  %v5552_v16 = vrot.slane %v5550_v30, 2  ;;  %v3489_v4 = vsel %vm3452_vm11, %v3486_v9, %v3488_v11  ;;  %v5858_v52 = vrot.slane %v11059_v10, 3  ;;  %v3901_v44 = vrot.slane %v10081_v39, 1  ;;  %v10082_v9 = vld [vmem:[#allocation2 + $0x38] sm:$0xff]   ;;  %v10085_v11 = vld [vmem:[#allocation2 + $0x50] sm:$0xff]   ;;  %v10087_v39 = vld [vmem:[#allocation2 + $0x60] sm:$0xff]  }
 0x17c   : > { %v5548_v1 = vsel %vm5405_vm12, %v5538_v54, %v5547_v59  ;;  %v5570_v27 = vrot.slane %v5568_v20, 2  ;;  %v3894_v6 = vsel %vm3452_vm11, %v3892_v53, %v3893_v42  ;;  %v3895_v54 = vrot.slane %v10078_v25, 1 }
 0x17d   : > { %v5860_v10 = vrot.slane %v11079_v7, 3  ;;  %v5864_v7 = vrot.slane %v11108_v23, 3  ;;  %v5868_v23 = vrot.slane %v11126_v21, 3  ;;  %v5872_v21 = vrot.slane %v11144_v45, 3 }
 0x17e   : > { %9594 = vmatmul.mubr.msk.bf16.gmra.mrb[16].mxu0 %vm2994_vm8, %v5503_v46  ;;  %v5555_v46 = vrot.slane %v5553_v28, 3  ;;  %v10079_v28 = vld [vmem:[#allocation2 + $0x20] sm:$0xff]   ;;  %v5876_v45 = vrot.slane %v11162_v61, 3  ;;  %v5880_v61 = vrot.slane %v11178_v0, 3  ;;  %v4305_v0 = vshrl.u32 %v10087_v39, 16 }
 0x17f   : > { %9597 = vmatprep.mubr.msk.bf16.mxu0 %vm2994_vm8, %v5512_v29  ;;  %v5564_v29 = vrot.slane %v5562_v35, 3 }
 0x180   : > { %v5556_v19 = vor.u32 %v5555_v46, %v5552_v16  ;;  %v5859_v46 = vsel %vm5852_vm13, %v5856_v36, %v5858_v52 }
 0x181   : > { %v5565_v22 = vor.u32 %v5564_v29, %v5561_v38  ;;  %v5862_v38 = vrot.slane %v11088_v32, 3 }
 0x182   : > { %9408 = vmatmul.mubr.msk.bf16.gmra.mrb[20].mxu1 %vm2994_vm8, %v3477_v2  ;;  %v5846_v2 = vld [vmem:[#allocation2 + $0x10] sm:$0x8]  ;;  %v5557_v55 = vsel %vm5405_vm12, %v5547_v59, %v5556_v19  ;;  %v3896_v59 = vsel %vm3452_vm11, %v3893_v42, %v3895_v54  ;;  %v10086_v42 = vld [vmem:[#allocation2 + $0x58] sm:$0xff]  }
 0x183   : > { %9411 = vmatprep.mubr.msk.bf16.mxu1 %vm2994_vm8, %v3479_v37  ;;  %v5566_v37 = vsel %vm5405_vm12, %v5556_v19, %v5565_v22  ;;  %v3903_v19 = vrot.slane %v10082_v9, 1  ;;  %v5863_v20 = vsel %vm5852_vm13, %v5860_v10, %v5862_v38 }
 0x185   : > { %v3904_v32 = vsel %vm3452_vm11, %v3901_v44, %v3903_v19 }
 0x186   : > { %9598 = vmatmul.mubr.msk.bf16.gmra.mrb[20].mxu0 %vm2994_vm8, %v5521_v60  ;;  %v9034_v60 = vcombine.low %v5846_v2, %v11028_v17  ;;  %v5865_v2 = vsel %vm5852_vm13, %v5862_v38, %v5864_v7  ;;  %v5886_v38 = vrot.slane %v11197_v47, 3 }
 0x187   : > { %9601 = vmatprep.mubr.msk.bf16.mxu0 %vm2994_vm8, %v5530_v34  ;;  %v5574_v34 = vor.u32 %v5573_v5, %v5570_v27 }
 0x188   : > { %v5853_v62 = vrot.slane %v9034_v60, 3  ;;  %v5870_v60 = vrot.slane %v11133_v33, 3 }
 0x189   : > { %v5575_v17 = vsel %vm5405_vm12, %v5565_v22, %v5574_v34  ;;  %v5866_v22 = vrot.slane %v11115_v58, 3  ;;  %v3911_v34 = vrot.slane %v10086_v42, 1 }
 0x18a   : > { %9412 = vmatmul.mubr.msk.bf16.gmra.mrb[24].mxu1 %vm2994_vm8, %v3481_v12  ;;  %v5855_v30 = vsel %vm5852_vm13, %v5853_v62, %v5854_v3  ;;  %v3897_v12 = vrot.slane %v10079_v28, 1  ;;  %v3913_v62 = vrot.slane %v10951_v48, 1  ;;  %v3915_v48 = vrot.slane %v10966_v40, 1 }
 0x18b   : > { %9415 = vmatprep.mubr.msk.bf16.mxu1 %vm2994_vm8, %v3483_v56  ;;  %v5857_v56 = vsel %vm5852_vm13, %v5854_v3, %v5856_v36  ;;  %v5867_v5 = vsel %vm5852_vm13, %v5864_v7, %v5866_v22  ;;  %v5869_v15 = vsel %vm5852_vm13, %v5866_v22, %v5868_v23  ;;  %v5874_v3 = vrot.slane %v11151_v14, 3  ;;  %v10089_v22 = vld [vmem:[#allocation2 + $0x70] sm:$0xff]  }
 0x18c   : > { %v3898_v35 = vsel %vm3452_vm11, %v3895_v54, %v3897_v12  ;;  %v3917_v54 = vrot.slane %v10968_v24, 1  ;;  %v3916_v14 = vsel %vm3452_vm11, %v3913_v62, %v3915_v48  ;;  %v3919_v24 = vrot.slane %v11000_v51, 1 }
 0x18d   : > { %v5875_v25 = vsel %vm5852_vm13, %v5872_v21, %v5874_v3  ;;  %v5877_v40 = vsel %vm5852_vm13, %v5874_v3, %v5876_v45  ;;  %v3921_v36 = vrot.slane %v11004_v43, 1  ;;  %v4326_v47 = vshll.u32 %v10089_v22, 16 }
 0x18e   : > { %9602 = vmatmul.mubr.msk.bf16.gmra.mrb[24].mxu0 %vm2994_vm8, %v5539_v57  ;;  %v10080_v57 = vld [vmem:[#allocation2 + $0x28] sm:$0xff]   ;;  %v3918_v28 = vsel %vm3452_vm11, %v3915_v48, %v3917_v54  ;;  %v4350_v48 = vshrl.u32 %v11019_v49, 16 }
 0x18f   : > { %9605 = vmatprep.mubr.msk.bf16.mxu0 %vm2994_vm8, %v5548_v1  ;;  %v3899_v16 = vrot.slane %v10080_v57, 1 }
 0x191   : > { %v3900_v1 = vsel %vm3452_vm11, %v3897_v12, %v3899_v16  ;;  %v3902_v29 = vsel %vm3452_vm11, %v3899_v16, %v3901_v44  ;;  %v12676_v16 = vld [vmem:[#allocation6_spill] sm:$0xff]  ;;  %v4308_v44 = vshll.u32 %v10087_v39, 16  ;;  %v10119_v39 = vmov 1983009808  }
 0x192   : > { %9416 = vmatmul.mubr.msk.bf16.gmra.mrb[28].mxu1 %vm2994_vm8, %v3485_v63  ;;  %v3905_v63 = vrot.slane %v10083_v26, 1  ;;  %v10088_v26 = vld [vmem:[#allocation2 + $0x68] sm:$0xff]  }
 0x193   : > { %9419 = vmatprep.mubr.msk.bf16.mxu1 %vm2994_vm8, %v3487_v8  ;;  %v4310_v9 = vrot.slane %v4308_v44, 2  ;;  %v4317_v7 = vshll.u32 %v10088_v26, 16 }
 0x194   : > { %v3906_v8 = vsel %vm3452_vm11, %v3903_v19, %v3905_v63 }
 0x196   : > { %9606 = vmatmul.mubr.msk.bf16.gmra.mrb[28].mxu0 %vm2994_vm8, %v5557_v55  ;;  %v10084_v55 = vld [vmem:[#allocation2 + $0x48] sm:$0xff]  }
 0x197   : > { %9609 = vmatprep.mubr.msk.bf16.mxu0 %vm2994_vm8, %v5566_v37  ;;  %v3907_v27 = vrot.slane %v10084_v55, 1  ;;  %v3909_v37 = vrot.slane %v10085_v11, 1  ;;  %v12677_v11 = vld [vmem:[#allocation4_spill] sm:$0xff] }
 0x199   : > { %v3908_v58 = vsel %vm3452_vm11, %v3905_v63, %v3907_v27  ;;  %v3910_v53 = vsel %vm3452_vm11, %v3907_v27, %v3909_v37  ;;  %v3912_v33 = vsel %vm3452_vm11, %v3909_v37, %v3911_v34  ;;  %v4314_v63 = vshrl.u32 %v10088_v26, 16 }
 0x19a   : > { %9420 = vmatmul.mubr.msk.bf16.gmra.mrb[32].mxu1 %vm2994_vm8, %v3489_v4  ;;  %v5871_v4 = vsel %vm5852_vm13, %v5868_v23, %v5870_v60 }
 0x19b   : > { %9425 = vmatprep.mubr.msk.bf16.mxu1 %vm2994_vm8, %v3894_v6  ;;  %v3914_v6 = vsel %vm3452_vm11, %v3911_v34, %v3913_v62  ;;  %v4316_v27 = vrot.slane %v4314_v63, 1  ;;  %v4341_v34 = vshrl.u32 %v11004_v43, 16 }
 0x19e   : > { %9610 = vmatmul.mubr.msk.bf16.gmra.mrb[32].mxu0 %vm2994_vm8, %v5575_v17  ;;  %v5873_v17 = vsel %vm5852_vm13, %v5870_v60, %v5872_v21 }
 0x19f   : > { %9615 = vmatprep.mubr.msk.bf16.mxu0 %vm2994_vm8, %v5855_v30  ;;  %v5878_v30 = vrot.slane %v11169_v41, 3  ;;  %v3920_v41 = vsel %vm3452_vm11, %v3917_v54, %v3919_v24  ;;  %v4359_v54 = vshrl.u32 %v12676_v16, 16 }
 0x1a1   : > { %v5879_v12 = vsel %vm5852_vm13, %v5876_v45, %v5878_v30  ;;  %v4362_v45 = vshll.u32 %v12676_v16, 16 }
 0x1a2   : > { %9426 = vmatmul.mubr.msk.bf16.vlgmr.msra.gmra.mrb[0].mxu1 %vm2994_vm8, %v3896_v59  ;;  %v5882_v59 = vrot.slane %v11183_v50, 3  ;;  %v5884_v50 = vrot.slane %v11192_v31, 3 }
 0x1a3   : > { %9429 = vmatprep.mubr.msk.bf16.mxu1 %vm2994_vm8, %v3898_v35  ;;  %9652 = vmatpush3.bf16.msra.mxu1 %v10209_v13  ;;  %v5861_v13 = vsel %vm5852_vm13, %v5858_v52, %v5860_v10  ;;  %v3922_v52 = vsel %vm3452_vm11, %v3919_v24, %v3921_v36  ;;  %v5881_v35 = vsel %vm5852_vm13, %v5878_v30, %v5880_v61  ;;  %v4352_v30 = vrot.slane %v4350_v48, 1  ;;  %v7091_v48 = vld [vmem:[%s11484_s18 + $0x40] sm:$0xff] }
 0x1a4   : > { %v5883_v57 = vsel %vm5852_vm13, %v5880_v61, %v5882_v59  ;;  %v5885_v19 = vsel %vm5852_vm13, %v5882_v59, %v5884_v50  ;;  %v5887_v31 = vsel %vm5852_vm13, %v5884_v50, %v5886_v38  ;;  %v4361_v24 = vrot.slane %v4359_v54, 1  ;;  %v12679_v50 = vld [vmem:[#allocation3_spill] sm:$0xff] }
 0x1a6   : > { %9616 = vmatmul.mubr.msk.bf16.vlgmr.msra.gmra.mrb[0].mxu0 %vm2994_vm8, %v5857_v56  ;;  %v3923_v56 = vrot.slane %v11019_v49, 1 }
 0x1a7   : > { %9619 = vmatprep.mubr.msk.bf16.mxu0 %vm2994_vm8, %v5859_v46  ;;  %v3925_v46 = vrot.slane %v12676_v16, 1 }
 0x1a8   : > { %v3924_v10 = vsel %vm3452_vm11, %v3921_v36, %v3923_v56 }
 0x1aa   : > { %9430 = vmatmul.mubr.msk.bf16.gmra.mrb[4].mxu1 %vm2994_vm8, %v3900_v1  ;;  %v10038_v1 = vld [vmem:[#allocation2 + $0x98] ss:$0 sps:$4 sm:$0x11]  }
 0x1ab   : > { %9433 = vmatprep.mubr.msk.bf16.mxu1 %vm2994_vm8, %v3902_v29  ;;  %v3926_v29 = vsel %vm3452_vm11, %v3923_v56, %v3925_v46 }
 0x1ae   : > { %9620 = vmatmul.mubr.msk.bf16.gmra.mrb[4].mxu0 %vm2994_vm8, %v5861_v13  ;;  %v4307_v13 = vrot.slane %v4305_v0, 1  ;;  %v6198_v0 = vunpack.c.l.s4 %v10119_v39 }
 0x1af   : > { %9623 = vmatprep.mubr.msk.bf16.mxu0 %vm2994_vm8, %v5863_v20  ;;  %v3927_v20 = vrot.slane %v10038_v1, 1  ;;  %v9053_v1 = vld [vmem:[%s12609_s4] ss:$0 sm:$0xff] }
 0x1b0   : > { %v6199_v44 = vunpack.c.0.s8 %v6198_v0 }
 0x1b1   : > { %v3928_v55 = vsel %vm3452_vm11, %v3925_v46, %v3927_v20 }
 0x1b2   : > { %9434 = vmatmul.mubr.msk.bf16.gmra.mrb[8].mxu1 %vm2994_vm8, %v3904_v32  ;;  %v4311_v32 = vor.u32 %v4310_v9, %v4307_v13  ;;  %v6934_v13 = vcombine.high %v9053_v1, %v9053_v1  ;;  %v7084_v9 = vld [vmem:[%s11484_s18 + $0x8] sm:$0xff] }
 0x1b3   : > { %9437 = vmatprep.mubr.msk.bf16.mxu1 %vm2994_vm8, %v3906_v8  ;;  %v4323_v8 = vshrl.u32 %v10089_v22, 16 }
 0x1b4   : > { %v4312_v37 = vsel %vm4205_vm9, %v12677_v11, %v4311_v32 }
 0x1b5   : > { %v4325_v23 = vrot.slane %v4323_v8, 1 }
 0x1b6   : > { %9624 = vmatmul.mubr.msk.bf16.gmra.mrb[8].mxu0 %vm2994_vm8, %v5865_v2  ;;  %v5888_v2 = vrot.slane %v11328_v18, 3  ;;  %v4335_v18 = vshll.u32 %v11000_v51, 16 }
 0x1b7   : > { %9627 = vmatprep.mubr.msk.bf16.mxu0 %vm2994_vm8, %v5867_v5  ;;  %v4319_v5 = vrot.slane %v4317_v7, 2  ;;  %v7086_v7 = vld [vmem:[%s11484_s18 + $0x18] sm:$0xff] }
 0x1b8   : > { %v5889_v60 = vsel %vm5852_vm13, %v5886_v38, %v5888_v2  ;;  %v7083_v38 = vld [vmem:[%s11484_s18] sm:$0xff] }
 0x1b9   : > { %v7147_v20 = vcombine.high %v7083_v38, %v7083_v38  ;;  %v7087_v2 = vld [vmem:[%s11484_s18 + $0x20] sm:$0xff] }
 0x1ba   : > { %9438 = vmatmul.mubr.msk.bf16.gmra.mrb[12].mxu1 %vm2994_vm8, %v3908_v58  ;;  %v4328_v58 = vrot.slane %v4326_v47, 2  ;;  %v7089_v47 = vld [vmem:[%s11484_s18 + $0x30] sm:$0xff] }
 0x1bb   : > { %9441 = vmatprep.mubr.msk.bf16.mxu1 %vm2994_vm8, %v3910_v53  ;;  %v4320_v53 = vor.u32 %v4319_v5, %v4316_v27 }
 0x1bc   : > { %v4329_v42 = vor.u32 %v4328_v58, %v4325_v23  ;;  %v7198_v58 = vcombine.high %v7086_v7, %v7086_v7 }
 0x1bd   : > { %v4321_v62 = vsel %vm4205_vm9, %v4311_v32, %v4320_v53  ;;  %v7088_v32 = vld [vmem:[%s11484_s18 + $0x28] sm:$0xff] }
 0x1be   : > { %9628 = vmatmul.mubr.msk.bf16.gmra.mrb[12].mxu0 %vm2994_vm8, %v5869_v15  ;;  %v4332_v15 = vshrl.u32 %v11000_v51, 16  ;;  %v4330_v3 = vsel %vm4205_vm9, %v4320_v53, %v4329_v42  ;;  %v7232_v23 = vcombine.high %v7088_v32, %v7088_v32  ;;  %v7090_v53 = vld [vmem:[%s11484_s18 + $0x38] sm:$0xff] }
 0x1bf   : > { %9631 = vmatprep.mubr.msk.bf16.mxu0 %vm2994_vm8, %v5871_v4  ;;  %v4344_v4 = vshll.u32 %v11004_v43, 16 }
 0x1c0   : > { %v4334_v21 = vrot.slane %v4332_v15, 1 }
 0x1c2   : > { %9442 = vmatmul.mubr.msk.bf16.gmra.mrb[16].mxu1 %vm2994_vm8, %v3912_v33  ;;  %v4337_v33 = vrot.slane %v4335_v18, 2 }
 0x1c3   : > { %9445 = vmatprep.mubr.msk.bf16.mxu1 %vm2994_vm8, %v3914_v6  ;;  %v4343_v6 = vrot.slane %v4341_v34, 1  ;;  %v7215_v34 = vcombine.high %v7087_v2, %v7087_v2 }
 0x1c4   : > { %v4338_v51 = vor.u32 %v4337_v33, %v4334_v21 }
 0x1c6   : > { %9632 = vmatmul.mubr.msk.bf16.gmra.mrb[16].mxu0 %vm2994_vm8, %v5873_v17  ;;  %v4346_v17 = vrot.slane %v4344_v4, 2 }
 0x1c7   : > { %9635 = vmatprep.mubr.msk.bf16.mxu0 %vm2994_vm8, %v5875_v25  ;;  %v4353_v25 = vshll.u32 %v11019_v49, 16  ;;  %v12678_v49 = vld [vmem:[#allocation5_spill] sm:$0xff] }
 0x1c8   : > { %v4347_v43 = vor.u32 %v4346_v17, %v4343_v6  ;;  %v4368_v61 = vshrl.u32 %v12678_v49, 16 }
 0x1ca   : > { %9446 = vmatmul.mubr.msk.bf16.gmra.mrb[20].mxu1 %vm2994_vm8, %v3916_v14  ;;  %v4339_v14 = vsel %vm4205_vm9, %v4329_v42, %v4338_v51  ;;  %v7249_v42 = vcombine.high %v7089_v47, %v7089_v47 }
 0x1cb   : > { %9449 = vmatprep.mubr.msk.bf16.mxu1 %vm2994_vm8, %v3918_v28  ;;  %v4355_v28 = vrot.slane %v4353_v25, 2 }
 0x1cd   : > { %v4356_v36 = vor.u32 %v4355_v28, %v4352_v30 }
 0x1ce   : > { %9636 = vmatmul.mubr.msk.bf16.gmra.mrb[20].mxu0 %vm2994_vm8, %v5877_v40  ;;  %v4348_v40 = vsel %vm4205_vm9, %v4338_v51, %v4347_v43  ;;  %v7266_v51 = vcombine.high %v7090_v53, %v7090_v53 }
 0x1cf   : > { %9639 = vmatprep.mubr.msk.bf16.mxu0 %vm2994_vm8, %v5879_v12  ;;  %v4364_v12 = vrot.slane %v4362_v45, 2 }
 0x1d1   : > { %v4365_v59 = vor.u32 %v4364_v12, %v4361_v24  ;;  %v7093_v24 = vld [vmem:[%s11484_s18 + $0x50] sm:$0xff] }
 0x1d2   : > { %9450 = vmatmul.mubr.msk.bf16.gmra.mrb[24].mxu1 %vm2994_vm8, %v3920_v41  ;;  %v4371_v41 = vshll.u32 %v12678_v49, 16 }
 0x1d3   : > { %9453 = vmatprep.mubr.msk.bf16.mxu1 %vm2994_vm8, %v3922_v52  ;;  %v4357_v52 = vsel %vm4205_vm9, %v4347_v43, %v4356_v36 }
 0x1d4   : > { %v4373_v56 = vrot.slane %v4371_v41, 2  ;;  %v7095_v41 = vld [vmem:[%s11484_s18 + $0x60] sm:$0xff] }
 0x1d6   : > { %9640 = vmatmul.mubr.msk.bf16.gmra.mrb[24].mxu0 %vm2994_vm8, %v5881_v35  ;;  %v4370_v35 = vrot.slane %v4368_v61, 1  ;;  %v7283_v61 = vcombine.high %v7091_v48, %v7091_v48 }
 0x1d7   : > { %9643 = vmatprep.mubr.msk.bf16.mxu0 %vm2994_vm8, %v5883_v57  ;;  %v4366_v57 = vsel %vm4205_vm9, %v4356_v36, %v4365_v59  ;;  %v7107_v36 = vld [vmem:[%s11484_s18 + $0xc0] sm:$0xff] }
 0x1d8   : > { %v4374_v16 = vor.u32 %v4373_v56, %v4370_v35  ;;  %v7317_v56 = vcombine.high %v7093_v24, %v7093_v24 }
 0x1da   : > { %9454 = vmatmul.mubr.msk.bf16.gmra.mrb[28].mxu1 %vm2994_vm8, %v3924_v10  ;;  %v4375_v46 = vsel %vm4205_vm9, %v4365_v59, %v4374_v16  ;;  %v11487_v10 = vsub.s32 %v6199_v44, %v12679_v50  ;;  %v7094_v16 = vld [vmem:[%s11484_s18 + $0x58] sm:$0xff] }
 0x1db   : > { %9457 = vmatprep.mubr.msk.bf16.mxu1 %vm2994_vm8, %v3926_v29  ;;  %v7085_v29 = vld [vmem:[%s11484_s18 + $0x10] sm:$0xff] }
 0x1dc   : > { %v7181_v26 = vcombine.high %v7085_v29, %v7085_v29  ;;  %v11499_v63 = vrot.slane %v7085_v29, %v11487_v10  ;;  %v11504_v22 = vrot.slane %v6934_v13, %v11487_v10  ;;  %v11507_v8 = vrot.slane %v7083_v38, %v11487_v10  ;;  %v7097_v13 = vld [vmem:[%s11484_s18 + $0x70] sm:$0xff] }
 0x1dd   : > { %v11516_v27 = vrot.slane %v7147_v20, %v11487_v10  ;;  %v11519_v5 = vrot.slane %v7086_v7, %v11487_v10  ;;  %v11529_v15 = vrot.slane %v7084_v9, %v11487_v10  ;;  %v11541_v21 = vrot.slane %v7089_v47, %v11487_v10  ;;  %v7106_v47 = vld [vmem:[%s11484_s18 + $0xb8] sm:$0xff] }
 0x1de   : > { %9644 = vmatmul.mubr.msk.bf16.gmra.mrb[28].mxu0 %vm2994_vm8, %v5885_v19  ;;  %v11496_v19 = vrot.slane %v9053_v1, %v11487_v10  ;;  %v11536_v4 = vcombine.high %v11504_v22, %v11504_v22  ;;  %v11544_v33 = vrot.slane %v7087_v2, %v11487_v10  ;;  %v11554_v43 = vrot.slane %v7232_v23, %v11487_v10 }
 0x1df   : > { %9647 = vmatprep.mubr.msk.bf16.mxu0 %vm2994_vm8, %v5887_v31  ;;  %v7164_v31 = vcombine.high %v7084_v9, %v7084_v9  ;;  %v11557_v54 = vrot.slane %v7198_v58, %v11487_v10  ;;  %v11560_v45 = vrot.slane %v7088_v32, %v11487_v10  ;;  %v11567_v28 = vrot.slane %v7249_v42, %v11487_v10  ;;  %v7099_v9 = vld [vmem:[%s11484_s18 + $0x80] sm:$0xff]  ;;  %v7100_v32 = vld [vmem:[%s11484_s18 + $0x88] sm:$0xff] }
 0x1e0   : > { %v11588_v35 = vrot.slane %v7266_v51, %v11487_v10  ;;  %v11599_v44 = vrot.slane %v7093_v24, %v11487_v10  ;;  %v11606_v38 = vrot.slane %v7091_v48, %v11487_v10  ;;  %v7351_v29 = vcombine.high %v7095_v41, %v7095_v41 }
 0x1e1   : > { %v11532_v18 = vrot.slane %v7164_v31, %v11487_v10  ;;  %v7334_v31 = vcombine.high %v7094_v16, %v7094_v16  ;;  %v11623_v58 = vrot.slane %v7317_v56, %v11487_v10  ;;  %v7419_v42 = vcombine.high %v7099_v9, %v7099_v9 }
 0x1e2   : > { %9458 = vmatmul.mubr.msk.bf16.gmra.mrb[32].mxu1 %vm2994_vm8, %v3928_v55  ;;  %v11513_v55 = vcombine.high %v11496_v19, %v11496_v19  ;;  %v11634_v48 = vrot.slane %v7351_v29, %v11487_v10  ;;  %v11637_v24 = vrot.slane %v7094_v16, %v11487_v10  ;;  %v11648_v51 = vrot.slane %v7095_v41, %v11487_v10 }
 0x1e3   : > { %9483 = vmatprep.mubr.msk.bf16.mxu1 %vm2994_vm8, %v4312_v37  ;;  %v11524_v37 = vrot.slane %v7181_v26, %v11487_v10  ;;  %v11613_v26 = vrot.slane %v7283_v61, %v11487_v10  ;;  %v7436_v61 = vcombine.high %v7100_v32, %v7100_v32  ;;  %v11653_v16 = vrot.slane %v7097_v13, %v11487_v10 }
 0x1e4   : > { %12680 = vst [vmem:[#allocation6_spill] sm:$0xff] %v11648_v51  ;;  %v11656_v23 = vrot.slane %v7099_v9, %v11487_v10  ;;  %v11662_v2 = vrot.slane %v7419_v42, %v11487_v10  ;;  %v11668_v29 = vrot.slane %v7100_v32, %v11487_v10  ;;  %v7105_v32 = vld [vmem:[%s11484_s18 + $0xb0] sm:$0xff]  ;;  %v7538_v30 = vcombine.high %v7106_v47, %v7106_v47 }
 0x1e5   : > { %v7555_v9 = vcombine.high %v7107_v36, %v7107_v36  ;;  %v7521_v25 = vcombine.high %v7105_v32, %v7105_v32  ;;  %v11734_v11 = vrot.slane %v7106_v47, %v11487_v10 }
 0x1e6   : > { %9648 = vmatmul.mubr.msk.bf16.gmra.mrb[32].mxu0 %vm2994_vm8, %v5889_v60  ;;  %v7092_v60 = vld [vmem:[%s11484_s18 + $0x48] sm:$0xff]  ;;  %12681 = vst [vmem:[#allocation4_spill] sm:$0xff] %v11656_v23  ;;  %12682 = vst [vmem:[#allocation5_spill] sm:$0xff] %v11662_v2 }
 0x1e7   : > { %v7300_v17 = vcombine.high %v7092_v60, %v7092_v60  ;;  %v11578_v49 = vrot.slane %v7092_v60, %v11487_v10  ;;  %v11645_v60 = vrot.slane %v7334_v31, %v11487_v10  ;;  %12684 = vst [vmem:[#allocation7_spill] sm:$0xff] %v11668_v29  ;;  %v11676_v31 = vrot.slane %v7436_v61, %v11487_v10  ;;  %v7104_v61 = vld [vmem:[%s11484_s18 + $0xa8] sm:$0xff] }
 0x1e8   : > { %12695 = vst [vmem:[#allocation18_spill] sm:$0xff] %v11734_v11  ;;  %v11790_v11 = vld [vmem:[%s11484_s18 + $0xc8] sm:$0xff] }
 0x1e9   : > { %v11582_v59 = vrot.slane %v7300_v17, %v11487_v10  ;;  %v7098_v17 = vld [vmem:[%s11484_s18 + $0x78] sm:$0xff]  ;;  %12685 = vst [vmem:[#allocation8_spill] sm:$0xff] %v11676_v31  ;;  %12704 = vst [vmem:[#allocation27_spill] sm:$0xff] %v11790_v11 }
 0x1ea   : > { %9484 = vmatmul.mubr.msk.bf16.vlgmr.msra.gmra.mrb[20].mxu1 %vm2994_vm8, %v4321_v62  ;;  %v7402_v56 = vcombine.high %v7098_v17, %v7098_v17  ;;  %v11679_v42 = vrot.slane %v7098_v17, %v11487_v10  ;;  %v11725_v62 = vrot.slane %v7104_v61, %v11487_v10 }
 0x1eb   : > { %9487 = vmatprep.mubr.msk.bf16.mxu1 %vm2994_vm8, %v4330_v3 }
 0x1ec   : > { %12686 = vst [vmem:[#allocation9_spill] sm:$0xff] %v11679_v42  ;;  %v11694_v1 = vrot.slane %v7402_v56, %v11487_v10  ;;  %12692 = vst [vmem:[#allocation15_spill] sm:$0xff] %v11725_v62 }
 0x1ee   : > { %12687 = vst [vmem:[#allocation10_spill] sm:$0xff] %v11694_v1 }
 0x1f2   : > { %9488 = vmatmul.mubr.msk.bf16.gmra.mrb[24].mxu1 %vm2994_vm8, %v4339_v14  ;;  %v7504_v14 = vcombine.high %v7104_v61, %v7104_v61  ;;  %v11753_v61 = vrot.slane %v7555_v9, %v11487_v10 }
 0x1f3   : > { %9491 = vmatprep.mubr.msk.bf16.mxu1 %vm2994_vm8, %v4348_v40  ;;  %v11570_v40 = vrot.slane %v7215_v34, %v11487_v10  ;;  %v7385_v34 = vcombine.high %v7097_v13, %v7097_v13  ;;  %v7103_v13 = vld [vmem:[%s11484_s18 + $0xa0] sm:$0xff] }
 0x1f4   : > { %v7487_v50 = vcombine.high %v7103_v13, %v7103_v13  ;;  %v11714_v20 = vrot.slane %v7103_v13, %v11487_v10  ;;  %v11740_v12 = vrot.slane %v7504_v14, %v11487_v10  ;;  %12700 = vst [vmem:[#allocation23_spill] sm:$0xff] %v11753_v61  ;;  %v7110_v14 = vld [vmem:[%s11484_s18 + $0xd8] sm:$0xff] }
 0x1f5   : > { %v11665_v41 = vrot.slane %v7385_v34, %v11487_v10  ;;  %v7101_v34 = vld [vmem:[%s11484_s18 + $0x90] sm:$0xff] }
 0x1f6   : > { %v7453_v39 = vcombine.high %v7101_v34, %v7101_v34  ;;  %12689 = vst [vmem:[#allocation12_spill] sm:$0xff] %v11714_v20  ;;  %v11719_v3 = vrot.slane %v7101_v34, %v11487_v10  ;;  %v11722_v17 = vrot.slane %v7487_v50, %v11487_v10  ;;  %v11737_v34 = vrot.slane %v7538_v30, %v11487_v10 }
 0x1f7   : > { %12683 = vst [vmem:[#allocation3_spill] sm:$0xff] %v11665_v41  ;;  %12697 = vst [vmem:[#allocation20_spill] sm:$0xff] %v11740_v12  ;;  %v11746_v50 = vrot.slane %v7107_v36, %v11487_v10  ;;  %v11756_v30 = vrot.slane %v7521_v25, %v11487_v10  ;;  %v11801_v36 = vrot.slane %v11790_v11, %v11487_v10 }
 0x1f8   : > { %12690 = vst [vmem:[#allocation13_spill] sm:$0xff] %v11719_v3  ;;  %12691 = vst [vmem:[#allocation14_spill] sm:$0xff] %v11722_v17  ;;  %v7606_v3 = vcombine.high %v7110_v14, %v7110_v14 }
 0x1f9   : > { %12696 = vst [vmem:[#allocation19_spill] sm:$0xff] %v11737_v34  ;;  %12699 = vst [vmem:[#allocation22_spill] sm:$0xff] %v11746_v50 }
 0x1fa   : > { %9492 = vmatmul.mubr.msk.bf16.gmra.mrb[28].mxu1 %vm2994_vm8, %v4357_v52  ;;  %v11585_v52 = vrot.slane %v7090_v53, %v11487_v10  ;;  %12701 = vst [vmem:[#allocation24_spill] sm:$0xff] %v11756_v30  ;;  %12705 = vst [vmem:[#allocation28_spill] sm:$0xff] %v11801_v36 }
 0x1fb   : > { %9495 = vmatprep.mubr.msk.bf16.mxu1 %vm2994_vm8, %v4366_v57  ;;  %v7096_v57 = vld [vmem:[%s11484_s18 + $0x68] sm:$0xff] }
 0x1fc   : > { %v7368_v7 = vcombine.high %v7096_v57, %v7096_v57  ;;  %v11628_v53 = vrot.slane %v7096_v57, %v11487_v10 }
 0x1fe   : > { %v11642_v57 = vrot.slane %v7368_v7, %v11487_v10  ;;  %v7102_v7 = vld [vmem:[%s11484_s18 + $0x98] sm:$0xff] }
 0x1ff   : > { %v7470_v0 = vcombine.high %v7102_v7, %v7102_v7  ;;  %v11731_v13 = vrot.slane %v7102_v7, %v11487_v10  ;;  %v11767_v7 = vrot.slane %v7110_v14, %v11487_v10 }
 0x201   : > { %v11711_v6 = vrot.slane %v7470_v0, %v11487_v10  ;;  %v11728_v0 = vrot.slane %v7453_v39, %v11487_v10  ;;  %12694 = vst [vmem:[#allocation17_spill] sm:$0xff] %v11731_v13  ;;  %12703 = vst [vmem:[#allocation26_spill] sm:$0xff] %v11767_v7 }
 0x202   : > { %9496 = vmatmul.mubr.msk.bf16.gmra.mrb[32].mxu1 %vm2994_vm8, %v4375_v46  ;;  %v7109_v46 = vld [vmem:[%s11484_s18 + $0xd0] sm:$0xff] }
 0x203   : > { %12688 = vst [vmem:[#allocation11_spill] sm:$0xff] %v11711_v6  ;;  %v7589_v56 = vcombine.high %v7109_v46, %v7109_v46  ;;  %12693 = vst [vmem:[#allocation16_spill] sm:$0xff] %v11728_v0  ;;  %v11743_v46 = vrot.slane %v7105_v32, %v11487_v10  ;;  %v11805_v6 = vrot.slane %v7606_v3, %v11487_v10 }
 0x205   : > { %12698 = vst [vmem:[#allocation21_spill] sm:$0xff] %v11743_v46  ;;  %v11764_v31 = vrot.slane %v7589_v56, %v11487_v10  ;;  %12706 = vst [vmem:[#allocation29_spill] sm:$0xff] %v11805_v6 }
 0x207   : > { %12702 = vst [vmem:[#allocation25_spill] sm:$0xff] %v11764_v31 }
 0x275   : > { %v9427_v39 = vpop.f32.mrb[0].mxu1 }
 0x276   : > { %v4020_v1 = vpop.f32.mrb[1].mxu1 }
 0x277   : > { %v9428_v9 = vpop.f32.mrb[2].mxu1 }
 0x278   : > { %v4023_v17 = vpop.f32.mrb[3].mxu1 }
 0x279   : > { %v9617_v56 = vpop.f32.mrb[0].mxu0 }
 0x27a   : > { %v9653_v0 = vadd.f32 %v9617_v56, %v9427_v39  ;;  %v5981_v62 = vpop.f32.mrb[1].mxu0 }
 0x27b   : > { %v9654_v34 = vadd.f32 %v5981_v62, %v4020_v1  ;;  %v9618_v13 = vpop.f32.mrb[2].mxu0 }
 0x27c   : > { %v6230_v56 = vcombine.high %v9653_v0, %v9653_v0  ;;  %v6237_v47 = vrot.slane %v9653_v0, %v11487_v10  ;;  %v9655_v32 = vadd.f32 %v9618_v13, %v9428_v9  ;;  %v5984_v61 = vpop.f32.mrb[3].mxu0 }
 0x27d   : > { %v6196_v62 = vcombine.high %v9654_v34, %v9654_v34  ;;  %v6203_v1 = vrot.slane %v9654_v34, %v11487_v10  ;;  %v9656_v14 = vadd.f32 %v5984_v61, %v4023_v17  ;;  %v9431_v25 = vpop.f32.mrb[4].mxu1 }
 0x27e   : > { %v6244_v31 = vrot.slane %v6230_v56, %v11487_v10  ;;  %v6245_v39 = vcombine.high %v6237_v47, %v6237_v47  ;;  %v6247_v7 = vcombine.high %v9655_v32, %v9655_v32  ;;  %v6254_v0 = vrot.slane %v9655_v32, %v11487_v10  ;;  %v4036_v13 = vpop.f32.mrb[5].mxu1 }
 0x27f   : > { %v6210_v9 = vrot.slane %v6196_v62, %v11487_v10  ;;  %v6211_v30 = vcombine.high %v6203_v1, %v6203_v1  ;;  %v6955_v36 = vadd.f32 %v11496_v19, %v6203_v1  ;;  %v6213_v50 = vcombine.high %v9656_v14, %v9656_v14  ;;  %v11811_v46 = vpop.f32.mrb[6].mxu1 }
 0x280   : > { %v6246_v17 = vcombine.high %v6244_v31, %v6244_v31  ;;  %v6963_v3 = vadd.f32 %v11496_v19, %v6245_v39  ;;  %v6964_v34 = vadd.f32 %v11513_v55, %v6244_v31  ;;  %v6261_v61 = vrot.slane %v6247_v7, %v11487_v10  ;;  %v11816_v47 = vpop.f32.mrb[7].mxu1 }
 0x281   : > { %v6212_v56 = vcombine.high %v6210_v9, %v6210_v9  ;;  %v6956_v32 = vadd.f32 %v11513_v55, %v6211_v30  ;;  %v6957_v62 = vadd.f32 %v11504_v22, %v6210_v9  ;;  %v7819_v6 = vadd.f32 %v11507_v8, %v6955_v36  ;;  %v9621_v1 = vpop.f32.mrb[4].mxu0 }
 0x282   : > { %v6965_v12 = vadd.f32 %v11504_v22, %v6246_v17  ;;  %v7827_v20 = vadd.f32 %v11499_v63, %v6963_v3  ;;  %v12707_v39 = vcombine.high %v11499_v63, %v11499_v63  ;;  %v6262_v11 = vcombine.high %v6254_v0, %v6254_v0  ;;  %v5997_v7 = vpop.f32.mrb[5].mxu0 }
 0x283   : > { %v6958_v29 = vadd.f32 %v11536_v4, %v6212_v56  ;;  %v12708_v30 = vcombine.high %v11507_v8, %v11507_v8  ;;  %v7821_v9 = vadd.f32 %v11516_v27, %v6957_v62  ;;  %v6263_v36 = vcombine.high %v6261_v61, %v6261_v61  ;;  %v11831_v41 = vpop.f32.mrb[6].mxu0 }
 0x284   : > { %v7828_v31 = vadd.f32 %v12707_v39, %v6964_v34  ;;  %v6966_v3 = vadd.f32 %v11536_v4, %v6254_v0  ;;  %v6967_v2 = vadd.f32 %v11496_v19, %v6262_v11  ;;  %v6968_v63 = vadd.f32 %v11513_v55, %v6261_v61  ;;  %v11836_v34 = vpop.f32.mrb[7].mxu0 }
 0x285   : > { %v7820_v42 = vadd.f32 %v12708_v30, %v6956_v32  ;;  %v12709_v56 = vcombine.high %v11516_v27, %v11516_v27  ;;  %v6969_v32 = vadd.f32 %v11504_v22, %v6263_v36  ;;  %v7829_v62 = vadd.f32 %v11524_v37, %v6965_v12  ;;  %v11843_v30 = vpop.f32.mrb[8].mxu1 }
 0x286   : > { %v8109_v17 = vcombine.low %v7827_v20, %v7828_v31  ;;  %v12710_v11 = vcombine.high %v11524_v37, %v11524_v37  ;;  %v7831_v61 = vadd.f32 %v11519_v5, %v6967_v2  ;;  %v12711_v31 = vcombine.high %v11519_v5, %v11519_v5 }
 0x287   : > { %v7822_v39 = vadd.f32 %v12709_v56, %v6958_v29  ;;  %v8075_v8 = vcombine.low %v7819_v6, %v7820_v42  ;;  %v11853_v29 = vpop.f32.mrb[9].mxu1  ;;  %v6220_v42 = vrot.slane %v9656_v14, %v11487_v10  ;;  %v6227_v36 = vrot.slane %v6213_v50, %v11487_v10 }
 0x288   : > { %v8117_v20 = vrot.slane %v8109_v17, %v11487_v10  ;;  %v7830_v0 = vadd.f32 %v12710_v11, %v6966_v3  ;;  %v7832_v27 = vadd.f32 %v12711_v31, %v6968_v63  ;;  %v11858_v17 = vpop.f32.mrb[10].mxu1  ;;  %v9657_v56 = vadd.f32 %v9621_v1, %v9431_v25 }
 0x289   : > { %v8076_v6 = vcombine.low %v7821_v9, %v7822_v39  ;;  %v8083_v12 = vrot.slane %v8075_v8, %v11487_v10  ;;  %v9658_v2 = vadd.f32 %v5997_v7, %v4036_v13  ;;  %v11860_v11 = vpop.f32.mrb[11].mxu1  ;;  %v6228_v63 = vcombine.high %v6220_v42, %v6220_v42  ;;  %v11864_v39 = vpop.f32.mrb[8].mxu0 }
 0x28a   : > { %v8110_v37 = vcombine.low %v7829_v62, %v7830_v0  ;;  %v8126_v3 = vcombine.low %v7831_v61, %v7832_v27  ;;  %v6229_v31 = vcombine.high %v6227_v36, %v6227_v36  ;;  %v6959_v9 = vadd.f32 %v11496_v19, %v6220_v42  ;;  %v11878_v1 = vpop.f32.mrb[9].mxu0 }
 0x28b   : > { %v8090_v5 = vrot.slane %v8076_v6, %v11487_v10  ;;  %v6961_v14 = vadd.f32 %v11504_v22, %v6227_v36  ;;  %v6297_v13 = vcombine.high %v9657_v56, %v9657_v56  ;;  %v6960_v8 = vadd.f32 %v11513_v55, %v6228_v63  ;;  %v11883_v61 = vpop.f32.mrb[10].mxu0 }
 0x28c   : > { %v8124_v50 = vrot.slane %v8110_v37, %v11487_v10  ;;  %v11875_v25 = vrot.slane %v8126_v3, %v11487_v10  ;;  %v6962_v62 = vadd.f32 %v11536_v4, %v6229_v31  ;;  %v7823_v0 = vadd.f32 %v11529_v15, %v6959_v9  ;;  %v11888_v37 = vpop.f32.mrb[11].mxu0 }
 0x28d   : > { %v8091_v7 = vcombine.low %v8083_v12, %v8090_v5  ;;  %v7825_v6 = vadd.f32 %v11532_v18, %v6961_v14  ;;  %v6304_v42 = vrot.slane %v9657_v56, %v11487_v10  ;;  %v6311_v36 = vrot.slane %v6297_v13, %v11487_v10  ;;  %v11899_v9 = vpop.f32.mrb[12].mxu1 }
 0x28e   : > { %v8125_v27 = vcombine.low %v8117_v20, %v8124_v50  ;;  %v12712_v12 = vcombine.high %v11529_v15, %v11529_v15  ;;  %v12713_v5 = vcombine.high %v11532_v18, %v11532_v18  ;;  %v6264_v31 = vcombine.high %v9658_v2, %v9658_v2 }
 0x28f   : > { %8651 = vst.msk [vmem:[%s11871_s27] sm:$0xff] %vm2994_vm8, %v8091_v7  ;;  %v6271_v20 = vrot.slane %v9658_v2, %v11487_v10  ;;  %v6312_v56 = vcombine.high %v6304_v42, %v6304_v42  ;;  %v6313_v50 = vcombine.high %v6311_v36, %v6311_v36  ;;  %v6977_v14 = vadd.f32 %v11504_v22, %v6304_v42  ;;  %v11905_v7 = vpop.f32.mrb[13].mxu1 }
 0x290   : > { %v7824_v3 = vadd.f32 %v12712_v12, %v6960_v8  ;;  %v7826_v63 = vadd.f32 %v12713_v5, %v6962_v62  ;;  %8653 = vst.msk [vmem:[%s11871_s27 + $0x10] sm:$0xff] %vm2994_vm8, %v8125_v27  ;;  %v7833_v13 = vadd.f32 %v11557_v54, %v6969_v32  ;;  %v6278_v18 = vrot.slane %v6264_v31, %v11487_v10  ;;  %v11909_v12 = vpop.f32.mrb[14].mxu1 }
 0x291   : > { %v6970_v62 = vadd.f32 %v11536_v4, %v6271_v20  ;;  %v6978_v2 = vadd.f32 %v11536_v4, %v6312_v56  ;;  %v6979_v27 = vadd.f32 %v11496_v19, %v6313_v50  ;;  %v7841_v36 = vadd.f32 %v11554_v43, %v6977_v14  ;;  %v11916_v32 = vpop.f32.mrb[15].mxu1 }
 0x292   : > { %v8092_v15 = vcombine.low %v7823_v0, %v7824_v3  ;;  %v8093_v8 = vcombine.low %v7825_v6, %v7826_v63  ;;  %v9659_v42 = vadd.f32 %v11831_v41, %v11811_v46  ;;  %v6279_v3 = vcombine.high %v6278_v18, %v6278_v18  ;;  %v11921_v63 = vpop.f32.mrb[12].mxu0 }
 0x293   : > { %v6971_v5 = vadd.f32 %v11496_v19, %v6278_v18  ;;  %v12714_v31 = vcombine.high %v11554_v43, %v11554_v43  ;;  %v7843_v56 = vadd.f32 %v11541_v21, %v6979_v27  ;;  %v12715_v41 = vcombine.high %v11557_v54, %v11557_v54  ;;  %v11930_v14 = vpop.f32.mrb[13].mxu0 }
 0x294   : > { %v8100_v0 = vrot.slane %v8092_v15, %v11487_v10  ;;  %v8107_v6 = vrot.slane %v8093_v8, %v11487_v10  ;;  %v6314_v50 = vcombine.high %v9659_v42, %v9659_v42  ;;  %v6972_v8 = vadd.f32 %v11513_v55, %v6279_v3  ;;  %v11935_v51 = vpop.f32.mrb[14].mxu0 }
 0x295   : > { %v7842_v20 = vadd.f32 %v12714_v31, %v6978_v2  ;;  %v7834_v46 = vadd.f32 %v12715_v41, %v6970_v62  ;;  %v7835_v18 = vadd.f32 %v11544_v33, %v6971_v5  ;;  %v6321_v23 = vrot.slane %v9659_v42, %v11487_v10  ;;  %v11940_v62 = vpop.f32.mrb[15].mxu0 }
 0x296   : > { %v8108_v15 = vcombine.low %v8100_v0, %v8107_v6  ;;  %v6328_v27 = vrot.slane %v6314_v50, %v11487_v10  ;;  %v9660_v54 = vadd.f32 %v11836_v34, %v11816_v47  ;;  %v12716_v0 = vcombine.high %v11544_v33, %v11544_v33 }
 0x297   : > { %v8161_v43 = vcombine.low %v7841_v36, %v7842_v20  ;;  %v8127_v2 = vcombine.low %v7833_v13, %v7834_v46  ;;  %v6329_v3 = vcombine.high %v6321_v23, %v6321_v23  ;;  %v6980_v42 = vadd.f32 %v11513_v55, %v6321_v23  ;;  %v11950_v13 = vpop.f32.mrb[16].mxu1 }
 0x298   : > { %8652 = vst.msk [vmem:[%s11871_s27 + $0x8] sm:$0xff] %vm2994_vm8, %v8108_v15  ;;  %v7836_v6 = vadd.f32 %v12716_v0, %v6972_v8  ;;  %v9661_v36 = vadd.f32 %v11864_v39, %v11843_v30  ;;  %v6330_v34 = vcombine.high %v6328_v27, %v6328_v27  ;;  %v6982_v31 = vadd.f32 %v11536_v4, %v6328_v27  ;;  %v11957_v20 = vpop.f32.mrb[17].mxu1 }
 0x299   : > { %v11953_v5 = vrot.slane %v8161_v43, %v11487_v10  ;;  %v8141_v47 = vrot.slane %v8127_v2, %v11487_v10  ;;  %v6981_v41 = vadd.f32 %v11504_v22, %v6329_v3  ;;  %v12717_v23 = vcombine.high %v11541_v21, %v11541_v21  ;;  %v11963_v46 = vpop.f32.mrb[18].mxu1  ;;  %v11978_v3 = vpop.f32.mrb[16].mxu0 }
 0x29a   : > { %v8143_v33 = vcombine.low %v7835_v18, %v7836_v6  ;;  %v6280_v39 = vcombine.high %v9660_v54, %v9660_v54  ;;  %v6983_v15 = vadd.f32 %v11496_v19, %v6330_v34  ;;  %v12718_v8 = vcombine.high %v11567_v28, %v11567_v28  ;;  %v11971_v18 = vpop.f32.mrb[19].mxu1  ;;  %v11984_v34 = vpop.f32.mrb[17].mxu0 }
 0x29b   : > { %v7844_v30 = vadd.f32 %v12717_v23, %v6980_v42  ;;  %v8142_v50 = vcombine.low %v11875_v25, %v8141_v47  ;;  %v6287_v2 = vrot.slane %v9660_v54, %v11487_v10  ;;  %12719 = vst [vmem:[#allocation30_spill] sm:$0xff] %v11971_v18  ;;  %v7845_v21 = vadd.f32 %v11567_v28, %v6981_v41 }
 0x29c   : > { %v7846_v43 = vadd.f32 %v12718_v8, %v6982_v31  ;;  %v11974_v27 = vrot.slane %v8143_v33, %v11487_v10  ;;  %v6294_v6 = vrot.slane %v6280_v39, %v11487_v10  ;;  %v6364_v47 = vcombine.high %v9661_v36, %v9661_v36 }
 0x29d   : > { %v8177_v0 = vcombine.low %v7843_v56, %v7844_v30  ;;  %8654 = vst.msk [vmem:[%s11871_s27 + $0x18] sm:$0xff] %vm2994_vm8, %v8142_v50  ;;  %v6295_v25 = vcombine.high %v6287_v2, %v6287_v2  ;;  %v6973_v42 = vadd.f32 %v11504_v22, %v6287_v2  ;;  %v6371_v54 = vrot.slane %v9661_v36, %v11487_v10  ;;  %v11988_v56 = vpop.f32.mrb[18].mxu0 }
 0x29e   : > { %v8178_v31 = vcombine.low %v7845_v21, %v7846_v43  ;;  %v6296_v23 = vcombine.high %v6294_v6, %v6294_v6  ;;  %v6975_v28 = vadd.f32 %v11496_v19, %v6294_v6  ;;  %12720 = vst [vmem:[#allocation31_spill] sm:$0xff] %v11988_v56  ;;  %v6378_v39 = vrot.slane %v6364_v47, %v11487_v10  ;;  %v11993_v8 = vpop.f32.mrb[19].mxu0 }
 0x29f   : > { %v8185_v33 = vrot.slane %v8177_v0, %v11487_v10  ;;  %v6974_v41 = vadd.f32 %v11536_v4, %v6295_v25  ;;  %v7837_v30 = vadd.f32 %v11570_v40, %v6973_v42  ;;  %v6379_v50 = vcombine.high %v6371_v54, %v6371_v54  ;;  %12721 = vst [vmem:[#allocation32_spill] sm:$0xff] %v11993_v8 }
 0x2a0   : > { %v8192_v36 = vrot.slane %v8178_v31, %v11487_v10  ;;  %v6976_v43 = vadd.f32 %v11513_v55, %v6296_v23  ;;  %v7839_v2 = vadd.f32 %v11560_v45, %v6975_v28  ;;  %v6991_v21 = vadd.f32 %v11496_v19, %v6371_v54 }
 0x2a1   : > { %v12722_v0 = vcombine.high %v11570_v40, %v11570_v40  ;;  %v6380_v25 = vcombine.high %v6378_v39, %v6378_v39  ;;  %v6992_v42 = vadd.f32 %v11513_v55, %v6379_v50  ;;  %v6993_v47 = vadd.f32 %v11504_v22, %v6378_v39 }
 0x2a2   : > { %v8193_v18 = vcombine.low %v8185_v33, %v8192_v36  ;;  %v12723_v31 = vcombine.high %v11560_v45, %v11560_v45  ;;  %v7855_v23 = vadd.f32 %v11578_v49, %v6991_v21  ;;  %v9662_v28 = vadd.f32 %v11878_v1, %v11853_v29 }
 0x2a3   : > { %v7838_v6 = vadd.f32 %v12722_v0, %v6974_v41  ;;  %v6994_v56 = vadd.f32 %v11536_v4, %v6380_v25  ;;  %v12724_v40 = vcombine.high %v11578_v49, %v11578_v49  ;;  %v7857_v50 = vadd.f32 %v11582_v59, %v6993_v47 }
 0x2a4   : > { %v7840_v8 = vadd.f32 %v12723_v31, %v6976_v43  ;;  %8657 = vst.msk [vmem:[%s11871_s27 + $0x30] sm:$0xff] %vm2994_vm8, %v8193_v18  ;;  %v6331_v39 = vcombine.high %v9662_v28, %v9662_v28  ;;  %v6338_v45 = vrot.slane %v9662_v28, %v11487_v10  ;;  %v7847_v36 = vadd.f32 %v11585_v52, %v6983_v15  ;;  %v12019_v43 = vpop.f32.mrb[20].mxu0 }
 0x2a5   : > { %v8144_v54 = vcombine.low %v7837_v30, %v7838_v6  ;;  %v7856_v41 = vadd.f32 %v12724_v40, %v6992_v42  ;;  %v12725_v1 = vcombine.high %v11582_v59, %v11582_v59  ;;  %v9663_v21 = vadd.f32 %v11883_v61, %v11858_v17  ;;  %v12027_v18 = vpop.f32.mrb[21].mxu0 }
 0x2a6   : > { %v8160_v33 = vcombine.low %v7839_v2, %v7840_v8  ;;  %v6345_v2 = vrot.slane %v6331_v39, %v11487_v10  ;;  %v6346_v15 = vcombine.high %v6338_v45, %v6338_v45  ;;  %v6984_v0 = vadd.f32 %v11513_v55, %v6338_v45  ;;  %v12032_v6 = vpop.f32.mrb[22].mxu0 }
 0x2a7   : > { %v8158_v29 = vrot.slane %v8144_v54, %v11487_v10  ;;  %v7858_v30 = vadd.f32 %v12725_v1, %v6994_v56  ;;  %v8228_v49 = vcombine.low %v7855_v23, %v7856_v41  ;;  %v6381_v42 = vcombine.high %v9663_v21, %v9663_v21  ;;  %v12036_v17 = vpop.f32.mrb[23].mxu0 }
 0x2a8   : > { %v8168_v8 = vrot.slane %v8160_v33, %v11487_v10  ;;  %v6985_v47 = vadd.f32 %v11504_v22, %v6346_v15  ;;  %v6986_v31 = vadd.f32 %v11536_v4, %v6345_v2  ;;  %v12726_v23 = vcombine.high %v11585_v52, %v11585_v52 }
 0x2a9   : > { %v8159_v59 = vcombine.low %v11974_v27, %v8158_v29  ;;  %v8229_v56 = vcombine.low %v7857_v50, %v7858_v30  ;;  %v8236_v25 = vrot.slane %v8228_v49, %v11487_v10  ;;  %v6388_v54 = vrot.slane %v9663_v21, %v11487_v10 }
 0x2aa   : > { %v8176_v61 = vcombine.low %v8168_v8, %v11953_v5  ;;  %v7848_v28 = vadd.f32 %v12726_v23, %v6984_v0  ;;  %v6395_v40 = vrot.slane %v6381_v42, %v11487_v10  ;;  %v9664_v5 = vadd.f32 %v11888_v37, %v11860_v11  ;;  %v12062_v8 = vpop.f32.mrb[24].mxu0 }
 0x2ab   : > { %8655 = vst.msk [vmem:[%s11871_s27 + $0x20] sm:$0xff] %vm2994_vm8, %v8159_v59  ;;  %v8243_v27 = vrot.slane %v8229_v56, %v11487_v10  ;;  %v7849_v41 = vadd.f32 %v11588_v35, %v6985_v47  ;;  %v12727_v52 = vcombine.high %v11588_v35, %v11588_v35  ;;  %v9665_v39 = vadd.f32 %v11921_v63, %v11899_v9  ;;  %v12071_v15 = vpop.f32.mrb[25].mxu0 }
 0x2ac   : > { %8656 = vst.msk [vmem:[%s11871_s27 + $0x28] sm:$0xff] %vm2994_vm8, %v8176_v61  ;;  %v8194_v33 = vcombine.low %v7847_v36, %v7848_v28  ;;  %v6396_v29 = vcombine.high %v6388_v54, %v6388_v54  ;;  %v6397_v1 = vcombine.high %v6395_v40, %v6395_v40  ;;  %v6996_v30 = vadd.f32 %v11513_v55, %v6395_v40  ;;  %v12076_v42 = vpop.f32.mrb[26].mxu0 }
 0x2ad   : > { %v7850_v50 = vadd.f32 %v12727_v52, %v6986_v31  ;;  %v8244_v45 = vcombine.low %v8236_v25, %v8243_v27  ;;  %v6347_v37 = vcombine.high %v9664_v5, %v9664_v5  ;;  %v6354_v21 = vrot.slane %v9664_v5, %v11487_v10  ;;  %v12083_v28 = vpop.f32.mrb[27].mxu0 }
 0x2ae   : > { %v8202_v11 = vrot.slane %v8194_v33, %v11487_v10  ;;  %v6995_v35 = vadd.f32 %v11496_v19, %v6396_v29  ;;  %v6997_v36 = vadd.f32 %v11504_v22, %v6397_v1  ;;  %v12728_v9 = vcombine.high %v11599_v44, %v11599_v44 }
 0x2af   : > { %v8195_v49 = vcombine.low %v7849_v41, %v7850_v50  ;;  %8660 = vst.msk [vmem:[%s11871_s27 + $0x48] sm:$0xff] %vm2994_vm8, %v8244_v45  ;;  %v6431_v2 = vcombine.high %v9665_v39, %v9665_v39  ;;  %v6361_v59 = vrot.slane %v6347_v37, %v11487_v10  ;;  %v6362_v56 = vcombine.high %v6354_v21, %v6354_v21 }
 0x2b0   : > { %v7860_v63 = vadd.f32 %v12728_v9, %v6996_v30  ;;  %v6987_v25 = vadd.f32 %v11496_v19, %v6354_v21  ;;  %v7859_v61 = vadd.f32 %v11599_v44, %v6995_v35  ;;  %v6438_v47 = vrot.slane %v9665_v39, %v11487_v10 }
 0x2b1   : > { %v8209_v0 = vrot.slane %v8195_v49, %v11487_v10  ;;  %v6445_v31 = vrot.slane %v6431_v2, %v11487_v10  ;;  %v9666_v23 = vadd.f32 %v11930_v14, %v11905_v7  ;;  %v6363_v54 = vcombine.high %v6361_v59, %v6361_v59  ;;  %v12106_v9 = vpop.f32.mrb[28].mxu0 }
 0x2b2   : > { %v6988_v40 = vadd.f32 %v11513_v55, %v6362_v56  ;;  %v6989_v5 = vadd.f32 %v11504_v22, %v6361_v59  ;;  %v8245_v41 = vcombine.low %v7859_v61, %v7860_v63  ;;  %v7851_v52 = vadd.f32 %v11606_v38, %v6987_v25 }
 0x2b3   : > { %v8210_v27 = vcombine.low %v8202_v11, %v8209_v0  ;;  %v6446_v50 = vcombine.high %v6438_v47, %v6438_v47  ;;  %v6447_v44 = vcombine.high %v6445_v31, %v6445_v31  ;;  %v6990_v33 = vadd.f32 %v11536_v4, %v6363_v54 }
 0x2b4   : > { %v12729_v7 = vcombine.high %v11606_v38, %v11606_v38  ;;  %v7853_v39 = vadd.f32 %v11613_v26, %v6989_v5  ;;  %v7005_v45 = vadd.f32 %v11504_v22, %v6438_v47  ;;  %v12097_v29 = vrot.slane %v8245_v41, %v11487_v10 }
 0x2b5   : > { %8658 = vst.msk [vmem:[%s11871_s27 + $0x38] sm:$0xff] %vm2994_vm8, %v8210_v27  ;;  %v7006_v1 = vadd.f32 %v11536_v4, %v6446_v50  ;;  %v7007_v30 = vadd.f32 %v11496_v19, %v6445_v31  ;;  %v7008_v49 = vadd.f32 %v11513_v55, %v6447_v44  ;;  %v12730_v11 = vcombine.high %v11613_v26, %v11613_v26  ;;  %v12116_v26 = vpop.f32.mrb[29].mxu0 }
 0x2b6   : > { %v7852_v14 = vadd.f32 %v12729_v7, %v6988_v40  ;;  %v7869_v38 = vadd.f32 %v11634_v48, %v7005_v45  ;;  %v6398_v35 = vcombine.high %v9666_v23, %v9666_v23  ;;  %v12731_v63 = vcombine.high %v11634_v48, %v11634_v48  ;;  %v12121_v54 = vpop.f32.mrb[30].mxu0 }
 0x2b7   : > { %v7854_v37 = vadd.f32 %v12730_v11, %v6990_v33  ;;  %v7871_v0 = vadd.f32 %v11628_v53, %v7007_v30  ;;  %v12732_v59 = vcombine.high %v11628_v53, %v11628_v53  ;;  %v6405_v25 = vrot.slane %v9666_v23, %v11487_v10  ;;  %v12124_v53 = vpop.f32.mrb[31].mxu0 }
 0x2b8   : > { %v8211_v21 = vcombine.low %v7851_v52, %v7852_v14  ;;  %v7870_v2 = vadd.f32 %v12731_v63, %v7006_v1  ;;  %v6412_v31 = vrot.slane %v6398_v35, %v11487_v10  ;;  %v7861_v27 = vadd.f32 %v11623_v58, %v6997_v36 }
 0x2b9   : > { %v7872_v56 = vadd.f32 %v12732_v59, %v7008_v49  ;;  %v8212_v61 = vcombine.low %v7853_v39, %v7854_v37  ;;  %v6413_v5 = vcombine.high %v6405_v25, %v6405_v25  ;;  %v6998_v41 = vadd.f32 %v11536_v4, %v6405_v25 }
 0x2ba   : > { %v8219_v47 = vrot.slane %v8211_v21, %v11487_v10  ;;  %v8280_v48 = vcombine.low %v7869_v38, %v7870_v2  ;;  %v6414_v52 = vcombine.high %v6412_v31, %v6412_v31  ;;  %v7000_v50 = vadd.f32 %v11513_v55, %v6412_v31  ;;  %v12156_v2 = vpop.f32.mrb[32].mxu0 }
 0x2bb   : > { %v8296_v40 = vcombine.low %v7871_v0, %v7872_v56  ;;  %v8226_v23 = vrot.slane %v8212_v61, %v11487_v10  ;;  %v9667_v44 = vadd.f32 %v11935_v51, %v11909_v12  ;;  %v6999_v7 = vadd.f32 %v11496_v19, %v6413_v5 }
 0x2bc   : > { %v12131_v36 = vrot.slane %v8280_v48, %v11487_v10  ;;  %v12733_v14 = vcombine.high %v11623_v58, %v11623_v58  ;;  %v7001_v1 = vadd.f32 %v11504_v22, %v6414_v52  ;;  %v12734_v30 = vcombine.high %v11637_v24, %v11637_v24 }
 0x2bd   : > { %v12134_v33 = vrot.slane %v8296_v40, %v11487_v10  ;;  %v8227_v45 = vcombine.low %v8219_v47, %v8226_v23  ;;  %v6448_v51 = vcombine.high %v9667_v44, %v9667_v44  ;;  %v7863_v12 = vadd.f32 %v11637_v24, %v6999_v7  ;;  %v12180_v52 = vpop.f32.mrb[20].mxu1 }
 0x2be   : > { %v7862_v39 = vadd.f32 %v12733_v14, %v6998_v41  ;;  %v7864_v49 = vadd.f32 %v12734_v30, %v7000_v50  ;;  %v6455_v37 = vrot.slane %v9667_v44, %v11487_v10  ;;  %v9668_v21 = vadd.f32 %v11940_v62, %v11916_v32  ;;  %v12160_v62 = vpop.f32.mrb[33].mxu0 }
 0x2bf   : > { %8659 = vst.msk [vmem:[%s11871_s27 + $0x40] sm:$0xff] %vm2994_vm8, %v8227_v45  ;;  %v6462_v58 = vrot.slane %v6448_v51, %v11487_v10  ;;  %v7865_v38 = vadd.f32 %v11645_v60, %v7001_v1  ;;  %v9669_v35 = vadd.f32 %v11978_v3, %v11950_v13  ;;  %v9670_v63 = vadd.f32 %v11984_v34, %v11957_v20  ;;  %v12163_v13 = vpop.f32.mrb[34].mxu0 }
 0x2c0   : > { %v8246_v11 = vcombine.low %v7861_v27, %v7862_v39  ;;  %v8262_v0 = vcombine.low %v7863_v12, %v7864_v49  ;;  %v6463_v59 = vcombine.high %v6455_v37, %v6455_v37  ;;  %v7009_v32 = vadd.f32 %v11504_v22, %v6455_v37  ;;  %v12169_v27 = vpop.f32.mrb[35].mxu0  ;;  %v12189_v49 = vpop.f32.mrb[21].mxu1 }
 0x2c1   : > { %v6464_v56 = vcombine.high %v6462_v58, %v6462_v58  ;;  %v6415_v25 = vcombine.high %v9668_v21, %v9668_v21  ;;  %v6422_v61 = vrot.slane %v9668_v21, %v11487_v10  ;;  %v6498_v47 = vcombine.high %v9669_v35, %v9669_v35  ;;  %v12191_v51 = vpop.f32.mrb[22].mxu1  ;;  %v12737_v58 = vld [vmem:[#allocation6_spill] sm:$0xff] }
 0x2c2   : > { %v8260_v24 = vrot.slane %v8246_v11, %v11487_v10  ;;  %v8270_v3 = vrot.slane %v8262_v0, %v11487_v10  ;;  %v7010_v34 = vadd.f32 %v11536_v4, %v6463_v59  ;;  %v7873_v31 = vadd.f32 %v11642_v57, %v7009_v32 }
 0x2c3   : > { %v7011_v48 = vadd.f32 %v11496_v19, %v6464_v56  ;;  %v6429_v40 = vrot.slane %v6415_v25, %v11487_v10  ;;  %v7002_v5 = vadd.f32 %v11536_v4, %v6422_v61  ;;  %v6505_v41 = vrot.slane %v9669_v35, %v11487_v10  ;;  %v12738_v56 = vld [vmem:[#allocation4_spill] sm:$0xff] }
 0x2c4   : > { %v8261_v20 = vcombine.low %v12097_v29, %v8260_v24  ;;  %v12735_v29 = vcombine.high %v11642_v57, %v11642_v57  ;;  %v6512_v50 = vrot.slane %v6498_v47, %v11487_v10  ;;  %v6465_v44 = vcombine.high %v9670_v63, %v9670_v63  ;;  %v12196_v24 = vpop.f32.mrb[23].mxu1 }
 0x2c5   : > { %v6472_v7 = vrot.slane %v9670_v63, %v11487_v10  ;;  %v7875_v14 = vadd.f32 %v11653_v16, %v7011_v48  ;;  %v6430_v39 = vcombine.high %v6429_v40, %v6429_v40  ;;  %v7003_v45 = vadd.f32 %v11496_v19, %v6429_v40 }
 0x2c6   : > { %8661 = vst.msk [vmem:[%s11871_s27 + $0x50] sm:$0xff] %vm2994_vm8, %v8261_v20  ;;  %v7874_v23 = vadd.f32 %v12735_v29, %v7010_v34  ;;  %v12736_v1 = vcombine.high %v11645_v60, %v11645_v60  ;;  %v6513_v12 = vcombine.high %v6505_v41, %v6505_v41  ;;  %v6514_v11 = vcombine.high %v6512_v50, %v6512_v50 }
 0x2c7   : > { %v7019_v37 = vadd.f32 %v11496_v19, %v6505_v41  ;;  %v7004_v21 = vadd.f32 %v11513_v55, %v6430_v39  ;;  %v7867_v35 = vadd.f32 %v12737_v58, %v7003_v45  ;;  %v7021_v0 = vadd.f32 %v11504_v22, %v6512_v50 }
 0x2c8   : > { %v7866_v30 = vadd.f32 %v12736_v1, %v7002_v5  ;;  %v8297_v57 = vcombine.low %v7873_v31, %v7874_v23  ;;  %v7020_v59 = vadd.f32 %v11513_v55, %v6513_v12  ;;  %v7022_v32 = vadd.f32 %v11536_v4, %v6514_v11  ;;  %v12221_v12 = vpop.f32.mrb[24].mxu1 }
 0x2c9   : > { %v7883_v25 = vadd.f32 %v12738_v56, %v7019_v37  ;;  %v12739_v61 = vcombine.high %v12737_v58, %v12737_v58  ;;  %v6479_v31 = vrot.slane %v6465_v44, %v11487_v10  ;;  %v12741_v40 = vcombine.high %v12738_v56, %v12738_v56 }
 0x2ca   : > { %v8263_v63 = vcombine.low %v7865_v38, %v7866_v30  ;;  %v8311_v60 = vrot.slane %v8297_v57, %v11487_v10  ;;  %v12740_v38 = vld [vmem:[#allocation5_spill] sm:$0xff]  ;;  %v6480_v23 = vcombine.high %v6472_v7, %v6472_v7  ;;  %v7012_v1 = vadd.f32 %v11513_v55, %v6472_v7 }
 0x2cb   : > { %v7868_v47 = vadd.f32 %v12739_v61, %v7004_v21  ;;  %v7885_v34 = vadd.f32 %v12740_v38, %v7021_v0  ;;  %v7884_v5 = vadd.f32 %v12741_v40, %v7020_v59  ;;  %v12742_v41 = vcombine.high %v12740_v38, %v12740_v38  ;;  %v12744_v21 = vld [vmem:[#allocation31_spill] sm:$0xff] }
 0x2cc   : > { %v8277_v20 = vrot.slane %v8263_v63, %v11487_v10  ;;  %v8312_v48 = vcombine.low %v12134_v33, %v8311_v60  ;;  %v6481_v45 = vcombine.high %v6479_v31, %v6479_v31  ;;  %v7013_v33 = vadd.f32 %v11504_v22, %v6480_v23  ;;  %v12745_v60 = vld [vmem:[#allocation3_spill] sm:$0xff] }
 0x2cd   : > { %v7886_v29 = vadd.f32 %v12742_v41, %v7022_v32  ;;  %v8279_v39 = vcombine.low %v7867_v35, %v7868_v47  ;;  %v8347_v44 = vcombine.low %v7883_v25, %v7884_v5  ;;  %v7014_v57 = vadd.f32 %v11536_v4, %v6479_v31  ;;  %v12232_v35 = vpop.f32.mrb[25].mxu1  ;;  %v12747_v31 = vld [vmem:[#allocation30_spill] sm:$0xff]  ;;  %v12749_v5 = vld [vmem:[#allocation9_spill] sm:$0xff] }
 0x2ce   : > { %v8278_v50 = vcombine.low %v8270_v3, %v8277_v20  ;;  %8664 = vst.msk [vmem:[%s11871_s27 + $0x68] sm:$0xff] %vm2994_vm8, %v8312_v48  ;;  %v7015_v3 = vadd.f32 %v11496_v19, %v6481_v45  ;;  %v12743_v37 = vcombine.high %v11653_v16, %v11653_v16  ;;  %v9671_v58 = vadd.f32 %v12744_v21, %v11963_v46  ;;  %v12240_v25 = vpop.f32.mrb[26].mxu1  ;;  %v12748_v48 = vld [vmem:[#allocation32_spill] sm:$0xff] }
 0x2cf   : > { %v8348_v30 = vcombine.low %v7885_v34, %v7886_v29  ;;  %v8287_v11 = vrot.slane %v8279_v39, %v11487_v10  ;;  %v8355_v63 = vrot.slane %v8347_v44, %v11487_v10  ;;  %v7877_v59 = vadd.f32 %v12745_v60, %v7013_v33  ;;  %v12244_v20 = vpop.f32.mrb[27].mxu1 }
 0x2d0   : > { %8662 = vst.msk [vmem:[%s11871_s27 + $0x58] sm:$0xff] %vm2994_vm8, %v8278_v50  ;;  %v7876_v7 = vadd.f32 %v12743_v37, %v7012_v1  ;;  %v12746_v32 = vcombine.high %v12745_v60, %v12745_v60  ;;  %v6515_v46 = vcombine.high %v9671_v58, %v9671_v58  ;;  %v6522_v47 = vrot.slane %v9671_v58, %v11487_v10  ;;  %v12265_v58 = vpop.f32.mrb[28].mxu1 }
 0x2d1   : > { %v8362_v0 = vrot.slane %v8348_v30, %v11487_v10  ;;  %v8295_v16 = vcombine.low %v8287_v11, %v12131_v36  ;;  %v9672_v40 = vadd.f32 %v12748_v48, %v12747_v31  ;;  %v7879_v41 = vadd.f32 %v12749_v5, %v7015_v3 }
 0x2d2   : > { %v7878_v56 = vadd.f32 %v12746_v32, %v7014_v57  ;;  %v8313_v61 = vcombine.low %v7875_v14, %v7876_v7  ;;  %v6529_v23 = vrot.slane %v6515_v46, %v11487_v10  ;;  %v6530_v36 = vcombine.high %v6522_v47, %v6522_v47  ;;  %v12750_v57 = vld [vmem:[#allocation7_spill] sm:$0xff]  ;;  %v12272_v32 = vpop.f32.mrb[29].mxu1 }
 0x2d3   : > { %v8363_v38 = vcombine.low %v8355_v63, %v8362_v0  ;;  %8663 = vst.msk [vmem:[%s11871_s27 + $0x60] sm:$0xff] %vm2994_vm8, %v8295_v16  ;;  %v7023_v14 = vadd.f32 %v11496_v19, %v6522_v47  ;;  %v6482_v39 = vcombine.high %v9672_v40, %v9672_v40  ;;  %v6489_v45 = vrot.slane %v9672_v40, %v11487_v10  ;;  %v12752_v0 = vld [vmem:[#allocation8_spill] sm:$0xff] }
 0x2d4   : > { %v8314_v34 = vcombine.low %v7877_v59, %v7878_v56  ;;  %v8321_v29 = vrot.slane %v8313_v61, %v11487_v10  ;;  %v9673_v1 = vadd.f32 %v12019_v43, %v12180_v52  ;;  %v6531_v44 = vcombine.high %v6529_v23, %v6529_v23 }
 0x2d5   : > { %8667 = vst.msk [vmem:[%s11871_s27 + $0x80] sm:$0xff] %vm2994_vm8, %v8363_v38  ;;  %v7024_v30 = vadd.f32 %v11513_v55, %v6530_v36  ;;  %v7025_v33 = vadd.f32 %v11504_v22, %v6529_v23  ;;  %v7887_v11 = vadd.f32 %v12750_v57, %v7023_v14  ;;  %v6496_v37 = vrot.slane %v6482_v39, %v11487_v10  ;;  %v12282_v38 = vpop.f32.mrb[30].mxu1  ;;  %v12755_v36 = vld [vmem:[#allocation10_spill] sm:$0xff] }
 0x2d6   : > { %v8328_v50 = vrot.slane %v8314_v34, %v11487_v10  ;;  %v6497_v7 = vcombine.high %v6489_v45, %v6489_v45  ;;  %v7016_v21 = vadd.f32 %v11513_v55, %v6489_v45  ;;  %v7026_v63 = vadd.f32 %v11536_v4, %v6531_v44  ;;  %v12290_v23 = vpop.f32.mrb[31].mxu1  ;;  %v12757_v45 = vld [vmem:[#allocation27_spill] sm:$0xff] }
 0x2d7   : > { %v12751_v43 = vcombine.high %v12750_v57, %v12750_v57  ;;  %v7889_v60 = vadd.f32 %v12752_v0, %v7025_v33  ;;  %v6566_v59 = vcombine.high %v9673_v1, %v9673_v1  ;;  %v7018_v16 = vadd.f32 %v11536_v4, %v6496_v37 }
 0x2d8   : > { %v8329_v3 = vcombine.low %v8321_v29, %v8328_v50  ;;  %v7017_v56 = vadd.f32 %v11504_v22, %v6497_v7  ;;  %v12753_v61 = vcombine.high %v12749_v5, %v12749_v5  ;;  %v6573_v47 = vrot.slane %v9673_v1, %v11487_v10 }
 0x2d9   : > { %v7888_v52 = vadd.f32 %v12751_v43, %v7024_v30  ;;  %v12754_v34 = vcombine.high %v12752_v0, %v12752_v0  ;;  %v6580_v40 = vrot.slane %v6566_v59, %v11487_v10  ;;  %v9674_v29 = vadd.f32 %v12027_v18, %v12189_v49 }
 0x2da   : > { %8665 = vst.msk [vmem:[%s11871_s27 + $0x70] sm:$0xff] %vm2994_vm8, %v8329_v3  ;;  %v7880_v46 = vadd.f32 %v12753_v61, %v7016_v21  ;;  %v7881_v14 = vadd.f32 %v12755_v36, %v7017_v56  ;;  %v12756_v5 = vcombine.high %v12755_v36, %v12755_v36  ;;  %v12758_v1 = vcombine.high %v12757_v45, %v12757_v45  ;;  %v12759_v21 = vld [vmem:[#allocation12_spill] sm:$0xff]  ;;  %v12316_v56 = vpop.f32.mrb[32].mxu1 }
 0x2db   : > { %v7890_v31 = vadd.f32 %v12754_v34, %v7026_v63  ;;  %v8364_v48 = vcombine.low %v7887_v11, %v7888_v52  ;;  %v6581_v33 = vcombine.high %v6580_v40, %v6580_v40  ;;  %v7034_v57 = vadd.f32 %v11536_v4, %v6573_v47 }
 0x2dc   : > { %v7882_v50 = vadd.f32 %v12756_v5, %v7018_v16  ;;  %v8330_v39 = vcombine.low %v7879_v41, %v7880_v46  ;;  %v12300_v44 = vrot.slane %v12758_v1, %v11487_v10  ;;  %v7035_v18 = vadd.f32 %v11496_v19, %v6580_v40 }
 0x2dd   : > { %v8365_v30 = vcombine.low %v7889_v60, %v7890_v31  ;;  %v8372_v49 = vrot.slane %v8364_v48, %v11487_v10  ;;  %v6532_v37 = vcombine.high %v9674_v29, %v9674_v29  ;;  %v7036_v7 = vadd.f32 %v11513_v55, %v6581_v33  ;;  %v12323_v31 = vpop.f32.mrb[33].mxu1 }
 0x2de   : > { %v8331_v11 = vcombine.low %v7881_v14, %v7882_v50  ;;  %v8338_v3 = vrot.slane %v8330_v39, %v11487_v10  ;;  %v7899_v63 = vadd.f32 %v12759_v21, %v7035_v18  ;;  %v6539_v43 = vrot.slane %v9674_v29, %v11487_v10  ;;  %v12763_v39 = vld [vmem:[#allocation13_spill] sm:$0xff] }
 0x2df   : > { %v8379_v41 = vrot.slane %v8365_v30, %v11487_v10  ;;  %v6546_v0 = vrot.slane %v6532_v37, %v11487_v10  ;;  %v9675_v60 = vadd.f32 %v12032_v6, %v12191_v51  ;;  %v9676_v59 = vadd.f32 %v12036_v17, %v12196_v24  ;;  %v12326_v17 = vpop.f32.mrb[34].mxu1 }
 0x2e0   : > { %v8345_v52 = vrot.slane %v8331_v11, %v11487_v10  ;;  %v12760_v61 = vcombine.high %v12759_v21, %v12759_v21  ;;  %v6547_v47 = vcombine.high %v6539_v43, %v6539_v43  ;;  %v9677_v34 = vadd.f32 %v12062_v8, %v12221_v12  ;;  %v12332_v5 = vpop.f32.mrb[35].mxu1  ;;  %v12761_v8 = vld [vmem:[#allocation11_spill] sm:$0xff] }
 0x2e1   : > { %v8380_v16 = vcombine.low %v8372_v49, %v8379_v41  ;;  %v6548_v40 = vcombine.high %v6546_v0, %v6546_v0  ;;  %v7028_v6 = vadd.f32 %v11513_v55, %v6546_v0  ;;  %v6582_v51 = vcombine.high %v9675_v60, %v9675_v60 }
 0x2e2   : > { %v7900_v46 = vadd.f32 %v12760_v61, %v7036_v7  ;;  %v8346_v48 = vcombine.low %v8338_v3, %v8345_v52  ;;  %v7027_v29 = vadd.f32 %v11496_v19, %v6547_v47  ;;  %v6589_v36 = vrot.slane %v9675_v60, %v11487_v10  ;;  %v12765_v60 = vld [vmem:[#allocation14_spill] sm:$0xff] }
 0x2e3   : > { %8668 = vst.msk [vmem:[%s11871_s27 + $0x88] sm:$0xff] %vm2994_vm8, %v8380_v16  ;;  %v6549_v14 = vcombine.high %v9676_v59, %v9676_v59  ;;  %v12762_v12 = vcombine.high %v12761_v8, %v12761_v8  ;;  %v12764_v45 = vcombine.high %v12763_v39, %v12763_v39  ;;  %v6596_v30 = vrot.slane %v6582_v51, %v11487_v10  ;;  %v12768_v51 = vld [vmem:[#allocation16_spill] sm:$0xff] }
 0x2e4   : > { %v8415_v24 = vcombine.low %v7899_v63, %v7900_v46  ;;  %8666 = vst.msk [vmem:[%s11871_s27 + $0x78] sm:$0xff] %vm2994_vm8, %v8346_v48  ;;  %v6556_v33 = vrot.slane %v9676_v59, %v11487_v10  ;;  %v7029_v18 = vadd.f32 %v11504_v22, %v6548_v40  ;;  %v7891_v49 = vadd.f32 %v12763_v39, %v7027_v29  ;;  %v12767_v48 = vld [vmem:[#allocation15_spill] sm:$0xff] }
 0x2e5   : > { %v7898_v50 = vadd.f32 %v12762_v12, %v7034_v57  ;;  %v7892_v1 = vadd.f32 %v12764_v45, %v7028_v6  ;;  %v6597_v11 = vcombine.high %v6589_v36, %v6589_v36  ;;  %v7037_v3 = vadd.f32 %v11504_v22, %v6589_v36  ;;  %v12771_v45 = vld [vmem:[#allocation17_spill] sm:$0xff] }
 0x2e6   : > { %v6598_v37 = vcombine.high %v6596_v30, %v6596_v30  ;;  %v7039_v41 = vadd.f32 %v11496_v19, %v6596_v30  ;;  %v6563_v57 = vrot.slane %v6549_v14, %v11487_v10  ;;  %v6564_v7 = vcombine.high %v6556_v33, %v6556_v33 }
 0x2e7   : > { %v8423_v21 = vrot.slane %v8415_v24, %v11487_v10  ;;  %v8381_v63 = vcombine.low %v7891_v49, %v7892_v1  ;;  %v7038_v43 = vadd.f32 %v11536_v4, %v6597_v11  ;;  %v7030_v52 = vadd.f32 %v11536_v4, %v6556_v33 }
 0x2e8   : > { %v7040_v0 = vadd.f32 %v11513_v55, %v6598_v37  ;;  %v7901_v59 = vadd.f32 %v12765_v60, %v7037_v3  ;;  %v6565_v16 = vcombine.high %v6563_v57, %v6563_v57  ;;  %v7031_v61 = vadd.f32 %v11496_v19, %v6564_v7 }
 0x2e9   : > { %v12766_v46 = vcombine.high %v12765_v60, %v12765_v60  ;;  %v7903_v40 = vadd.f32 %v12767_v48, %v7039_v41  ;;  %v7032_v6 = vadd.f32 %v11513_v55, %v6563_v57  ;;  %v7893_v24 = vadd.f32 %v12768_v51, %v7029_v18 }
 0x2ea   : > { %v12769_v29 = vcombine.high %v12767_v48, %v12767_v48  ;;  %v7033_v14 = vadd.f32 %v11504_v22, %v6565_v16  ;;  %v12770_v12 = vcombine.high %v12768_v51, %v12768_v51  ;;  %v7895_v1 = vadd.f32 %v12771_v45, %v7031_v61 }
 0x2eb   : > { %v7902_v47 = vadd.f32 %v12766_v46, %v7038_v43  ;;  %v12772_v33 = vcombine.high %v12771_v45, %v12771_v45  ;;  %v6633_v11 = vcombine.high %v9677_v34, %v9677_v34  ;;  %v6640_v18 = vrot.slane %v9677_v34, %v11487_v10 }
 0x2ec   : > { %v7904_v36 = vadd.f32 %v12769_v29, %v7040_v0  ;;  %v7894_v39 = vadd.f32 %v12770_v12, %v7030_v52  ;;  %v7897_v37 = vadd.f32 %v12761_v8, %v7033_v14  ;;  %v9678_v57 = vadd.f32 %v12071_v15, %v12232_v35 }
 0x2ed   : > { %v8416_v30 = vcombine.low %v7901_v59, %v7902_v47  ;;  %v7896_v49 = vadd.f32 %v12772_v33, %v7032_v6  ;;  %v6647_v52 = vrot.slane %v6633_v11, %v11487_v10  ;;  %v6648_v0 = vcombine.high %v6640_v18, %v6640_v18 }
 0x2ee   : > { %v8432_v3 = vcombine.low %v7903_v40, %v7904_v36  ;;  %v8382_v41 = vcombine.low %v7893_v24, %v7894_v39  ;;  %v8389_v60 = vrot.slane %v8381_v63, %v11487_v10  ;;  %v8399_v8 = vcombine.low %v7897_v37, %v7898_v50  ;;  %v12773_v40 = vld [vmem:[#allocation19_spill] sm:$0xff]  ;;  %v12775_v39 = vld [vmem:[#allocation18_spill] sm:$0xff] }
 0x2ef   : > { %v8430_v7 = vrot.slane %v8416_v30, %v11487_v10  ;;  %v8398_v43 = vcombine.low %v7895_v1, %v7896_v49  ;;  %v7048_v61 = vadd.f32 %v11513_v55, %v6640_v18  ;;  %v7049_v15 = vadd.f32 %v11504_v22, %v6648_v0 }
 0x2f0   : > { %v12380_v59 = vrot.slane %v8432_v3, %v11487_v10  ;;  %v8396_v34 = vrot.slane %v8382_v41, %v11487_v10  ;;  %v7050_v35 = vadd.f32 %v11536_v4, %v6647_v52  ;;  %v8413_v48 = vrot.slane %v8399_v8, %v11487_v10  ;;  %v12779_v8 = vld [vmem:[#allocation21_spill] sm:$0xff] }
 0x2f1   : > { %v8431_v16 = vcombine.low %v8423_v21, %v8430_v7  ;;  %v8406_v47 = vrot.slane %v8398_v43, %v11487_v10  ;;  %v6599_v63 = vcombine.high %v9678_v57, %v9678_v57  ;;  %v7913_v6 = vadd.f32 %v12773_v40, %v7049_v15  ;;  %v12780_v15 = vld [vmem:[#allocation22_spill] sm:$0xff] }
 0x2f2   : > { %v8397_v46 = vcombine.low %v8389_v60, %v8396_v34  ;;  %v12774_v50 = vcombine.high %v12773_v40, %v12773_v40  ;;  %v6606_v51 = vrot.slane %v9678_v57, %v11487_v10  ;;  %v9679_v24 = vadd.f32 %v12076_v42, %v12240_v25 }
 0x2f3   : > { %8671 = vst.msk [vmem:[%s11871_s27 + $0xa0] sm:$0xff] %vm2994_vm8, %v8431_v16  ;;  %v8414_v29 = vcombine.low %v8406_v47, %v8413_v48  ;;  %v6613_v36 = vrot.slane %v6599_v63, %v11487_v10  ;;  %v9680_v14 = vadd.f32 %v12083_v28, %v12244_v20  ;;  %v9681_v12 = vadd.f32 %v12106_v9, %v12265_v58  ;;  %v12777_v9 = vld [vmem:[#allocation20_spill] sm:$0xff]  ;;  %v12781_v63 = vld [vmem:[#allocation23_spill] sm:$0xff] }
 0x2f4   : > { %v7914_v21 = vadd.f32 %v12774_v50, %v7050_v35  ;;  %8669 = vst.msk [vmem:[%s11871_s27 + $0x90] sm:$0xff] %vm2994_vm8, %v8397_v46  ;;  %v12776_v45 = vcombine.high %v12775_v39, %v12775_v39  ;;  %v6614_v30 = vcombine.high %v6606_v51, %v6606_v51  ;;  %v7041_v33 = vadd.f32 %v11504_v22, %v6606_v51 }
 0x2f5   : > { %v6649_v49 = vcombine.high %v9679_v24, %v9679_v24  ;;  %8670 = vst.msk [vmem:[%s11871_s27 + $0x98] sm:$0xff] %vm2994_vm8, %v8414_v29  ;;  %v6615_v42 = vcombine.high %v6613_v36, %v6613_v36  ;;  %v6656_v25 = vrot.slane %v9679_v24, %v11487_v10  ;;  %v6616_v11 = vcombine.high %v9680_v14, %v9680_v14 }
 0x2f6   : > { %v7912_v1 = vadd.f32 %v12776_v45, %v7048_v61  ;;  %v6623_v18 = vrot.slane %v9680_v14, %v11487_v10  ;;  %v8467_v28 = vcombine.low %v7913_v6, %v7914_v21  ;;  %v7042_v20 = vadd.f32 %v11536_v4, %v6614_v30 }
 0x2f7   : > { %v7905_v58 = vadd.f32 %v12777_v9, %v7041_v33  ;;  %v6663_v3 = vrot.slane %v6649_v49, %v11487_v10  ;;  %v7043_v37 = vadd.f32 %v11496_v19, %v6615_v42  ;;  %v6664_v41 = vcombine.high %v6656_v25, %v6656_v25 }
 0x2f8   : > { %v7051_v57 = vadd.f32 %v11496_v19, %v6656_v25  ;;  %v6630_v7 = vrot.slane %v6616_v11, %v11487_v10  ;;  %v12778_v43 = vcombine.high %v12777_v9, %v12777_v9  ;;  %v6631_v34 = vcombine.high %v6623_v18, %v6623_v18  ;;  %v12785_v25 = vld [vmem:[#allocation24_spill] sm:$0xff] }
 0x2f9   : > { %v6665_v0 = vcombine.high %v6663_v3, %v6663_v3  ;;  %v7053_v60 = vadd.f32 %v11504_v22, %v6663_v3  ;;  %v7907_v16 = vadd.f32 %v12779_v8, %v7043_v37  ;;  %v7052_v61 = vadd.f32 %v11513_v55, %v6664_v41 }
 0x2fa   : > { %v7906_v52 = vadd.f32 %v12778_v43, %v7042_v20  ;;  %v7915_v35 = vadd.f32 %v12780_v15, %v7051_v57  ;;  %v6632_v46 = vcombine.high %v6630_v7, %v6630_v7  ;;  %v7044_v6 = vadd.f32 %v11513_v55, %v6623_v18 }
 0x2fb   : > { %v7054_v48 = vadd.f32 %v11536_v4, %v6665_v0  ;;  %v7917_v40 = vadd.f32 %v12781_v63, %v7053_v60  ;;  %v12782_v50 = vcombine.high %v12780_v15, %v12780_v15  ;;  %v7045_v51 = vadd.f32 %v11504_v22, %v6631_v34 }
 0x2fc   : > { %v8433_v47 = vcombine.low %v7905_v58, %v7906_v52  ;;  %v7046_v24 = vadd.f32 %v11536_v4, %v6630_v7  ;;  %v7047_v29 = vadd.f32 %v11496_v19, %v6632_v46  ;;  %v12783_v14 = vcombine.high %v12781_v63, %v12781_v63  ;;  %v12787_v63 = vld [vmem:[#allocation26_spill] sm:$0xff] }
 0x2fd   : > { %v7916_v21 = vadd.f32 %v12782_v50, %v7052_v61  ;;  %v12784_v30 = vcombine.high %v12779_v8, %v12779_v8  ;;  %v6700_v49 = vcombine.high %v9681_v12, %v9681_v12  ;;  %v7909_v11 = vadd.f32 %v12785_v25, %v7045_v51 }
 0x2fe   : > { %v8447_v36 = vrot.slane %v8433_v47, %v11487_v10  ;;  %v7918_v45 = vadd.f32 %v12783_v14, %v7054_v48  ;;  %v12786_v18 = vcombine.high %v12785_v25, %v12785_v25  ;;  %v7911_v9 = vadd.f32 %v12775_v39, %v7047_v29 }
 0x2ff   : > { %v7908_v33 = vadd.f32 %v12784_v30, %v7044_v6  ;;  %v8483_v42 = vcombine.low %v7915_v35, %v7916_v21  ;;  %v6707_v41 = vrot.slane %v9681_v12, %v11487_v10  ;;  %v8481_v57 = vrot.slane %v8467_v28, %v11487_v10  ;;  %v12465_v35 = vld [vmem:[%s11484_s18 + $0xe0] sm:$0xff] }
 0x300   : > { %v7910_v20 = vadd.f32 %v12786_v18, %v7046_v24  ;;  %v8448_v58 = vcombine.low %v12380_v59, %v8447_v36  ;;  %v8484_v3 = vcombine.low %v7917_v40, %v7918_v45  ;;  %v8466_v43 = vcombine.low %v7911_v9, %v7912_v1  ;;  %v12789_v24 = vld [vmem:[#allocation28_spill] sm:$0xff]  ;;  %v12790_v36 = vld [vmem:[#allocation29_spill] sm:$0xff] }
 0x301   : > { %v8449_v37 = vcombine.low %v7907_v16, %v7908_v33  ;;  %v6714_v52 = vrot.slane %v6700_v49, %v11487_v10  ;;  %v8491_v0 = vrot.slane %v8483_v42, %v11487_v10  ;;  %v6715_v39 = vcombine.high %v6707_v41, %v6707_v41 }
 0x302   : > { %v8450_v7 = vcombine.low %v7909_v11, %v7910_v20  ;;  %8672 = vst.msk [vmem:[%s11871_s27 + $0xa8] sm:$0xff] %vm2994_vm8, %v8448_v58  ;;  %v8498_v60 = vrot.slane %v8484_v3, %v11487_v10  ;;  %v8474_v12 = vrot.slane %v8466_v43, %v11487_v10  ;;  %v12459_v16 = vadd.f32 %v11536_v4, %v6707_v41 }
 0x303   : > { %v8457_v59 = vrot.slane %v8449_v37, %v11487_v10  ;;  %v6716_v28 = vcombine.high %v6714_v52, %v6714_v52  ;;  %v7064_v1 = vadd.f32 %v11513_v55, %v6714_v52  ;;  %v7063_v61 = vadd.f32 %v11496_v19, %v6715_v39 }
 0x304   : > { %v8464_v34 = vrot.slane %v8450_v7, %v11487_v10  ;;  %v8499_v8 = vcombine.low %v8491_v0, %v8498_v60  ;;  %v9682_v15 = vadd.f32 %v12116_v26, %v12272_v32  ;;  %v8482_v47 = vcombine.low %v8474_v12, %v8481_v57  ;;  %v10091_v0 = vld.sshfl [vmem:[%s11484_s18 + $0xd0] sm:$0xff pattern:$0x76325410] }
 0x305   : > { %v7065_v48 = vadd.f32 %v11504_v22, %v6716_v28  ;;  %v12788_v40 = vcombine.high %v12787_v63, %v12787_v63  ;;  %v7927_v50 = vadd.f32 %v12787_v63, %v7063_v61  ;;  %v7587_v26 = vcombine.high %v12789_v24, %v12789_v24 }
 0x306   : > { %v8465_v46 = vcombine.low %v8457_v59, %v8464_v34  ;;  %8675 = vst.msk [vmem:[%s11871_s27 + $0xc0] sm:$0xff] %vm2994_vm8, %v8499_v8  ;;  %v6666_v21 = vcombine.high %v9682_v15, %v9682_v15  ;;  %v6673_v51 = vrot.slane %v9682_v15, %v11487_v10  ;;  %8674 = vst.msk [vmem:[%s11871_s27 + $0xb8] sm:$0xff] %vm2994_vm8, %v8482_v47 }
 0x307   : > { %v7928_v6 = vadd.f32 %v12788_v40, %v7064_v1  ;;  %v7588_v32 = vcombine.high %v12300_v44, %v12300_v44  ;;  %v9683_v29 = vadd.f32 %v12121_v54, %v12282_v38  ;;  %v7622_v14 = vcombine.high %v12790_v36, %v12790_v36 }
 0x308   : > { %8673 = vst.msk [vmem:[%s11871_s27 + $0xb0] sm:$0xff] %vm2994_vm8, %v8465_v46  ;;  %v7630_v45 = vrot.slane %v12465_v35, %v11487_v10  ;;  %v6680_v33 = vrot.slane %v6666_v21, %v11487_v10  ;;  %v6681_v49 = vcombine.high %v6673_v51, %v6673_v51  ;;  %v7055_v42 = vadd.f32 %v11496_v19, %v6673_v51 }
 0x309   : > { %v8534_v30 = vcombine.low %v7927_v50, %v7928_v6  ;;  %v6717_v25 = vcombine.high %v9683_v29, %v9683_v29  ;;  %v6724_v11 = vrot.slane %v9683_v29, %v11487_v10  ;;  %v7929_v20 = vadd.f32 %v12790_v36, %v7065_v48 }
 0x30a   : > { %v7638_v18 = vcombine.high %v7630_v45, %v7630_v45  ;;  %v6682_v38 = vcombine.high %v6680_v33, %v6680_v33  ;;  %v7056_v9 = vadd.f32 %v11513_v55, %v6681_v49  ;;  %v7057_v58 = vadd.f32 %v11504_v22, %v6680_v33  ;;  %v12791_v49 = vld [vmem:[#allocation25_spill] sm:$0xff] }
 0x30b   : > { %v8542_v54 = vrot.slane %v8534_v30, %v11487_v10  ;;  %v7919_v3 = vadd.f32 %v12789_v24, %v7055_v42  ;;  %v6731_v37 = vrot.slane %v6717_v25, %v11487_v10  ;;  %v7066_v41 = vadd.f32 %v11536_v4, %v6724_v11 }
 0x30c   : > { %v9684_v57 = vadd.f32 %v12124_v53, %v12290_v23  ;;  %v7058_v7 = vadd.f32 %v11536_v4, %v6682_v38  ;;  %v7920_v43 = vadd.f32 %v7587_v26, %v7056_v9  ;;  %v7921_v52 = vadd.f32 %v12300_v44, %v7057_v58 }
 0x30d   : > { %v6732_v60 = vcombine.high %v6731_v37, %v6731_v37  ;;  %v7067_v59 = vadd.f32 %v11496_v19, %v6731_v37  ;;  %v7930_v39 = vadd.f32 %v7622_v14, %v7066_v41  ;;  %v7604_v8 = vcombine.high %v10091_v0, %v10091_v0 }
 0x30e   : > { %v6683_v34 = vcombine.high %v9684_v57, %v9684_v57  ;;  %v7922_v12 = vadd.f32 %v7588_v32, %v7058_v7  ;;  %v8500_v28 = vcombine.low %v7919_v3, %v7920_v43  ;;  %v6690_v1 = vrot.slane %v9684_v57, %v11487_v10  ;;  %v7113_v32 = vld [vmem:[%s11484_s18 + $0xf0] sm:$0xff] }
 0x30f   : > { %v7068_v61 = vadd.f32 %v11513_v55, %v6732_v60  ;;  %v7931_v53 = vadd.f32 %v7630_v45, %v7067_v59  ;;  %v8535_v23 = vcombine.low %v7929_v20, %v7930_v39  ;;  %v9685_v48 = vadd.f32 %v12156_v2, %v12316_v56  ;;  %v7114_v59 = vld [vmem:[%s11484_s18 + $0xf8] sm:$0xff] }
 0x310   : > { %v6697_v15 = vrot.slane %v6683_v34, %v11487_v10  ;;  %v8501_v46 = vcombine.low %v7921_v52, %v7922_v12  ;;  %v8508_v44 = vrot.slane %v8500_v28, %v11487_v10  ;;  %v6698_v47 = vcombine.high %v6690_v1, %v6690_v1 }
 0x311   : > { %v7932_v63 = vadd.f32 %v7638_v18, %v7068_v61  ;;  %v8549_v40 = vrot.slane %v8535_v23, %v11487_v10  ;;  %v6767_v24 = vcombine.high %v9685_v48, %v9685_v48  ;;  %v6774_v26 = vrot.slane %v9685_v48, %v11487_v10 }
 0x312   : > { %v6699_v6 = vcombine.high %v6697_v15, %v6697_v15  ;;  %v7060_v50 = vadd.f32 %v11513_v55, %v6697_v15  ;;  %v8515_v21 = vrot.slane %v8501_v46, %v11487_v10  ;;  %v7059_v51 = vadd.f32 %v11496_v19, %v6698_v47 }
 0x313   : > { %v8550_v29 = vcombine.low %v8542_v54, %v8549_v40  ;;  %v8551_v36 = vcombine.low %v7931_v53, %v7932_v63  ;;  %v6781_v30 = vrot.slane %v6767_v24, %v11487_v10  ;;  %v6782_v33 = vcombine.high %v6774_v26, %v6774_v26 }
 0x314   : > { %v7061_v2 = vadd.f32 %v11504_v22, %v6699_v6  ;;  %v7924_v56 = vadd.f32 %v7604_v8, %v7060_v50  ;;  %v8516_v14 = vcombine.low %v8508_v44, %v8515_v21  ;;  %v7923_v45 = vadd.f32 %v10091_v0, %v7059_v51 }
 0x315   : > { %v12792_v42 = vcombine.high %v12791_v49, %v12791_v49  ;;  %8678 = vst.msk [vmem:[%s11871_s27 + $0xd8] sm:$0xff] %vm2994_vm8, %v8550_v29  ;;  %v7657_v18 = vcombine.high %v7113_v32, %v7113_v32  ;;  %v6783_v38 = vcombine.high %v6781_v30, %v6781_v30  ;;  %v9686_v9 = vadd.f32 %v12160_v62, %v12323_v31  ;;  %v7112_v31 = vld [vmem:[%s11484_s18 + $0xe8] sm:$0xff] }
 0x316   : > { %v7925_v11 = vadd.f32 %v12791_v49, %v7061_v2  ;;  %8676 = vst.msk [vmem:[%s11871_s27 + $0xc8] sm:$0xff] %vm2994_vm8, %v8516_v14  ;;  %v8517_v20 = vcombine.low %v7923_v45, %v7924_v56  ;;  %v12531_v58 = vrot.slane %v8551_v36, %v11487_v10  ;;  %v7077_v3 = vadd.f32 %v11504_v22, %v6782_v33 }
 0x317   : > { %v7926_v25 = vadd.f32 %v12792_v42, %v12459_v16  ;;  %v12534_v16 = vadd.f32 %v11513_v55, %v6774_v26  ;;  %v7623_v37 = vcombine.high %v12465_v35, %v12465_v35  ;;  %v12542_v7 = vrot.slane %v7113_v32, %v11487_v10 }
 0x318   : > { %v8525_v41 = vrot.slane %v8517_v20, %v11487_v10  ;;  %v7671_v62 = vrot.slane %v7657_v18, %v11487_v10  ;;  %v6733_v43 = vcombine.high %v9686_v9, %v9686_v9  ;;  %v6740_v52 = vrot.slane %v9686_v9, %v11487_v10 }
 0x319   : > { %v8518_v54 = vcombine.low %v7925_v11, %v7926_v25  ;;  %v7637_v0 = vrot.slane %v7623_v37, %v11487_v10  ;;  %v7647_v60 = vrot.slane %v7112_v31, %v11487_v10  ;;  %v7078_v39 = vadd.f32 %v11536_v4, %v6781_v30 }
 0x31a   : > { %v7079_v34 = vadd.f32 %v11496_v19, %v6783_v38  ;;  %v9687_v12 = vadd.f32 %v12163_v13, %v12326_v17  ;;  %v6747_v28 = vrot.slane %v6733_v43, %v11487_v10  ;;  %v6748_v1 = vcombine.high %v6740_v52, %v6740_v52 }
 0x31b   : > { %v8532_v57 = vrot.slane %v8518_v54, %v11487_v10  ;;  %v7069_v8 = vadd.f32 %v11504_v22, %v6740_v52  ;;  %v7639_v61 = vcombine.high %v7637_v0, %v7637_v0  ;;  %v7672_v53 = vcombine.high %v12542_v7, %v12542_v7 }
 0x31c   : > { %v6784_v23 = vcombine.high %v9687_v12, %v9687_v12  ;;  %v6791_v15 = vrot.slane %v9687_v12, %v11487_v10  ;;  %v7674_v46 = vcombine.high %v7114_v59, %v7114_v59  ;;  %v7673_v44 = vcombine.high %v7671_v62, %v7671_v62 }
 0x31d   : > { %v8533_v35 = vcombine.low %v8525_v41, %v8532_v57  ;;  %v6749_v47 = vcombine.high %v6747_v28, %v6747_v28  ;;  %v7070_v48 = vadd.f32 %v11536_v4, %v6748_v1  ;;  %v7655_v13 = vcombine.high %v7647_v60, %v7647_v60 }
 0x31e   : > { %v7071_v17 = vadd.f32 %v11496_v19, %v6747_v28  ;;  %v7933_v63 = vadd.f32 %v7637_v0, %v7069_v8  ;;  %v6798_v40 = vrot.slane %v6784_v23, %v11487_v10  ;;  %v6799_v6 = vcombine.high %v6791_v15, %v6791_v15 }
 0x31f   : > { %8677 = vst.msk [vmem:[%s11871_s27 + $0xd0] sm:$0xff] %vm2994_vm8, %v8533_v35  ;;  %v7072_v50 = vadd.f32 %v11513_v55, %v6749_v47  ;;  %v7934_v21 = vadd.f32 %v7639_v61, %v7070_v48  ;;  %v7080_v51 = vadd.f32 %v11513_v55, %v6791_v15  ;;  %v7681_v24 = vrot.slane %v7114_v59, %v11487_v10 }
 0x320   : > { %v7081_v26 = vadd.f32 %v11504_v22, %v6799_v6  ;;  %v7082_v32 = vadd.f32 %v11536_v4, %v6798_v40  ;;  %v7688_v29 = vrot.slane %v7674_v46, %v11487_v10  ;;  %v9688_v36 = vadd.f32 %v12169_v27, %v12332_v5 }
 0x321   : > { %v7941_v2 = vadd.f32 %v7671_v62, %v7077_v3  ;;  %v8552_v56 = vcombine.low %v7933_v63, %v7934_v21  ;;  %v7689_v14 = vcombine.high %v7681_v24, %v7681_v24  ;;  %v7943_v45 = vadd.f32 %v7681_v24, %v7079_v34 }
 0x322   : > { %v7690_v30 = vcombine.high %v7688_v29, %v7688_v29  ;;  %v7945_v33 = vadd.f32 %v7688_v29, %v7081_v26  ;;  %v6750_v49 = vcombine.high %v9688_v36, %v9688_v36  ;;  %v6757_v55 = vrot.slane %v9688_v36, %v11487_v10 }
 0x323   : > { %v7936_v42 = vadd.f32 %v7655_v13, %v7072_v50  ;;  %v8566_v25 = vrot.slane %v8552_v56, %v11487_v10  ;;  %v7944_v11 = vadd.f32 %v7689_v14, %v7080_v51  ;;  %v7640_v18 = vcombine.high %v7112_v31, %v7112_v31 }
 0x324   : > { %v7935_v20 = vadd.f32 %v7647_v60, %v7071_v17  ;;  %v7946_v54 = vadd.f32 %v7690_v30, %v7082_v32  ;;  %v6764_v38 = vrot.slane %v6750_v49, %v11487_v10  ;;  %v6765_v27 = vcombine.high %v6757_v55, %v6757_v55 }
 0x325   : > { %v8567_v5 = vcombine.low %v12531_v58, %v8566_v25  ;;  %v8602_v9 = vcombine.low %v7943_v45, %v7944_v11  ;;  %v7073_v3 = vadd.f32 %v11504_v22, %v6757_v55  ;;  %v7654_v37 = vrot.slane %v7640_v18, %v11487_v10 }
 0x326   : > { %v7942_v41 = vadd.f32 %v7673_v44, %v7078_v39  ;;  %v8603_v57 = vcombine.low %v7945_v33, %v7946_v54  ;;  %v6766_v62 = vcombine.high %v6764_v38, %v6764_v38  ;;  %v7074_v43 = vadd.f32 %v11536_v4, %v6765_v27 }
 0x327   : > { %v8568_v52 = vcombine.low %v7935_v20, %v7936_v42  ;;  %8679 = vst.msk [vmem:[%s11871_s27 + $0xe0] sm:$0xff] %vm2994_vm8, %v8567_v5  ;;  %v8610_v31 = vrot.slane %v8602_v9, %v11487_v10  ;;  %v7656_v0 = vcombine.high %v7654_v37, %v7654_v37  ;;  %v7937_v22 = vadd.f32 %v7654_v37, %v7073_v3 }
 0x328   : > { %v8617_v60 = vrot.slane %v8603_v57, %v11487_v10  ;;  %v7075_v58 = vadd.f32 %v11496_v19, %v6766_v62  ;;  %v7940_v35 = vadd.f32 %v7672_v53, %v12534_v16  ;;  %v8586_v39 = vcombine.low %v7941_v2, %v7942_v41 }
 0x329   : > { %v7938_v59 = vadd.f32 %v7656_v0, %v7074_v43  ;;  %v8576_v12 = vrot.slane %v8568_v52, %v11487_v10 }
 0x32a   : > { %v8618_v34 = vcombine.low %v8610_v31, %v8617_v60  ;;  %v7939_v4 = vadd.f32 %v12542_v7, %v7075_v58  ;;  %v8600_v19 = vrot.slane %v8586_v39, %v11487_v10 }
 0x32b   : > { %v8569_v28 = vcombine.low %v7937_v22, %v7938_v59 }
 0x32c   : > { %8682 = vst.msk [vmem:[%s11871_s27 + $0xf8] sm:$0xff] %vm2994_vm8, %v8618_v34  ;;  %v8585_v1 = vcombine.low %v7939_v4, %v7940_v35 }
 0x32d   : > { %v8583_v8 = vrot.slane %v8569_v28, %v11487_v10 }
 0x32e   : > { %v8593_v61 = vrot.slane %v8585_v1, %v11487_v10 }
 0x32f   : > { %v8584_v23 = vcombine.low %v8576_v12, %v8583_v8 }
 0x330   : > { %v8601_v15 = vcombine.low %v8593_v61, %v8600_v19 }
 0x331   : > { %8680 = vst.msk [vmem:[%s11871_s27 + $0xe8] sm:$0xff] %vm2994_vm8, %v8584_v23 }
 0x332   : > { %8681 = vst.msk [vmem:[%s11871_s27 + $0xf0] sm:$0xff] %vm2994_vm8, %v8601_v15 }
 0x333 PF: > { %s16_s23 = sadd.s32 1, %s10114_s23   ;;  %s12793_s21 = smov %s10110_s22 }
 0x334   : > { %p13_p5 = scmp.ge.s32.totalorder %s16_s23, 4   ;;  %s12794_s22 = smov %s12796_s24 }
 0x336   :  { %15 = sbr.rel (!%p13_p5) target bundleno = 2 (0x2), region = 95 }

// kernel: _lambda_.4
= control target key start
LH: loop header
LB: loop body
LE: loop exit
PB: predicated region body
PF: predicated region fallthrough
CT: control target
= control target key end

     0   :  { %s10578_s24 = smov 0   ;;  %s10580_s25 = smov 0   ;;  %s14369_s0 = inlined_call_operand.vmem [shape: f32[2,16,16,8], index: 0, kind: input, shape index: {}]   ;;  %s14370_s1 = inlined_call_operand.vmem [shape: f32[1,8], index: 1, kind: input, shape index: {}]   ;;  %s14371_s2 = inlined_call_operand.vmem [shape: f32[1,8], index: 2, kind: input, shape index: {}]   ;;  %s14372_s3 = inlined_call_operand.vmem [shape: bf16[9,8,8], index: 3, kind: input, shape index: {}]   ;;  %s14373_s4 = inlined_call_operand.vmem [shape: f32[1,8], index: 4, kind: input, shape index: {}]   ;;  %s14374_s5 = inlined_call_operand.vmem [shape: bf16[2,16,16,8], index: 5, kind: output, shape index: {0}]   ;;  %s14375_s6 = inlined_call_operand.vmem [shape: f32[2,8,8], index: 6, kind: output, shape index: {1}]   ;;  %s14376_s7 = inlined_call_operand.vmem [shape: f32[2,8,8], index: 7, kind: output, shape index: {2}]  }
   0x1   :  { %s10582_s26 = smov 0  }
   0x2 LB: > { %s30_s27 = sadd.s32 1, %s10528_s25  ;;  %p9270_p0 = scmp.ge.s32.totalorder %s10532_s26, 1  ;;  %s10532_s26 = sphi %s10582_s26, %s18_s26   ;;  %s10528_s25 = sphi %s10580_s25, %s14990_s25   ;;  %s10524_s24 = sphi %s10578_s24, %s14989_s24  }
   0x3   : > { %p32_p1 = scmp.ge.s32.totalorder %s30_s27, 2  ;;  %p277_p2 = scmp.lt.s32.totalorder %s10532_s26, 3 }
   0x5   : > { %s14992_s27 = smov (%p32_p1, %s30_s27), 0  ;;  %p278_p3 = pnand %p9270_p0, %p277_p2 }
   0x7   : > { %281 = sbr.rel (%p278_p3) target bundleno = 985 (0x3d9), region = 40 }
   0xe   : > { %v9279_v0 = vld [vmem:[%s14372_s3 + $0x4] sm:$0xf]  ;;  %vm3050_vm0 = vcmask 1043456   ;;  %v9393_v1 = vld [vmem:[%s14372_s3 + $0x10] sm:$0xf]  ;;  %p333_p4 = scmp.lt.s32.totalorder %s10524_s24, 1  ;;  %v745_v3 = vlaneseq }
   0xf   : > { %10383 = vmatprep.subr.msk.bf16.mxu1 %vm3050_vm0, %v9279_v0  ;;  %v3052_v2 = vsel %vm3050_vm0, %v9279_v0, 0  ;;  %10387 = vmatprep.subr.msk.bf16.mxu0 %vm3050_vm0, %v9393_v1  ;;  %v10610_v4 = vld [vmem:[%s14370_s1] ss:$0 sm:$0xff]  ;;  %v10534_v5 = vmov 1966171168   ;;  %vm1749_vm1 = vcmask 60416  }
  0x10   : > { %9752 = vmatpush3.bf16.msra.mxu1 %v3052_v2  ;;  %s14994_s24 = smov (!%p333_p4, %s10524_s24), 1  ;;  %v743_v6 = vunpack.c.l.s4 %v10534_v5  ;;  %vm1752_vm2 = vcmask 57344   ;;  %v10535_v7 = vmov 0   ;;  %vm1754_vm3 = vcmask 60417   ;;  %v10626_v8 = vld [vmem:[%s14371_s2] ss:$0 sm:$0xff] }
  0x11   : > { %s9546_s11 = sshll.u32 %s14994_s24, 8  ;;  %1750 = vst.msk [vmem:[#allocation2] sm:$0xf] %vm1749_vm1, %v10535_v7  ;;  %1751 = vst.msk [vmem:[#allocation2 + $0x4] sm:$0xf] %vm1749_vm1, %v10535_v7  ;;  %v10641_v16 = vshrl.u32 %v745_v3, 7 }
  0x12   : > { %1753 = vst.msk [vmem:[#allocation2 + $0x8] sm:$0x1] %vm1752_vm2, %v10535_v7  ;;  %s10621_s14 = scalar_lea.vmem %s14369_s0, %s9546_s11  ;;  %v10536_v9 = vmov 1935823168   ;;  %v10632_v11 = vld [vmem:[%s14372_s3 + $0x14] sm:$0xf]  ;;  %v744_v15 = vunpack.c.0.s8 %v743_v6 }
  0x13   : > { %1756 = vst.msk [vmem:[#allocation2 + $0x9c] sm:$0xf] %vm1749_vm1, %v10535_v7  ;;  %1757 = vst.msk [vmem:[#allocation2 + $0xa0] sm:$0xf] %vm1749_vm1, %v10535_v7  ;;  %v1764_v10 = vunpack.c.l.s4 %v10536_v9  ;;  %v10637_v12 = vld [vmem:[%s14372_s3] sm:$0xf] }
  0x14   : > { %1755 = vst.msk [vmem:[#allocation2 + $0x98] sm:$0xe] %vm1754_vm3, %v10535_v7  ;;  %v372_v13 = vld [vmem:[%s10621_s14] sm:$0xff]  ;;  %v373_v14 = vld [vmem:[%s10621_s14 + $0x8] sm:$0xff]  ;;  %14475 = vst [vmem:[#allocation3_spill] sm:$0xff] %v10641_v16  ;;  %v10644_v17 = vsel %vm3050_vm0, %v9393_v1, 0  ;;  %10384 = vmatprep.subr.msk.bf16.mxu1 %vm3050_vm0, %v10637_v12  ;;  %v10665_v32 = vsub.s32 %v744_v15, %v10641_v16 }
  0x15   : > { %v374_v18 = vld [vmem:[%s10621_s14 + $0x10] sm:$0xff]  ;;  %v411_v19 = vmul.f32 %v10610_v4, %v372_v13  ;;  %v412_v20 = vmul.f32 %v10610_v4, %v373_v14  ;;  %vm674_vm4 = vcmask 1040384   ;;  %9904 = vmatpush3.bf16.msra.mxu0 %v10644_v17  ;;  %v375_v21 = vld [vmem:[%s10621_s14 + $0x18] sm:$0xff]  ;;  %v376_v22 = vld [vmem:[%s10621_s14 + $0x20] sm:$0xff]  ;;  %vm675_vm5 = vsmask.f32 256 }
  0x16   : > { %v377_v23 = vld [vmem:[%s10621_s14 + $0x28] sm:$0xff]  ;;  %v413_v24 = vmul.f32 %v10610_v4, %v374_v18  ;;  %v414_v25 = vmul.f32 %v10610_v4, %v375_v21  ;;  %10389 = vmatprep.subr.msk.bf16.mxu0 %vm3050_vm0, %v10632_v11  ;;  %v415_v26 = vmul.f32 %v10610_v4, %v376_v22  ;;  %v378_v27 = vld [vmem:[%s10621_s14 + $0x30] sm:$0xff]  ;;  %v1765_v30 = vunpack.c.0.s8 %v1764_v10  ;;  %v379_v36 = vld [vmem:[%s10621_s14 + $0x38] sm:$0xff]  ;;  %s9547_s22 = sshll.u32 %s14994_s24, 7  ;;  %s9275_s30 = sshll.u32 %s14994_s24, 3 }
  0x17   : > { %v450_v28 = vadd.f32 %v10626_v8, %v411_v19  ;;  %v451_v29 = vadd.f32 %v10626_v8, %v412_v20  ;;  %v416_v31 = vmul.f32 %v10610_v4, %v377_v23  ;;  %v417_v42 = vmul.f32 %v10610_v4, %v378_v27  ;;  %v380_v55 = vld [vmem:[%s10621_s14 + $0x40] sm:$0xff]  ;;  %v381_v5 = vld [vmem:[%s10621_s14 + $0x48] sm:$0xff]  ;;  %vm10687_vm6 = vmand %vm674_vm4, %vm675_vm5  ;;  %s11989_s29 = scalar_lea.vmem %s14374_s5, %s9547_s22  ;;  %s359_s10 = scalar_lea.vmem %s14375_s6, %s9275_s30 }
  0x18   : > { %v452_v33 = vadd.f32 %v10626_v8, %v413_v24  ;;  %v453_v34 = vadd.f32 %v10626_v8, %v414_v25  ;;  %v454_v35 = vadd.f32 %v10626_v8, %v415_v26  ;;  %v2713_v39 = vld [vmem:[#allocation2] sm:$0xf]  ;;  %v2714_v40 = vld [vmem:[#allocation2 + $0x4] sm:$0xf]  ;;  %v10676_v48 = vsub.s32 %v1765_v30, %v10641_v16  ;;  %s366_s13 = scalar_lea.vmem %s14376_s7, %s9275_s30 }
  0x19   : > { %v482_v37 = vmax.f32 %v450_v28, 0.0  ;;  %v483_v38 = vmax.f32 %v451_v29, 0.0  ;;  %v455_v41 = vadd.f32 %v10626_v8, %v416_v31  ;;  %v10673_v43 = vcombine.low %v2713_v39, %v2714_v40 }
  0x1a   : > { %v484_v44 = vmax.f32 %v452_v33, 0.0  ;;  %v485_v45 = vmax.f32 %v453_v34, 0.0  ;;  %v486_v46 = vmax.f32 %v454_v35, 0.0  ;;  %v418_v50 = vmul.f32 %v10610_v4, %v379_v36 }
  0x1b   : > { %v514_v47 = vpack.c.bf16 %v483_v38, %v482_v37  ;;  %v487_v49 = vmax.f32 %v455_v41, 0.0  ;;  %v2848_v51 = vshrl.u32 %v10673_v43, 16  ;;  %v2850_v52 = vshll.u32 %v10673_v43, 16 }
  0x1c   : > { %v515_v53 = vpack.c.bf16 %v485_v45, %v484_v44  ;;  %v456_v54 = vadd.f32 %v10626_v8, %v417_v42  ;;  %v457_v59 = vadd.f32 %v10626_v8, %v418_v50  ;;  %v10695_v10 = vsel %vm3050_vm0, %v10637_v12, 0 }
  0x1d   : > { %v531_v56 = vshrl.u32 %v514_v47, 16  ;;  %v534_v57 = vshll.u32 %v514_v47, 16  ;;  %v516_v58 = vpack.c.bf16 %v487_v49, %v486_v46  ;;  %v2852_v60 = vrot.slane %v2850_v52, 1 }
  0x1e   : > { %v538_v61 = vshrl.u32 %v515_v53, 16  ;;  %v541_v62 = vshll.u32 %v515_v53, 16  ;;  %v488_v63 = vmax.f32 %v456_v54, 0.0  ;;  %v489_v3 = vmax.f32 %v457_v59, 0.0 }
  0x1f   : > { %v533_v0 = vrot.slane %v531_v56, 7  ;;  %v545_v1 = vshrl.u32 %v516_v58, 16  ;;  %v548_v2 = vshll.u32 %v516_v58, 16  ;;  %v10691_v7 = vor.u32 %v2852_v60, %v2848_v51 }
  0x20   : > { %v540_v9 = vrot.slane %v538_v61, 7  ;;  %v10698_v13 = vmul.f32 %v10610_v4, %v380_v55  ;;  %v10704_v19 = vpack.c.bf16 %v489_v3, %v488_v63  ;;  %v10710_v12 = vmul.f32 %v10610_v4, %v381_v5 }
  0x21   : > { %v536_v14 = vor.u32 %v534_v57, %v533_v0  ;;  %v693_v15 = vsel %vm10687_vm6, %v533_v0, 0  ;;  %v10702_v18 = vrot.slane %v545_v1, 7  ;;  %vm2846_vm7 = vsmask.f32 7424 }
  0x22   : > { %v543_v20 = vor.u32 %v541_v62, %v540_v9  ;;  %v796_v21 = vrot.slane %v693_v15, %v10665_v32  ;;  %v694_v22 = vsel %vm10687_vm6, %v540_v9, 0  ;;  %v552_v26 = vshrl.u32 %v10704_v19, 16 }
  0x23   : > { %v677_v23 = vsel %vm10687_vm6, 0, %v536_v14  ;;  %v550_v24 = vor.u32 %v548_v2, %v10702_v18  ;;  %v859_v25 = vrot.slane %v694_v22, %v10665_v32  ;;  %vm2995_vm8 = vcmask 64512  }
  0x24   : > { %v741_v27 = vcombine.high %v677_v23, %v677_v23  ;;  %v748_v28 = vrot.slane %v677_v23, %v10665_v32  ;;  %v678_v29 = vsel %vm10687_vm6, 0, %v543_v20  ;;  %v803_v30 = vrot.slane %v796_v21, %v10665_v32 }
  0x25   : > { %v804_v31 = vcombine.high %v678_v29, %v678_v29  ;;  %v811_v33 = vrot.slane %v678_v29, %v10665_v32  ;;  %v679_v34 = vsel %vm10687_vm6, 0, %v550_v24  ;;  %v866_v35 = vrot.slane %v859_v25, %v10665_v32 }
  0x26   : > { %v755_v36 = vrot.slane %v741_v27, %v10665_v32  ;;  %v756_v37 = vcombine.high %v748_v28, %v748_v28  ;;  %v764_v38 = vrot.slane %v748_v28, %v10665_v32  ;;  %v867_v39 = vcombine.high %v679_v34, %v679_v34 }
  0x27   : > { %v818_v40 = vrot.slane %v804_v31, %v10665_v32  ;;  %v819_v41 = vcombine.high %v811_v33, %v811_v33  ;;  %v827_v42 = vrot.slane %v811_v33, %v10665_v32  ;;  %v874_v44 = vrot.slane %v679_v34, %v10665_v32 }
  0x28   : > { %v757_v45 = vcombine.high %v755_v36, %v755_v36  ;;  %v771_v46 = vrot.slane %v755_v36, %v10665_v32  ;;  %v778_v47 = vrot.slane %v756_v37, %v10665_v32  ;;  %v786_v49 = vcombine.high %v764_v38, %v764_v38 }
  0x29   : > { %v820_v50 = vcombine.high %v818_v40, %v818_v40  ;;  %v834_v51 = vrot.slane %v818_v40, %v10665_v32  ;;  %v841_v52 = vrot.slane %v819_v41, %v10665_v32  ;;  %v849_v53 = vcombine.high %v827_v42, %v827_v42 }
  0x2a   : > { %v785_v54 = vrot.slane %v757_v45, %v10665_v32  ;;  %v787_v55 = vcombine.high %v771_v46, %v771_v46  ;;  %v788_v56 = vcombine.high %v778_v47, %v778_v47  ;;  %v1761_v57 = vcombine.low %v778_v47, %v778_v47 }
  0x2b   : > { %v1762_v58 = vcombine.low %v764_v38, %v786_v49  ;;  %v848_v59 = vrot.slane %v820_v50, %v10665_v32  ;;  %v851_v60 = vcombine.high %v841_v52, %v841_v52  ;;  %v1810_v61 = vcombine.low %v803_v30, %v841_v52 }
  0x2c   : > { %v789_v62 = vcombine.high %v785_v54, %v785_v54  ;;  %v1769_v63 = vrot.slane %v1761_v57, %v10676_v48  ;;  %v1785_v0 = vcombine.low %v788_v56, %v785_v54  ;;  %v1786_v1 = vcombine.low %v771_v46, %v787_v55 }
  0x2d   : > { %v1776_v2 = vrot.slane %v1762_v58, %v10676_v48  ;;  %v1824_v3 = vrot.slane %v1810_v61, %v10676_v48  ;;  %v1833_v5 = vcombine.low %v849_v53, %v834_v51  ;;  %v1834_v9 = vcombine.low %v851_v60, %v848_v59 }
  0x2e   : > { %v1793_v14 = vrot.slane %v1785_v0, %v10676_v48  ;;  %v1800_v15 = vrot.slane %v1786_v1, %v10676_v48  ;;  %v1809_v20 = vcombine.low %v789_v62, %v827_v42  ;;  %v850_v21 = vcombine.high %v834_v51, %v834_v51 }
  0x2f   : > { %v1777_v22 = vcombine.low %v1769_v63, %v1776_v2  ;;  %v1841_v23 = vrot.slane %v1833_v5, %v10676_v48  ;;  %v1848_v24 = vrot.slane %v1834_v9, %v10676_v48  ;;  %v852_v25 = vcombine.high %v848_v59, %v848_v59 }
  0x30   : > { %v1801_v27 = vcombine.low %v1793_v14, %v1800_v15  ;;  %v1817_v28 = vrot.slane %v1809_v20, %v10676_v48  ;;  %v881_v29 = vrot.slane %v867_v39, %v10665_v32  ;;  %v882_v30 = vcombine.high %v874_v44, %v874_v44 }
  0x31   : > { %v1784_v31 = vrot.slane %v1777_v22, %v10676_v48  ;;  %v1849_v33 = vcombine.low %v1841_v23, %v1848_v24  ;;  %v890_v34 = vrot.slane %v874_v44, %v10665_v32  ;;  %v1857_v36 = vcombine.low %v850_v21, %v866_v35 }
  0x32   : > { %v1808_v37 = vrot.slane %v1801_v27, %v10676_v48  ;;  %v1825_v38 = vcombine.low %v1817_v28, %v1824_v3  ;;  %v897_v40 = vrot.slane %v881_v29, %v10665_v32  ;;  %v904_v41 = vrot.slane %v882_v30, %v10665_v32 }
  0x33   : > { %2676 = vst.msk [vmem:[#allocation2 + $0x8] sm:$0xe] %vm1754_vm3, %v1784_v31  ;;  %v1856_v42 = vrot.slane %v1849_v33, %v10676_v48  ;;  %v912_v45 = vcombine.high %v890_v34, %v890_v34  ;;  %v1858_v39 = vcombine.low %v852_v25, %v890_v34  ;;  %v1865_v46 = vrot.slane %v1857_v36, %v10676_v48 }
  0x34   : > { %2677 = vst.msk [vmem:[#allocation2 + $0xc] sm:$0xf] %vm1749_vm1, %v1808_v37  ;;  %v1832_v44 = vrot.slane %v1825_v38, %v10676_v48  ;;  %v914_v35 = vcombine.high %v904_v41, %v904_v41  ;;  %v10757_v47 = vrot.slane %v552_v26, 7  ;;  %v555_v49 = vshll.u32 %v10704_v19, 16 }
  0x35   : > { %2679 = vst.msk [vmem:[#allocation2 + $0x14] sm:$0xf] %vm1749_vm1, %v1856_v42  ;;  %v1872_v50 = vrot.slane %v1858_v39, %v10676_v48  ;;  %v1882_v51 = vcombine.low %v912_v45, %v897_v40  ;;  %v695_v52 = vsel %vm10687_vm6, %v10702_v18, 0  ;;  %v883_v53 = vcombine.high %v881_v29, %v881_v29 }
  0x36   : > { %2678 = vst.msk [vmem:[#allocation2 + $0x10] sm:$0xf] %vm1749_vm1, %v1832_v44  ;;  %v1881_v54 = vcombine.low %v904_v41, %v914_v35  ;;  %v557_v55 = vor.u32 %v555_v49, %v10757_v47  ;;  %v913_v26 = vcombine.high %v897_v40, %v897_v40  ;;  %v922_v56 = vrot.slane %v695_v52, %v10665_v32 }
  0x37   : > { %v1873_v19 = vcombine.low %v1865_v46, %v1872_v50  ;;  %v1896_v57 = vrot.slane %v1882_v51, %v10676_v48  ;;  %v911_v58 = vrot.slane %v883_v53, %v10665_v32  ;;  %v458_v59 = vadd.f32 %v10626_v8, %v10698_v13 }
  0x38   : > { %v1889_v18 = vrot.slane %v1881_v54, %v10676_v48  ;;  %v10775_v60 = vsel %vm10687_vm6, 0, %v557_v55  ;;  %v929_v61 = vrot.slane %v922_v56, %v10665_v32  ;;  %v459_v62 = vadd.f32 %v10626_v8, %v10710_v12 }
  0x39   : > { %v1880_v63 = vrot.slane %v1873_v19, %v10676_v48  ;;  %v915_v0 = vcombine.high %v911_v58, %v911_v58  ;;  %v930_v1 = vcombine.high %v10775_v60, %v10775_v60  ;;  %v937_v13 = vrot.slane %v10775_v60, %v10665_v32  ;;  %v383_v60 = vld [vmem:[%s10621_s14 + $0x58] sm:$0xff] }
  0x3a   : > { %v3761_v2 = vld [vmem:[#allocation2 + $0x8] sm:$0xe]  ;;  %v1897_v3 = vcombine.low %v1889_v18, %v1896_v57  ;;  %v1906_v5 = vcombine.low %v913_v26, %v929_v61  ;;  %v490_v9 = vmax.f32 %v458_v59, 0.0  ;;  %v491_v14 = vmax.f32 %v459_v62, 0.0  ;;  %v382_v18 = vld [vmem:[%s10621_s14 + $0x50] sm:$0xff] }
  0x3b   : > { %v10422_v15 = vld [vmem:[#allocation2 + $0x8] sm:$0xff]   ;;  %vm4206_vm9 = vsmask.f32 6400  ;;  %2680 = vst.msk [vmem:[#allocation2 + $0x18] sm:$0xf] %vm1749_vm1, %v1880_v63  ;;  %v945_v12 = vcombine.high %v937_v13, %v937_v13  ;;  %v953_v21 = vrot.slane %v937_v13, %v10665_v32  ;;  %v1905_v22 = vcombine.low %v911_v58, %v915_v0 }
  0x3c   : > { %v10785_v20 = vld [vmem:[#allocation2 + $0xc] sm:$0xf]  ;;  %v696_v23 = vsel %vm10687_vm6, %v10757_v47, 0  ;;  %v1904_v25 = vrot.slane %v1897_v3, %v10676_v48  ;;  %v1920_v27 = vrot.slane %v1906_v5, %v10676_v48  ;;  %v518_v28 = vpack.c.bf16 %v491_v14, %v490_v9 }
  0x3d   : > { %v10793_v24 = vcombine.low %v3761_v2, %v10785_v20  ;;  %v2855_v29 = vshll.u32 %v10422_v15, 16  ;;  %v2859_v30 = vshrl.u32 %v10422_v15, 16  ;;  %v10423_v31 = vld [vmem:[#allocation2 + $0x10] sm:$0xff]   ;;  %v967_v34 = vrot.slane %v945_v12, %v10665_v32 }
  0x3e   : > { %v10797_v33 = vld [vmem:[#allocation2 + $0x10] sm:$0xff]   ;;  %v975_v36 = vcombine.high %v953_v21, %v953_v21  ;;  %2681 = vst.msk [vmem:[#allocation2 + $0x1c] sm:$0xf] %vm1749_vm1, %v1904_v25  ;;  %v1913_v40 = vrot.slane %v1905_v22, %v10676_v48  ;;  %v559_v41 = vshrl.u32 %v518_v28, 16  ;;  %v2863_v45 = vshll.u32 %v10423_v31, 16 }
  0x3f   : > { %v4208_v37 = vshrl.u32 %v10793_v24, 16  ;;  %v4211_v38 = vshll.u32 %v10793_v24, 16  ;;  %v2857_v42 = vrot.slane %v2855_v29, 1  ;;  %v4216_v39 = vshrl.u32 %v10797_v33, 16 }
  0x40   : > { %v4219_v46 = vshll.u32 %v10797_v33, 16  ;;  %v2867_v47 = vshrl.u32 %v10423_v31, 16  ;;  %v977_v49 = vcombine.high %v967_v34, %v967_v34  ;;  %v2865_v52 = vrot.slane %v2863_v45, 1 }
  0x41   : > { %v4210_v44 = vrot.slane %v4208_v37, 1  ;;  %v4213_v35 = vrot.slane %v4211_v38, 2  ;;  %v2858_v50 = vsel %vm2846_vm7, %v10691_v7, %v2857_v42  ;;  %v2861_v51 = vor.u32 %v2859_v30, %v2857_v42 }
  0x42   : > { %v4218_v53 = vrot.slane %v4216_v39, 1  ;;  %9753 = vmatprep.mubr.msk.bf16.mxu1 %vm2995_vm8, %v2858_v50  ;;  %v4221_v55 = vrot.slane %v4219_v46, 2  ;;  %v1921_v26 = vcombine.low %v1913_v40, %v1920_v27  ;;  %v1929_v56 = vcombine.low %v953_v21, %v975_v36  ;;  %v10854_v50 = vld [vmem:[%s14372_s3 + $0x18] sm:$0xf] }
  0x43   : > { %v4214_v54 = vor.u32 %v4213_v35, %v4210_v44  ;;  %v2866_v19 = vsel %vm2846_vm7, %v2861_v51, %v2865_v52  ;;  %v4746_v57 = vsel %vm3050_vm0, %v10632_v11, 0  ;;  %v1930_v58 = vcombine.low %v967_v34, %v977_v49  ;;  %v384_v49 = vld [vmem:[%s10621_s14 + $0x60] sm:$0xff] }
  0x44   : > { %v10812_v59 = vrot.slane %v559_v41, 7  ;;  %9754 = vmatmul.mubr.msk.bf16.vlgmr.msra.gmra.mrb[0].mxu1 %vm2995_vm8, %v2866_v19  ;;  %v4222_v7 = vor.u32 %v4221_v55, %v4218_v53  ;;  %v1928_v61 = vrot.slane %v1921_v26, %v10676_v48  ;;  %v1937_v62 = vrot.slane %v1929_v56, %v10676_v48 }
  0x45   : > { %v562_v63 = vshll.u32 %v518_v28, 16  ;;  %v10819_v0 = vld [vmem:[#allocation2 + $0x18] sm:$0xff]   ;;  %v2869_v13 = vor.u32 %v2867_v47, %v2865_v52  ;;  %v1944_v2 = vrot.slane %v1930_v58, %v10676_v48  ;;  %9790 = vmatpush3.bf16.msra.mxu1 %v10695_v10  ;;  %v944_v11 = vrot.slane %v930_v1, %v10665_v32  ;;  %v385_v58 = vld [vmem:[%s10621_s14 + $0x68] sm:$0xff] }
  0x46   : > { %v985_v3 = vrot.slane %v696_v23, %v10665_v32  ;;  %v4223_v5 = vsel %vm4206_vm9, %v4214_v54, %v4222_v7  ;;  %v10427_v9 = vld [vmem:[#allocation2 + $0x18] sm:$0xff]   ;;  %2682 = vst.msk [vmem:[#allocation2 + $0x20] sm:$0xf] %vm1749_vm1, %v1928_v61  ;;  %v421_v15 = vmul.f32 %v10610_v4, %v382_v18  ;;  %v422_v12 = vmul.f32 %v10610_v4, %v383_v60 }
  0x47   : > { %v564_v14 = vor.u32 %v562_v63, %v10812_v59  ;;  %9905 = vmatprep.mubr.msk.bf16.mxu0 %vm2995_vm8, %v4223_v5  ;;  %v4225_v21 = vshrl.u32 %v10819_v0, 16  ;;  %v4228_v10 = vshll.u32 %v10819_v0, 16  ;;  %v1945_v1 = vcombine.low %v1937_v62, %v1944_v2 }
  0x48   : > { %v946_v22 = vcombine.high %v944_v11, %v944_v11  ;;  %v2871_v23 = vshll.u32 %v10427_v9, 16  ;;  %v960_v27 = vrot.slane %v944_v11, %v10665_v32  ;;  %v697_v28 = vsel %vm10687_vm6, %v10812_v59, 0 }
  0x49   : > { %v681_v25 = vsel %vm10687_vm6, 0, %v564_v14  ;;  %v4227_v29 = vrot.slane %v4225_v21, 1  ;;  %v4230_v30 = vrot.slane %v4228_v10, 2  ;;  %v1952_v31 = vrot.slane %v1945_v1, %v10676_v48 }
  0x4a   : > { %v974_v34 = vrot.slane %v946_v22, %v10665_v32  ;;  %v2873_v36 = vrot.slane %v2871_v23, 1  ;;  %v2875_v37 = vshrl.u32 %v10427_v9, 16  ;;  %v976_v38 = vcombine.high %v960_v27, %v960_v27 }
  0x4b   : > { %v1000_v40 = vrot.slane %v681_v25, %v10665_v32  ;;  %v10842_v41 = vor.u32 %v4230_v30, %v4227_v29  ;;  %2683 = vst.msk [vmem:[#allocation2 + $0x24] sm:$0xf] %vm1749_vm1, %v1952_v31  ;;  %v460_v45 = vadd.f32 %v10626_v8, %v421_v15  ;;  %v461_v39 = vadd.f32 %v10626_v8, %v422_v12 }
  0x4c   : > { %v978_v42 = vcombine.high %v974_v34, %v974_v34  ;;  %v2874_v46 = vsel %vm2846_vm7, %v2869_v13, %v2873_v36  ;;  %v992_v44 = vrot.slane %v985_v3, %v10665_v32  ;;  %v1953_v52 = vcombine.low %v960_v27, %v976_v38 }
  0x4d   : > { %v1008_v35 = vcombine.high %v1000_v40, %v1000_v40  ;;  %v1016_v47 = vrot.slane %v1000_v40, %v10665_v32  ;;  %v4232_v51 = vsel %vm4206_vm9, %v4222_v7, %v10842_v41  ;;  %9757 = vmatprep.mubr.msk.bf16.mxu1 %vm2995_vm8, %v2874_v46  ;;  %v492_v54 = vmax.f32 %v460_v45, 0.0 }
  0x4e   : > { %v1954_v53 = vcombine.low %v974_v34, %v978_v42  ;;  %9906 = vmatmul.mubr.msk.bf16.vlgmr.msra.gmra.mrb[0].mxu0 %vm2995_vm8, %v4232_v51  ;;  %v493_v56 = vmax.f32 %v461_v39, 0.0  ;;  %v993_v19 = vcombine.high %v681_v25, %v681_v25  ;;  %v1961_v59 = vrot.slane %v1953_v52, %v10676_v48 }
  0x4f   : > { %v1030_v55 = vrot.slane %v1008_v35, %v10665_v32  ;;  %v1038_v26 = vcombine.high %v1016_v47, %v1016_v47  ;;  %9942 = vmatpush3.bf16.msra.mxu0 %v4746_v57  ;;  %v10865_v60 = vrot.slane %v697_v28, %v10665_v32  ;;  %v423_v7 = vmul.f32 %v10610_v4, %v384_v49 }
  0x50   : > { %v1968_v18 = vrot.slane %v1954_v53, %v10676_v48  ;;  %v519_v63 = vpack.c.bf16 %v493_v56, %v492_v54  ;;  %v1007_v13 = vrot.slane %v993_v19, %v10665_v32  ;;  %10390 = vmatprep.subr.msk.bf16.mxu0 %vm3050_vm0, %v10854_v50  ;;  %v2877_v2 = vor.u32 %v2875_v37, %v2873_v36 }
  0x51   : > { %v1977_v61 = vcombine.low %v992_v44, %v1030_v55  ;;  %v1978_v62 = vcombine.low %v1016_v47, %v1038_v26  ;;  %v1040_v57 = vcombine.high %v1030_v55, %v1030_v55  ;;  %v424_v3 = vmul.f32 %v10610_v4, %v385_v58 }
  0x52   : > { %v1969_v11 = vcombine.low %v1961_v59, %v1968_v18  ;;  %v10428_v5 = vld [vmem:[#allocation2 + $0x20] sm:$0xff]   ;;  %v566_v15 = vshrl.u32 %v519_v63, 16  ;;  %v1009_v12 = vcombine.high %v1007_v13, %v1007_v13  ;;  %v569_v1 = vshll.u32 %v519_v63, 16 }
  0x53   : > { %v1985_v9 = vrot.slane %v1977_v61, %v10676_v48  ;;  %v1992_v14 = vrot.slane %v1978_v62, %v10676_v48  ;;  %v10874_v21 = vld [vmem:[#allocation2 + $0x20] sm:$0xff]   ;;  %v1023_v22 = vrot.slane %v1007_v13, %v10665_v32  ;;  %v1055_v23 = vrot.slane %v10865_v60, %v10665_v32 }
  0x54   : > { %v1976_v10 = vrot.slane %v1969_v11, %v10676_v48  ;;  %v2879_v25 = vshll.u32 %v10428_v5, 16  ;;  %v568_v28 = vrot.slane %v566_v15, 7  ;;  %v462_v29 = vadd.f32 %v10626_v8, %v423_v7  ;;  %v386_v15 = vld [vmem:[%s10621_s14 + $0x70] sm:$0xff] }
  0x55   : > { %v1993_v27 = vcombine.low %v1985_v9, %v1992_v14  ;;  %v4234_v30 = vshrl.u32 %v10874_v21, 16  ;;  %v4237_v31 = vshll.u32 %v10874_v21, 16  ;;  %v1037_v34 = vrot.slane %v1009_v12, %v10665_v32 }
  0x56   : > { %2684 = vst.msk [vmem:[#allocation2 + $0x28] sm:$0xf] %vm1749_vm1, %v1976_v10  ;;  %v1039_v36 = vcombine.high %v1023_v22, %v1023_v22  ;;  %v2881_v37 = vrot.slane %v2879_v25, 1  ;;  %v571_v40 = vor.u32 %v569_v1, %v568_v28  ;;  %v463_v42 = vadd.f32 %v10626_v8, %v424_v3 }
  0x57   : > { %v2000_v38 = vrot.slane %v1993_v27, %v10676_v48  ;;  %v4236_v45 = vrot.slane %v4234_v30, 1  ;;  %v4239_v39 = vrot.slane %v4237_v31, 2  ;;  %v2883_v46 = vshrl.u32 %v10428_v5, 16 }
  0x58   : > { %v2001_v44 = vcombine.low %v1040_v57, %v1037_v34  ;;  %v2882_v35 = vsel %vm2846_vm7, %v2877_v2, %v2881_v37  ;;  %v682_v47 = vsel %vm10687_vm6, 0, %v571_v40  ;;  %v1041_v49 = vcombine.high %v1037_v34, %v1037_v34 }
  0x59   : > { %2685 = vst.msk [vmem:[#allocation2 + $0x2c] sm:$0xf] %vm1749_vm1, %v2000_v38  ;;  %v2002_v51 = vcombine.low %v1023_v22, %v1039_v36  ;;  %9758 = vmatmul.mubr.msk.bf16.gmra.mrb[4].mxu1 %vm2995_vm8, %v2882_v35  ;;  %v10892_v52 = vor.u32 %v4239_v39, %v4236_v45  ;;  %v1056_v53 = vcombine.high %v682_v47, %v682_v47  ;;  %v494_v56 = vmax.f32 %v462_v29, 0.0 }
  0x5a   : > { %v1063_v54 = vrot.slane %v682_v47, %v10665_v32  ;;  %v2009_v55 = vrot.slane %v2001_v44, %v10676_v48  ;;  %v495_v19 = vmax.f32 %v463_v42, 0.0  ;;  %v698_v58 = vsel %vm10687_vm6, %v568_v28, 0 }
  0x5b   : > { %v2016_v26 = vrot.slane %v2002_v51, %v10676_v48  ;;  %v4241_v59 = vsel %vm4206_vm9, %v10842_v41, %v10892_v52  ;;  %v1070_v7 = vrot.slane %v1056_v53, %v10665_v32  ;;  %v2885_v61 = vor.u32 %v2883_v46, %v2881_v37 }
  0x5c   : > { %v1071_v18 = vcombine.high %v1063_v54, %v1063_v54  ;;  %v1079_v60 = vrot.slane %v1063_v54, %v10665_v32  ;;  %9909 = vmatprep.mubr.msk.bf16.mxu0 %vm2995_vm8, %v4241_v59  ;;  %v520_v63 = vpack.c.bf16 %v495_v19, %v494_v56  ;;  %v1111_v13 = vrot.slane %v698_v58, %v10665_v32  ;;  %v387_v19 = vld [vmem:[%s10621_s14 + $0x78] sm:$0xff] }
  0x5d   : > { %v2017_v62 = vcombine.low %v2009_v55, %v2016_v26  ;;  %v1072_v57 = vcombine.high %v1070_v7, %v1070_v7  ;;  %v1086_v3 = vrot.slane %v1070_v7, %v10665_v32  ;;  %v388_v7 = vld [vmem:[%s10621_s14 + $0x80] sm:$0xff]  ;;  %vm4653_vm10 = vcmask 1045504  }
  0x5e   : > { %v1093_v2 = vrot.slane %v1071_v18, %v10665_v32  ;;  %v2025_v11 = vcombine.low %v1041_v49, %v1079_v60  ;;  %v573_v5 = vshrl.u32 %v520_v63, 16  ;;  %v576_v9 = vshll.u32 %v520_v63, 16 }
  0x5f   : > { %v2024_v41 = vrot.slane %v2017_v62, %v10676_v48  ;;  %v1101_v14 = vcombine.high %v1079_v60, %v1079_v60  ;;  %v1100_v22 = vrot.slane %v1072_v57, %v10665_v32  ;;  %v1102_v25 = vcombine.high %v1086_v3, %v1086_v3 }
  0x60   : > { %v10910_v12 = vld [vmem:[#allocation2 + $0x28] sm:$0xff]   ;;  %v2026_v10 = vcombine.low %v1055_v23, %v1093_v2  ;;  %v2033_v1 = vrot.slane %v2025_v11, %v10676_v48  ;;  %v575_v28 = vrot.slane %v573_v5, 7  ;;  %v1103_v29 = vcombine.high %v1093_v2, %v1093_v2 }
  0x61   : > { %v10431_v27 = vld [vmem:[#allocation2 + $0x28] sm:$0xff]   ;;  %2686 = vst.msk [vmem:[#allocation2 + $0x30] sm:$0xf] %vm1749_vm1, %v2024_v41  ;;  %v1118_v30 = vrot.slane %v1111_v13, %v10665_v32  ;;  %v2049_v31 = vcombine.low %v1101_v14, %v1086_v3  ;;  %v4243_v34 = vshrl.u32 %v10910_v12, 16  ;;  %v4246_v36 = vshll.u32 %v10910_v12, 16 }
  0x62   : > { %v2040_v37 = vrot.slane %v2026_v10, %v10676_v48  ;;  %v425_v23 = vmul.f32 %v10610_v4, %v386_v15  ;;  %v2887_v38 = vshll.u32 %v10431_v27, 16  ;;  %v578_v40 = vor.u32 %v576_v9, %v575_v28  ;;  %v389_v14 = vld [vmem:[%s10621_s14 + $0x88] sm:$0xff] }
  0x63   : > { %v1104_v42 = vcombine.high %v1100_v22, %v1100_v22  ;;  %v2050_v45 = vcombine.low %v1103_v29, %v1100_v22  ;;  %v4245_v39 = vrot.slane %v4243_v34, 1  ;;  %v4248_v46 = vrot.slane %v4246_v36, 2 }
  0x64   : > { %v2041_v44 = vcombine.low %v2033_v1, %v2040_v37  ;;  %v2057_v35 = vrot.slane %v2049_v31, %v10676_v48  ;;  %v2889_v47 = vrot.slane %v2887_v38, 1  ;;  %v683_v49 = vsel %vm10687_vm6, 0, %v578_v40 }
  0x65   : > { %v2064_v51 = vrot.slane %v2050_v45, %v10676_v48  ;;  %v2073_v53 = vcombine.low %v1102_v25, %v1118_v30  ;;  %v10924_v54 = vor.u32 %v4248_v46, %v4245_v39  ;;  %v1126_v26 = vrot.slane %v683_v49, %v10665_v32  ;;  %v390_v30 = vld [vmem:[%s10621_s14 + $0x90] sm:$0xff] }
  0x66   : > { %v2048_v55 = vrot.slane %v2041_v44, %v10676_v48  ;;  %v699_v56 = vsel %vm10687_vm6, %v575_v28, 0  ;;  %v2890_v58 = vsel %vm2846_vm7, %v2885_v61, %v2889_v47  ;;  %v2891_v59 = vshrl.u32 %v10431_v27, 16 }
  0x67   : > { %v2065_v18 = vcombine.low %v2057_v35, %v2064_v51  ;;  %v2081_v60 = vrot.slane %v2073_v53, %v10676_v48  ;;  %v4250_v62 = vsel %vm4206_vm9, %v10892_v52, %v10924_v54  ;;  %9761 = vmatprep.mubr.msk.bf16.mxu1 %vm2995_vm8, %v2890_v58  ;;  %v1142_v63 = vrot.slane %v1126_v26, %v10665_v32 }
  0x68   : > { %2687 = vst.msk [vmem:[#allocation2 + $0x34] sm:$0xf] %vm1749_vm1, %v2048_v55  ;;  %v1119_v13 = vcombine.high %v683_v49, %v683_v49  ;;  %v1134_v2 = vcombine.high %v1126_v26, %v1126_v26  ;;  %9910 = vmatmul.mubr.msk.bf16.gmra.mrb[4].mxu0 %vm2995_vm8, %v4250_v62  ;;  %v1174_v11 = vrot.slane %v699_v56, %v10665_v32  ;;  %vm3453_vm11 = vcmask 1046528  }
  0x69   : > { %v2072_v61 = vrot.slane %v2065_v18, %v10676_v48  ;;  %v426_v57 = vmul.f32 %v10610_v4, %v387_v19  ;;  %v464_v3 = vadd.f32 %v10626_v8, %v425_v23  ;;  %v2074_v52 = vcombine.low %v1104_v42, %v1142_v63 }
  0x6a   : > { %v1133_v41 = vrot.slane %v1119_v13, %v10665_v32  ;;  %v1156_v5 = vrot.slane %v1134_v2, %v10665_v32  ;;  %v1164_v9 = vcombine.high %v1142_v63, %v1142_v63  ;;  %v1181_v15 = vrot.slane %v1174_v11, %v10665_v32 }
  0x6b   : > { %2688 = vst.msk [vmem:[#allocation2 + $0x38] sm:$0xf] %vm1749_vm1, %v2072_v61  ;;  %v465_v10 = vadd.f32 %v10626_v8, %v426_v57  ;;  %v496_v1 = vmax.f32 %v464_v3, 0.0  ;;  %v427_v22 = vmul.f32 %v10610_v4, %v388_v7  ;;  %v2088_v25 = vrot.slane %v2074_v52, %v10676_v48  ;;  %v391_v3 = vld [vmem:[%s10621_s14 + $0x98] sm:$0xff] }
  0x6c   : > { %v1135_v27 = vcombine.high %v1133_v41, %v1133_v41  ;;  %v1149_v28 = vrot.slane %v1133_v41, %v10665_v32  ;;  %v1166_v29 = vcombine.high %v1156_v5, %v1156_v5  ;;  %v2893_v31 = vor.u32 %v2891_v59, %v2889_v47 }
  0x6d   : > { %v497_v34 = vmax.f32 %v465_v10, 0.0  ;;  %v428_v36 = vmul.f32 %v10610_v4, %v389_v14  ;;  %v466_v37 = vadd.f32 %v10626_v8, %v427_v22  ;;  %v2089_v23 = vcombine.low %v2081_v60, %v2088_v25 }
  0x6e   : > { %v1163_v38 = vrot.slane %v1135_v27, %v10665_v32  ;;  %v1165_v40 = vcombine.high %v1149_v28, %v1149_v28  ;;  %v2097_v42 = vcombine.low %v1156_v5, %v1166_v29  ;;  %v2098_v39 = vcombine.low %v1164_v9, %v1149_v28  ;;  %v10985_v27 = vld [vmem:[%s14370_s1] ss:$0 sm:$0xff] }
  0x6f   : > { %v10432_v45 = vld [vmem:[#allocation2 + $0x30] sm:$0xff]   ;;  %v521_v46 = vpack.c.bf16 %v497_v34, %v496_v1  ;;  %v467_v44 = vadd.f32 %v10626_v8, %v428_v36  ;;  %v429_v35 = vmul.f32 %v10610_v4, %v390_v30  ;;  %v2096_v47 = vrot.slane %v2089_v23, %v10676_v48 }
  0x70   : > { %v10960_v49 = vld [vmem:[#allocation2 + $0x30] sm:$0xff]   ;;  %v1167_v51 = vcombine.high %v1163_v38, %v1163_v38  ;;  %v2105_v53 = vrot.slane %v2097_v42, %v10676_v48  ;;  %v2122_v55 = vcombine.low %v1165_v40, %v1181_v15  ;;  %v2895_v26 = vshll.u32 %v10432_v45, 16 }
  0x71   : > { %v2112_v56 = vrot.slane %v2098_v39, %v10676_v48  ;;  %v580_v19 = vshrl.u32 %v521_v46, 16  ;;  %v498_v58 = vmax.f32 %v466_v37, 0.0  ;;  %v4252_v59 = vshrl.u32 %v10960_v49, 16  ;;  %2689 = vst.msk [vmem:[#allocation2 + $0x3c] sm:$0xf] %vm1749_vm1, %v2096_v47 }
  0x72   : > { %v4255_v18 = vshll.u32 %v10960_v49, 16  ;;  %v2121_v4 = vcombine.low %v1163_v38, %v1167_v51  ;;  %v2136_v60 = vrot.slane %v2122_v55, %v10676_v48  ;;  %v2897_v7 = vrot.slane %v2895_v26, 1 }
  0x73   : > { %v2113_v62 = vcombine.low %v2105_v53, %v2112_v56  ;;  %v582_v63 = vrot.slane %v580_v19, 7  ;;  %v583_v13 = vshll.u32 %v521_v46, 16  ;;  %v4254_v2 = vrot.slane %v4252_v59, 1 }
  0x74   : > { %v4257_v61 = vrot.slane %v4255_v18, 2  ;;  %v2129_v11 = vrot.slane %v2121_v4, %v10676_v48  ;;  %v499_v57 = vmax.f32 %v467_v44, 0.0  ;;  %v2898_v52 = vsel %vm2846_vm7, %v2893_v31, %v2897_v7 }
  0x75   : > { %v2899_v41 = vshrl.u32 %v10432_v45, 16  ;;  %v2120_v5 = vrot.slane %v2113_v62, %v10676_v48  ;;  %v585_v9 = vor.u32 %v583_v13, %v582_v63  ;;  %9762 = vmatmul.mubr.msk.bf16.gmra.mrb[8].mxu1 %vm2995_vm8, %v2898_v52  ;;  %v700_v1 = vsel %vm10687_vm6, %v582_v63, 0 }
  0x76   : > { %v4258_v14 = vor.u32 %v4257_v61, %v4254_v2  ;;  %v2137_v15 = vcombine.low %v2129_v11, %v2136_v60  ;;  %v522_v10 = vpack.c.bf16 %v499_v57, %v498_v58  ;;  %v10980_v25 = vrot.slane %v700_v1, %v10665_v32  ;;  %v392_v60 = vld [vmem:[%s10621_s14 + $0xa0] sm:$0xff] }
  0x77   : > { %2690 = vst.msk [vmem:[#allocation2 + $0x40] sm:$0xf] %vm1749_vm1, %v2120_v5  ;;  %v684_v22 = vsel %vm10687_vm6, 0, %v585_v9  ;;  %v430_v28 = vmul.f32 %v10985_v27, %v391_v3  ;;  %v468_v29 = vadd.f32 %v10626_v8, %v429_v35  ;;  %v2901_v23 = vor.u32 %v2899_v41, %v2897_v7  ;;  %v11001_v8 = vld [vmem:[%s14371_s2] ss:$0 sm:$0xff] }
  0x78   : > { %v4259_v30 = vsel %vm4206_vm9, %v10924_v54, %v4258_v14  ;;  %v2144_v31 = vrot.slane %v2137_v15, %v10676_v48  ;;  %v1182_v34 = vcombine.high %v684_v22, %v684_v22  ;;  %v1189_v36 = vrot.slane %v684_v22, %v10665_v32  ;;  %v10994_v37 = vld [vmem:[#allocation2 + $0x38] sm:$0xff]  }
  0x79   : > { %9913 = vmatprep.mubr.msk.bf16.mxu0 %vm2995_vm8, %v4259_v30  ;;  %v587_v38 = vshrl.u32 %v522_v10, 16  ;;  %v1244_v40 = vrot.slane %v10980_v25, %v10665_v32  ;;  %v469_v54 = vadd.f32 %v11001_v8, %v430_v28  ;;  %v10435_v42 = vld [vmem:[#allocation2 + $0x38] sm:$0xff]   ;;  %v590_v44 = vshll.u32 %v522_v10, 16 }
  0x7a   : > { %2691 = vst.msk [vmem:[#allocation2 + $0x44] sm:$0xf] %vm1749_vm1, %v2144_v31  ;;  %v1196_v45 = vrot.slane %v1182_v34, %v10665_v32  ;;  %v1197_v39 = vcombine.high %v1189_v36, %v1189_v36  ;;  %v1205_v46 = vrot.slane %v1189_v36, %v10665_v32  ;;  %v4261_v35 = vshrl.u32 %v10994_v37, 16 }
  0x7b   : > { %v4264_v47 = vshll.u32 %v10994_v37, 16  ;;  %v11009_v51 = vrot.slane %v587_v38, 7  ;;  %v500_v53 = vmax.f32 %v468_v29, 0.0  ;;  %v2903_v55 = vshll.u32 %v10435_v42, 16 }
  0x7c   : > { %v2907_v26 = vshrl.u32 %v10435_v42, 16  ;;  %v1198_v56 = vcombine.high %v1196_v45, %v1196_v45  ;;  %v1212_v19 = vrot.slane %v1196_v45, %v10665_v32  ;;  %v4263_v58 = vrot.slane %v4261_v35, 1 }
  0x7d   : > { %v4266_v59 = vrot.slane %v4264_v47, 2  ;;  %v1219_v18 = vrot.slane %v1197_v39, %v10665_v32  ;;  %v1227_v4 = vcombine.high %v1205_v46, %v1205_v46  ;;  %v2905_v7 = vrot.slane %v2903_v55, 1 }
  0x7e   : > { %v1226_v62 = vrot.slane %v1198_v56, %v10665_v32  ;;  %v1228_v63 = vcombine.high %v1212_v19, %v1212_v19  ;;  %v592_v13 = vor.u32 %v590_v44, %v11009_v51  ;;  %v501_v57 = vmax.f32 %v469_v54, 0.0 }
  0x7f   : > { %v4267_v2 = vor.u32 %v4266_v59, %v4263_v58  ;;  %v1229_v61 = vcombine.high %v1219_v18, %v1219_v18  ;;  %v2145_v11 = vcombine.low %v1205_v46, %v1227_v4  ;;  %v2906_v3 = vsel %vm2846_vm7, %v2901_v23, %v2905_v7 }
  0x80   : > { %v1230_v52 = vcombine.high %v1226_v62, %v1226_v62  ;;  %v2169_v41 = vcombine.low %v1212_v19, %v1228_v63  ;;  %v431_v5 = vmul.f32 %v10985_v27, %v392_v60  ;;  %9765 = vmatprep.mubr.msk.bf16.mxu1 %vm2995_vm8, %v2906_v3  ;;  %v685_v22 = vsel %vm10687_vm6, 0, %v592_v13 }
  0x81   : > { %v4268_v9 = vsel %vm4206_vm9, %v4258_v14, %v4267_v2  ;;  %v10436_v15 = vld [vmem:[#allocation2 + $0x40] sm:$0xff]   ;;  %v2146_v10 = vcombine.low %v1219_v18, %v1229_v61  ;;  %v2153_v1 = vrot.slane %v2145_v11, %v10676_v48  ;;  %v1245_v31 = vcombine.high %v685_v22, %v685_v22 }
  0x82   : > { %9914 = vmatmul.mubr.msk.bf16.gmra.mrb[8].mxu0 %vm2995_vm8, %v4268_v9  ;;  %v11024_v28 = vld [vmem:[#allocation2 + $0x40] sm:$0xff]   ;;  %v2170_v29 = vcombine.low %v1226_v62, %v1230_v52  ;;  %v2177_v30 = vrot.slane %v2169_v41, %v10676_v48  ;;  %v1252_v34 = vrot.slane %v685_v22, %v10665_v32  ;;  %v2909_v14 = vor.u32 %v2907_v26, %v2905_v7 }
  0x83   : > { %v2911_v36 = vshll.u32 %v10436_v15, 16  ;;  %v2160_v23 = vrot.slane %v2146_v10, %v10676_v48  ;;  %v523_v38 = vpack.c.bf16 %v501_v57, %v500_v53  ;;  %v4270_v54 = vshrl.u32 %v11024_v28, 16  ;;  %v393_v57 = vld [vmem:[%s10621_s14 + $0xa8] sm:$0xff] }
  0x84   : > { %v4273_v42 = vshll.u32 %v11024_v28, 16  ;;  %v2184_v45 = vrot.slane %v2170_v29, %v10676_v48  ;;  %v1259_v39 = vrot.slane %v1245_v31, %v10665_v32  ;;  %v1260_v35 = vcombine.high %v1252_v34, %v1252_v34 }
  0x85   : > { %v2913_v46 = vrot.slane %v2911_v36, 1  ;;  %v2161_v44 = vcombine.low %v2153_v1, %v2160_v23  ;;  %v1268_v47 = vrot.slane %v1252_v34, %v10665_v32  ;;  %v4272_v55 = vrot.slane %v4270_v54, 1  ;;  %v4647_v54 = vld [vmem:[#allocation2 + $0x8] sm:$0xc] }
  0x86   : > { %v4275_v56 = vrot.slane %v4273_v42, 2  ;;  %v2185_v26 = vcombine.low %v2177_v30, %v2184_v45  ;;  %v1261_v19 = vcombine.high %v1259_v39, %v1259_v39  ;;  %v2915_v59 = vshrl.u32 %v10436_v15, 16 }
  0x87   : > { %v2914_v53 = vsel %vm2846_vm7, %v2909_v14, %v2913_v46  ;;  %v2168_v58 = vrot.slane %v2161_v44, %v10676_v48  ;;  %v1275_v18 = vrot.slane %v1259_v39, %v10665_v32  ;;  %v1282_v7 = vrot.slane %v1260_v35, %v10665_v32 }
  0x88   : > { %9766 = vmatmul.mubr.msk.bf16.gmra.mrb[12].mxu1 %vm2995_vm8, %v2914_v53  ;;  %v11038_v4 = vor.u32 %v4275_v56, %v4272_v55  ;;  %v2192_v60 = vrot.slane %v2185_v26, %v10676_v48  ;;  %v11043_v62 = vrot.slane %v1261_v19, %v10665_v32  ;;  %v1290_v63 = vcombine.high %v1268_v47, %v1268_v47 }
  0x89   : > { %2692 = vst.msk [vmem:[#allocation2 + $0x48] sm:$0xf] %vm1749_vm1, %v2168_v58  ;;  %v1291_v13 = vcombine.high %v1275_v18, %v1275_v18  ;;  %v594_v61 = vshrl.u32 %v523_v38, 16  ;;  %v597_v11 = vshll.u32 %v523_v38, 16  ;;  %v1292_v52 = vcombine.high %v1282_v7, %v1282_v7 }
  0x8a   : > { %v4277_v3 = vsel %vm4206_vm9, %v4267_v2, %v11038_v4  ;;  %2693 = vst.msk [vmem:[#allocation2 + $0x4c] sm:$0xf] %vm1749_vm1, %v2192_v60  ;;  %v2193_v41 = vcombine.low %v1244_v40, %v1282_v7  ;;  %v701_v9 = vsel %vm10687_vm6, %v11009_v51, 0  ;;  %v2917_v15 = vor.u32 %v2915_v59, %v2913_v46 }
  0x8b   : > { %9917 = vmatprep.mubr.msk.bf16.mxu0 %vm2995_vm8, %v4277_v3  ;;  %v2194_v10 = vcombine.low %v1268_v47, %v1290_v63  ;;  %v2218_v1 = vcombine.low %v1275_v18, %v1291_v13  ;;  %v596_v22 = vrot.slane %v594_v61, 7  ;;  %v2217_v2 = vcombine.low %v1292_v52, %v11043_v62 }
  0x8c   : > { %v2201_v29 = vrot.slane %v2193_v41, %v10676_v48  ;;  %v1300_v30 = vrot.slane %v701_v9, %v10665_v32  ;;  %v432_v31 = vmul.f32 %v10985_v27, %v393_v57  ;;  %v470_v51 = vadd.f32 %v11001_v8, %v431_v5 }
  0x8d   : > { %v2208_v25 = vrot.slane %v2194_v10, %v10676_v48  ;;  %v2232_v40 = vrot.slane %v2218_v1, %v10676_v48  ;;  %v599_v34 = vor.u32 %v597_v11, %v596_v22  ;;  %v2225_v14 = vrot.slane %v2217_v2, %v10676_v48 }
  0x8e   : > { %v1293_v36 = vcombine.high %v11043_v62, %v11043_v62  ;;  %v471_v23 = vadd.f32 %v11001_v8, %v432_v31  ;;  %v702_v38 = vsel %vm10687_vm6, %v596_v22, 0  ;;  %v502_v39 = vmax.f32 %v470_v51, 0.0 }
  0x8f   : > { %v2209_v42 = vcombine.low %v2201_v29, %v2208_v25  ;;  %v686_v45 = vsel %vm10687_vm6, 0, %v599_v34  ;;  %v1363_v46 = vrot.slane %v702_v38, %v10665_v32  ;;  %v2233_v44 = vcombine.low %v2225_v14, %v2232_v40 }
  0x90   : > { %v1308_v5 = vcombine.high %v686_v45, %v686_v45  ;;  %v1315_v35 = vrot.slane %v686_v45, %v10665_v32  ;;  %v503_v47 = vmax.f32 %v471_v23, 0.0  ;;  %v1307_v26 = vrot.slane %v1300_v30, %v10665_v32  ;;  %v394_v45 = vld [vmem:[%s10621_s14 + $0xb0] sm:$0xff] }
  0x91   : > { %v11074_v55 = vld [vmem:[#allocation2 + $0x48] sm:$0xff]   ;;  %v2216_v56 = vrot.slane %v2209_v42, %v10676_v48  ;;  %v1370_v19 = vrot.slane %v1363_v46, %v10665_v32  ;;  %v9414_v53 = vcombine.low %v4647_v54, %v10785_v20  ;;  %v2240_v59 = vrot.slane %v2233_v44, %v10676_v48 }
  0x92   : > { %v10439_v58 = vld [vmem:[#allocation2 + $0x48] sm:$0xff]   ;;  %v1322_v18 = vrot.slane %v1308_v5, %v10665_v32  ;;  %v1323_v60 = vcombine.high %v1315_v35, %v1315_v35  ;;  %v1331_v7 = vrot.slane %v1315_v35, %v10665_v32  ;;  %v4279_v62 = vshrl.u32 %v11074_v55, 16 }
  0x93   : > { %v4282_v63 = vshll.u32 %v11074_v55, 16  ;;  %2694 = vst.msk [vmem:[#allocation2 + $0x50] sm:$0xf] %vm1749_vm1, %v2216_v56  ;;  %v524_v13 = vpack.c.bf16 %v503_v47, %v502_v39  ;;  %v9335_v20 = vld [vmem:[%s14372_s3 + $0x8] sm:$0xf]  ;;  %v2919_v61 = vshll.u32 %v10439_v58, 16 }
  0x94   : > { %2695 = vst.msk [vmem:[#allocation2 + $0x54] sm:$0xf] %vm1749_vm1, %v2240_v59  ;;  %v2923_v11 = vshrl.u32 %v10439_v58, 16  ;;  %v1324_v57 = vcombine.high %v1322_v18, %v1322_v18  ;;  %v1338_v3 = vrot.slane %v1322_v18, %v10665_v32  ;;  %10385 = vmatprep.subr.msk.bf16.mxu1 %vm3050_vm0, %v9335_v20  ;;  %v4281_v52 = vrot.slane %v4279_v62, 1 }
  0x95   : > { %v4284_v41 = vrot.slane %v4282_v63, 2  ;;  %v1345_v9 = vrot.slane %v1323_v60, %v10665_v32  ;;  %v1353_v10 = vcombine.high %v1331_v7, %v1331_v7  ;;  %v2921_v1 = vrot.slane %v2919_v61, 1  ;;  %v395_v63 = vld [vmem:[%s10621_s14 + $0xb8] sm:$0xff] }
  0x96   : > { %v11094_v22 = vrot.slane %v1324_v57, %v10665_v32  ;;  %v2241_v29 = vcombine.low %v1293_v36, %v1331_v7  ;;  %v601_v2 = vshrl.u32 %v524_v13, 16  ;;  %v4654_v23 = vrot.slane %v9414_v53, 2 }
  0x97   : > { %v11096_v30 = vor.u32 %v4284_v41, %v4281_v52  ;;  %v1355_v31 = vcombine.high %v1345_v9, %v1345_v9  ;;  %v2242_v25 = vcombine.low %v1307_v26, %v1345_v9  ;;  %v2265_v40 = vcombine.low %v1353_v10, %v1338_v3 }
  0x98   : > { %v2922_v34 = vsel %vm2846_vm7, %v2917_v15, %v2921_v1  ;;  %v2249_v51 = vrot.slane %v2241_v29, %v10676_v48  ;;  %v11100_v14 = vrot.slane %v601_v2, 7  ;;  %v2925_v15 = vor.u32 %v2923_v11, %v2921_v1 }
  0x99   : > { %v4286_v38 = vsel %vm4206_vm9, %v11038_v4, %v11096_v30  ;;  %9769 = vmatprep.mubr.msk.bf16.mxu1 %vm2995_vm8, %v2922_v34  ;;  %v2256_v36 = vrot.slane %v2242_v25, %v10676_v48  ;;  %v2266_v54 = vcombine.low %v1355_v31, %v11094_v22  ;;  %v2273_v42 = vrot.slane %v2265_v40, %v10676_v48 }
  0x9a   : > { %9918 = vmatmul.mubr.msk.bf16.gmra.mrb[12].mxu0 %vm2995_vm8, %v4286_v38  ;;  %v604_v39 = vshll.u32 %v524_v13, 16  ;;  %v1354_v46 = vcombine.high %v1338_v3, %v1338_v3  ;;  %v4655_v44 = vrot.slane %v10797_v33, 2  ;;  %v1356_v47 = vcombine.high %v11094_v22, %v11094_v22 }
  0x9b   : > { %v11112_v5 = vld [vmem:[#allocation2 + $0x50] sm:$0xff]   ;;  %v2257_v4 = vcombine.low %v2249_v51, %v2256_v36  ;;  %v2280_v35 = vrot.slane %v2266_v54, %v10676_v48  ;;  %v4657_v56 = vrot.slane %v10819_v0, 2  ;;  %v433_v33 = vmul.f32 %v10985_v27, %v394_v45  ;;  %v396_v54 = vld [vmem:[%s10621_s14 + $0xc0] sm:$0xff] }
  0x9c   : > { %v11118_v26 = vld [vmem:[#allocation2 + $0x50] sm:$0xff]   ;;  %v606_v53 = vor.u32 %v604_v39, %v11100_v14  ;;  %v2289_v58 = vcombine.low %v1354_v46, %v1370_v19  ;;  %v11122_v59 = vsel %vm4653_vm10, %v4654_v23, %v4655_v44  ;;  %v2927_v18 = vshll.u32 %v11112_v5, 16  ;;  %v397_v46 = vld [vmem:[%s10621_s14 + $0xc8] sm:$0xff] }
  0x9d   : > { %v2264_v60 = vrot.slane %v2257_v4, %v10676_v48  ;;  %v2281_v7 = vcombine.low %v2273_v42, %v2280_v35  ;;  %v11129_v62 = vsel %vm3050_vm0, %v10854_v50, 0  ;;  %v4288_v13 = vshrl.u32 %v11118_v26, 16 }
  0x9e   : > { %v4291_v20 = vshll.u32 %v11118_v26, 16  ;;  %v2931_v19 = vshrl.u32 %v11112_v5, 16  ;;  %v687_v61 = vsel %vm10687_vm6, 0, %v606_v53  ;;  %v2929_v11 = vrot.slane %v2927_v18, 1 }
  0x9f   : > { %v2288_v57 = vrot.slane %v2281_v7, %v10676_v48  ;;  %2696 = vst.msk [vmem:[#allocation2 + $0x58] sm:$0xf] %vm1749_vm1, %v2264_v60  ;;  %v1371_v3 = vcombine.high %v687_v61, %v687_v61  ;;  %v1378_v52 = vrot.slane %v687_v61, %v10665_v32  ;;  %v4290_v50 = vrot.slane %v4288_v13, 1 }
  0xa0   : > { %v4293_v41 = vrot.slane %v4291_v20, 2  ;;  %v2297_v9 = vrot.slane %v2289_v58, %v10676_v48  ;;  %v434_v10 = vmul.f32 %v10985_v27, %v395_v63  ;;  %v2930_v1 = vsel %vm2846_vm7, %v2925_v15, %v2929_v11 }
  0xa1   : > { %2697 = vst.msk [vmem:[#allocation2 + $0x5c] sm:$0xf] %vm1749_vm1, %v2288_v57  ;;  %v1385_v22 = vrot.slane %v1371_v3, %v10665_v32  ;;  %v1386_v29 = vcombine.high %v1378_v52, %v1378_v52  ;;  %v11148_v2 = vsel %vm4653_vm10, %v4655_v44, %v4657_v56  ;;  %9770 = vmatmul.mubr.msk.bf16.gmra.mrb[16].mxu1 %vm2995_vm8, %v2930_v1  ;;  %v703_v38 = vsel %vm10687_vm6, %v11100_v14, 0 }
  0xa2   : > { %v11151_v31 = vor.u32 %v4293_v41, %v4290_v50  ;;  %v1394_v25 = vrot.slane %v1378_v52, %v10665_v32  ;;  %v472_v40 = vadd.f32 %v11001_v8, %v433_v33  ;;  %v473_v34 = vadd.f32 %v11001_v8, %v434_v10 }
  0xa3   : > { %v1401_v51 = vrot.slane %v1385_v22, %v10665_v32  ;;  %v1408_v23 = vrot.slane %v1386_v29, %v10665_v32  ;;  %v1387_v36 = vcombine.high %v1385_v22, %v1385_v22  ;;  %v1426_v58 = vrot.slane %v703_v38, %v10665_v32 }
  0xa4   : > { %v4295_v42 = vsel %vm4206_vm9, %v11096_v30, %v11151_v31  ;;  %v1416_v45 = vcombine.high %v1394_v25, %v1394_v25  ;;  %v2290_v15 = vcombine.low %v1356_v47, %v1394_v25  ;;  %v504_v39 = vmax.f32 %v472_v40, 0.0 }
  0xa5   : > { %9921 = vmatprep.mubr.msk.bf16.mxu0 %vm2995_vm8, %v4295_v42  ;;  %v1418_v44 = vcombine.high %v1408_v23, %v1408_v23  ;;  %v505_v5 = vmax.f32 %v473_v34, 0.0  ;;  %v1415_v4 = vrot.slane %v1387_v36, %v10665_v32  ;;  %v1417_v35 = vcombine.high %v1401_v51, %v1401_v51 }
  0xa6   : > { %v2304_v53 = vrot.slane %v2290_v15, %v10676_v48  ;;  %v2314_v14 = vcombine.low %v1416_v45, %v1401_v51  ;;  %v435_v33 = vmul.f32 %v10985_v27, %v396_v54  ;;  %v436_v47 = vmul.f32 %v10985_v27, %v397_v46 }
  0xa7   : > { %v2313_v18 = vcombine.low %v1408_v23, %v1418_v44  ;;  %v525_v30 = vpack.c.bf16 %v505_v5, %v504_v39  ;;  %v1419_v60 = vcombine.high %v1415_v4, %v1415_v4  ;;  %v1433_v20 = vrot.slane %v1426_v58, %v10665_v32 }
  0xa8   : > { %v11172_v7 = vld [vmem:[#allocation2 + $0x58] sm:$0xff]   ;;  %v2305_v63 = vcombine.low %v2297_v9, %v2304_v53  ;;  %v2328_v13 = vrot.slane %v2314_v14, %v10676_v48  ;;  %v474_v61 = vadd.f32 %v11001_v8, %v435_v33  ;;  %v2933_v29 = vor.u32 %v2931_v19, %v2929_v11  ;;  %v398_v53 = vld [vmem:[%s10621_s14 + $0xd0] sm:$0xff] }
  0xa9   : > { %v11177_v57 = vld [vmem:[#allocation2 + $0x58] sm:$0xff]   ;;  %v2321_v3 = vrot.slane %v2313_v18, %v10676_v48  ;;  %v608_v52 = vshrl.u32 %v525_v30, 16  ;;  %v611_v50 = vshll.u32 %v525_v30, 16  ;;  %v2337_v41 = vcombine.low %v1415_v4, %v1419_v60 }
  0xaa   : > { %v4297_v10 = vshrl.u32 %v11172_v7, 16  ;;  %v4300_v1 = vshll.u32 %v11172_v7, 16  ;;  %v2312_v22 = vrot.slane %v2305_v63, %v10676_v48  ;;  %v2338_v9 = vcombine.low %v1417_v35, %v1433_v20 }
  0xab   : > { %v2935_v25 = vshll.u32 %v11177_v57, 16  ;;  %v2329_v40 = vcombine.low %v2321_v3, %v2328_v13  ;;  %v610_v34 = vrot.slane %v608_v52, 7  ;;  %v2345_v38 = vrot.slane %v2337_v41, %v10676_v48 }
  0xac   : > { %v4299_v51 = vrot.slane %v4297_v10, 1  ;;  %v4302_v23 = vrot.slane %v4300_v1, 2  ;;  %2698 = vst.msk [vmem:[#allocation2 + $0x60] sm:$0xf] %vm1749_vm1, %v2312_v22  ;;  %v2352_v36 = vrot.slane %v2338_v9, %v10676_v48  ;;  %v475_v15 = vadd.f32 %v11001_v8, %v436_v47 }
  0xad   : > { %v2937_v54 = vrot.slane %v2935_v25, 1  ;;  %v2336_v42 = vrot.slane %v2329_v40, %v10676_v48  ;;  %v613_v45 = vor.u32 %v611_v50, %v610_v34  ;;  %v506_v39 = vmax.f32 %v474_v61, 0.0  ;;  %v399_v61 = vld [vmem:[%s10621_s14 + $0xd8] sm:$0xff] }
  0xae   : > { %v11189_v19 = vor.u32 %v4302_v23, %v4299_v51  ;;  %v2353_v11 = vcombine.low %v2345_v38, %v2352_v36  ;;  %v704_v46 = vsel %vm10687_vm6, %v610_v34, 0  ;;  %v2939_v5 = vshrl.u32 %v11177_v57, 16 }
  0xaf   : > { %v2938_v44 = vsel %vm2846_vm7, %v2933_v29, %v2937_v54  ;;  %2699 = vst.msk [vmem:[#allocation2 + $0x64] sm:$0xf] %vm1749_vm1, %v2336_v42  ;;  %v688_v4 = vsel %vm10687_vm6, 0, %v613_v45  ;;  %v507_v35 = vmax.f32 %v475_v15, 0.0  ;;  %v11207_v60 = vrot.slane %v704_v46, %v10665_v32  ;;  %v11241_v46 = vld [vmem:[%s14372_s3 + $0x1c] sm:$0xf] }
  0xb0   : > { %14478 = vst [vmem:[#allocation4_spill] sm:$0xff] %v11189_v19  ;;  %v4304_v14 = vsel %vm4206_vm9, %v11151_v31, %v11189_v19  ;;  %9773 = vmatprep.mubr.msk.bf16.mxu1 %vm2995_vm8, %v2938_v44  ;;  %v1441_v58 = vrot.slane %v688_v4, %v10665_v32  ;;  %v2360_v33 = vrot.slane %v2353_v11, %v10676_v48  ;;  %v4659_v47 = vrot.slane %v10874_v21, 2 }
  0xb1   : > { %v1434_v18 = vcombine.high %v688_v4, %v688_v4  ;;  %9922 = vmatmul.mubr.msk.bf16.gmra.mrb[16].mxu0 %vm2995_vm8, %v4304_v14  ;;  %v526_v30 = vpack.c.bf16 %v507_v35, %v506_v39  ;;  %v4661_v63 = vrot.slane %v10910_v12, 2  ;;  %v437_v3 = vmul.f32 %v10985_v27, %v398_v53 }
  0xb2   : > { %9943 = vmatprep.mubr.msk.bf16.mxu0 %vm2995_vm8, %v11122_v59  ;;  %v1449_v31 = vcombine.high %v1441_v58, %v1441_v58  ;;  %v1457_v13 = vrot.slane %v1441_v58, %v10665_v32  ;;  %2700 = vst.msk [vmem:[#allocation2 + $0x68] sm:$0xf] %vm1749_vm1, %v2360_v33  ;;  %v2941_v52 = vor.u32 %v2939_v5, %v2937_v54  ;;  %vm5406_vm12 = vsmask.f32 5376 }
  0xb3   : > { %v1448_v20 = vrot.slane %v1434_v18, %v10665_v32  ;;  %v615_v50 = vshrl.u32 %v526_v30, 16  ;;  %v618_v41 = vshll.u32 %v526_v30, 16  ;;  %v1496_v21 = vrot.slane %v11207_v60, %v10665_v32 }
  0xb4   : > { %v1471_v10 = vrot.slane %v1449_v31, %v10665_v32  ;;  %v1479_v1 = vcombine.high %v1457_v13, %v1457_v13  ;;  %v4660_v29 = vsel %vm4653_vm10, %v4657_v56, %v4659_v47  ;;  %v438_v25 = vmul.f32 %v10985_v27, %v399_v61 }
  0xb5   : > { %v1450_v59 = vcombine.high %v1448_v20, %v1448_v20  ;;  %v1464_v22 = vrot.slane %v1448_v20, %v10665_v32  ;;  %v617_v9 = vrot.slane %v615_v50, 7  ;;  %v476_v40 = vadd.f32 %v11001_v8, %v437_v3  ;;  %v400_v20 = vld [vmem:[%s10621_s14 + $0xe0] sm:$0xff] }
  0xb6   : > { %v11227_v34 = vld [vmem:[#allocation2 + $0x60] sm:$0xff]   ;;  %v1481_v51 = vcombine.high %v1471_v10, %v1471_v10  ;;  %v2361_v23 = vcombine.low %v1457_v13, %v1479_v1  ;;  %v4662_v42 = vsel %vm4653_vm10, %v4659_v47, %v4661_v63  ;;  %v477_v0 = vadd.f32 %v11001_v8, %v438_v25 }
  0xb7   : > { %v1478_v38 = vrot.slane %v1450_v59, %v10665_v32  ;;  %v1480_v36 = vcombine.high %v1464_v22, %v1464_v22  ;;  %v620_v54 = vor.u32 %v618_v41, %v617_v9  ;;  %v508_v45 = vmax.f32 %v476_v40, 0.0 }
  0xb8   : > { %v2943_v56 = vshll.u32 %v11227_v34, 16  ;;  %v2362_v15 = vcombine.low %v1471_v10, %v1481_v51  ;;  %v2369_v11 = vrot.slane %v2361_v23, %v10676_v48  ;;  %v705_v39 = vsel %vm10687_vm6, %v617_v9, 0 }
  0xb9   : > { %9944 = vmatmul.mubr.msk.bf16.vlgmr.msra.gmra.mrb[0].mxu0 %vm2995_vm8, %v11148_v2  ;;  %v689_v44 = vsel %vm10687_vm6, 0, %v620_v54  ;;  %v1482_v5 = vcombine.high %v1478_v38, %v1478_v38  ;;  %v2385_v4 = vcombine.low %v1464_v22, %v1480_v36  ;;  %v509_v35 = vmax.f32 %v477_v0, 0.0  ;;  %v401_v22 = vld [vmem:[%s10621_s14 + $0xe8] sm:$0xff] }
  0xba   : > { %v2945_v53 = vrot.slane %v2943_v56, 1  ;;  %9980 = vmatpush3.bf16.msra.mxu0 %v11129_v62  ;;  %v2376_v14 = vrot.slane %v2362_v15, %v10676_v48  ;;  %v1504_v58 = vrot.slane %v689_v44, %v10665_v32  ;;  %9947 = vmatprep.mubr.msk.bf16.mxu0 %vm2995_vm8, %v4660_v29  ;;  %v1497_v33 = vcombine.high %v689_v44, %v689_v44 }
  0xbb   : > { %v2386_v18 = vcombine.low %v1478_v38, %v1482_v5  ;;  %v2393_v2 = vrot.slane %v2385_v4, %v10676_v48  ;;  %v527_v30 = vpack.c.bf16 %v509_v35, %v508_v45  ;;  %v11253_v60 = vrot.slane %v705_v39, %v10665_v32  ;;  %10391 = vmatprep.subr.msk.bf16.mxu0 %vm3050_vm0, %v11241_v46 }
  0xbc   : > { %v2946_v62 = vsel %vm2846_vm7, %v2941_v52, %v2945_v53  ;;  %v2377_v47 = vcombine.low %v2369_v11, %v2376_v14  ;;  %v2947_v31 = vshrl.u32 %v11227_v34, 16  ;;  %v1512_v13 = vcombine.high %v1504_v58, %v1504_v58 }
  0xbd   : > { %9774 = vmatmul.mubr.msk.bf16.gmra.mrb[20].mxu1 %vm2995_vm8, %v2946_v62  ;;  %v1520_v61 = vrot.slane %v1504_v58, %v10665_v32  ;;  %v2400_v3 = vrot.slane %v2386_v18, %v10676_v48  ;;  %v622_v50 = vshrl.u32 %v527_v30, 16  ;;  %v625_v41 = vshll.u32 %v527_v30, 16 }
  0xbe   : > { %v2384_v10 = vrot.slane %v2377_v47, %v10676_v48  ;;  %v1534_v1 = vrot.slane %v1512_v13, %v10665_v32  ;;  %v1511_v59 = vrot.slane %v1497_v33, %v10665_v32  ;;  %v1559_v52 = vrot.slane %v11253_v60, %v10665_v32 }
  0xbf   : > { %v1542_v9 = vcombine.high %v1520_v61, %v1520_v61  ;;  %v2401_v29 = vcombine.low %v2393_v2, %v2400_v3  ;;  %v624_v25 = vrot.slane %v622_v50, 7  ;;  %v439_v40 = vmul.f32 %v10985_v27, %v400_v20 }
  0xc0   : > { %2701 = vst.msk [vmem:[#allocation2 + $0x6c] sm:$0xf] %vm1749_vm1, %v2384_v10  ;;  %v2409_v51 = vcombine.low %v1496_v21, %v1534_v1  ;;  %v1513_v23 = vcombine.high %v1511_v59, %v1511_v59  ;;  %v1527_v38 = vrot.slane %v1511_v59, %v10665_v32  ;;  %v1544_v36 = vcombine.high %v1534_v1, %v1534_v1 }
  0xc1   : > { %v2408_v54 = vrot.slane %v2401_v29, %v10676_v48  ;;  %v2410_v0 = vcombine.low %v1520_v61, %v1542_v9  ;;  %9948 = vmatmul.mubr.msk.bf16.gmra.mrb[4].mxu0 %vm2995_vm8, %v4662_v42  ;;  %v627_v45 = vor.u32 %v625_v41, %v624_v25  ;;  %v440_v56 = vmul.f32 %v10985_v27, %v401_v22 }
  0xc2   : > { %v2417_v15 = vrot.slane %v2409_v51, %v10676_v48  ;;  %v1541_v11 = vrot.slane %v1513_v23, %v10665_v32  ;;  %v1543_v39 = vcombine.high %v1527_v38, %v1527_v38  ;;  %v478_v44 = vadd.f32 %v11001_v8, %v439_v40 }
  0xc3   : > { %v2424_v21 = vrot.slane %v2410_v0, %v10676_v48  ;;  %2702 = vst.msk [vmem:[#allocation2 + $0x70] sm:$0xf] %vm1749_vm1, %v2408_v54  ;;  %v690_v5 = vsel %vm10687_vm6, 0, %v627_v45  ;;  %v479_v4 = vadd.f32 %v11001_v8, %v440_v56  ;;  %v706_v42 = vsel %vm10687_vm6, %v624_v25, 0 }
  0xc4   : > { %v1545_v35 = vcombine.high %v1541_v11, %v1541_v11  ;;  %v1567_v14 = vrot.slane %v690_v5, %v10665_v32  ;;  %v2433_v58 = vcombine.low %v1544_v36, %v1541_v11  ;;  %v2434_v33 = vcombine.low %v1527_v38, %v1543_v39 }
  0xc5   : > { %v2425_v18 = vcombine.low %v2417_v15, %v2424_v21  ;;  %v510_v2 = vmax.f32 %v478_v44, 0.0  ;;  %v511_v30 = vmax.f32 %v479_v4, 0.0  ;;  %v1560_v60 = vcombine.high %v690_v5, %v690_v5 }
  0xc6   : > { %v1575_v62 = vcombine.high %v1567_v14, %v1567_v14  ;;  %v1583_v47 = vrot.slane %v1567_v14, %v10665_v32  ;;  %v2441_v13 = vrot.slane %v2433_v58, %v10676_v48  ;;  %v2448_v20 = vrot.slane %v2434_v33, %v10676_v48 }
  0xc7   : > { %v11289_v61 = vld [vmem:[#allocation2 + $0x68] sm:$0xff]   ;;  %v2949_v3 = vor.u32 %v2947_v31, %v2945_v53  ;;  %v2432_v50 = vrot.slane %v2425_v18, %v10676_v48  ;;  %v528_v41 = vpack.c.bf16 %v511_v30, %v510_v2  ;;  %v1574_v10 = vrot.slane %v1560_v60, %v10665_v32  ;;  %v402_v2 = vld [vmem:[%s10621_s14 + $0xf0] sm:$0xff] }
  0xc8   : > { %v1597_v1 = vrot.slane %v1575_v62, %v10665_v32  ;;  %v2449_v59 = vcombine.low %v2441_v13, %v2448_v20  ;;  %v2457_v22 = vcombine.low %v1545_v35, %v1583_v47  ;;  %v1615_v9 = vrot.slane %v706_v42, %v10665_v32 }
  0xc9   : > { %v2951_v29 = vshll.u32 %v11289_v61, 16  ;;  %2703 = vst.msk [vmem:[#allocation2 + $0x74] sm:$0xf] %vm1749_vm1, %v2432_v50  ;;  %v629_v25 = vshrl.u32 %v528_v41, 16  ;;  %v632_v40 = vshll.u32 %v528_v41, 16  ;;  %v1605_v51 = vcombine.high %v1583_v47, %v1583_v47 }
  0xca   : > { %v2456_v53 = vrot.slane %v2449_v59, %v10676_v48  ;;  %v2458_v31 = vcombine.low %v1559_v52, %v1597_v1  ;;  %v2465_v23 = vrot.slane %v2457_v22, %v10676_v48  ;;  %v1576_v38 = vcombine.high %v1574_v10, %v1574_v10 }
  0xcb   : > { %v2953_v36 = vrot.slane %v2951_v29, 1  ;;  %v631_v54 = vrot.slane %v629_v25, 7  ;;  %v1590_v0 = vrot.slane %v1574_v10, %v10665_v32  ;;  %v1607_v45 = vcombine.high %v1597_v1, %v1597_v1  ;;  %v403_v1 = vld [vmem:[%s10621_s14 + $0xf8] sm:$0xff] }
  0xcc   : > { %v2472_v56 = vrot.slane %v2458_v31, %v10676_v48  ;;  %2704 = vst.msk [vmem:[#allocation2 + $0x78] sm:$0xf] %vm1749_vm1, %v2456_v53  ;;  %v1604_v15 = vrot.slane %v1576_v38, %v10665_v32  ;;  %v1622_v11 = vrot.slane %v1615_v9, %v10665_v32  ;;  %v4663_v39 = vrot.slane %v10960_v49, 2 }
  0xcd   : > { %v2954_v52 = vsel %vm2846_vm7, %v2949_v3, %v2953_v36  ;;  %v2955_v44 = vshrl.u32 %v11289_v61, 16  ;;  %v634_v21 = vor.u32 %v632_v40, %v631_v54  ;;  %v1606_v5 = vcombine.high %v1590_v0, %v1590_v0 }
  0xce   : > { %9777 = vmatprep.mubr.msk.bf16.mxu1 %vm2995_vm8, %v2954_v52  ;;  %v2473_v4 = vcombine.low %v2465_v23, %v2472_v56  ;;  %v1608_v42 = vcombine.high %v1604_v15, %v1604_v15  ;;  %v2481_v35 = vcombine.low %v1605_v51, %v1590_v0  ;;  %v2482_v14 = vcombine.low %v1607_v45, %v1604_v15 }
  0xcf   : > { %v691_v58 = vsel %vm10687_vm6, 0, %v634_v21  ;;  %v2505_v33 = vcombine.low %v1606_v5, %v1622_v11  ;;  %v4664_v49 = vsel %vm4653_vm10, %v4661_v63, %v4663_v39  ;;  %v4665_v18 = vrot.slane %v10994_v37, 2 }
  0xd0   : > { %v11315_v30 = vld [vmem:[#allocation2 + $0x70] sm:$0xff]   ;;  %v2480_v60 = vrot.slane %v2473_v4, %v10676_v48  ;;  %v1630_v62 = vrot.slane %v691_v58, %v10665_v32  ;;  %v2489_v47 = vrot.slane %v2481_v35, %v10676_v48  ;;  %v2496_v13 = vrot.slane %v2482_v14, %v10676_v48  ;;  %9951 = vmatprep.mubr.msk.bf16.mxu0 %vm2995_vm8, %v4664_v49 }
  0xd1   : > { %v2957_v20 = vor.u32 %v2955_v44, %v2953_v36  ;;  %v4666_v12 = vsel %vm4653_vm10, %v4663_v39, %v4665_v18  ;;  %v707_v37 = vsel %vm10687_vm6, %v631_v54, 0  ;;  %v1623_v63 = vcombine.high %v691_v58, %v691_v58 }
  0xd2   : > { %v2959_v3 = vshll.u32 %v11315_v30, 16  ;;  %2705 = vst.msk [vmem:[#allocation2 + $0x7c] sm:$0xf] %vm1749_vm1, %v2480_v60  ;;  %v1646_v50 = vrot.slane %v1630_v62, %v10665_v32  ;;  %v2497_v41 = vcombine.low %v2489_v47, %v2496_v13  ;;  %v2513_v10 = vrot.slane %v2505_v33, %v10676_v48  ;;  %9952 = vmatmul.mubr.msk.bf16.gmra.mrb[8].mxu0 %vm2995_vm8, %v4666_v12 }
  0xd3   : > { %v1637_v59 = vrot.slane %v1623_v63, %v10665_v32  ;;  %v1638_v22 = vcombine.high %v1630_v62, %v1630_v62  ;;  %v1678_v9 = vrot.slane %v707_v37, %v10665_v32  ;;  %v441_v29 = vmul.f32 %v10985_v27, %v402_v2 }
  0xd4   : > { %v2961_v25 = vrot.slane %v2959_v3, 1  ;;  %v2504_v40 = vrot.slane %v2497_v41, %v10676_v48  ;;  %v2506_v51 = vcombine.low %v1608_v42, %v1646_v50  ;;  %v1668_v53 = vcombine.high %v1646_v50, %v1646_v50  ;;  %v11361_v50 = vld [vmem:[#allocation2 + $0x60] sm:$0xff]  }
  0xd5   : > { %v1639_v31 = vcombine.high %v1637_v59, %v1637_v59  ;;  %v1653_v23 = vrot.slane %v1637_v59, %v10665_v32  ;;  %v1660_v38 = vrot.slane %v1638_v22, %v10665_v32  ;;  %v1685_v36 = vrot.slane %v1678_v9, %v10665_v32 }
  0xd6   : > { %v2962_v54 = vsel %vm2846_vm7, %v2957_v20, %v2961_v25  ;;  %v2963_v0 = vshrl.u32 %v11315_v30, 16  ;;  %v2520_v45 = vrot.slane %v2506_v51, %v10676_v48  ;;  %2706 = vst.msk [vmem:[#allocation2 + $0x80] sm:$0xf] %vm1749_vm1, %v2504_v40  ;;  %v442_v56 = vmul.f32 %v10985_v27, %v403_v1 }
  0xd7   : > { %9778 = vmatmul.mubr.msk.bf16.gmra.mrb[24].mxu1 %vm2995_vm8, %v2962_v54  ;;  %v1667_v15 = vrot.slane %v1639_v31, %v10665_v32  ;;  %v1669_v11 = vcombine.high %v1653_v23, %v1653_v23  ;;  %v1670_v39 = vcombine.high %v1660_v38, %v1660_v38  ;;  %v2530_v52 = vcombine.low %v1668_v53, %v1653_v23  ;;  %v11375_v31 = vld [vmem:[#allocation2 + $0x68] sm:$0xff]  }
  0xd8   : > { %v2521_v44 = vcombine.low %v2513_v10, %v2520_v45  ;;  %v480_v21 = vadd.f32 %v11001_v8, %v441_v29  ;;  %v481_v5 = vadd.f32 %v11001_v8, %v442_v56  ;;  %v4667_v4 = vrot.slane %v11024_v28, 2 }
  0xd9   : > { %v11348_v42 = vld [vmem:[#allocation2 + $0x78] sm:$0xff]   ;;  %v1671_v35 = vcombine.high %v1667_v15, %v1667_v15  ;;  %v2529_v14 = vcombine.low %v1660_v38, %v1670_v39  ;;  %v2544_v27 = vrot.slane %v2530_v52, %v10676_v48  ;;  %v2554_v58 = vcombine.low %v1669_v11, %v1685_v36  ;;  %v11389_v39 = vld [vmem:[#allocation2 + $0x70] sm:$0xff]  }
  0xda   : > { %v2528_v33 = vrot.slane %v2521_v44, %v10676_v48  ;;  %v512_v49 = vmax.f32 %v480_v21, 0.0  ;;  %v513_v2 = vmax.f32 %v481_v5, 0.0  ;;  %v4668_v60 = vsel %vm4653_vm10, %v4665_v18, %v4667_v4 }
  0xdb   : > { %v2965_v62 = vor.u32 %v2963_v0, %v2961_v25  ;;  %v2967_v47 = vshll.u32 %v11348_v42, 16  ;;  %v2537_v8 = vrot.slane %v2529_v14, %v10676_v48  ;;  %v2553_v13 = vcombine.low %v1667_v15, %v1671_v35  ;;  %9955 = vmatprep.mubr.msk.bf16.mxu0 %vm2995_vm8, %v4668_v60 }
  0xdc   : > { %2707 = vst.msk [vmem:[#allocation2 + $0x84] sm:$0xf] %vm1749_vm1, %v2528_v33  ;;  %v2568_v28 = vrot.slane %v2554_v58, %v10676_v48  ;;  %v529_v20 = vpack.c.bf16 %v513_v2, %v512_v49  ;;  %v4669_v12 = vrot.slane %v11074_v55, 2  ;;  %v4671_v37 = vrot.slane %v11118_v26, 2 }
  0xdd   : > { %v2969_v63 = vrot.slane %v2967_v47, 1  ;;  %v2545_v3 = vcombine.low %v2537_v8, %v2544_v27  ;;  %v2561_v18 = vrot.slane %v2553_v13, %v10676_v48  ;;  %v2971_v55 = vshrl.u32 %v11348_v42, 16 }
  0xde   : > { %v636_v41 = vshrl.u32 %v529_v20, 16  ;;  %v639_v10 = vshll.u32 %v529_v20, 16  ;;  %v4670_v1 = vsel %vm4653_vm10, %v4667_v4, %v4669_v12  ;;  %v4672_v59 = vsel %vm4653_vm10, %v4669_v12, %v4671_v37 }
  0xdf   : > { %v2970_v22 = vsel %vm2846_vm7, %v2965_v62, %v2969_v63  ;;  %v2552_v9 = vrot.slane %v2545_v3, %v10676_v48  ;;  %v2569_v29 = vcombine.low %v2561_v18, %v2568_v28  ;;  %9956 = vmatmul.mubr.msk.bf16.gmra.mrb[12].mxu0 %vm2995_vm8, %v4670_v1  ;;  %v4673_v25 = vrot.slane %v11172_v7, 2 }
  0xe0   : > { %9781 = vmatprep.mubr.msk.bf16.mxu1 %vm2995_vm8, %v2970_v22  ;;  %v638_v26 = vrot.slane %v636_v41, 7  ;;  %9959 = vmatprep.mubr.msk.bf16.mxu0 %vm2995_vm8, %v4672_v59  ;;  %v4675_v51 = vrot.slane %v11361_v50, 2  ;;  %v2973_v54 = vor.u32 %v2971_v55, %v2969_v63  ;;  %v4677_v52 = vrot.slane %v11375_v31, 2  ;;  %v11410_v63 = vld [vmem:[#allocation2 + $0x78] sm:$0xff]  }
  0xe1   : > { %v2576_v40 = vrot.slane %v2569_v29, %v10676_v48  ;;  %2708 = vst.msk [vmem:[#allocation2 + $0x88] sm:$0xf] %vm1749_vm1, %v2552_v9  ;;  %v4674_v0 = vsel %vm4653_vm10, %v4671_v37, %v4673_v25  ;;  %v4679_v49 = vrot.slane %v11389_v39, 2  ;;  %vm5853_vm13 = vcmask 1044480  }
  0xe2   : > { %v641_v53 = vor.u32 %v639_v10, %v638_v26  ;;  %v708_v23 = vsel %vm10687_vm6, %v638_v26, 0  ;;  %v4676_v11 = vsel %vm4653_vm10, %v4673_v25, %v4675_v51  ;;  %v4678_v13 = vsel %vm4653_vm10, %v4675_v51, %v4677_v52 }
  0xe3   : > { %v11379_v38 = vld [vmem:[#allocation2 + $0x80] sm:$0xff]   ;;  %2709 = vst.msk [vmem:[#allocation2 + $0x8c] sm:$0xf] %vm1749_vm1, %v2576_v40  ;;  %v1741_v36 = vrot.slane %v708_v23, %v10665_v32  ;;  %v4680_v41 = vsel %vm4653_vm10, %v4677_v52, %v4679_v49  ;;  %v4681_v26 = vrot.slane %v11410_v63, 2  ;;  %v11438_v52 = vld [vmem:[#allocation2 + $0x14] sm:$0xf] }
  0xe4   : > { %v692_v7 = vsel %vm10687_vm6, 0, %v641_v53  ;;  %v2975_v45 = vshll.u32 %v11379_v38, 16  ;;  %v2979_v35 = vshrl.u32 %v11379_v38, 16  ;;  %v11414_v10 = vld [vmem:[#allocation2 + $0x80] sm:$0xff]  }
  0xe5   : > { %v1686_v56 = vcombine.high %v692_v7, %v692_v7  ;;  %v1693_v15 = vrot.slane %v692_v7, %v10665_v32  ;;  %v1748_v44 = vrot.slane %v1741_v36, %v10665_v32  ;;  %v4683_v51 = vrot.slane %v11414_v10, 2 }
  0xe6   : > { %v2977_v21 = vrot.slane %v2975_v45, 1 }
  0xe7   : > { %v1700_v5 = vrot.slane %v1686_v56, %v10665_v32  ;;  %v1701_v6 = vcombine.high %v1693_v15, %v1693_v15  ;;  %v1709_v4 = vrot.slane %v1693_v15, %v10665_v32  ;;  %9960 = vmatmul.mubr.msk.bf16.gmra.mrb[16].mxu0 %vm2995_vm8, %v4674_v0  ;;  %v2631_v14 = vrot.slane %v1748_v44, %v10676_v48 }
  0xe8   : > { %9963 = vmatprep.mubr.msk.bf16.mxu0 %vm2995_vm8, %v4676_v11  ;;  %v2978_v27 = vsel %vm2846_vm7, %v2973_v54, %v2977_v21  ;;  %v2981_v20 = vor.u32 %v2979_v35, %v2977_v21  ;;  %v4682_v54 = vsel %vm4653_vm10, %v4679_v49, %v4681_v26  ;;  %v4684_v0 = vsel %vm4653_vm10, %v4681_v26, %v4683_v51  ;;  %v4961_v11 = vld [vmem:[#allocation2 + $0x10] sm:$0xc] }
  0xe9   : > { %v1702_v58 = vcombine.high %v1700_v5, %v1700_v5  ;;  %v1723_v33 = vrot.slane %v1701_v6, %v10665_v32  ;;  %9782 = vmatmul.mubr.msk.bf16.gmra.mrb[28].mxu1 %vm2995_vm8, %v2978_v27  ;;  %v1731_v60 = vcombine.high %v1709_v4, %v1709_v4  ;;  %v1716_v62 = vrot.slane %v1700_v5, %v10665_v32  ;;  %v11448_v6 = vld [vmem:[#allocation2 + $0x18] sm:$0xff]  }
  0xea   : > { %v11403_v2 = vld [vmem:[#allocation2 + $0x88] sm:$0xff]   ;;  %v2638_v47 = vrot.slane %v2631_v14, %v10676_v48 }
  0xeb   : > { %v1733_v8 = vcombine.high %v1723_v33, %v1723_v33  ;;  %v1730_v28 = vrot.slane %v1702_v58, %v10665_v32  ;;  %v2983_v12 = vshll.u32 %v11403_v2, 16  ;;  %v2577_v37 = vcombine.low %v1709_v4, %v1731_v60  ;;  %v11428_v7 = vld [vmem:[#allocation2 + $0x88] sm:$0xff]  }
  0xec   : > { %v1732_v3 = vcombine.high %v1716_v62, %v1716_v62  ;;  %2712 = vst.msk [vmem:[#allocation2 + $0x98] sm:$0x1] %vm1752_vm2, %v2638_v47  ;;  %v4685_v56 = vrot.slane %v11428_v7, 2  ;;  %v2987_v15 = vshrl.u32 %v11403_v2, 16  ;;  %v5094_v60 = vrot.slane %v11448_v6, 2 }
  0xed   : > { %v2578_v18 = vcombine.low %v1723_v33, %v1733_v8  ;;  %v1734_v1 = vcombine.high %v1730_v28, %v1730_v28  ;;  %v2985_v59 = vrot.slane %v2983_v12, 1  ;;  %v2585_v22 = vrot.slane %v2577_v37, %v10676_v48  ;;  %v10483_v37 = vld [vmem:[%s14372_s3 + $0x8] sm:$0xf] }
  0xee   : > { %v2601_v9 = vcombine.low %v1716_v62, %v1732_v3  ;;  %v4686_v5 = vsel %vm4653_vm10, %v4683_v51, %v4685_v56 }
  0xef   : > { %v2592_v32 = vrot.slane %v2578_v18, %v10676_v48  ;;  %9964 = vmatmul.mubr.msk.bf16.gmra.mrb[20].mxu0 %vm2995_vm8, %v4678_v13  ;;  %v2602_v29 = vcombine.low %v1730_v28, %v1734_v1  ;;  %v2986_v55 = vsel %vm2846_vm7, %v2981_v20, %v2985_v59  ;;  %v2989_v4 = vor.u32 %v2987_v15, %v2985_v59  ;;  %v11465_v13 = vld [vmem:[#allocation2 + $0x20] sm:$0xff]   ;;  %v11468_v20 = vld [vmem:[#allocation2 + $0x28] sm:$0xff]   ;;  %v11487_v1 = vld [vmem:[#allocation2 + $0x10] sm:$0xff]  }
  0xf0   : > { %9967 = vmatprep.mubr.msk.bf16.mxu0 %vm2995_vm8, %v4680_v41  ;;  %v2609_v25 = vrot.slane %v2601_v9, %v10676_v48  ;;  %9785 = vmatprep.mubr.msk.bf16.mxu1 %vm2995_vm8, %v2986_v55  ;;  %v5096_v12 = vrot.slane %v11465_v13, 2  ;;  %v5098_v3 = vrot.slane %v11468_v20, 2  ;;  %v11481_v18 = vld [vmem:[%s14372_s3 + $0xc] sm:$0xf]  ;;  %v5632_v9 = vsel %vm3050_vm0, %v11241_v46, 0 }
  0xf1   : > { %v2593_v40 = vcombine.low %v2585_v22, %v2592_v32  ;;  %v2616_v53 = vrot.slane %v2602_v29, %v10676_v48  ;;  %v11483_v41 = vld [vmem:[#allocation2 + $0x8] sm:$0xff]   ;;  %v11492_v22 = vld [vmem:[#allocation2 + $0x30] sm:$0xff]   ;;  %v11497_v29 = vld [vmem:[#allocation2 + $0x38] sm:$0xff]  }
  0xf2   : > { %v5097_v59 = vsel %vm4653_vm10, %v5094_v60, %v5096_v12  ;;  %v5099_v32 = vsel %vm4653_vm10, %v5096_v12, %v5098_v3  ;;  %v11504_v55 = vld [vmem:[%s14372_s3 + $0x20] sm:$0xf]  ;;  %v5100_v26 = vrot.slane %v11492_v22, 2  ;;  %v5102_v46 = vrot.slane %v11497_v29, 2  ;;  %v11566_v12 = vld [vmem:[#allocation2 + $0x48] sm:$0xff]  }
  0xf3   : > { %v2600_v23 = vrot.slane %v2593_v40, %v10676_v48  ;;  %v2617_v36 = vcombine.low %v2609_v25, %v2616_v53  ;;  %v11440_v44 = vld [vmem:[#allocation2 + $0x98] ss:$0 sps:$4 sm:$0x33]   ;;  %v11516_v40 = vld [vmem:[#allocation2 + $0x20] sm:$0xff]  }
  0xf4   : > { %14479 = vst [vmem:[#allocation5_spill] sm:$0xff] %v11440_v44  ;;  %v4689_v33 = vrot.slane %v11440_v44, 2  ;;  %v11512_v25 = vld [vmem:[#allocation2 + $0x18] sm:$0xff]   ;;  %v5101_v51 = vsel %vm4653_vm10, %v5098_v3, %v5100_v26  ;;  %v11521_v53 = vld [vmem:[#allocation2 + $0x40] sm:$0xff]   ;;  %v11575_v3 = vld [vmem:[#allocation2 + $0x70] sm:$0xff]  }
  0xf5   : > { %2710 = vst.msk [vmem:[#allocation2 + $0x90] sm:$0xf] %vm1749_vm1, %v2600_v23  ;;  %v2624_v45 = vrot.slane %v2617_v36, %v10676_v48  ;;  %v11446_v48 = vcombine.low %v4961_v11, %v11438_v52  ;;  %v5103_v23 = vsel %vm4653_vm10, %v5100_v26, %v5102_v46  ;;  %v11524_v36 = vld [vmem:[#allocation2 + $0x48] sm:$0xff]   ;;  %v11539_v11 = vld [vmem:[#allocation2 + $0x50] sm:$0xff]  }
  0xf7   : > { %9968 = vmatmul.mubr.msk.bf16.gmra.mrb[24].mxu0 %vm2995_vm8, %v4682_v54  ;;  %2711 = vst.msk [vmem:[#allocation2 + $0x94] sm:$0xf] %vm1749_vm1, %v2624_v45  ;;  %v5093_v49 = vrot.slane %v11446_v48, 2  ;;  %v5104_v54 = vrot.slane %v11521_v53, 2  ;;  %v11530_v45 = vld [vmem:[#allocation2 + $0x28] sm:$0xff]  }
  0xf8   : > { %9971 = vmatprep.mubr.msk.bf16.mxu0 %vm2995_vm8, %v4684_v0  ;;  %v5106_v0 = vrot.slane %v11524_v36, 2 }
  0xf9   : > { %v5095_v28 = vsel %vm4653_vm10, %v5093_v49, %v5094_v60  ;;  %v5105_v15 = vsel %vm4653_vm10, %v5102_v46, %v5104_v54  ;;  %v11557_v60 = vld [vmem:[#allocation2 + $0x60] sm:$0xff]  }
  0xfc   : > { %v11442_v21 = vld [vmem:[#allocation2 + $0x90] ss:$0 sps:$4 sm:$0x11]  }
  0xfd   : > { %v2991_v35 = vshll.u32 %v11442_v21, 16 }
  0xfe   : > { %v11451_v14 = vld [vmem:[#allocation2 + $0x90] sm:$0xff]  }
  0xff   : > { %14480 = vst [vmem:[#allocation6_spill] sm:$0xff] %v11451_v14  ;;  %9972 = vmatmul.mubr.msk.bf16.gmra.mrb[28].mxu0 %vm2995_vm8, %v4686_v5  ;;  %v2993_v27 = vrot.slane %v2991_v35, 1  ;;  %v4687_v58 = vrot.slane %v11451_v14, 2  ;;  %v5107_v5 = vsel %vm4653_vm10, %v5104_v54, %v5106_v0  ;;  %v5108_v35 = vrot.slane %v11539_v11, 2  ;;  %v11592_v54 = vld [vmem:[#allocation2 + $0x88] sm:$0xff]  }
 0x101   : > { %v2994_v62 = vsel %vm2846_vm7, %v2989_v4, %v2993_v27  ;;  %v4688_v47 = vsel %vm4653_vm10, %v4685_v56, %v4687_v58  ;;  %v4690_v8 = vsel %vm4653_vm10, %v4687_v58, %v4689_v33  ;;  %v11534_v56 = vld [vmem:[#allocation2 + $0x30] sm:$0xff]   ;;  %v11542_v4 = vld [vmem:[#allocation2 + $0x58] sm:$0xff]   ;;  %v11552_v33 = vld [vmem:[#allocation2 + $0x40] sm:$0xff]   ;;  %v5109_v49 = vsel %vm4653_vm10, %v5106_v0, %v5108_v35 }
 0x102   : > { %9786 = vmatmul.mubr.msk.bf16.gmra.mrb[32].mxu1 %vm2995_vm8, %v2994_v62  ;;  %9975 = vmatprep.mubr.msk.bf16.mxu0 %vm2995_vm8, %v4688_v47  ;;  %v5110_v27 = vrot.slane %v11542_v4, 2  ;;  %v11548_v58 = vld [vmem:[#allocation2 + $0x38] sm:$0xff]   ;;  %v11560_v47 = vld [vmem:[#allocation2 + $0x68] sm:$0xff]  }
 0x103   : > { %9791 = vmatprep.mubr.msk.bf16.mxu1 %vm2995_vm8, %v10673_v43  ;;  %v3546_v43 = vsel %vm3050_vm0, %v10483_v37, 0  ;;  %v11570_v37 = vld [vmem:[#allocation2 + $0x50] sm:$0xff]  }
 0x104   : > { %v5111_v62 = vsel %vm4653_vm10, %v5108_v35, %v5110_v27 }
 0x107   : > { %9976 = vmatmul.mubr.msk.bf16.gmra.mrb[32].mxu0 %vm2995_vm8, %v4690_v8  ;;  %v5112_v8 = vrot.slane %v11557_v60, 2 }
 0x108   : > { %9981 = vmatprep.mubr.msk.bf16.mxu0 %vm2995_vm8, %v5095_v28  ;;  %v5114_v28 = vrot.slane %v11560_v47, 2 }
 0x10a   : > { %9792 = vmatmul.mubr.msk.bf16.vlgmr.msra.gmra.mrb[0].mxu1 %vm2995_vm8, %v11483_v41 }
 0x10b   : > { %9795 = vmatprep.mubr.msk.bf16.mxu1 %vm2995_vm8, %v11487_v1  ;;  %9828 = vmatpush3.bf16.msra.mxu1 %v3546_v43  ;;  %v5113_v43 = vsel %vm4653_vm10, %v5110_v27, %v5112_v8  ;;  %v11606_v27 = vld [vmem:[#allocation2 + $0x98] sm:$0xff]  }
 0x10c   : > { %10386 = vmatprep.subr.msk.bf16.mxu1 %vm3050_vm0, %v11481_v18 }
 0x10f   : > { %9982 = vmatmul.mubr.msk.bf16.vlgmr.msra.gmra.mrb[0].mxu0 %vm2995_vm8, %v5097_v59  ;;  %v5115_v59 = vsel %vm4653_vm10, %v5112_v8, %v5114_v28 }
 0x110   : > { %10018 = vmatpush3.bf16.msra.mxu0 %v5632_v9  ;;  %9985 = vmatprep.mubr.msk.bf16.mxu0 %vm2995_vm8, %v5099_v32  ;;  %v11578_v9 = vld [vmem:[#allocation2 + $0x78] sm:$0xff]   ;;  %v5116_v32 = vrot.slane %v11575_v3, 2 }
 0x111   : > { %10392 = vmatprep.subr.msk.bf16.mxu0 %vm3050_vm0, %v11504_v55  ;;  %v5118_v26 = vrot.slane %v11578_v9, 2 }
 0x112   : > { %9796 = vmatmul.mubr.msk.bf16.gmra.mrb[4].mxu1 %vm2995_vm8, %v11512_v25  ;;  %v5117_v46 = vsel %vm4653_vm10, %v5114_v28, %v5116_v32  ;;  %v5408_v28 = vshrl.u32 %v11446_v48, 16 }
 0x113   : > { %9799 = vmatprep.mubr.msk.bf16.mxu1 %vm2995_vm8, %v11516_v40 }
 0x117   : > { %9986 = vmatmul.mubr.msk.bf16.gmra.mrb[4].mxu0 %vm2995_vm8, %v5101_v51  ;;  %v11589_v51 = vld [vmem:[#allocation2 + $0x80] sm:$0xff]  }
 0x118   : > { %9989 = vmatprep.mubr.msk.bf16.mxu0 %vm2995_vm8, %v5103_v23  ;;  %v5119_v23 = vsel %vm4653_vm10, %v5116_v32, %v5118_v26  ;;  %v5120_v0 = vrot.slane %v11589_v51, 2  ;;  %v5416_v32 = vshrl.u32 %v11448_v6, 16 }
 0x11a   : > { %9800 = vmatmul.mubr.msk.bf16.gmra.mrb[8].mxu1 %vm2995_vm8, %v11530_v45 }
 0x11b   : > { %9803 = vmatprep.mubr.msk.bf16.mxu1 %vm2995_vm8, %v11534_v56 }
 0x11f   : > { %9990 = vmatmul.mubr.msk.bf16.gmra.mrb[8].mxu0 %vm2995_vm8, %v5105_v15  ;;  %v5122_v15 = vrot.slane %v11592_v54, 2 }
 0x120   : > { %9993 = vmatprep.mubr.msk.bf16.mxu0 %vm2995_vm8, %v5107_v5  ;;  %v3447_v5 = vld [vmem:[#allocation2] sm:$0xe] }
 0x121   : > { %v5123_v35 = vsel %vm4653_vm10, %v5120_v0, %v5122_v15 }
 0x122   : > { %9804 = vmatmul.mubr.msk.bf16.gmra.mrb[12].mxu1 %vm2995_vm8, %v11548_v58 }
 0x123   : > { %9807 = vmatprep.mubr.msk.bf16.mxu1 %vm2995_vm8, %v11552_v33 }
 0x127   : > { %9994 = vmatmul.mubr.msk.bf16.gmra.mrb[12].mxu0 %vm2995_vm8, %v5109_v49  ;;  %v10494_v49 = vld [vmem:[#allocation2 + $0x4] sm:$0xf] }
 0x128   : > { %9997 = vmatprep.mubr.msk.bf16.mxu0 %vm2995_vm8, %v5111_v62  ;;  %v9336_v62 = vcombine.low %v3447_v5, %v10494_v49  ;;  %v5410_v5 = vrot.slane %v5408_v28, 2  ;;  %v5418_v49 = vrot.slane %v5416_v32, 2  ;;  %v5434_v28 = vshrl.u32 %v11468_v20, 16 }
 0x129   : > { %v3459_v32 = vrot.slane %v11512_v25, 1  ;;  %v5446_v25 = vshll.u32 %v11492_v22, 16 }
 0x12a   : > { %9808 = vmatmul.mubr.msk.bf16.gmra.mrb[16].mxu1 %vm2995_vm8, %v11566_v12 }
 0x12b   : > { %9811 = vmatprep.mubr.msk.bf16.mxu1 %vm2995_vm8, %v11570_v37 }
 0x12f   : > { %9998 = vmatmul.mubr.msk.bf16.gmra.mrb[16].mxu0 %vm2995_vm8, %v5113_v43  ;;  %v5126_v43 = vrot.slane %v11606_v27, 2 }
 0x130   : > { %10001 = vmatprep.mubr.msk.bf16.mxu0 %vm2995_vm8, %v5115_v59  ;;  %v5411_v59 = vshll.u32 %v11446_v48, 16 }
 0x132   : > { %9812 = vmatmul.mubr.msk.bf16.gmra.mrb[20].mxu1 %vm2995_vm8, %v11177_v57  ;;  %v5121_v57 = vsel %vm4653_vm10, %v5118_v26, %v5120_v0  ;;  %v5419_v26 = vshll.u32 %v11448_v6, 16 }
 0x133   : > { %9815 = vmatprep.mubr.msk.bf16.mxu1 %vm2995_vm8, %v11227_v34  ;;  %v11603_v34 = vld [vmem:[#allocation2 + $0x90] sm:$0xff]  }
 0x134   : > { %v5124_v8 = vrot.slane %v11603_v34, 2  ;;  %v5421_v16 = vrot.slane %v5419_v26, 3 }
 0x136   : > { %v5125_v0 = vsel %vm4653_vm10, %v5122_v15, %v5124_v8  ;;  %v5127_v48 = vsel %vm4653_vm10, %v5124_v8, %v5126_v43  ;;  %v5422_v15 = vor.u32 %v5421_v16, %v5418_v49  ;;  %v5437_v8 = vshll.u32 %v11468_v20, 16 }
 0x137   : > { %10002 = vmatmul.mubr.msk.bf16.gmra.mrb[20].mxu0 %vm2995_vm8, %v5117_v46  ;;  %v3454_v46 = vrot.slane %v9336_v62, 1  ;;  %v5425_v62 = vshrl.u32 %v11465_v13, 16  ;;  %v5455_v49 = vshll.u32 %v11497_v29, 16 }
 0x138   : > { %10005 = vmatprep.mubr.msk.bf16.mxu0 %vm2995_vm8, %v5119_v23  ;;  %v3455_v23 = vrot.slane %v11483_v41, 1  ;;  %v5428_v41 = vshll.u32 %v11465_v13, 16 }
 0x13a   : > { %9816 = vmatmul.mubr.msk.bf16.gmra.mrb[24].mxu1 %vm2995_vm8, %v11289_v61  ;;  %v3456_v44 = vsel %vm3453_vm11, %v3454_v46, %v3455_v23  ;;  %v5427_v46 = vrot.slane %v5425_v62, 2  ;;  %v3463_v62 = vrot.slane %v11530_v45, 1 }
 0x13b   : > { %9819 = vmatprep.mubr.msk.bf16.mxu1 %vm2995_vm8, %v11315_v30 }
 0x13f   : > { %10006 = vmatmul.mubr.msk.bf16.gmra.mrb[24].mxu0 %vm2995_vm8, %v5121_v57  ;;  %v10477_v57 = vld [vmem:[#allocation2 + $0xa0] ss:$0 sps:$4 sm:$0x33]  }
 0x140   : > { %10009 = vmatprep.mubr.msk.bf16.mxu0 %vm2995_vm8, %v5123_v35  ;;  %v5413_v35 = vrot.slane %v5411_v59, 3  ;;  %v5128_v19 = vrot.slane %v10477_v57, 2  ;;  %v3457_v59 = vrot.slane %v11487_v1, 1  ;;  %v5436_v57 = vrot.slane %v5434_v28, 2 }
 0x142   : > { %9820 = vmatmul.mubr.msk.bf16.gmra.mrb[28].mxu1 %vm2995_vm8, %v11348_v42  ;;  %v5414_v14 = vor.u32 %v5413_v35, %v5410_v5  ;;  %v5129_v26 = vsel %vm4653_vm10, %v5126_v43, %v5128_v19  ;;  %v5439_v5 = vrot.slane %v5437_v8, 3  ;;  %v3460_v35 = vsel %vm3453_vm11, %v3457_v59, %v3459_v32 }
 0x143   : > { %9823 = vmatprep.mubr.msk.bf16.mxu1 %vm2995_vm8, %v11379_v38  ;;  %v3985_v19 = vsel %vm3050_vm0, %v11481_v18, 0  ;;  %v5448_v8 = vrot.slane %v5446_v25, 3  ;;  %v5946_v18 = vsel %vm3050_vm0, %v11504_v55, 0  ;;  %v5461_v55 = vshrl.u32 %v11521_v53, 16 }
 0x144   : > { %v5423_v16 = vsel %vm5406_vm12, %v5414_v14, %v5422_v15  ;;  %v5440_v43 = vor.u32 %v5439_v5, %v5436_v57  ;;  %v5452_v14 = vshrl.u32 %v11497_v29, 16  ;;  %v5470_v5 = vshrl.u32 %v11524_v36, 16 }
 0x145   : > { %v3467_v25 = vrot.slane %v11548_v58, 1  ;;  %v5488_v58 = vshrl.u32 %v11542_v4, 16 }
 0x147   : > { %10010 = vmatmul.mubr.msk.bf16.gmra.mrb[28].mxu0 %vm2995_vm8, %v5125_v0  ;;  %v5430_v0 = vrot.slane %v5428_v41, 3 }
 0x148   : > { %10013 = vmatprep.mubr.msk.bf16.mxu0 %vm2995_vm8, %v5127_v48  ;;  %v3458_v48 = vsel %vm3453_vm11, %v3455_v23, %v3457_v59  ;;  %v3461_v23 = vrot.slane %v11516_v40, 1  ;;  %v10495_v40 = vld [vmem:[%s14372_s3 + $0x10] sm:$0xf] }
 0x149   : > { %v5431_v1 = vor.u32 %v5430_v0, %v5427_v46  ;;  %v5457_v46 = vrot.slane %v5455_v49, 3  ;;  %v5464_v0 = vshll.u32 %v11521_v53, 16 }
 0x14a   : > { %9824 = vmatmul.mubr.msk.bf16.gmra.mrb[32].mxu1 %vm2995_vm8, %v11403_v2  ;;  %v3462_v45 = vsel %vm3453_vm11, %v3459_v32, %v3461_v23  ;;  %v3465_v32 = vrot.slane %v11534_v56, 1  ;;  %v5482_v56 = vshll.u32 %v11539_v11, 16 }
 0x14b   : > { %9829 = vmatprep.mubr.msk.bf16.mxu1 %vm2995_vm8, %v3456_v44  ;;  %v5443_v44 = vshrl.u32 %v11492_v22, 16  ;;  %v5432_v41 = vsel %vm5406_vm12, %v5422_v15, %v5431_v1  ;;  %v5441_v59 = vsel %vm5406_vm12, %v5431_v1, %v5440_v43  ;;  %v5463_v1 = vrot.slane %v5461_v55, 2 }
 0x14d   : > { %v5445_v28 = vrot.slane %v5443_v44, 2  ;;  %v5466_v44 = vrot.slane %v5464_v0, 3 }
 0x14f   : > { %10014 = vmatmul.mubr.msk.bf16.gmra.mrb[32].mxu0 %vm2995_vm8, %v5129_v26  ;;  %v5454_v26 = vrot.slane %v5452_v14, 2  ;;  %v5449_v15 = vor.u32 %v5448_v8, %v5445_v28  ;;  %v5472_v14 = vrot.slane %v5470_v5, 2  ;;  %v5479_v28 = vshrl.u32 %v11539_v11, 16 }
 0x150   : > { %10019 = vmatprep.mubr.msk.bf16.mxu0 %vm2995_vm8, %v5423_v16  ;;  %v3464_v16 = vsel %vm3453_vm11, %v3461_v23, %v3463_v62  ;;  %v3466_v23 = vsel %vm3453_vm11, %v3463_v62, %v3465_v32  ;;  %v3469_v62 = vrot.slane %v11552_v33, 1  ;;  %v5497_v5 = vshrl.u32 %v11557_v60, 16 }
 0x151   : > { %v5458_v57 = vor.u32 %v5457_v46, %v5454_v26  ;;  %v5481_v26 = vrot.slane %v5479_v28, 2  ;;  %v5484_v46 = vrot.slane %v5482_v56, 3  ;;  %v5500_v33 = vshll.u32 %v11557_v60, 16 }
 0x152   : > { %9830 = vmatmul.mubr.msk.bf16.vlgmr.msra.gmra.mrb[0].mxu1 %vm2995_vm8, %v3458_v48  ;;  %v5473_v48 = vshll.u32 %v11524_v36, 16  ;;  %v3470_v0 = vsel %vm3453_vm11, %v3467_v25, %v3469_v62 }
 0x153   : > { %9833 = vmatprep.mubr.msk.bf16.mxu1 %vm2995_vm8, %v3460_v35  ;;  %9866 = vmatpush3.bf16.msra.mxu1 %v3985_v19  ;;  %v5450_v35 = vsel %vm5406_vm12, %v5440_v43, %v5449_v15  ;;  %v5459_v19 = vsel %vm5406_vm12, %v5449_v15, %v5458_v57  ;;  %v3468_v43 = vsel %vm3453_vm11, %v3465_v32, %v3467_v25  ;;  %v5490_v15 = vrot.slane %v5488_v58, 2 }
 0x154   : > { %10388 = vmatprep.subr.msk.bf16.mxu1 %vm3050_vm0, %v10495_v40  ;;  %v5475_v49 = vrot.slane %v5473_v48, 3  ;;  %v3471_v40 = vrot.slane %v11566_v12, 1  ;;  %v5506_v12 = vshrl.u32 %v11560_v47, 16  ;;  %v5509_v32 = vshll.u32 %v11560_v47, 16 }
 0x155   : > { %v5502_v25 = vrot.slane %v5500_v33, 3 }
 0x156   : > { %v5476_v8 = vor.u32 %v5475_v49, %v5472_v14 }
 0x157   : > { %10020 = vmatmul.mubr.msk.bf16.vlgmr.msra.gmra.mrb[0].mxu0 %vm2995_vm8, %v5432_v41  ;;  %v5467_v41 = vor.u32 %v5466_v44, %v5463_v1  ;;  %v5499_v44 = vrot.slane %v5497_v5, 2 }
 0x158   : > { %10056 = vmatpush3.bf16.msra.mxu0 %v5946_v18  ;;  %10023 = vmatprep.mubr.msk.bf16.mxu0 %vm2995_vm8, %v5441_v59  ;;  %v5491_v18 = vshll.u32 %v11542_v4, 16 }
 0x159   : > { %v5468_v59 = vsel %vm5406_vm12, %v5458_v57, %v5467_v41  ;;  %v3472_v57 = vsel %vm3453_vm11, %v3469_v62, %v3471_v40  ;;  %v5503_v56 = vor.u32 %v5502_v25, %v5499_v44  ;;  %v5527_v62 = vshll.u32 %v11578_v9, 16 }
 0x15a   : > { %9834 = vmatmul.mubr.msk.bf16.gmra.mrb[4].mxu1 %vm2995_vm8, %v3462_v45  ;;  %v5477_v45 = vsel %vm5406_vm12, %v5467_v41, %v5476_v8  ;;  %v5493_v55 = vrot.slane %v5491_v18, 3  ;;  %v5511_v41 = vrot.slane %v5509_v32, 3  ;;  %v5524_v18 = vshrl.u32 %v11578_v9, 16 }
 0x15b   : > { %9837 = vmatprep.mubr.msk.bf16.mxu1 %vm2995_vm8, %v3464_v16  ;;  %v5485_v16 = vor.u32 %v5484_v46, %v5481_v26 }
 0x15c   : > { %v5494_v48 = vor.u32 %v5493_v55, %v5490_v15  ;;  %v3479_v15 = vrot.slane %v11289_v61, 1  ;;  %v5542_v61 = vshrl.u32 %v11592_v54, 16 }
 0x15d   : > { %v5486_v1 = vsel %vm5406_vm12, %v5476_v8, %v5485_v16 }
 0x15e   : > { %v5495_v49 = vsel %vm5406_vm12, %v5485_v16, %v5494_v48  ;;  %v5504_v46 = vsel %vm5406_vm12, %v5494_v48, %v5503_v56  ;;  %v5529_v16 = vrot.slane %v5527_v62, 3 }
 0x15f   : > { %10024 = vmatmul.mubr.msk.bf16.gmra.mrb[4].mxu0 %vm2995_vm8, %v5450_v35  ;;  %v3473_v35 = vrot.slane %v11570_v37, 1  ;;  %v5518_v37 = vshll.u32 %v11575_v3, 16 }
 0x160   : > { %10027 = vmatprep.mubr.msk.bf16.mxu0 %vm2995_vm8, %v5459_v19  ;;  %v10496_v19 = vld [vmem:[#allocation2 + $0x58] sm:$0xff]  }
 0x161   : > { %v3475_v14 = vrot.slane %v10496_v19, 1  ;;  %v3474_v28 = vsel %vm3453_vm11, %v3471_v40, %v3473_v35 }
 0x162   : > { %9838 = vmatmul.mubr.msk.bf16.gmra.mrb[8].mxu1 %vm2995_vm8, %v3466_v23  ;;  %v5508_v23 = vrot.slane %v5506_v12, 2  ;;  %v5536_v12 = vshll.u32 %v11589_v51, 16 }
 0x163   : > { %9841 = vmatprep.mubr.msk.bf16.mxu1 %vm2995_vm8, %v3468_v43  ;;  %v5515_v43 = vshrl.u32 %v11575_v3, 16  ;;  %v3476_v8 = vsel %vm3453_vm11, %v3473_v35, %v3475_v14  ;;  %v5545_v35 = vshll.u32 %v11592_v54, 16 }
 0x164   : > { %v5512_v58 = vor.u32 %v5511_v41, %v5508_v23  ;;  %v5538_v19 = vrot.slane %v5536_v12, 3  ;;  %v5544_v23 = vrot.slane %v5542_v61, 2  ;;  %v5847_v12 = vld [vmem:[#allocation2 + $0x10] sm:$0x8] }
 0x165   : > { %v5517_v40 = vrot.slane %v5515_v43, 2  ;;  %v5547_v41 = vrot.slane %v5545_v35, 3  ;;  %v5551_v43 = vshrl.u32 %v11603_v34, 16  ;;  %v3893_v35 = vrot.slane %v10793_v24, 1  ;;  %v10499_v24 = vld [vmem:[#allocation2 + $0x18] sm:$0xff]  }
 0x166   : > { %v5513_v55 = vsel %vm5406_vm12, %v5503_v56, %v5512_v58 }
 0x167   : > { %10028 = vmatmul.mubr.msk.bf16.gmra.mrb[8].mxu0 %vm2995_vm8, %v5468_v59  ;;  %v10497_v59 = vld [vmem:[#allocation2 + $0x60] sm:$0xff]  }
 0x168   : > { %10031 = vmatprep.mubr.msk.bf16.mxu0 %vm2995_vm8, %v5477_v45  ;;  %v3477_v26 = vrot.slane %v10497_v59, 1  ;;  %v5520_v45 = vrot.slane %v5518_v37, 3  ;;  %v5553_v59 = vrot.slane %v5551_v43, 2 }
 0x16a   : > { %9842 = vmatmul.mubr.msk.bf16.gmra.mrb[12].mxu1 %vm2995_vm8, %v3470_v0  ;;  %v5526_v0 = vrot.slane %v5524_v18, 2  ;;  %v3478_v5 = vsel %vm3453_vm11, %v3475_v14, %v3477_v26  ;;  %v5521_v33 = vor.u32 %v5520_v45, %v5517_v40  ;;  %v3480_v48 = vsel %vm3453_vm11, %v3477_v26, %v3479_v15 }
 0x16b   : > { %9845 = vmatprep.mubr.msk.bf16.mxu1 %vm2995_vm8, %v3472_v57  ;;  %v5533_v57 = vshrl.u32 %v11589_v51, 16  ;;  %v3483_v14 = vrot.slane %v11348_v42, 1  ;;  %v5560_v42 = vshrl.u32 %v11606_v27, 16  ;;  %v3485_v18 = vrot.slane %v11379_v38, 1 }
 0x16c   : > { %v5530_v32 = vor.u32 %v5529_v16, %v5526_v0  ;;  %v5522_v44 = vsel %vm5406_vm12, %v5512_v58, %v5521_v33  ;;  %v5563_v58 = vshll.u32 %v11606_v27, 16  ;;  %v3487_v40 = vrot.slane %v11403_v2, 1 }
 0x16d   : > { %v5535_v25 = vrot.slane %v5533_v57, 2  ;;  %v3486_v0 = vsel %vm3453_vm11, %v3483_v14, %v3485_v18  ;;  %v3489_v2 = vrot.slane %v11442_v21, 1 }
 0x16f   : > { %10032 = vmatmul.mubr.msk.bf16.gmra.mrb[12].mxu0 %vm2995_vm8, %v5486_v1  ;;  %v3481_v1 = vrot.slane %v11315_v30, 1  ;;  %v5539_v56 = vor.u32 %v5538_v19, %v5535_v25  ;;  %v5554_v30 = vshll.u32 %v11603_v34, 16  ;;  %v9492_v19 = vcombine.low %v5847_v12, %v11438_v52  ;;  %v10505_v12 = vld [vmem:[#allocation2 + $0x48] sm:$0xff]  }
 0x170   : > { %10035 = vmatprep.mubr.msk.bf16.mxu0 %vm2995_vm8, %v5495_v49  ;;  %v5531_v49 = vsel %vm5406_vm12, %v5521_v33, %v5530_v32  ;;  %v3488_v33 = vsel %vm3453_vm11, %v3485_v18, %v3487_v40 }
 0x171   : > { %v3484_v37 = vsel %vm3453_vm11, %v3481_v1, %v3483_v14  ;;  %v5540_v62 = vsel %vm5406_vm12, %v5530_v32, %v5539_v56  ;;  %v5556_v26 = vrot.slane %v5554_v30, 3  ;;  %v3490_v14 = vsel %vm3453_vm11, %v3487_v40, %v3489_v2 }
 0x172   : > { %9846 = vmatmul.mubr.msk.bf16.gmra.mrb[16].mxu1 %vm2995_vm8, %v3474_v28  ;;  %v3482_v28 = vsel %vm3453_vm11, %v3479_v15, %v3481_v1  ;;  %v5562_v15 = vrot.slane %v5560_v42, 2  ;;  %v10498_v1 = vld [vmem:[#allocation2 + $0x10] sm:$0xff]   ;;  %v5859_v42 = vrot.slane %v11468_v20, 3  ;;  %v5861_v20 = vrot.slane %v11492_v22, 3 }
 0x173   : > { %9849 = vmatprep.mubr.msk.bf16.mxu1 %vm2995_vm8, %v3476_v8  ;;  %v5548_v8 = vor.u32 %v5547_v41, %v5544_v23  ;;  %v5557_v16 = vor.u32 %v5556_v26, %v5553_v59  ;;  %v5854_v23 = vrot.slane %v9492_v19, 3  ;;  %v5855_v41 = vrot.slane %v11448_v6, 3  ;;  %v10502_v59 = vld [vmem:[#allocation2 + $0x30] sm:$0xff]  }
 0x174   : > { %v5857_v6 = vrot.slane %v11465_v13, 3  ;;  %v3902_v26 = vrot.slane %v10502_v59, 1  ;;  %v3908_v2 = vrot.slane %v10505_v12, 1 }
 0x175   : > { %v5549_v45 = vsel %vm5406_vm12, %v5539_v56, %v5548_v8  ;;  %v10500_v56 = vld [vmem:[#allocation2 + $0x20] sm:$0xff]   ;;  %v5856_v30 = vsel %vm5853_vm13, %v5854_v23, %v5855_v41 }
 0x176   : > { %v3898_v43 = vrot.slane %v10500_v56, 1  ;;  %v5860_v40 = vsel %vm5853_vm13, %v5857_v6, %v5859_v42 }
 0x177   : > { %10036 = vmatmul.mubr.msk.bf16.gmra.mrb[16].mxu0 %vm2995_vm8, %v5504_v46  ;;  %v11739_v46 = vld [vmem:[#allocation2 + $0xa0] ss:$0 sps:$4 sm:$0x77]  }
 0x178   : > { %10039 = vmatprep.mubr.msk.bf16.mxu0 %vm2995_vm8, %v5513_v55  ;;  %v5565_v55 = vrot.slane %v5563_v58, 3  ;;  %v5569_v38 = vshrl.u32 %v11739_v46, 16  ;;  %v10501_v58 = vld [vmem:[#allocation2 + $0x28] sm:$0xff]  }
 0x179   : > { %v3900_v18 = vrot.slane %v10501_v58, 1  ;;  %v3924_v58 = vrot.slane %v11428_v7, 1 }
 0x17a   : > { %9850 = vmatmul.mubr.msk.bf16.gmra.mrb[20].mxu1 %vm2995_vm8, %v3478_v5  ;;  %v5572_v5 = vshll.u32 %v11739_v46, 16  ;;  %v5566_v57 = vor.u32 %v5565_v55, %v5562_v15  ;;  %v5571_v32 = vrot.slane %v5569_v38, 2  ;;  %v5863_v15 = vrot.slane %v11497_v29, 3 }
 0x17b   : > { %9853 = vmatprep.mubr.msk.bf16.mxu1 %vm2995_vm8, %v3480_v48  ;;  %v5558_v48 = vsel %vm5406_vm12, %v5548_v8, %v5557_v16  ;;  %v3901_v13 = vsel %vm3453_vm11, %v3898_v43, %v3900_v18  ;;  %v5865_v29 = vrot.slane %v11521_v53, 3 }
 0x17c   : > { %v5574_v61 = vrot.slane %v5572_v5, 3  ;;  %v5567_v25 = vsel %vm5406_vm12, %v5557_v16, %v5566_v57  ;;  %v10504_v16 = vld [vmem:[#allocation2 + $0x40] sm:$0xff]   ;;  %v5864_v5 = vsel %vm5853_vm13, %v5861_v20, %v5863_v15 }
 0x17d   : > { %v3906_v38 = vrot.slane %v10504_v16, 1 }
 0x17f   : > { %10040 = vmatmul.mubr.msk.bf16.gmra.mrb[20].mxu0 %vm2995_vm8, %v5522_v44  ;;  %v3894_v44 = vrot.slane %v10498_v1, 1  ;;  %v3909_v53 = vsel %vm3453_vm11, %v3906_v38, %v3908_v2 }
 0x180   : > { %10043 = vmatprep.mubr.msk.bf16.mxu0 %vm2995_vm8, %v5531_v49  ;;  %v5575_v49 = vor.u32 %v5574_v61, %v5571_v32  ;;  %v10506_v32 = vld [vmem:[#allocation2 + $0x50] sm:$0xff]  }
 0x181   : > { %v3895_v21 = vsel %vm3453_vm11, %v3893_v35, %v3894_v44  ;;  %v3910_v61 = vrot.slane %v10506_v32, 1  ;;  %v5889_v32 = vrot.slane %v11739_v46, 3  ;;  %v4345_v46 = vshll.u32 %v11414_v10, 16 }
 0x182   : > { %9854 = vmatmul.mubr.msk.bf16.gmra.mrb[24].mxu1 %vm2995_vm8, %v3482_v28  ;;  %v3896_v28 = vrot.slane %v10499_v24, 1  ;;  %v5576_v52 = vsel %vm5406_vm12, %v5566_v57, %v5575_v49  ;;  %v5867_v57 = vrot.slane %v11524_v36, 3  ;;  %v5869_v36 = vrot.slane %v11539_v11, 3 }
 0x183   : > { %9857 = vmatprep.mubr.msk.bf16.mxu1 %vm2995_vm8, %v3484_v37  ;;  %v3911_v1 = vsel %vm3453_vm11, %v3908_v2, %v3910_v61  ;;  %v3914_v49 = vrot.slane %v11361_v50, 1  ;;  %v3916_v50 = vrot.slane %v11375_v31, 1  ;;  %v3920_v31 = vrot.slane %v11410_v63, 1 }
 0x184   : > { %v3897_v37 = vsel %vm3453_vm11, %v3894_v44, %v3896_v28  ;;  %v3899_v8 = vsel %vm3453_vm11, %v3896_v28, %v3898_v43  ;;  %v5868_v35 = vsel %vm5853_vm13, %v5865_v29, %v5867_v57  ;;  %v5871_v44 = vrot.slane %v11542_v4, 3 }
 0x185   : > { %v5873_v4 = vrot.slane %v11557_v60, 3  ;;  %v3918_v28 = vrot.slane %v11389_v39, 1  ;;  %v3917_v60 = vsel %vm3453_vm11, %v3914_v49, %v3916_v50  ;;  %v5879_v43 = vrot.slane %v11578_v9, 3 }
 0x186   : > { %v5881_v9 = vrot.slane %v11589_v51, 3 }
 0x187   : > { %10044 = vmatmul.mubr.msk.bf16.gmra.mrb[24].mxu0 %vm2995_vm8, %v5540_v62  ;;  %v5858_v62 = vsel %vm5853_vm13, %v5855_v41, %v5857_v6  ;;  %v5875_v41 = vrot.slane %v11560_v47, 3  ;;  %v5874_v24 = vsel %vm5853_vm13, %v5871_v44, %v5873_v4  ;;  %v5877_v47 = vrot.slane %v11575_v3, 3 }
 0x188   : > { %10047 = vmatprep.mubr.msk.bf16.mxu0 %vm2995_vm8, %v5549_v45  ;;  %v3903_v45 = vsel %vm3453_vm11, %v3900_v18, %v3902_v26  ;;  %v3919_v56 = vsel %vm3453_vm11, %v3916_v50, %v3918_v28  ;;  %v3921_v3 = vsel %vm3453_vm11, %v3918_v28, %v3920_v31  ;;  %v5882_v18 = vsel %vm5853_vm13, %v5879_v43, %v5881_v9 }
 0x189   : > { %v5880_v6 = vsel %vm5853_vm13, %v5877_v47, %v5879_v43  ;;  %v4351_v50 = vshrl.u32 %v11428_v7, 16 }
 0x18a   : > { %9858 = vmatmul.mubr.msk.bf16.gmra.mrb[28].mxu1 %vm2995_vm8, %v3486_v0  ;;  %v5862_v0 = vsel %vm5853_vm13, %v5859_v42, %v5861_v20  ;;  %v5883_v42 = vrot.slane %v11592_v54, 3  ;;  %v10480_v54 = vld [vmem:[#allocation2 + $0x98] ss:$0 sps:$4 sm:$0x11]  }
 0x18b   : > { %9861 = vmatprep.mubr.msk.bf16.mxu1 %vm2995_vm8, %v3488_v33  ;;  %v3928_v16 = vrot.slane %v10480_v54, 1 }
 0x18c   : > { %v5884_v20 = vsel %vm5853_vm13, %v5881_v9, %v5883_v42 }
 0x18f   : > { %10048 = vmatmul.mubr.msk.bf16.gmra.mrb[28].mxu0 %vm2995_vm8, %v5558_v48  ;;  %v5866_v48 = vsel %vm5853_vm13, %v5863_v15, %v5865_v29 }
 0x190   : > { %10051 = vmatprep.mubr.msk.bf16.mxu0 %vm2995_vm8, %v5567_v25  ;;  %v10507_v25 = vld [vmem:[#allocation2 + $0x58] sm:$0xff]  }
 0x191   : > { %v3912_v19 = vrot.slane %v10507_v25, 1 }
 0x192   : > { %9862 = vmatmul.mubr.msk.bf16.gmra.mrb[32].mxu1 %vm2995_vm8, %v3490_v14  ;;  %v5870_v14 = vsel %vm5853_vm13, %v5867_v57, %v5869_v36  ;;  %v4324_v57 = vshrl.u32 %v11389_v39, 16 }
 0x193   : > { %9867 = vmatprep.mubr.msk.bf16.mxu1 %vm2995_vm8, %v3895_v21  ;;  %v5872_v21 = vsel %vm5853_vm13, %v5869_v36, %v5871_v44  ;;  %v3913_v11 = vsel %vm3453_vm11, %v3910_v61, %v3912_v19  ;;  %v3915_v23 = vsel %vm3453_vm11, %v3912_v19, %v3914_v49  ;;  %v14482_v61 = vld [vmem:[#allocation4_spill] sm:$0xff]  ;;  %v4336_v44 = vshll.u32 %v11410_v63, 16 }
 0x197   : > { %10052 = vmatmul.mubr.msk.bf16.gmra.mrb[32].mxu0 %vm2995_vm8, %v5576_v52  ;;  %v5876_v52 = vsel %vm5853_vm13, %v5873_v4, %v5875_v41 }
 0x198   : > { %10057 = vmatprep.mubr.msk.bf16.mxu0 %vm2995_vm8, %v5856_v30  ;;  %v5878_v30 = vsel %vm5853_vm13, %v5875_v41, %v5877_v47  ;;  %v4347_v41 = vrot.slane %v4345_v46, 2  ;;  %v4353_v47 = vrot.slane %v4351_v50, 1 }
 0x19a   : > { %9868 = vmatmul.mubr.msk.bf16.vlgmr.msra.gmra.mrb[0].mxu1 %vm2995_vm8, %v3897_v37  ;;  %v3922_v37 = vrot.slane %v11414_v10, 1 }
 0x19b   : > { %9871 = vmatprep.mubr.msk.bf16.mxu1 %vm2995_vm8, %v3899_v8  ;;  %10094 = vmatpush3.bf16.msra.mxu1 %v10644_v17  ;;  %v10503_v17 = vld [vmem:[#allocation2 + $0x38] sm:$0xff]  }
 0x19c   : > { %v3904_v55 = vrot.slane %v10503_v17, 1  ;;  %v3923_v8 = vsel %vm3453_vm11, %v3920_v31, %v3922_v37  ;;  %v3925_v51 = vsel %vm3453_vm11, %v3922_v37, %v3924_v58 }
 0x19e   : > { %v3905_v22 = vsel %vm3453_vm11, %v3902_v26, %v3904_v55  ;;  %v3907_v33 = vsel %vm3453_vm11, %v3904_v55, %v3906_v38  ;;  %v10508_v26 = vld [vmem:[#allocation2 + $0x60] sm:$0xff]   ;;  %v10509_v38 = vld [vmem:[#allocation2 + $0x68] sm:$0xff]  }
 0x19f   : > { %10058 = vmatmul.mubr.msk.bf16.vlgmr.msra.gmra.mrb[0].mxu0 %vm2995_vm8, %v5858_v62  ;;  %v14481_v62 = vld [vmem:[#allocation6_spill] sm:$0xff] }
 0x1a0   : > { %10061 = vmatprep.mubr.msk.bf16.mxu0 %vm2995_vm8, %v5860_v40  ;;  %v3926_v59 = vrot.slane %v14481_v62, 1  ;;  %v4306_v40 = vshrl.u32 %v10508_v26, 16  ;;  %v4360_v28 = vshrl.u32 %v14481_v62, 16 }
 0x1a2   : > { %9872 = vmatmul.mubr.msk.bf16.gmra.mrb[4].mxu1 %vm2995_vm8, %v3901_v13  ;;  %v4309_v13 = vshll.u32 %v10508_v26, 16  ;;  %v3927_v15 = vsel %vm3453_vm11, %v3924_v58, %v3926_v59  ;;  %v4308_v17 = vrot.slane %v4306_v40, 1  ;;  %v4362_v31 = vrot.slane %v4360_v28, 1 }
 0x1a3   : > { %9875 = vmatprep.mubr.msk.bf16.mxu1 %vm2995_vm8, %v3903_v45  ;;  %v5885_v45 = vrot.slane %v11603_v34, 3  ;;  %v4327_v34 = vshll.u32 %v11389_v39, 16  ;;  %v10537_v26 = vmov 1983009808  }
 0x1a4   : > { %v4311_v55 = vrot.slane %v4309_v13, 2  ;;  %v6199_v40 = vunpack.c.l.s4 %v10537_v26 }
 0x1a5   : > { %v5886_v29 = vsel %vm5853_vm13, %v5883_v42, %v5885_v45  ;;  %v4329_v36 = vrot.slane %v4327_v34, 2 }
 0x1a6   : > { %v6200_v13 = vunpack.c.0.s8 %v6199_v40 }
 0x1a7   : > { %10062 = vmatmul.mubr.msk.bf16.gmra.mrb[4].mxu0 %vm2995_vm8, %v5862_v0  ;;  %v5887_v0 = vrot.slane %v11606_v27, 3  ;;  %v3929_v27 = vsel %vm3453_vm11, %v3926_v59, %v3928_v16 }
 0x1a8   : > { %10065 = vmatprep.mubr.msk.bf16.mxu0 %vm2995_vm8, %v5864_v5  ;;  %v4315_v5 = vshrl.u32 %v10509_v38, 16 }
 0x1a9   : > { %v5888_v12 = vsel %vm5853_vm13, %v5885_v45, %v5887_v0  ;;  %v5890_v25 = vsel %vm5853_vm13, %v5887_v0, %v5889_v32 }
 0x1aa   : > { %9876 = vmatmul.mubr.msk.bf16.gmra.mrb[8].mxu1 %vm2995_vm8, %v3905_v22  ;;  %v4318_v22 = vshll.u32 %v10509_v38, 16  ;;  %v4317_v2 = vrot.slane %v4315_v5, 1 }
 0x1ab   : > { %9879 = vmatprep.mubr.msk.bf16.mxu1 %vm2995_vm8, %v3907_v33  ;;  %v4312_v33 = vor.u32 %v4311_v55, %v4308_v17 }
 0x1af   : > { %10066 = vmatmul.mubr.msk.bf16.gmra.mrb[8].mxu0 %vm2995_vm8, %v5866_v48  ;;  %v4320_v48 = vrot.slane %v4318_v22, 2 }
 0x1b0   : > { %10069 = vmatprep.mubr.msk.bf16.mxu0 %vm2995_vm8, %v5868_v35  ;;  %v4313_v35 = vsel %vm4206_vm9, %v14482_v61, %v4312_v33 }
 0x1b1   : > { %v4321_v39 = vor.u32 %v4320_v48, %v4317_v2 }
 0x1b2   : > { %9880 = vmatmul.mubr.msk.bf16.gmra.mrb[12].mxu1 %vm2995_vm8, %v3909_v53  ;;  %v4326_v53 = vrot.slane %v4324_v57, 1 }
 0x1b3   : > { %9883 = vmatprep.mubr.msk.bf16.mxu1 %vm2995_vm8, %v3911_v1  ;;  %v4333_v1 = vshrl.u32 %v11410_v63, 16  ;;  %v4322_v49 = vsel %vm4206_vm9, %v4312_v33, %v4321_v39 }
 0x1b4   : > { %v4330_v19 = vor.u32 %v4329_v36, %v4326_v53 }
 0x1b6   : > { %v4331_v4 = vsel %vm4206_vm9, %v4321_v39, %v4330_v19 }
 0x1b7   : > { %10070 = vmatmul.mubr.msk.bf16.gmra.mrb[12].mxu0 %vm2995_vm8, %v5870_v14  ;;  %v4342_v14 = vshrl.u32 %v11414_v10, 16 }
 0x1b8   : > { %10073 = vmatprep.mubr.msk.bf16.mxu0 %vm2995_vm8, %v5872_v21  ;;  %v4335_v21 = vrot.slane %v4333_v1, 1 }
 0x1ba   : > { %9884 = vmatmul.mubr.msk.bf16.gmra.mrb[16].mxu1 %vm2995_vm8, %v3913_v11  ;;  %v4338_v11 = vrot.slane %v4336_v44, 2 }
 0x1bb   : > { %9887 = vmatprep.mubr.msk.bf16.mxu1 %vm2995_vm8, %v3915_v23  ;;  %v4344_v23 = vrot.slane %v4342_v14, 1 }
 0x1bc   : > { %v4339_v63 = vor.u32 %v4338_v11, %v4335_v21 }
 0x1bd   : > { %v4348_v10 = vor.u32 %v4347_v41, %v4344_v23 }
 0x1bf   : > { %10074 = vmatmul.mubr.msk.bf16.gmra.mrb[16].mxu0 %vm2995_vm8, %v5874_v24  ;;  %v4354_v24 = vshll.u32 %v11428_v7, 16  ;;  %v4349_v43 = vsel %vm4206_vm9, %v4339_v63, %v4348_v10 }
 0x1c0   : > { %10077 = vmatprep.mubr.msk.bf16.mxu0 %vm2995_vm8, %v5876_v52  ;;  %v4363_v52 = vshll.u32 %v14481_v62, 16 }
 0x1c2   : > { %9888 = vmatmul.mubr.msk.bf16.gmra.mrb[20].mxu1 %vm2995_vm8, %v3917_v60  ;;  %v4340_v60 = vsel %vm4206_vm9, %v4330_v19, %v4339_v63 }
 0x1c3   : > { %9891 = vmatprep.mubr.msk.bf16.mxu1 %vm2995_vm8, %v3919_v56  ;;  %v4356_v56 = vrot.slane %v4354_v24, 2 }
 0x1c5   : > { %v4357_v37 = vor.u32 %v4356_v56, %v4353_v47 }
 0x1c7   : > { %10078 = vmatmul.mubr.msk.bf16.gmra.mrb[20].mxu0 %vm2995_vm8, %v5878_v30  ;;  %v4365_v30 = vrot.slane %v4363_v52, 2 }
 0x1c8   : > { %10081 = vmatprep.mubr.msk.bf16.mxu0 %vm2995_vm8, %v5880_v6  ;;  %v14483_v6 = vld [vmem:[#allocation5_spill] sm:$0xff] }
 0x1c9   : > { %v4369_v7 = vshrl.u32 %v14483_v6, 16  ;;  %v4366_v9 = vor.u32 %v4365_v30, %v4362_v31 }
 0x1ca   : > { %9892 = vmatmul.mubr.msk.bf16.gmra.mrb[24].mxu1 %vm2995_vm8, %v3921_v3  ;;  %v4372_v3 = vshll.u32 %v14483_v6, 16 }
 0x1cb   : > { %9895 = vmatprep.mubr.msk.bf16.mxu1 %vm2995_vm8, %v3923_v8  ;;  %v4358_v8 = vsel %vm4206_vm9, %v4348_v10, %v4357_v37  ;;  %v4371_v42 = vrot.slane %v4369_v7, 1 }
 0x1cc   : > { %v4374_v58 = vrot.slane %v4372_v3, 2 }
 0x1ce   : > { %v4375_v62 = vor.u32 %v4374_v58, %v4371_v42 }
 0x1cf   : > { %10082 = vmatmul.mubr.msk.bf16.gmra.mrb[24].mxu0 %vm2995_vm8, %v5882_v18  ;;  %v4367_v18 = vsel %vm4206_vm9, %v4357_v37, %v4366_v9 }
 0x1d0   : > { %10085 = vmatprep.mubr.msk.bf16.mxu0 %vm2995_vm8, %v5884_v20  ;;  %v4376_v59 = vsel %vm4206_vm9, %v4366_v9, %v4375_v62  ;;  %v9511_v20 = vld [vmem:[%s14373_s4] ss:$0 sm:$0xff] }
 0x1d2   : > { %9896 = vmatmul.mubr.msk.bf16.gmra.mrb[28].mxu1 %vm2995_vm8, %v3925_v51  ;;  %v14484_v51 = vld [vmem:[#allocation3_spill] sm:$0xff] }
 0x1d3   : > { %9899 = vmatprep.mubr.msk.bf16.mxu1 %vm2995_vm8, %v3927_v15  ;;  %v11893_v54 = vsub.s32 %v6200_v13, %v14484_v51  ;;  %v6935_v15 = vcombine.high %v9511_v20, %v9511_v20 }
 0x1d5   : > { %14485 = vst [vmem:[#allocation6_spill] sm:$0xff] %v11893_v54  ;;  %v11896_v16 = vrot.slane %v9511_v20, %v11893_v54  ;;  %v11899_v5 = vrot.slane %v6935_v15, %v11893_v54 }
 0x1d7   : > { %10086 = vmatmul.mubr.msk.bf16.gmra.mrb[28].mxu0 %vm2995_vm8, %v5886_v29  ;;  %v11909_v53 = vcombine.high %v11899_v5, %v11899_v5 }
 0x1d8   : > { %10089 = vmatprep.mubr.msk.bf16.mxu0 %vm2995_vm8, %v5888_v12 }
 0x1da   : > { %9900 = vmatmul.mubr.msk.bf16.gmra.mrb[32].mxu1 %vm2995_vm8, %v3929_v27  ;;  %v11904_v27 = vcombine.high %v11896_v16, %v11896_v16 }
 0x1db   : > { %9925 = vmatprep.mubr.msk.bf16.mxu1 %vm2995_vm8, %v4313_v35 }
 0x1df   : > { %10090 = vmatmul.mubr.msk.bf16.gmra.mrb[32].mxu0 %vm2995_vm8, %v5890_v25 }
 0x1e2   : > { %9926 = vmatmul.mubr.msk.bf16.vlgmr.msra.gmra.mrb[20].mxu1 %vm2995_vm8, %v4322_v49 }
 0x1e3   : > { %9929 = vmatprep.mubr.msk.bf16.mxu1 %vm2995_vm8, %v4331_v4 }
 0x1ea   : > { %9930 = vmatmul.mubr.msk.bf16.gmra.mrb[24].mxu1 %vm2995_vm8, %v4340_v60 }
 0x1eb   : > { %9933 = vmatprep.mubr.msk.bf16.mxu1 %vm2995_vm8, %v4349_v43 }
 0x1f2   : > { %9934 = vmatmul.mubr.msk.bf16.gmra.mrb[28].mxu1 %vm2995_vm8, %v4358_v8 }
 0x1f3   : > { %9937 = vmatprep.mubr.msk.bf16.mxu1 %vm2995_vm8, %v4367_v18 }
 0x1fa   : > { %9938 = vmatmul.mubr.msk.bf16.gmra.mrb[32].mxu1 %vm2995_vm8, %v4376_v59 }
 0x26d   : > { %v9869_v45 = vpop.f32.mrb[0].mxu1 }
 0x26e   : > { %v4021_v17 = vpop.f32.mrb[1].mxu1 }
 0x26f   : > { %v9870_v55 = vpop.f32.mrb[2].mxu1 }
 0x270   : > { %v4024_v0 = vpop.f32.mrb[3].mxu1 }
 0x272   : > { %v10059_v38 = vpop.f32.mrb[0].mxu0 }
 0x273   : > { %v10095_v22 = vadd.f32 %v10059_v38, %v9869_v45  ;;  %v5982_v29 = vpop.f32.mrb[1].mxu0 }
 0x274   : > { %v10096_v33 = vadd.f32 %v5982_v29, %v4021_v17  ;;  %v10060_v57 = vpop.f32.mrb[2].mxu0 }
 0x275   : > { %v6231_v34 = vcombine.high %v10095_v22, %v10095_v22  ;;  %v6238_v12 = vrot.slane %v10095_v22, %v11893_v54  ;;  %v10097_v2 = vadd.f32 %v10060_v57, %v9870_v55  ;;  %v5985_v48 = vpop.f32.mrb[3].mxu0  ;;  %v9873_v32 = vpop.f32.mrb[4].mxu1 }
 0x276   : > { %v6197_v61 = vcombine.high %v10096_v33, %v10096_v33  ;;  %v6204_v35 = vrot.slane %v10096_v33, %v11893_v54  ;;  %v10098_v36 = vadd.f32 %v5985_v48, %v4024_v0  ;;  %v4037_v39 = vpop.f32.mrb[5].mxu1 }
 0x277   : > { %v6245_v1 = vrot.slane %v6231_v34, %v11893_v54  ;;  %v6246_v44 = vcombine.high %v6238_v12, %v6238_v12  ;;  %v6248_v25 = vcombine.high %v10097_v2, %v10097_v2  ;;  %v6255_v19 = vrot.slane %v10097_v2, %v11893_v54  ;;  %v11913_v14 = vpop.f32.mrb[6].mxu1 }
 0x278   : > { %v6211_v46 = vrot.slane %v6197_v61, %v11893_v54  ;;  %v6212_v49 = vcombine.high %v6204_v35, %v6204_v35  ;;  %v11917_v21 = vadd.f32 %v11896_v16, %v6204_v35  ;;  %v6214_v11 = vcombine.high %v10098_v36, %v10098_v36  ;;  %v11919_v4 = vpop.f32.mrb[7].mxu1 }
 0x279   : > { %v6247_v23 = vcombine.high %v6245_v1, %v6245_v1  ;;  %v11922_v41 = vadd.f32 %v11896_v16, %v6246_v44  ;;  %v11925_v63 = vadd.f32 %v11904_v27, %v6245_v1  ;;  %v6262_v50 = vrot.slane %v6248_v25, %v11893_v54 }
 0x27a   : > { %v6213_v24 = vcombine.high %v6211_v46, %v6211_v46  ;;  %v11929_v10 = vadd.f32 %v11904_v27, %v6212_v49  ;;  %v11932_v28 = vadd.f32 %v11899_v5, %v6211_v46  ;;  %v6263_v52 = vcombine.high %v6255_v19, %v6255_v19  ;;  %v10063_v60 = vpop.f32.mrb[4].mxu0 }
 0x27b   : > { %v7246_v47 = vcombine.low %v11922_v41, %v11925_v63  ;;  %v6264_v56 = vcombine.high %v6262_v50, %v6262_v50  ;;  %v11937_v43 = vadd.f32 %v11899_v5, %v6247_v23  ;;  %v11940_v31 = vadd.f32 %v11909_v53, %v6255_v19  ;;  %v5998_v30 = vpop.f32.mrb[5].mxu0 }
 0x27c   : > { %v11943_v37 = vadd.f32 %v11909_v53, %v6213_v24  ;;  %v7212_v6 = vcombine.low %v11917_v21, %v11929_v10  ;;  %v11948_v7 = vadd.f32 %v11896_v16, %v6263_v52  ;;  %v11951_v3 = vadd.f32 %v11904_v27, %v6262_v50  ;;  %v10064_v9 = vpop.f32.mrb[6].mxu0 }
 0x27d   : > { %14486 = vst [vmem:[#allocation4_spill] sm:$0xff] %v11937_v43  ;;  %14487 = vst [vmem:[#allocation5_spill] sm:$0xff] %v11940_v31  ;;  %v7254_v8 = vrot.slane %v7246_v47, %v11893_v54  ;;  %v7247_v42 = vcombine.low %v11937_v43, %v11940_v31  ;;  %v6221_v58 = vrot.slane %v10098_v36, %v11893_v54  ;;  %v6001_v62 = vpop.f32.mrb[7].mxu0  ;;  %v9877_v59 = vpop.f32.mrb[8].mxu1 }
 0x27e   : > { %14488 = vst [vmem:[#allocation3_spill] sm:$0xff] %v11943_v37  ;;  %14489 = vst [vmem:[#allocation7_spill] sm:$0xff] %v11951_v3  ;;  %v6228_v18 = vrot.slane %v6214_v11, %v11893_v54  ;;  %v7213_v26 = vcombine.low %v11932_v28, %v11943_v37  ;;  %v7220_v40 = vrot.slane %v7212_v6, %v11893_v54  ;;  %v4053_v51 = vpop.f32.mrb[9].mxu1 }
 0x27f   : > { %v7263_v13 = vcombine.low %v11948_v7, %v11951_v3  ;;  %v10099_v20 = vadd.f32 %v10063_v60, %v9873_v32  ;;  %v7261_v45 = vrot.slane %v7247_v42, %v11893_v54  ;;  %v6229_v15 = vcombine.high %v6221_v58, %v6221_v58  ;;  %v11968_v0 = vpop.f32.mrb[10].mxu1 }
 0x280   : > { %v6230_v17 = vcombine.high %v6228_v18, %v6228_v18  ;;  %v11966_v55 = vadd.f32 %v11896_v16, %v6221_v58  ;;  %v7227_v38 = vrot.slane %v7213_v26, %v11893_v54  ;;  %v11975_v29 = vadd.f32 %v11899_v5, %v6228_v18  ;;  %v11977_v57 = vpop.f32.mrb[11].mxu1 }
 0x281   : > { %v11972_v22 = vrot.slane %v7263_v13, %v11893_v54  ;;  %v6298_v33 = vcombine.high %v10099_v20, %v10099_v20  ;;  %v7262_v34 = vcombine.low %v7254_v8, %v7261_v45  ;;  %v11980_v12 = vadd.f32 %v11904_v27, %v6229_v15 }
 0x282   : > { %v11983_v2 = vadd.f32 %v11909_v53, %v6230_v17  ;;  %v6305_v48 = vrot.slane %v10099_v20, %v11893_v54  ;;  %v7228_v32 = vcombine.low %v7220_v40, %v7227_v38  ;;  %v10100_v35 = vadd.f32 %v5998_v30, %v4037_v39  ;;  %v10067_v1 = vpop.f32.mrb[8].mxu0 }
 0x283   : > { %v6312_v61 = vrot.slane %v6298_v33, %v11893_v54  ;;  %v11993_v36 = vadd.f32 %v11899_v5, %v6264_v56  ;;  %v7789_v44 = vsel %vm2995_vm8, %v7262_v34, 0.0  ;;  %v9550_v25 = vpack.c.bf16 %v7262_v34, %v7262_v34  ;;  %v6014_v49 = vpop.f32.mrb[9].mxu0 }
 0x284   : > { %14490 = vst [vmem:[#allocation8_spill] sm:$0xff] %v11983_v2  ;;  %v7229_v19 = vcombine.low %v11966_v55, %v11980_v12  ;;  %v7230_v46 = vcombine.low %v11975_v29, %v11983_v2  ;;  %v7788_v11 = vsel %vm2995_vm8, %v7228_v32, 0.0  ;;  %v9548_v23 = vpack.c.bf16 %v7228_v32, %v7228_v32  ;;  %v12001_v24 = vpop.f32.mrb[10].mxu0 }
 0x285   : > { %14491 = vst [vmem:[#allocation9_spill] sm:$0xff] %v11993_v36  ;;  %v6313_v50 = vcombine.high %v6305_v48, %v6305_v48  ;;  %v6314_v39 = vcombine.high %v6312_v61, %v6312_v61  ;;  %v12003_v52 = vadd.f32 %v7789_v44, %v7788_v11  ;;  %9047 = vst.msk [vmem:[%s11989_s29 + $0x8] sm:$0xf] %vm1749_vm1, %v9550_v25  ;;  %v12012_v30 = vpop.f32.mrb[11].mxu0  ;;  %v12014_v6 = vpop.f32.mrb[12].mxu1 }
 0x286   : > { %v7237_v60 = vrot.slane %v7229_v19, %v11893_v54  ;;  %v7244_v47 = vrot.slane %v7230_v46, %v11893_v54  ;;  %v12010_v56 = vadd.f32 %v11899_v5, %v6305_v48  ;;  %9045 = vst.msk [vmem:[%s11989_s29] sm:$0xf] %vm1749_vm1, %v9548_v23  ;;  %v6265_v58 = vcombine.high %v10100_v35, %v10100_v35  ;;  %v12025_v26 = vpop.f32.mrb[13].mxu1 }
 0x287   : > { %v12019_v8 = vadd.f32 %v11909_v53, %v6313_v50  ;;  %v12022_v42 = vadd.f32 %v11896_v16, %v6314_v39  ;;  %v6272_v18 = vrot.slane %v10100_v35, %v11893_v54  ;;  %v10101_v13 = vadd.f32 %v10064_v9, %v11913_v14  ;;  %v12029_v15 = vpop.f32.mrb[14].mxu1 }
 0x288   : > { %14492 = vst [vmem:[#allocation10_spill] sm:$0xff] %v12010_v56  ;;  %v7245_v40 = vcombine.low %v7237_v60, %v7244_v47  ;;  %v10102_v20 = vadd.f32 %v6001_v62, %v11919_v4  ;;  %v10103_v45 = vadd.f32 %v10067_v1, %v9877_v59  ;;  %v6279_v38 = vrot.slane %v6265_v58, %v11893_v54  ;;  %v12039_v48 = vpop.f32.mrb[15].mxu1 }
 0x289   : > { %14493 = vst [vmem:[#allocation11_spill] sm:$0xff] %v12019_v8  ;;  %14494 = vst [vmem:[#allocation12_spill] sm:$0xff] %v12022_v42  ;;  %v7298_v17 = vcombine.low %v12010_v56, %v12019_v8  ;;  %v12035_v33 = vadd.f32 %v11909_v53, %v6272_v18  ;;  %v12037_v34 = vadd.f32 %v6014_v49, %v4053_v51 }
 0x28a   : > { %v7819_v14 = vsel %vm2995_vm8, %v7245_v40, 0.0  ;;  %v9549_v9 = vpack.c.bf16 %v7245_v40, %v7245_v40  ;;  %v6315_v4 = vcombine.high %v10101_v13, %v10101_v13  ;;  %v6322_v62 = vrot.slane %v10101_v13, %v11893_v54  ;;  %v12051_v51 = vpop.f32.mrb[12].mxu0 }
 0x28b   : > { %14495 = vst [vmem:[#allocation13_spill] sm:$0xff] %v12035_v33  ;;  %v12044_v59 = vrot.slane %v7298_v17, %v11893_v54  ;;  %v6280_v32 = vcombine.high %v6279_v38, %v6279_v38  ;;  %v12047_v61 = vadd.f32 %v11896_v16, %v6279_v38  ;;  %v7264_v35 = vcombine.low %v11993_v36, %v12035_v33  ;;  %v12061_v46 = vpop.f32.mrb[13].mxu0 }
 0x28c   : > { %9046 = vst.msk [vmem:[%s11989_s29 + $0x4] sm:$0xf] %vm1749_vm1, %v9549_v9  ;;  %v12056_v1 = vrot.slane %v6315_v4, %v11893_v54  ;;  %v6330_v44 = vcombine.high %v6322_v62, %v6322_v62  ;;  %v12059_v25 = vadd.f32 %v11904_v27, %v6322_v62  ;;  %v6281_v19 = vcombine.high %v10102_v20, %v10102_v20  ;;  %v12068_v39 = vpop.f32.mrb[14].mxu0 }
 0x28d   : > { %v12064_v49 = vadd.f32 %v11904_v27, %v6280_v32  ;;  %v7278_v11 = vrot.slane %v7264_v35, %v11893_v54  ;;  %v6288_v23 = vrot.slane %v10102_v20, %v11893_v54  ;;  %v6365_v50 = vcombine.high %v10103_v45, %v10103_v45  ;;  %v12081_v40 = vpop.f32.mrb[15].mxu0  ;;  %v12083_v13 = vpop.f32.mrb[16].mxu1 }
 0x28e   : > { %14496 = vst [vmem:[#allocation14_spill] sm:$0xff] %v12059_v25  ;;  %v6331_v60 = vcombine.high %v12056_v1, %v12056_v1  ;;  %v12073_v47 = vadd.f32 %v11899_v5, %v6330_v44  ;;  %v12077_v58 = vadd.f32 %v11909_v53, %v12056_v1  ;;  %v7314_v18 = vcombine.low %v12022_v42, %v12059_v25  ;;  %v12089_v4 = vpop.f32.mrb[17].mxu1 }
 0x28f   : > { %14497 = vst [vmem:[#allocation15_spill] sm:$0xff] %v12064_v49  ;;  %v7279_v20 = vcombine.low %v11972_v22, %v7278_v11  ;;  %v7280_v17 = vcombine.low %v12047_v61, %v12064_v49  ;;  %v6295_v38 = vrot.slane %v6281_v19, %v11893_v54  ;;  %v6296_v9 = vcombine.high %v6288_v23, %v6288_v23  ;;  %v12098_v22 = vpop.f32.mrb[18].mxu1 }
 0x290   : > { %14498 = vst [vmem:[#allocation16_spill] sm:$0xff] %v12073_v47  ;;  %14499 = vst [vmem:[#allocation17_spill] sm:$0xff] %v12077_v58  ;;  %v7315_v62 = vcombine.low %v12073_v47, %v12077_v58  ;;  %v7322_v32 = vrot.slane %v7314_v18, %v11893_v54  ;;  %v12095_v35 = vadd.f32 %v11899_v5, %v6288_v23  ;;  %v12102_v42 = vpop.f32.mrb[19].mxu1 }
 0x291   : > { %v6372_v1 = vrot.slane %v10103_v45, %v11893_v54  ;;  %v7288_v44 = vrot.slane %v7280_v17, %v11893_v54  ;;  %v7820_v19 = vsel %vm2995_vm8, %v7279_v20, 0.0  ;;  %v9551_v11 = vpack.c.bf16 %v7279_v20, %v7279_v20 }
 0x292   : > { %14500 = vst [vmem:[#allocation18_spill] sm:$0xff] %v12095_v35  ;;  %v6297_v25 = vcombine.high %v6295_v38, %v6295_v38  ;;  %v7821_v8 = vadd.f32 %v7820_v19, %v7819_v14  ;;  %v7329_v58 = vrot.slane %v7315_v62, %v11893_v54  ;;  %v12106_v18 = vadd.f32 %v11909_v53, %v6296_v9  ;;  %v12120_v14 = vpop.f32.mrb[16].mxu0 }
 0x293   : > { %v12109_v23 = vadd.f32 %v11896_v16, %v6295_v38  ;;  %9048 = vst.msk [vmem:[%s11989_s29 + $0xc] sm:$0xf] %vm1749_vm1, %v9551_v11  ;;  %v6379_v17 = vrot.slane %v6365_v50, %v11893_v54  ;;  %v6380_v20 = vcombine.high %v6372_v1, %v6372_v1  ;;  %v12118_v47 = vadd.f32 %v11896_v16, %v6372_v1 }
 0x294   : > { %14501 = vst [vmem:[#allocation19_spill] sm:$0xff] %v12106_v18  ;;  %v12114_v45 = vadd.f32 %v11904_v27, %v6297_v25  ;;  %v7330_v62 = vcombine.low %v7322_v32, %v7329_v58  ;;  %v7281_v9 = vcombine.low %v12095_v35, %v12106_v18  ;;  %v6332_v38 = vcombine.high %v12037_v34, %v12037_v34  ;;  %v12128_v25 = vpop.f32.mrb[17].mxu0 }
 0x295   : > { %14503 = vst [vmem:[#allocation21_spill] sm:$0xff] %v12118_v47  ;;  %v6339_v19 = vrot.slane %v12037_v34, %v11893_v54  ;;  %v6381_v1 = vcombine.high %v6379_v17, %v6379_v17  ;;  %v12133_v11 = vadd.f32 %v11904_v27, %v6380_v20  ;;  %v12136_v58 = vadd.f32 %v11899_v5, %v6379_v17  ;;  %v12138_v32 = vpop.f32.mrb[18].mxu0 }
 0x296   : > { %14502 = vst [vmem:[#allocation20_spill] sm:$0xff] %v12114_v45  ;;  %v7297_v50 = vcombine.low %v12109_v23, %v12114_v45  ;;  %v7793_v56 = vsel %vm2995_vm8, %v7330_v62, 0.0  ;;  %v9554_v18 = vpack.c.bf16 %v7330_v62, %v7330_v62  ;;  %v7295_v34 = vrot.slane %v7281_v9, %v11893_v54  ;;  %v12143_v49 = vpop.f32.mrb[19].mxu0 }
 0x297   : > { %14504 = vst [vmem:[#allocation22_spill] sm:$0xff] %v12133_v11  ;;  %14505 = vst [vmem:[#allocation23_spill] sm:$0xff] %v12136_v58  ;;  %v6346_v35 = vrot.slane %v6332_v38, %v11893_v54  ;;  %v12147_v33 = vadd.f32 %v11909_v53, %v6381_v1  ;;  %v7365_v17 = vcombine.low %v12118_v47, %v12133_v11 }
 0x298   : > { %v7305_v45 = vrot.slane %v7297_v50, %v11893_v54  ;;  %v6347_v20 = vcombine.high %v6339_v19, %v6339_v19  ;;  %9051 = vst.msk [vmem:[%s11989_s29 + $0x18] sm:$0xf] %vm1749_vm1, %v9554_v18  ;;  %v7296_v36 = vcombine.low %v7288_v44, %v7295_v34  ;;  %v12154_v62 = vadd.f32 %v11896_v16, %v6331_v60 }
 0x299   : > { %14506 = vst [vmem:[#allocation24_spill] sm:$0xff] %v12147_v33  ;;  %v12157_v9 = vadd.f32 %v11904_v27, %v6339_v19  ;;  %v12160_v38 = vadd.f32 %v11909_v53, %v6346_v35  ;;  %v7366_v1 = vcombine.low %v12136_v58, %v12147_v33  ;;  %v7373_v11 = vrot.slane %v7365_v17, %v11893_v54 }
 0x29a   : > { %14507 = vst [vmem:[#allocation25_spill] sm:$0xff] %v12154_v62  ;;  %v7313_v50 = vcombine.low %v7305_v45, %v12044_v59  ;;  %v12167_v18 = vadd.f32 %v11899_v5, %v6347_v20  ;;  %v7791_v60 = vsel %vm2995_vm8, %v7296_v36, 0.0  ;;  %v9552_v44 = vpack.c.bf16 %v7296_v36, %v7296_v36  ;;  %v12177_v33 = vpop.f32.mrb[20].mxu0 }
 0x29b   : > { %14508 = vst [vmem:[#allocation26_spill] sm:$0xff] %v12157_v9  ;;  %14509 = vst [vmem:[#allocation27_spill] sm:$0xff] %v12160_v38  ;;  %v7331_v19 = vcombine.low %v12154_v62, %v12157_v9  ;;  %v10105_v35 = vadd.f32 %v12001_v24, %v11968_v0  ;;  %v7792_v59 = vadd.f32 %v7791_v60, %v12003_v52  ;;  %v12184_v9 = vpop.f32.mrb[21].mxu0 }
 0x29c   : > { %14510 = vst [vmem:[#allocation28_spill] sm:$0xff] %v12167_v18  ;;  %v7822_v45 = vsel %vm2995_vm8, %v7313_v50, 0.0  ;;  %v9553_v34 = vpack.c.bf16 %v7313_v50, %v7313_v50  ;;  %v7380_v17 = vrot.slane %v7366_v1, %v11893_v54  ;;  %9049 = vst.msk [vmem:[%s11989_s29 + $0x10] sm:$0xf] %vm1749_vm1, %v9552_v44  ;;  %v7332_v36 = vcombine.low %v12167_v18, %v12160_v38  ;;  %v12193_v1 = vpop.f32.mrb[22].mxu0 }
 0x29d   : > { %v7339_v20 = vrot.slane %v7331_v19, %v11893_v54  ;;  %v7823_v58 = vadd.f32 %v7822_v45, %v7821_v8  ;;  %v6382_v47 = vcombine.high %v10105_v35, %v10105_v35  ;;  %v6389_v24 = vrot.slane %v10105_v35, %v11893_v54  ;;  %v12201_v19 = vpop.f32.mrb[23].mxu0 }
 0x29e   : > { %9050 = vst.msk [vmem:[%s11989_s29 + $0x14] sm:$0xf] %vm1749_vm1, %v9553_v34  ;;  %v7381_v0 = vcombine.low %v7373_v11, %v7380_v17  ;;  %v10106_v52 = vadd.f32 %v12012_v30, %v11977_v57  ;;  %v12191_v50 = vadd.f32 %v7793_v56, %v7792_v59  ;;  %v7346_v60 = vrot.slane %v7332_v36, %v11893_v54 }
 0x29f   : > { %v6396_v8 = vrot.slane %v6382_v47, %v11893_v54  ;;  %v10107_v44 = vadd.f32 %v12051_v51, %v12014_v6  ;;  %v10108_v11 = vadd.f32 %v12061_v46, %v12025_v26  ;;  %v6397_v45 = vcombine.high %v6389_v24, %v6389_v24 }
 0x2a0   : > { %v9557_v35 = vpack.c.bf16 %v7381_v0, %v7381_v0  ;;  %v6348_v34 = vcombine.high %v10106_v52, %v10106_v52  ;;  %v12204_v57 = vsel %vm2995_vm8, %v7381_v0, 0.0  ;;  %v7347_v56 = vcombine.low %v7339_v20, %v7346_v60 }
 0x2a1   : > { %v12207_v30 = vadd.f32 %v11904_v27, %v6396_v8  ;;  %v6355_v47 = vrot.slane %v10106_v52, %v11893_v54  ;;  %v12213_v6 = vadd.f32 %v11896_v16, %v6397_v45  ;;  %v6432_v51 = vcombine.high %v10107_v44, %v10107_v44 }
 0x2a2   : > { %9054 = vst.msk [vmem:[%s11989_s29 + $0x24] sm:$0xf] %vm1749_vm1, %v9557_v35  ;;  %v6362_v26 = vrot.slane %v6348_v34, %v11893_v54  ;;  %v6439_v46 = vrot.slane %v10107_v44, %v11893_v54  ;;  %v7824_v59 = vsel %vm2995_vm8, %v7347_v56, 0.0  ;;  %v9555_v17 = vpack.c.bf16 %v7347_v56, %v7347_v56  ;;  %v12223_v35 = vpop.f32.mrb[24].mxu0 }
 0x2a3   : > { %14511 = vst [vmem:[#allocation29_spill] sm:$0xff] %v12207_v30  ;;  %14512 = vst [vmem:[#allocation30_spill] sm:$0xff] %v12213_v6  ;;  %v6398_v36 = vcombine.high %v6396_v8, %v6396_v8  ;;  %v6363_v20 = vcombine.high %v6355_v47, %v6355_v47  ;;  %v7825_v0 = vadd.f32 %v7824_v59, %v7823_v58  ;;  %v12234_v34 = vpop.f32.mrb[25].mxu0 }
 0x2a4   : > { %v7382_v24 = vcombine.low %v12213_v6, %v12207_v30  ;;  %v6364_v52 = vcombine.high %v6362_v26, %v6362_v26  ;;  %v12221_v60 = vadd.f32 %v11896_v16, %v6355_v47  ;;  %9052 = vst.msk [vmem:[%s11989_s29 + $0x1c] sm:$0xf] %vm1749_vm1, %v9555_v17  ;;  %v12231_v44 = vadd.f32 %v11899_v5, %v6362_v26  ;;  %v12243_v30 = vpop.f32.mrb[26].mxu0 }
 0x2a5   : > { %v12228_v45 = vadd.f32 %v11904_v27, %v6363_v20  ;;  %v6446_v8 = vrot.slane %v6432_v51, %v11893_v54  ;;  %v6447_v58 = vcombine.high %v6439_v46, %v6439_v46  ;;  %v12240_v47 = vadd.f32 %v11899_v5, %v6439_v46 }
 0x2a6   : > { %14513 = vst [vmem:[#allocation31_spill] sm:$0xff] %v12221_v60  ;;  %14515 = vst [vmem:[#allocation33_spill] sm:$0xff] %v12231_v44  ;;  %v12237_v56 = vadd.f32 %v11909_v53, %v6364_v52  ;;  %v6399_v59 = vcombine.high %v10108_v11, %v10108_v11  ;;  %v6406_v17 = vrot.slane %v10108_v11, %v11893_v54  ;;  %v12253_v52 = vpop.f32.mrb[27].mxu0 }
 0x2a7   : > { %14514 = vst [vmem:[#allocation32_spill] sm:$0xff] %v12228_v45  ;;  %14517 = vst [vmem:[#allocation35_spill] sm:$0xff] %v12240_v47  ;;  %v7348_v26 = vcombine.low %v12221_v60, %v12228_v45  ;;  %v6448_v20 = vcombine.high %v6446_v8, %v6446_v8  ;;  %v12248_v51 = vadd.f32 %v11909_v53, %v6447_v58 }
 0x2a8   : > { %14516 = vst [vmem:[#allocation34_spill] sm:$0xff] %v12237_v56  ;;  %v12251_v6 = vadd.f32 %v11896_v16, %v6446_v8  ;;  %v7349_v46 = vcombine.low %v12231_v44, %v12237_v56  ;;  %v6413_v38 = vrot.slane %v6399_v59, %v11893_v54  ;;  %v6414_v11 = vcombine.high %v6406_v17, %v6406_v17 }
 0x2a9   : > { %14518 = vst [vmem:[#allocation36_spill] sm:$0xff] %v12248_v51  ;;  %v12259_v18 = vadd.f32 %v11899_v5, %v6398_v36  ;;  %v7356_v45 = vrot.slane %v7348_v26, %v11893_v54  ;;  %v12263_v60 = vadd.f32 %v11904_v27, %v6448_v20  ;;  %v7417_v8 = vcombine.low %v12240_v47, %v12248_v51 }
 0x2aa   : > { %14519 = vst [vmem:[#allocation37_spill] sm:$0xff] %v12251_v6  ;;  %v12268_v58 = vadd.f32 %v11909_v53, %v6406_v17  ;;  %v7363_v62 = vrot.slane %v7349_v46, %v11893_v54  ;;  %v6415_v56 = vcombine.high %v6413_v38, %v6413_v38  ;;  %v12272_v59 = vadd.f32 %v11896_v16, %v6414_v11 }
 0x2ab   : > { %14520 = vst [vmem:[#allocation38_spill] sm:$0xff] %v12259_v18  ;;  %14521 = vst [vmem:[#allocation39_spill] sm:$0xff] %v12263_v60  ;;  %v12275_v36 = vadd.f32 %v11904_v27, %v6413_v38  ;;  %v7390_v26 = vrot.slane %v7382_v24, %v11893_v54  ;;  %v7433_v20 = vcombine.low %v12251_v6, %v12263_v60  ;;  %v12291_v24 = vpop.f32.mrb[28].mxu0 }
 0x2ac   : > { %14522 = vst [vmem:[#allocation40_spill] sm:$0xff] %v12268_v58  ;;  %14523 = vst [vmem:[#allocation41_spill] sm:$0xff] %v12272_v59  ;;  %v7383_v51 = vcombine.low %v12259_v18, %v12268_v58  ;;  %v10109_v17 = vadd.f32 %v12068_v39, %v12029_v15  ;;  %v7364_v47 = vcombine.low %v7356_v45, %v7363_v62  ;;  %v12298_v39 = vpop.f32.mrb[29].mxu0 }
 0x2ad   : > { %14524 = vst [vmem:[#allocation42_spill] sm:$0xff] %v12275_v36  ;;  %v12285_v46 = vrot.slane %v7417_v8, %v11893_v54  ;;  %v7399_v11 = vcombine.low %v12272_v59, %v12275_v36  ;;  %v10110_v38 = vadd.f32 %v12081_v40, %v12039_v48  ;;  %v12296_v15 = vadd.f32 %v11899_v5, %v6415_v56  ;;  %v12302_v48 = vpop.f32.mrb[30].mxu0 }
 0x2ae   : > { %v7397_v60 = vrot.slane %v7383_v51, %v11893_v54  ;;  %v6449_v6 = vcombine.high %v10109_v17, %v10109_v17  ;;  %v6456_v58 = vrot.slane %v10109_v17, %v11893_v54  ;;  %v7795_v62 = vsel %vm2995_vm8, %v7364_v47, 0.0  ;;  %v12306_v18 = vpop.f32.mrb[31].mxu0 }
 0x2af   : > { %14525 = vst [vmem:[#allocation43_spill] sm:$0xff] %v12296_v15  ;;  %v9556_v45 = vpack.c.bf16 %v7364_v47, %v7364_v47  ;;  %v7441_v8 = vrot.slane %v7433_v20, %v11893_v54  ;;  %v6416_v36 = vcombine.high %v10110_v38, %v10110_v38  ;;  %v7796_v40 = vadd.f32 %v7795_v62, %v12191_v50 }
 0x2b0   : > { %v7398_v59 = vcombine.low %v7390_v26, %v7397_v60  ;;  %v6463_v51 = vrot.slane %v6449_v6, %v11893_v54  ;;  %v6464_v17 = vcombine.high %v6456_v58, %v6456_v58  ;;  %v7407_v56 = vrot.slane %v7399_v11, %v11893_v54 }
 0x2b1   : > { %9053 = vst.msk [vmem:[%s11989_s29 + $0x20] sm:$0xf] %vm1749_vm1, %v9556_v45  ;;  %v6423_v47 = vrot.slane %v10110_v38, %v11893_v54  ;;  %v6430_v20 = vrot.slane %v6416_v36, %v11893_v54  ;;  %v7827_v44 = vadd.f32 %v12204_v57, %v7825_v0  ;;  %v12316_v60 = vadd.f32 %v11899_v5, %v6456_v58 }
 0x2b2   : > { %v7797_v31 = vsel %vm2995_vm8, %v7398_v59, 0.0  ;;  %v9558_v50 = vpack.c.bf16 %v7398_v59, %v7398_v59  ;;  %v12319_v6 = vadd.f32 %v11909_v53, %v6464_v17  ;;  %v6465_v62 = vcombine.high %v6463_v51, %v6463_v51  ;;  %v12346_v51 = vpop.f32.mrb[32].mxu0 }
 0x2b3   : > { %14526 = vst [vmem:[#allocation44_spill] sm:$0xff] %v12316_v60  ;;  %v7798_v26 = vadd.f32 %v7797_v31, %v7796_v40  ;;  %v6431_v45 = vcombine.high %v6430_v20, %v6430_v20  ;;  %v12322_v11 = vadd.f32 %v11909_v53, %v6423_v47  ;;  %v12329_v0 = vadd.f32 %v11896_v16, %v6430_v20  ;;  %v12350_v17 = vpop.f32.mrb[33].mxu0 }
 0x2b4   : > { %14527 = vst [vmem:[#allocation45_spill] sm:$0xff] %v12319_v6  ;;  %9055 = vst.msk [vmem:[%s11989_s29 + $0x28] sm:$0xf] %vm1749_vm1, %v9558_v50  ;;  %v7434_v57 = vcombine.low %v12316_v60, %v12319_v6  ;;  %v10111_v58 = vadd.f32 %v12120_v14, %v12083_v13  ;;  %v10112_v59 = vadd.f32 %v12128_v25, %v12089_v4 }
 0x2b5   : > { %14528 = vst [vmem:[#allocation46_spill] sm:$0xff] %v12322_v11  ;;  %14529 = vst [vmem:[#allocation47_spill] sm:$0xff] %v12329_v0  ;;  %v12336_v31 = vadd.f32 %v11904_v27, %v6431_v45  ;;  %v7400_v36 = vcombine.low %v12296_v15, %v12322_v11  ;;  %v10113_v38 = vadd.f32 %v12138_v32, %v12098_v22  ;;  %v12365_v60 = vpop.f32.mrb[20].mxu1 }
 0x2b6   : > { %v12344_v40 = vadd.f32 %v12143_v49, %v12102_v42  ;;  %v7448_v13 = vrot.slane %v7434_v57, %v11893_v54  ;;  %v6499_v14 = vcombine.high %v10111_v58, %v10111_v58  ;;  %v6506_v4 = vrot.slane %v10111_v58, %v11893_v54  ;;  %v12359_v49 = vpop.f32.mrb[34].mxu0 }
 0x2b7   : > { %14530 = vst [vmem:[#allocation48_spill] sm:$0xff] %v12336_v31  ;;  %v6466_v25 = vcombine.high %v10112_v59, %v10112_v59  ;;  %v12353_v47 = vadd.f32 %v11896_v16, %v6465_v62  ;;  %v7414_v20 = vrot.slane %v7400_v36, %v11893_v54  ;;  %v7416_v22 = vcombine.low %v12329_v0, %v12336_v31  ;;  %v12362_v58 = vpop.f32.mrb[35].mxu0 }
 0x2b8   : > { %v6473_v42 = vrot.slane %v10112_v59, %v11893_v54  ;;  %v7449_v32 = vcombine.low %v7441_v8, %v7448_v13  ;;  %v6513_v50 = vrot.slane %v6499_v14, %v11893_v54  ;;  %v6514_v45 = vcombine.high %v6506_v4, %v6506_v4  ;;  %v12368_v59 = vpop.f32.mrb[21].mxu1 }
 0x2b9   : > { %14531 = vst [vmem:[#allocation49_spill] sm:$0xff] %v12353_v47  ;;  %v6516_v57 = vcombine.high %v10113_v38, %v10113_v38  ;;  %v7415_v6 = vcombine.low %v7407_v56, %v7414_v20  ;;  %v7424_v62 = vrot.slane %v7416_v22, %v11893_v54  ;;  %v6480_v36 = vrot.slane %v6466_v25, %v11893_v54  ;;  %v12378_v22 = vpop.f32.mrb[22].mxu1 }
 0x2ba   : > { %v6481_v31 = vcombine.high %v6473_v42, %v6473_v42  ;;  %v9561_v0 = vpack.c.bf16 %v7449_v32, %v7449_v32  ;;  %v6515_v11 = vcombine.high %v6513_v50, %v6513_v50  ;;  %v12371_v8 = vadd.f32 %v11896_v16, %v6506_v4  ;;  %v4551_v3 = vpop.f32.mrb[23].mxu1 }
 0x2bb   : > { %v12374_v13 = vadd.f32 %v11904_v27, %v6514_v45  ;;  %v7432_v56 = vcombine.low %v7424_v62, %v12285_v46  ;;  %v7828_v14 = vsel %vm2995_vm8, %v7415_v6, 0.0  ;;  %v9559_v20 = vpack.c.bf16 %v7415_v6, %v7415_v6 }
 0x2bc   : > { %14532 = vst [vmem:[#allocation50_spill] sm:$0xff] %v12371_v8  ;;  %v12381_v25 = vadd.f32 %v11899_v5, %v6513_v50  ;;  %9058 = vst.msk [vmem:[%s11989_s29 + $0x34] sm:$0xf] %vm1749_vm1, %v9561_v0  ;;  %v7829_v15 = vadd.f32 %v7828_v14, %v7827_v44  ;;  %v12386_v4 = vadd.f32 %v11909_v53, %v6515_v11 }
 0x2bd   : > { %14533 = vst [vmem:[#allocation51_spill] sm:$0xff] %v12374_v13  ;;  %v7484_v45 = vcombine.low %v12371_v8, %v12374_v13  ;;  %v6482_v46 = vcombine.high %v6480_v36, %v6480_v36  ;;  %v7799_v62 = vsel %vm2995_vm8, %v7432_v56, 0.0  ;;  %v9560_v6 = vpack.c.bf16 %v7432_v56, %v7432_v56  ;;  %9056 = vst.msk [vmem:[%s11989_s29 + $0x2c] sm:$0xf] %vm1749_vm1, %v9559_v20 }
 0x2be   : > { %14534 = vst [vmem:[#allocation52_spill] sm:$0xff] %v12381_v25  ;;  %14535 = vst [vmem:[#allocation53_spill] sm:$0xff] %v12386_v4  ;;  %v12394_v50 = vadd.f32 %v11904_v27, %v6473_v42  ;;  %v12397_v43 = vadd.f32 %v11899_v5, %v6481_v31  ;;  %v7485_v44 = vcombine.low %v12381_v25, %v12386_v4  ;;  %v12427_v25 = vpop.f32.mrb[24].mxu1 }
 0x2bf   : > { %v7492_v11 = vrot.slane %v7484_v45, %v11893_v54  ;;  %v12403_v0 = vadd.f32 %v11909_v53, %v6480_v36  ;;  %v12405_v14 = vadd.f32 %v7799_v62, %v7798_v26  ;;  %9057 = vst.msk [vmem:[%s11989_s29 + $0x30] sm:$0xf] %vm1749_vm1, %v9560_v6  ;;  %v6523_v42 = vrot.slane %v10113_v38, %v11893_v54 }
 0x2c0   : > { %14536 = vst [vmem:[#allocation54_spill] sm:$0xff] %v12394_v50  ;;  %14537 = vst [vmem:[#allocation55_spill] sm:$0xff] %v12397_v43  ;;  %v7450_v56 = vcombine.low %v12353_v47, %v12394_v50  ;;  %v6530_v31 = vrot.slane %v6516_v57, %v11893_v54  ;;  %v6483_v20 = vcombine.high %v12344_v40, %v12344_v40 }
 0x2c1   : > { %14538 = vst [vmem:[#allocation56_spill] sm:$0xff] %v12403_v0  ;;  %v7499_v4 = vrot.slane %v7485_v44, %v11893_v54  ;;  %v7451_v36 = vcombine.low %v12397_v43, %v12403_v0  ;;  %v6490_v26 = vrot.slane %v12344_v40, %v11893_v54  ;;  %v12421_v45 = vadd.f32 %v11896_v16, %v6482_v46  ;;  %v12436_v46 = vpop.f32.mrb[25].mxu1 }
 0x2c2   : > { %v7458_v62 = vrot.slane %v7450_v56, %v11893_v54  ;;  %v6531_v6 = vcombine.high %v6523_v42, %v6523_v42  ;;  %v6532_v38 = vcombine.high %v6530_v31, %v6530_v31  ;;  %v12425_v57 = vadd.f32 %v11896_v16, %v6523_v42 }
 0x2c3   : > { %14539 = vst [vmem:[#allocation57_spill] sm:$0xff] %v12421_v45  ;;  %v12429_v13 = vcombine.low %v7492_v11, %v7499_v4  ;;  %v7465_v44 = vrot.slane %v7451_v36, %v11893_v54  ;;  %v12433_v8 = vadd.f32 %v11899_v5, %v6530_v31  ;;  %v6497_v40 = vrot.slane %v6483_v20, %v11893_v54  ;;  %v12447_v11 = vpop.f32.mrb[26].mxu1 }
 0x2c4   : > { %14540 = vst [vmem:[#allocation58_spill] sm:$0xff] %v12425_v57  ;;  %v12439_v56 = vadd.f32 %v11904_v27, %v6531_v6  ;;  %v12442_v42 = vadd.f32 %v11909_v53, %v6532_v38  ;;  %v6498_v0 = vcombine.high %v6490_v26, %v6490_v26  ;;  %v12445_v4 = vadd.f32 %v11904_v27, %v6490_v26  ;;  %v12455_v6 = vpop.f32.mrb[27].mxu1 }
 0x2c5   : > { %14541 = vst [vmem:[#allocation59_spill] sm:$0xff] %v12433_v8  ;;  %v7830_v31 = vsel %vm2995_vm8, %v7449_v32, 0.0  ;;  %v9564_v20 = vpack.c.bf16 %v12429_v13, %v12429_v13  ;;  %v7466_v36 = vcombine.low %v7458_v62, %v7465_v44  ;;  %v12453_v43 = vadd.f32 %v11909_v53, %v6497_v40 }
 0x2c6   : > { %14542 = vst [vmem:[#allocation60_spill] sm:$0xff] %v12439_v56  ;;  %14543 = vst [vmem:[#allocation61_spill] sm:$0xff] %v12442_v42  ;;  %v7501_v38 = vcombine.low %v12425_v57, %v12439_v56  ;;  %v7502_v26 = vcombine.low %v12433_v8, %v12442_v42  ;;  %v12462_v50 = vadd.f32 %v11899_v5, %v6498_v0 }
 0x2c7   : > { %14544 = vst [vmem:[#allocation62_spill] sm:$0xff] %v12445_v4  ;;  %14545 = vst [vmem:[#allocation63_spill] sm:$0xff] %v12453_v43  ;;  %v7467_v32 = vcombine.low %v12421_v45, %v12445_v4  ;;  %v9562_v62 = vpack.c.bf16 %v7466_v36, %v7466_v36  ;;  %v7831_v44 = vadd.f32 %v7830_v31, %v7829_v15  ;;  %v12483_v31 = vpop.f32.mrb[28].mxu1 }
 0x2c8   : > { %14546 = vst [vmem:[#allocation64_spill] sm:$0xff] %v12462_v50  ;;  %9061 = vst.msk [vmem:[%s11989_s29 + $0x40] sm:$0xf] %vm1749_vm1, %v9564_v20  ;;  %v10115_v40 = vadd.f32 %v12177_v33, %v12365_v60  ;;  %v7509_v47 = vrot.slane %v7501_v38, %v11893_v54  ;;  %v7516_v56 = vrot.slane %v7502_v26, %v11893_v54 }
 0x2c9   : > { %v7468_v42 = vcombine.low %v12462_v50, %v12453_v43  ;;  %9059 = vst.msk [vmem:[%s11989_s29 + $0x38] sm:$0xf] %vm1749_vm1, %v9562_v62  ;;  %v7475_v0 = vrot.slane %v7467_v32, %v11893_v54  ;;  %v10116_v20 = vadd.f32 %v12184_v9, %v12368_v59  ;;  %v10117_v33 = vadd.f32 %v12193_v1, %v12378_v22  ;;  %v12487_v62 = vpop.f32.mrb[29].mxu1 }
 0x2ca   : > { %v6567_v8 = vcombine.high %v10115_v40, %v10115_v40  ;;  %v7517_v57 = vcombine.low %v7509_v47, %v7516_v56  ;;  %v10118_v60 = vadd.f32 %v12201_v19, %v4551_v3  ;;  %v12489_v59 = vpop.f32.mrb[30].mxu1  ;;  %v6574_v1 = vrot.slane %v10115_v40, %v11893_v54 }
 0x2cb   : > { %v7482_v15 = vrot.slane %v7468_v42, %v11893_v54  ;;  %v6533_v26 = vcombine.high %v10116_v20, %v10116_v20  ;;  %v6540_v32 = vrot.slane %v10116_v20, %v11893_v54  ;;  %v6583_v47 = vcombine.high %v10117_v33, %v10117_v33  ;;  %v12493_v56 = vpop.f32.mrb[31].mxu1 }
 0x2cc   : > { %v6581_v38 = vrot.slane %v6567_v8, %v11893_v54  ;;  %v9565_v43 = vpack.c.bf16 %v7517_v57, %v7517_v57  ;;  %v7801_v8 = vsel %vm2995_vm8, %v7466_v36, 0.0  ;;  %v6590_v20 = vrot.slane %v10117_v33, %v11893_v54 }
 0x2cd   : > { %v7483_v9 = vcombine.low %v7475_v0, %v7482_v15  ;;  %v6547_v3 = vrot.slane %v6533_v26, %v11893_v54  ;;  %v6548_v19 = vcombine.high %v6540_v32, %v6540_v32  ;;  %v6597_v0 = vrot.slane %v6583_v47, %v11893_v54  ;;  %v12529_v45 = vpop.f32.mrb[32].mxu1 }
 0x2ce   : > { %v6582_v22 = vcombine.high %v6581_v38, %v6581_v38  ;;  %9062 = vst.msk [vmem:[%s11989_s29 + $0x44] sm:$0xf] %vm1749_vm1, %v9565_v43  ;;  %v12501_v15 = vadd.f32 %v11896_v16, %v6581_v38  ;;  %v6598_v36 = vcombine.high %v6590_v20, %v6590_v20  ;;  %v7802_v47 = vadd.f32 %v7801_v8, %v12405_v14 }
 0x2cf   : > { %v9563_v42 = vpack.c.bf16 %v7483_v9, %v7483_v9  ;;  %v6549_v50 = vcombine.high %v6547_v3, %v6547_v3  ;;  %v12507_v26 = vadd.f32 %v11896_v16, %v6548_v19  ;;  %v7832_v32 = vsel %vm2995_vm8, %v7483_v9, 0.0 }
 0x2d0   : > { %14547 = vst [vmem:[#allocation65_spill] sm:$0xff] %v12501_v15  ;;  %v12504_v40 = vadd.f32 %v11904_v27, %v6582_v22  ;;  %v12513_v43 = vadd.f32 %v11904_v27, %v6547_v3  ;;  %v6599_v33 = vcombine.high %v6597_v0, %v6597_v0  ;;  %v12517_v38 = vadd.f32 %v11909_v53, %v6574_v1 }
 0x2d1   : > { %14549 = vst [vmem:[#allocation67_spill] sm:$0xff] %v12507_v26  ;;  %9060 = vst.msk [vmem:[%s11989_s29 + $0x3c] sm:$0xf] %vm1749_vm1, %v9563_v42  ;;  %v6550_v4 = vcombine.high %v10118_v60, %v10118_v60  ;;  %v7834_v19 = vsel %vm2995_vm8, %v7517_v57, 0.0  ;;  %v12523_v9 = vadd.f32 %v11899_v5, %v6590_v20  ;;  %v12526_v42 = vadd.f32 %v11909_v53, %v6598_v36  ;;  %v12537_v57 = vpop.f32.mrb[33].mxu1 }
 0x2d2   : > { %14548 = vst [vmem:[#allocation66_spill] sm:$0xff] %v12504_v40  ;;  %14550 = vst [vmem:[#allocation68_spill] sm:$0xff] %v12513_v43  ;;  %v7552_v22 = vcombine.low %v12501_v15, %v12504_v40  ;;  %v6557_v3 = vrot.slane %v10118_v60, %v11893_v54  ;;  %v7833_v14 = vadd.f32 %v7832_v32, %v7831_v44  ;;  %v12545_v44 = vpop.f32.mrb[34].mxu1 }
 0x2d3   : > { %14551 = vst [vmem:[#allocation69_spill] sm:$0xff] %v12517_v38  ;;  %14552 = vst [vmem:[#allocation70_spill] sm:$0xff] %v12523_v9  ;;  %v7518_v1 = vcombine.low %v12507_v26, %v12513_v43  ;;  %v6564_v8 = vrot.slane %v6550_v4, %v11893_v54  ;;  %v12535_v40 = vadd.f32 %v11899_v5, %v6549_v50 }
 0x2d4   : > { %14553 = vst [vmem:[#allocation71_spill] sm:$0xff] %v12526_v42  ;;  %v7560_v20 = vrot.slane %v7552_v22, %v11893_v54  ;;  %v12541_v36 = vadd.f32 %v11904_v27, %v6599_v33  ;;  %v7553_v60 = vcombine.low %v12523_v9, %v12526_v42  ;;  %v6565_v15 = vcombine.high %v6557_v3, %v6557_v3  ;;  %v12555_v22 = vpop.f32.mrb[35].mxu1 }
 0x2d5   : > { %v6566_v32 = vcombine.high %v6564_v8, %v6564_v8  ;;  %v12548_v43 = vadd.f32 %v11909_v53, %v6557_v3  ;;  %v12551_v50 = vadd.f32 %v11904_v27, %v6564_v8  ;;  %v10119_v4 = vadd.f32 %v12223_v35, %v12427_v25 }
 0x2d6   : > { %14554 = vst [vmem:[#allocation72_spill] sm:$0xff] %v12541_v36  ;;  %v12558_v33 = vadd.f32 %v11896_v16, %v6597_v0  ;;  %v7567_v42 = vrot.slane %v7553_v60, %v11893_v54  ;;  %v12562_v9 = vadd.f32 %v11896_v16, %v6565_v15  ;;  %v10120_v3 = vadd.f32 %v12234_v34, %v12436_v46 }
 0x2d7   : > { %14555 = vst [vmem:[#allocation73_spill] sm:$0xff] %v12551_v50  ;;  %v12567_v26 = vadd.f32 %v11899_v5, %v6566_v32  ;;  %v7519_v8 = vcombine.low %v12535_v40, %v12548_v43  ;;  %v6634_v35 = vcombine.high %v10119_v4, %v10119_v4  ;;  %v6641_v25 = vrot.slane %v10119_v4, %v11893_v54 }
 0x2d8   : > { %14556 = vst [vmem:[#allocation74_spill] sm:$0xff] %v12558_v33  ;;  %14557 = vst [vmem:[#allocation75_spill] sm:$0xff] %v12562_v9  ;;  %v7568_v0 = vcombine.low %v7560_v20, %v7567_v42  ;;  %v7535_v60 = vcombine.low %v12562_v9, %v12551_v50  ;;  %v6600_v2 = vcombine.high %v10120_v3, %v10120_v3  ;;  %v7803_v4 = vsel %vm2995_vm8, %v12429_v13, 0.0 }
 0x2d9   : > { %v6607_v15 = vrot.slane %v10120_v3, %v11893_v54  ;;  %v7526_v37 = vrot.slane %v7518_v1, %v11893_v54  ;;  %v7569_v34 = vcombine.low %v12558_v33, %v12541_v36  ;;  %v7533_v46 = vrot.slane %v7519_v8, %v11893_v54 }
 0x2da   : > { %v7536_v32 = vcombine.low %v12567_v26, %v12517_v38  ;;  %v12583_v42 = vadd.f32 %v7834_v19, %v7833_v14  ;;  %v9568_v20 = vpack.c.bf16 %v7568_v0, %v7568_v0  ;;  %v7543_v9 = vrot.slane %v7535_v60, %v11893_v54 }
 0x2db   : > { %v7534_v50 = vcombine.low %v7526_v37, %v7533_v46  ;;  %v6648_v1 = vrot.slane %v6634_v35, %v11893_v54  ;;  %v6649_v8 = vcombine.high %v6641_v25, %v6641_v25  ;;  %v6614_v36 = vrot.slane %v6600_v2, %v11893_v54 }
 0x2dc   : > { %v7550_v3 = vrot.slane %v7536_v32, %v11893_v54  ;;  %9065 = vst.msk [vmem:[%s11989_s29 + $0x50] sm:$0xf] %vm1749_vm1, %v9568_v20  ;;  %v6615_v33 = vcombine.high %v6607_v15, %v6607_v15  ;;  %v10121_v13 = vadd.f32 %v12243_v30, %v12447_v11  ;;  %v7577_v19 = vrot.slane %v7569_v34, %v11893_v54 }
 0x2dd   : > { %v7804_v37 = vadd.f32 %v7803_v4, %v7802_v47  ;;  %v9566_v60 = vpack.c.bf16 %v7534_v50, %v7534_v50  ;;  %v6616_v46 = vcombine.high %v6614_v36, %v6614_v36  ;;  %v12595_v32 = vadd.f32 %v11899_v5, %v6607_v15 }
 0x2de   : > { %v7551_v14 = vcombine.low %v7543_v9, %v7550_v3  ;;  %v12598_v35 = vadd.f32 %v11909_v53, %v6615_v33  ;;  %v6650_v20 = vcombine.high %v10121_v13, %v10121_v13  ;;  %v12601_v2 = vsel %vm2995_vm8, %v7568_v0, 0.0 }
 0x2df   : > { %9063 = vst.msk [vmem:[%s11989_s29 + $0x48] sm:$0xf] %vm1749_vm1, %v9566_v60  ;;  %v12606_v30 = vadd.f32 %v11904_v27, %v6641_v25  ;;  %v6657_v11 = vrot.slane %v10121_v13, %v11893_v54  ;;  %v12610_v47 = vadd.f32 %v11899_v5, %v6649_v8  ;;  %v12613_v9 = vadd.f32 %v11909_v53, %v6648_v1 }
 0x2e0   : > { %v9567_v38 = vpack.c.bf16 %v7551_v14, %v7551_v14  ;;  %v7570_v36 = vcombine.low %v12595_v32, %v12598_v35  ;;  %v6664_v33 = vrot.slane %v6650_v20, %v11893_v54  ;;  %v12621_v0 = vadd.f32 %v11896_v16, %v6616_v46 }
 0x2e1   : > { %14558 = vst [vmem:[#allocation76_spill] sm:$0xff] %v12606_v30  ;;  %14559 = vst [vmem:[#allocation77_spill] sm:$0xff] %v12610_v47  ;;  %v6665_v25 = vcombine.high %v6657_v11, %v6657_v11  ;;  %v12624_v15 = vadd.f32 %v11896_v16, %v6657_v11  ;;  %v10122_v34 = vadd.f32 %v12253_v52, %v12455_v6 }
 0x2e2   : > { %14560 = vst [vmem:[#allocation78_spill] sm:$0xff] %v12613_v9  ;;  %9064 = vst.msk [vmem:[%s11989_s29 + $0x4c] sm:$0xf] %vm1749_vm1, %v9567_v38  ;;  %v7584_v4 = vrot.slane %v7570_v36, %v11893_v54  ;;  %v6666_v3 = vcombine.high %v6664_v33, %v6664_v33  ;;  %v12630_v1 = vadd.f32 %v11899_v5, %v6664_v33 }
 0x2e3   : > { %14561 = vst [vmem:[#allocation79_spill] sm:$0xff] %v12624_v15  ;;  %v10123_v8 = vadd.f32 %v12291_v24, %v12483_v31  ;;  %v12635_v38 = vadd.f32 %v11904_v27, %v6665_v25  ;;  %v6617_v13 = vcombine.high %v10122_v34, %v10122_v34  ;;  %v6624_v60 = vrot.slane %v10122_v34, %v11893_v54 }
 0x2e4   : > { %14562 = vst [vmem:[#allocation80_spill] sm:$0xff] %v12630_v1  ;;  %v10124_v46 = vadd.f32 %v12298_v39, %v12487_v62  ;;  %v7585_v20 = vcombine.low %v7577_v19, %v7584_v4  ;;  %v12641_v52 = vadd.f32 %v11909_v53, %v6666_v3  ;;  %v7805_v24 = vsel %vm2995_vm8, %v7534_v50, 0.0 }
 0x2e5   : > { %14563 = vst [vmem:[#allocation81_spill] sm:$0xff] %v12635_v38  ;;  %v6701_v6 = vcombine.high %v10123_v8, %v10123_v8  ;;  %v12644_v11 = vrot.slane %v10123_v8, %v11893_v54  ;;  %v7620_v31 = vcombine.low %v12624_v15, %v12635_v38  ;;  %v6631_v36 = vrot.slane %v6617_v13, %v11893_v54 }
 0x2e6   : > { %14564 = vst [vmem:[#allocation82_spill] sm:$0xff] %v12641_v52  ;;  %v6632_v33 = vcombine.high %v6624_v60, %v6624_v60  ;;  %v9569_v25 = vpack.c.bf16 %v7585_v20, %v7585_v20  ;;  %v7621_v39 = vcombine.low %v12630_v1, %v12641_v52  ;;  %v12653_v62 = vadd.f32 %v11904_v27, %v6624_v60 }
 0x2e7   : > { %v6715_v19 = vrot.slane %v6701_v6, %v11893_v54  ;;  %v7604_v34 = vcombine.low %v12610_v47, %v12613_v9  ;;  %v7628_v50 = vrot.slane %v7620_v31, %v11893_v54  ;;  %v6633_v4 = vcombine.high %v6631_v36, %v6631_v36 }
 0x2e8   : > { %v12660_v3 = vadd.f32 %v11899_v5, %v6632_v33  ;;  %9066 = vst.msk [vmem:[%s11989_s29 + $0x54] sm:$0xf] %vm1749_vm1, %v9569_v25  ;;  %v7635_v8 = vrot.slane %v7621_v39, %v11893_v54  ;;  %v12666_v13 = vadd.f32 %v11909_v53, %v6631_v36  ;;  %v7586_v60 = vcombine.low %v12621_v0, %v12653_v62 }
 0x2e9   : > { %v6716_v6 = vcombine.high %v12644_v11, %v12644_v11  ;;  %v7806_v52 = vadd.f32 %v7805_v24, %v7804_v37  ;;  %v7836_v31 = vsel %vm2995_vm8, %v7551_v14, 0.0  ;;  %v12674_v1 = vadd.f32 %v11896_v16, %v6633_v4 }
 0x2ea   : > { %14565 = vst [vmem:[#allocation83_spill] sm:$0xff] %v12666_v13  ;;  %v12677_v33 = vadd.f32 %v11904_v27, %v6715_v19  ;;  %v7636_v25 = vcombine.low %v7628_v50, %v7635_v8  ;;  %v7587_v36 = vcombine.low %v12660_v3, %v12666_v13  ;;  %v7594_v39 = vrot.slane %v7586_v60, %v11893_v54 }
 0x2eb   : > { %v12683_v38 = vadd.f32 %v11896_v16, %v6716_v6  ;;  %v7603_v37 = vcombine.low %v12674_v1, %v12606_v30  ;;  %v6667_v14 = vcombine.high %v10124_v46, %v10124_v46  ;;  %v6674_v24 = vrot.slane %v10124_v46, %v11893_v54 }
 0x2ec   : > { %14566 = vst [vmem:[#allocation84_spill] sm:$0xff] %v12677_v33  ;;  %v10125_v4 = vadd.f32 %v12302_v48, %v12489_v59  ;;  %v7618_v50 = vrot.slane %v7604_v34, %v11893_v54  ;;  %v9572_v8 = vpack.c.bf16 %v7636_v25, %v7636_v25  ;;  %v7601_v15 = vrot.slane %v7587_v36, %v11893_v54 }
 0x2ed   : > { %v6717_v9 = vcombine.high %v6715_v19, %v6715_v19  ;;  %v7838_v60 = vsel %vm2995_vm8, %v7585_v20, 0.0  ;;  %v7611_v6 = vrot.slane %v7603_v37, %v11893_v54  ;;  %v6681_v47 = vrot.slane %v6667_v14, %v11893_v54 }
 0x2ee   : > { %v6682_v13 = vcombine.high %v6674_v24, %v6674_v24  ;;  %9069 = vst.msk [vmem:[%s11989_s29 + $0x60] sm:$0xf] %vm1749_vm1, %v9572_v8  ;;  %v7602_v30 = vcombine.low %v7594_v39, %v7601_v15  ;;  %v7671_v46 = vcombine.low %v12683_v38, %v12677_v33  ;;  %v6718_v48 = vcombine.high %v10125_v4, %v10125_v4 }
 0x2ef   : > { %v6725_v59 = vrot.slane %v10125_v4, %v11893_v54  ;;  %v7619_v34 = vcombine.low %v7611_v6, %v7618_v50  ;;  %v6683_v36 = vcombine.high %v6681_v47, %v6681_v47  ;;  %v12701_v19 = vadd.f32 %v11896_v16, %v6674_v24 }
 0x2f0   : > { %v12704_v20 = vadd.f32 %v11904_v27, %v6682_v13  ;;  %v7837_v37 = vadd.f32 %v7836_v31, %v12583_v42  ;;  %v9570_v14 = vpack.c.bf16 %v7602_v30, %v7602_v30  ;;  %v6732_v15 = vrot.slane %v6718_v48, %v11893_v54 }
 0x2f1   : > { %v12709_v39 = vadd.f32 %v11899_v5, %v6717_v9  ;;  %v9571_v8 = vpack.c.bf16 %v7619_v34, %v7619_v34  ;;  %v12712_v4 = vadd.f32 %v11899_v5, %v6681_v47  ;;  %v12715_v50 = vadd.f32 %v11909_v53, %v6683_v36 }
 0x2f2   : > { %v7637_v13 = vcombine.low %v12701_v19, %v12704_v20  ;;  %v7839_v24 = vadd.f32 %v7838_v60, %v7837_v37  ;;  %v7808_v6 = vadd.f32 %v12601_v2, %v7806_v52  ;;  %9067 = vst.msk [vmem:[%s11989_s29 + $0x58] sm:$0xf] %vm1749_vm1, %v9570_v14  ;;  %v6733_v42 = vcombine.high %v6732_v15, %v6732_v15 }
 0x2f3   : > { %14567 = vst [vmem:[#allocation85_spill] sm:$0xff] %v12709_v39  ;;  %v12723_v31 = vadd.f32 %v11909_v53, %v6725_v59  ;;  %v7811_v9 = vsel %vm2995_vm8, %v7636_v25, 0.0  ;;  %v7809_v47 = vsel %vm2995_vm8, %v7602_v30, 0.0  ;;  %9068 = vst.msk [vmem:[%s11989_s29 + $0x5c] sm:$0xf] %vm1749_vm1, %v9571_v8  ;;  %v7679_v48 = vrot.slane %v7671_v46, %v11893_v54 }
 0x2f4   : > { %v7638_v36 = vcombine.low %v12712_v4, %v12715_v50  ;;  %v7645_v60 = vrot.slane %v7637_v13, %v11893_v54  ;;  %v10126_v52 = vadd.f32 %v12306_v18, %v12493_v56  ;;  %v10127_v25 = vadd.f32 %v12346_v51, %v12529_v45 }
 0x2f5   : > { %14568 = vst [vmem:[#allocation86_spill] sm:$0xff] %v12723_v31  ;;  %v7672_v2 = vcombine.low %v12709_v39, %v12723_v31  ;;  %v10128_v59 = vadd.f32 %v12350_v17, %v12537_v57  ;;  %v10129_v46 = vadd.f32 %v12359_v49, %v12545_v44  ;;  %v10130_v37 = vadd.f32 %v12362_v58, %v12555_v22 }
 0x2f6   : > { %v7652_v30 = vrot.slane %v7638_v36, %v11893_v54  ;;  %v12747_v14 = vadd.f32 %v11904_v27, %v6733_v42  ;;  %v6684_v18 = vcombine.high %v10126_v52, %v10126_v52  ;;  %v6691_v56 = vrot.slane %v10126_v52, %v11893_v54 }
 0x2f7   : > { %v7686_v8 = vrot.slane %v7672_v2, %v11893_v54  ;;  %v7810_v51 = vadd.f32 %v7809_v47, %v7808_v6  ;;  %v6768_v13 = vcombine.high %v10127_v25, %v10127_v25  ;;  %v12752_v17 = vrot.slane %v10127_v25, %v11893_v54 }
 0x2f8   : > { %14569 = vst [vmem:[#allocation87_spill] sm:$0xff] %v12747_v14  ;;  %v7653_v45 = vcombine.low %v7645_v60, %v7652_v30  ;;  %v12755_v49 = vadd.f32 %v11896_v16, %v6732_v15  ;;  %v6698_v58 = vrot.slane %v6684_v18, %v11893_v54  ;;  %v6699_v44 = vcombine.high %v6691_v56, %v6691_v56 }
 0x2f9   : > { %v12757_v57 = vcombine.low %v7679_v48, %v7686_v8  ;;  %v7840_v22 = vsel %vm2995_vm8, %v7619_v34, 0.0  ;;  %v6782_v6 = vrot.slane %v6768_v13, %v11893_v54  ;;  %v6734_v47 = vcombine.high %v10128_v59, %v10128_v59 }
 0x2fa   : > { %14570 = vst [vmem:[#allocation88_spill] sm:$0xff] %v12755_v49  ;;  %v9573_v42 = vpack.c.bf16 %v7653_v45, %v7653_v45  ;;  %v7688_v36 = vcombine.low %v12755_v49, %v12747_v14  ;;  %v6700_v15 = vcombine.high %v6698_v58, %v6698_v58  ;;  %v6783_v48 = vcombine.high %v12752_v17, %v12752_v17 }
 0x2fb   : > { %v9575_v60 = vpack.c.bf16 %v12757_v57, %v12757_v57  ;;  %v12771_v2 = vadd.f32 %v11896_v16, %v6699_v44  ;;  %v12774_v34 = vadd.f32 %v11904_v27, %v6698_v58  ;;  %v6784_v52 = vcombine.high %v6782_v6, %v6782_v6 }
 0x2fc   : > { %9070 = vst.msk [vmem:[%s11989_s29 + $0x64] sm:$0xf] %vm1749_vm1, %v9573_v42  ;;  %v7812_v25 = vadd.f32 %v7811_v9, %v7810_v51  ;;  %v12778_v30 = vadd.f32 %v11909_v53, %v12644_v11  ;;  %v7841_v8 = vadd.f32 %v7840_v22, %v7839_v24  ;;  %v12783_v18 = vadd.f32 %v11899_v5, %v6700_v15 }
 0x2fd   : > { %9072 = vst.msk [vmem:[%s11989_s29 + $0x6c] sm:$0xf] %vm1749_vm1, %v9575_v60  ;;  %v7654_v56 = vcombine.low %v12771_v2, %v12774_v34  ;;  %v6741_v13 = vrot.slane %v10128_v59, %v11893_v54  ;;  %v6748_v58 = vrot.slane %v6734_v47, %v11893_v54  ;;  %v6785_v44 = vcombine.high %v10129_v46, %v10129_v46 }
 0x2fe   : > { %v7696_v9 = vrot.slane %v7688_v36, %v11893_v54  ;;  %v7655_v11 = vcombine.low %v12783_v18, %v12778_v30  ;;  %v12793_v24 = vadd.f32 %v11899_v5, %v6783_v48  ;;  %v6792_v51 = vrot.slane %v10129_v46, %v11893_v54 }
 0x2ff   : > { %v7662_v22 = vrot.slane %v7654_v56, %v11893_v54  ;;  %v6749_v42 = vcombine.high %v6741_v13, %v6741_v13  ;;  %v6750_v60 = vcombine.high %v6748_v58, %v6748_v58  ;;  %v12798_v15 = vadd.f32 %v11896_v16, %v6784_v52 }
 0x300   : > { %v7669_v59 = vrot.slane %v7655_v11, %v11893_v54  ;;  %v12802_v47 = vadd.f32 %v11899_v5, %v6741_v13  ;;  %v12805_v36 = vadd.f32 %v11896_v16, %v6748_v58  ;;  %v6799_v48 = vrot.slane %v6785_v44, %v11893_v54 }
 0x301   : > { %14571 = vst [vmem:[#allocation89_spill] sm:$0xff] %v12798_v15  ;;  %v12809_v14 = vadd.f32 %v11909_v53, %v6749_v42  ;;  %v12812_v46 = vadd.f32 %v11904_v27, %v6750_v60  ;;  %v6800_v56 = vcombine.high %v6792_v51, %v6792_v51  ;;  %v12815_v52 = vadd.f32 %v11904_v27, %v6792_v51 }
 0x302   : > { %v7670_v49 = vcombine.low %v7662_v22, %v7669_v59  ;;  %v12818_v13 = vadd.f32 %v11909_v53, %v6799_v48  ;;  %v6751_v11 = vcombine.high %v10130_v37, %v10130_v37  ;;  %v6758_v58 = vrot.slane %v10130_v37, %v11893_v54 }
 0x303   : > { %14572 = vst [vmem:[#allocation90_spill] sm:$0xff] %v12815_v52  ;;  %v12822_v44 = vadd.f32 %v11909_v53, %v6782_v6  ;;  %v7689_v42 = vcombine.low %v12802_v47, %v12809_v14  ;;  %v12827_v60 = vadd.f32 %v11899_v5, %v6800_v56  ;;  %v7739_v51 = vcombine.low %v12798_v15, %v12815_v52 }
 0x304   : > { %14573 = vst [vmem:[#allocation91_spill] sm:$0xff] %v12818_v13  ;;  %v9574_v22 = vpack.c.bf16 %v7670_v49, %v7670_v49  ;;  %v7705_v59 = vcombine.low %v12805_v36, %v12812_v46  ;;  %v6765_v48 = vrot.slane %v6751_v11, %v11893_v54  ;;  %v6766_v31 = vcombine.high %v6758_v58, %v6758_v58 }
 0x305   : > { %v7842_v37 = vsel %vm2995_vm8, %v7653_v45, 0.0  ;;  %v7813_v6 = vsel %vm2995_vm8, %v7670_v49, 0.0  ;;  %v7703_v39 = vrot.slane %v7689_v42, %v11893_v54  ;;  %v7740_v56 = vcombine.low %v12827_v60, %v12818_v13 }
 0x306   : > { %9071 = vst.msk [vmem:[%s11989_s29 + $0x68] sm:$0xf] %vm1749_vm1, %v9574_v22  ;;  %v7747_v52 = vrot.slane %v7739_v51, %v11893_v54  ;;  %v6767_v15 = vcombine.high %v6765_v48, %v6765_v48  ;;  %v12843_v33 = vadd.f32 %v11899_v5, %v6758_v58  ;;  %v12846_v11 = vadd.f32 %v11909_v53, %v6766_v31 }
 0x307   : > { %v12850_v45 = vadd.f32 %v11904_v27, %v12752_v17  ;;  %v7723_v49 = vcombine.low %v12793_v24, %v12822_v44  ;;  %v7704_v42 = vcombine.low %v7696_v9, %v7703_v39  ;;  %v7754_v22 = vrot.slane %v7740_v56, %v11893_v54 }
 0x308   : > { %v7814_v13 = vadd.f32 %v7813_v6, %v7812_v25  ;;  %v7713_v51 = vrot.slane %v7705_v59, %v11893_v54  ;;  %v12857_v5 = vadd.f32 %v11896_v16, %v6767_v15  ;;  %v7706_v53 = vcombine.low %v12843_v33, %v12846_v11 }
 0x309   : > { %v7843_v31 = vadd.f32 %v7842_v37, %v7841_v8  ;;  %v7815_v27 = vsel %vm2995_vm8, %v7704_v42, 0.0  ;;  %v9576_v17 = vpack.c.bf16 %v7704_v42, %v7704_v42  ;;  %v7755_v58 = vcombine.low %v7747_v52, %v7754_v22 }
 0x30a   : > { %v7816_v48 = vadd.f32 %v7815_v27, %v7814_v13  ;;  %v7720_v39 = vrot.slane %v7706_v53, %v11893_v54  ;;  %v7722_v25 = vcombine.low %v12857_v5, %v12850_v45  ;;  %v7844_v9 = vsel %vm2995_vm8, %v12757_v57, 0.0 }
 0x30b   : > { %9073 = vst.msk [vmem:[%s11989_s29 + $0x70] sm:$0xf] %vm1749_vm1, %v9576_v17  ;;  %v9579_v16 = vpack.c.bf16 %v7755_v58, %v7755_v58  ;;  %v7737_v8 = vrot.slane %v7723_v49, %v11893_v54  ;;  %v7845_v52 = vadd.f32 %v7844_v9, %v7843_v31  ;;  %v7848_v42 = vsel %vm2995_vm8, %v7755_v58, 0.0 }
 0x30c   : > { %v7721_v15 = vcombine.low %v7713_v51, %v7720_v39  ;;  %v7730_v59 = vrot.slane %v7722_v25, %v11893_v54 }
 0x30d   : > { %9076 = vst.msk [vmem:[%s11989_s29 + $0x7c] sm:$0xf] %vm1749_vm1, %v9579_v16 }
 0x30e   : > { %v7738_v13 = vcombine.low %v7730_v59, %v7737_v8  ;;  %v7846_v37 = vsel %vm2995_vm8, %v7721_v15, 0.0  ;;  %v9577_v6 = vpack.c.bf16 %v7721_v15, %v7721_v15 }
 0x30f   : > { %v7847_v56 = vadd.f32 %v7846_v37, %v7845_v52 }
 0x310   : > { %v7817_v57 = vsel %vm2995_vm8, %v7738_v13, 0.0  ;;  %v9578_v22 = vpack.c.bf16 %v7738_v13, %v7738_v13  ;;  %9074 = vst.msk [vmem:[%s11989_s29 + $0x74] sm:$0xf] %vm1749_vm1, %v9577_v6 }
 0x311   : > { %v7818_v49 = vadd.f32 %v7817_v57, %v7816_v48  ;;  %v7849_v51 = vadd.f32 %v7848_v42, %v7847_v56 }
 0x312   : > { %9075 = vst.msk [vmem:[%s11989_s29 + $0x78] sm:$0xf] %vm1749_vm1, %v9578_v22  ;;  %v14575_v22 = vld [vmem:[#allocation3_spill] sm:$0xff] }
 0x313   : > { %v7850_v53 = vsel %vm2995_vm8, %v7818_v49, 0.0  ;;  %v7851_v31 = vsel %vm2995_vm8, %v7849_v51, 0.0  ;;  %v14576_v49 = vld [vmem:[#allocation8_spill] sm:$0xff] }
 0x314   : > { %v7852_v27 = vadd.f32 %v7851_v31, %v7850_v53  ;;  %v14577_v51 = vld [vmem:[#allocation4_spill] sm:$0xff]  ;;  %v14578_v53 = vld [vmem:[#allocation7_spill] sm:$0xff]  ;;  %v14579_v31 = vld [vmem:[#allocation5_spill] sm:$0xff] }
 0x316   : > { %v7853_v17 = vrot.slane %v7852_v27, 4 }
 0x318   : > { %v7854_v39 = vadd.f32 %v7853_v17, %v7852_v27  ;;  %v14580_v27 = vld [vmem:[#allocation9_spill] sm:$0xff] }
 0x31a   : > { %v7855_v25 = vrot.slane %v7854_v39, 2 }
 0x31c   : > { %v7856_v58 = vadd.f32 %v7855_v25, %v7854_v39  ;;  %v14581_v39 = vld [vmem:[#allocation13_spill] sm:$0xff] }
 0x31e   : > { %v7857_v16 = vrot.slane %v7856_v58, 1 }
 0x320   : > { %v7858_v48 = vadd.f32 %v7857_v16, %v7856_v58  ;;  %v14582_v58 = vld [vmem:[#allocation15_spill] sm:$0xff] }
 0x322   : > { %8914 = vst.msk [vmem:[%s359_s10] sm:$0xff] %vm2995_vm8, %v7858_v48  ;;  %v7860_v9 = vmul.f32 0.00390625, %v7858_v48  ;;  %v14583_v48 = vld [vmem:[#allocation18_spill] sm:$0xff] }
 0x324   : > { %v7862_v8 = vcombine.high %v7860_v9, %v7860_v9  ;;  %v12890_v15 = vrot.slane %v7860_v9, %v11893_v54 }
 0x326   : > { %v12893_v59 = vrot.slane %v7862_v8, %v11893_v54  ;;  %v12897_v52 = vcombine.high %v12890_v15, %v12890_v15  ;;  %v12905_v37 = vsub.f32 %v11917_v21, %v12890_v15  ;;  %v12909_v6 = vsub.f32 %v11966_v55, %v12890_v15  ;;  %v14584_v8 = vld [vmem:[#allocation19_spill] sm:$0xff]  ;;  %v14593_v54 = vld [vmem:[#allocation14_spill] sm:$0xff] }
 0x327   : > { %v12913_v56 = vsub.f32 %v11922_v41, %v12890_v15  ;;  %v12921_v57 = vsub.f32 %v11948_v7, %v12890_v15  ;;  %v12925_v21 = vsub.f32 %v12047_v61, %v12890_v15  ;;  %v12929_v55 = vsub.f32 %v12109_v23, %v12890_v15 }
 0x328   : > { %v12901_v13 = vcombine.high %v12893_v59, %v12893_v59  ;;  %v12917_v42 = vsub.f32 %v11929_v10, %v12897_v52  ;;  %v12933_v41 = vsub.f32 %v11932_v28, %v12893_v59  ;;  %v12937_v10 = vsub.f32 %v11980_v12, %v12897_v52 }
 0x329   : > { %14574 = vst [vmem:[#allocation92_spill] sm:$0xff] %v12929_v55  ;;  %v12941_v7 = vsub.f32 %v11975_v29, %v12893_v59  ;;  %v12945_v61 = vsub.f32 %v11925_v63, %v12897_v52  ;;  %v12957_v12 = vsub.f32 %v14577_v51, %v12893_v59  ;;  %v12961_v29 = vsub.f32 %v14578_v53, %v12897_v52  ;;  %v14587_v53 = vld [vmem:[#allocation10_spill] sm:$0xff]  ;;  %v14595_v55 = vld [vmem:[#allocation16_spill] sm:$0xff] }
 0x32a   : > { %v12949_v23 = vsub.f32 %v14575_v22, %v12901_v13  ;;  %v12953_v28 = vsub.f32 %v14576_v49, %v12901_v13  ;;  %v12965_v63 = vsub.f32 %v14579_v31, %v12901_v13  ;;  %v12969_v17 = vsub.f32 %v14580_v27, %v12893_v59  ;;  %v14585_v49 = vld [vmem:[#allocation20_spill] sm:$0xff]  ;;  %v14589_v27 = vld [vmem:[#allocation11_spill] sm:$0xff] }
 0x32b   : > { %v12973_v25 = vsub.f32 %v14581_v39, %v12901_v13  ;;  %v12977_v16 = vsub.f32 %v14582_v58, %v12897_v52  ;;  %v12981_v9 = vsub.f32 %v14583_v48, %v12893_v59  ;;  %v12985_v22 = vsub.f32 %v14584_v8, %v12901_v13  ;;  %v14591_v58 = vld [vmem:[#allocation12_spill] sm:$0xff] }
 0x32c   : > { %v12989_v51 = vsub.f32 %v14585_v49, %v12897_v52  ;;  %v12993_v31 = vsub.f32 %v14587_v53, %v12893_v59  ;;  %v12997_v39 = vsub.f32 %v14589_v27, %v12901_v13  ;;  %v13001_v48 = vsub.f32 %v14591_v58, %v12890_v15 }
 0x32d   : > { %v13005_v8 = vsub.f32 %v14593_v54, %v12897_v52  ;;  %v13009_v49 = vsub.f32 %v14595_v55, %v12893_v59 }
 0x32e   : > { %14586 = vst [vmem:[#allocation3_spill] sm:$0xff] %v12989_v51  ;;  %14588 = vst [vmem:[#allocation8_spill] sm:$0xff] %v12993_v31  ;;  %v14597_v51 = vld [vmem:[#allocation17_spill] sm:$0xff] }
 0x32f   : > { %14590 = vst [vmem:[#allocation4_spill] sm:$0xff] %v12997_v39  ;;  %14592 = vst [vmem:[#allocation7_spill] sm:$0xff] %v13001_v48  ;;  %v13013_v53 = vsub.f32 %v14597_v51, %v12901_v13  ;;  %v14599_v31 = vld [vmem:[#allocation25_spill] sm:$0xff]  ;;  %v14601_v39 = vld [vmem:[#allocation26_spill] sm:$0xff] }
 0x330   : > { %14594 = vst [vmem:[#allocation5_spill] sm:$0xff] %v13005_v8  ;;  %14596 = vst [vmem:[#allocation9_spill] sm:$0xff] %v13009_v49  ;;  %v13017_v27 = vsub.f32 %v14599_v31, %v12890_v15  ;;  %v13021_v58 = vsub.f32 %v14601_v39, %v12897_v52  ;;  %v14603_v48 = vld [vmem:[#allocation28_spill] sm:$0xff]  ;;  %v14605_v8 = vld [vmem:[#allocation27_spill] sm:$0xff] }
 0x331   : > { %14598 = vst [vmem:[#allocation13_spill] sm:$0xff] %v13013_v53  ;;  %v13025_v54 = vsub.f32 %v14603_v48, %v12893_v59  ;;  %v13029_v55 = vsub.f32 %v14605_v8, %v12901_v13  ;;  %v14607_v49 = vld [vmem:[#allocation31_spill] sm:$0xff]  ;;  %v14609_v53 = vld [vmem:[#allocation32_spill] sm:$0xff] }
 0x332   : > { %14600 = vst [vmem:[#allocation15_spill] sm:$0xff] %v13017_v27  ;;  %14602 = vst [vmem:[#allocation18_spill] sm:$0xff] %v13021_v58  ;;  %v13033_v51 = vsub.f32 %v14607_v49, %v12890_v15  ;;  %v13037_v31 = vsub.f32 %v14609_v53, %v12897_v52  ;;  %v14611_v27 = vld [vmem:[#allocation33_spill] sm:$0xff]  ;;  %v14613_v58 = vld [vmem:[#allocation34_spill] sm:$0xff] }
 0x333   : > { %14604 = vst [vmem:[#allocation19_spill] sm:$0xff] %v13025_v54  ;;  %14606 = vst [vmem:[#allocation20_spill] sm:$0xff] %v13029_v55  ;;  %v13041_v39 = vsub.f32 %v14611_v27, %v12893_v59  ;;  %v13045_v48 = vsub.f32 %v14613_v58, %v12901_v13  ;;  %v14615_v54 = vld [vmem:[#allocation21_spill] sm:$0xff]  ;;  %v14617_v55 = vld [vmem:[#allocation22_spill] sm:$0xff] }
 0x334   : > { %14608 = vst [vmem:[#allocation10_spill] sm:$0xff] %v13033_v51  ;;  %14610 = vst [vmem:[#allocation11_spill] sm:$0xff] %v13037_v31  ;;  %v13049_v8 = vsub.f32 %v14615_v54, %v12890_v15  ;;  %v13053_v49 = vsub.f32 %v14617_v55, %v12897_v52  ;;  %v14619_v51 = vld [vmem:[#allocation23_spill] sm:$0xff]  ;;  %v14621_v31 = vld [vmem:[#allocation24_spill] sm:$0xff] }
 0x335   : > { %14612 = vst [vmem:[#allocation12_spill] sm:$0xff] %v13041_v39  ;;  %14614 = vst [vmem:[#allocation14_spill] sm:$0xff] %v13045_v48  ;;  %v13057_v53 = vsub.f32 %v14619_v51, %v12893_v59  ;;  %v13061_v27 = vsub.f32 %v14621_v31, %v12901_v13  ;;  %v14623_v39 = vld [vmem:[#allocation30_spill] sm:$0xff]  ;;  %v14625_v48 = vld [vmem:[#allocation29_spill] sm:$0xff] }
 0x336   : > { %14616 = vst [vmem:[#allocation16_spill] sm:$0xff] %v13049_v8  ;;  %14618 = vst [vmem:[#allocation17_spill] sm:$0xff] %v13053_v49  ;;  %v13065_v58 = vsub.f32 %v14623_v39, %v12890_v15  ;;  %v13069_v54 = vsub.f32 %v14625_v48, %v12897_v52  ;;  %v14627_v8 = vld [vmem:[#allocation38_spill] sm:$0xff]  ;;  %v14629_v49 = vld [vmem:[#allocation40_spill] sm:$0xff] }
 0x337   : > { %14620 = vst [vmem:[#allocation25_spill] sm:$0xff] %v13057_v53  ;;  %14622 = vst [vmem:[#allocation26_spill] sm:$0xff] %v13061_v27  ;;  %v13073_v55 = vsub.f32 %v14627_v8, %v12893_v59  ;;  %v13077_v51 = vsub.f32 %v14629_v49, %v12901_v13  ;;  %v14631_v53 = vld [vmem:[#allocation41_spill] sm:$0xff]  ;;  %v14633_v27 = vld [vmem:[#allocation42_spill] sm:$0xff] }
 0x338   : > { %14624 = vst [vmem:[#allocation28_spill] sm:$0xff] %v13065_v58  ;;  %14626 = vst [vmem:[#allocation27_spill] sm:$0xff] %v13069_v54  ;;  %v13081_v31 = vsub.f32 %v14631_v53, %v12890_v15  ;;  %v13085_v39 = vsub.f32 %v14633_v27, %v12897_v52  ;;  %v14635_v58 = vld [vmem:[#allocation43_spill] sm:$0xff]  ;;  %v14637_v54 = vld [vmem:[#allocation46_spill] sm:$0xff] }
 0x339   : > { %14628 = vst [vmem:[#allocation31_spill] sm:$0xff] %v13073_v55  ;;  %14630 = vst [vmem:[#allocation32_spill] sm:$0xff] %v13077_v51  ;;  %v13089_v48 = vsub.f32 %v14635_v58, %v12893_v59  ;;  %v13093_v8 = vsub.f32 %v14637_v54, %v12901_v13  ;;  %v14639_v55 = vld [vmem:[#allocation47_spill] sm:$0xff]  ;;  %v14641_v51 = vld [vmem:[#allocation48_spill] sm:$0xff] }
 0x33a   : > { %14632 = vst [vmem:[#allocation33_spill] sm:$0xff] %v13081_v31  ;;  %14634 = vst [vmem:[#allocation34_spill] sm:$0xff] %v13085_v39  ;;  %v13097_v49 = vsub.f32 %v14639_v55, %v12890_v15  ;;  %v13101_v53 = vsub.f32 %v14641_v51, %v12897_v52  ;;  %v14643_v31 = vld [vmem:[#allocation35_spill] sm:$0xff]  ;;  %v14645_v39 = vld [vmem:[#allocation36_spill] sm:$0xff] }
 0x33b   : > { %14636 = vst [vmem:[#allocation21_spill] sm:$0xff] %v13089_v48  ;;  %14638 = vst [vmem:[#allocation22_spill] sm:$0xff] %v13093_v8  ;;  %v13105_v27 = vsub.f32 %v14643_v31, %v12893_v59  ;;  %v13109_v58 = vsub.f32 %v14645_v39, %v12901_v13  ;;  %v14647_v48 = vld [vmem:[#allocation37_spill] sm:$0xff]  ;;  %v14649_v8 = vld [vmem:[#allocation39_spill] sm:$0xff] }
 0x33c   : > { %14640 = vst [vmem:[#allocation23_spill] sm:$0xff] %v13097_v49  ;;  %14642 = vst [vmem:[#allocation24_spill] sm:$0xff] %v13101_v53  ;;  %v13113_v54 = vsub.f32 %v14647_v48, %v12890_v15  ;;  %v13117_v55 = vsub.f32 %v14649_v8, %v12897_v52  ;;  %v14651_v49 = vld [vmem:[#allocation44_spill] sm:$0xff]  ;;  %v14653_v53 = vld [vmem:[#allocation45_spill] sm:$0xff] }
 0x33d   : > { %14644 = vst [vmem:[#allocation30_spill] sm:$0xff] %v13105_v27  ;;  %14646 = vst [vmem:[#allocation29_spill] sm:$0xff] %v13109_v58  ;;  %v13121_v51 = vsub.f32 %v14651_v49, %v12893_v59  ;;  %v13125_v31 = vsub.f32 %v14653_v53, %v12901_v13  ;;  %v14655_v27 = vld [vmem:[#allocation49_spill] sm:$0xff]  ;;  %v14657_v58 = vld [vmem:[#allocation54_spill] sm:$0xff] }
 0x33e   : > { %14648 = vst [vmem:[#allocation38_spill] sm:$0xff] %v13113_v54  ;;  %14650 = vst [vmem:[#allocation40_spill] sm:$0xff] %v13117_v55  ;;  %v13129_v39 = vsub.f32 %v14655_v27, %v12890_v15  ;;  %v13133_v48 = vsub.f32 %v14657_v58, %v12897_v52  ;;  %v14659_v54 = vld [vmem:[#allocation55_spill] sm:$0xff]  ;;  %v14660_v55 = vld [vmem:[#allocation56_spill] sm:$0xff] }
 0x33f   : > { %14652 = vst [vmem:[#allocation41_spill] sm:$0xff] %v13121_v51  ;;  %14654 = vst [vmem:[#allocation42_spill] sm:$0xff] %v13125_v31  ;;  %v13137_v8 = vsub.f32 %v14659_v54, %v12893_v59  ;;  %v13141_v49 = vsub.f32 %v14660_v55, %v12901_v13  ;;  %v14661_v51 = vld [vmem:[#allocation57_spill] sm:$0xff]  ;;  %v14662_v31 = vld [vmem:[#allocation62_spill] sm:$0xff]  ;;  %v13161_v55 = vsub.f32 %v12802_v47, %v12893_v59 }
 0x340   : > { %14656 = vst [vmem:[#allocation43_spill] sm:$0xff] %v13129_v39  ;;  %14658 = vst [vmem:[#allocation46_spill] sm:$0xff] %v13133_v48  ;;  %v13145_v53 = vsub.f32 %v14661_v51, %v12890_v15  ;;  %v13149_v27 = vsub.f32 %v14662_v31, %v12897_v52  ;;  %v14664_v39 = vld [vmem:[#allocation64_spill] sm:$0xff]  ;;  %v14665_v48 = vld [vmem:[#allocation63_spill] sm:$0xff]  ;;  %v13165_v51 = vsub.f32 %v12809_v14, %v12901_v13 }
 0x341   : > { %v13153_v58 = vsub.f32 %v14664_v39, %v12893_v59  ;;  %v13157_v54 = vsub.f32 %v14665_v48, %v12901_v13  ;;  %14666 = vst [vmem:[#allocation48_spill] sm:$0xff] %v13161_v55  ;;  %v13169_v31 = vsub.f32 %v12805_v36, %v12890_v15  ;;  %v13177_v48 = vsub.f32 %v12843_v33, %v12893_v59  ;;  %v14676_v55 = vld [vmem:[#allocation53_spill] sm:$0xff] }
 0x342   : > { %14663 = vst [vmem:[#allocation47_spill] sm:$0xff] %v13149_v27  ;;  %14667 = vst [vmem:[#allocation35_spill] sm:$0xff] %v13165_v51  ;;  %v14669_v27 = vld [vmem:[#allocation50_spill] sm:$0xff]  ;;  %v13181_v47 = vsub.f32 %v12846_v11, %v12901_v13  ;;  %v13185_v14 = vsub.f32 %v12857_v5, %v12890_v15  ;;  %v14673_v51 = vld [vmem:[#allocation51_spill] sm:$0xff]  ;;  %v13197_v33 = vsub.f32 %v14676_v55, %v12901_v13 }
 0x343   : > { %14668 = vst [vmem:[#allocation36_spill] sm:$0xff] %v13169_v31  ;;  %v13173_v39 = vsub.f32 %v14669_v27, %v12890_v15  ;;  %14670 = vst [vmem:[#allocation37_spill] sm:$0xff] %v13177_v48  ;;  %v13189_v36 = vsub.f32 %v14673_v51, %v12897_v52  ;;  %v14674_v31 = vld [vmem:[#allocation52_spill] sm:$0xff]  ;;  %v13201_v11 = vsub.f32 %v12850_v45, %v12897_v52  ;;  %v14681_v48 = vld [vmem:[#allocation59_spill] sm:$0xff] }
 0x344   : > { %14671 = vst [vmem:[#allocation39_spill] sm:$0xff] %v13181_v47  ;;  %14672 = vst [vmem:[#allocation44_spill] sm:$0xff] %v13185_v14  ;;  %v13193_v27 = vsub.f32 %v14674_v31, %v12893_v59  ;;  %v14679_v47 = vld [vmem:[#allocation58_spill] sm:$0xff]  ;;  %v14680_v14 = vld [vmem:[#allocation60_spill] sm:$0xff]  ;;  %v13213_v31 = vsub.f32 %v14681_v48, %v12893_v59  ;;  %v13233_v48 = vsub.f32 %v12548_v43, %v12901_v13 }
 0x345   : > { %14677 = vst [vmem:[#allocation49_spill] sm:$0xff] %v13197_v33  ;;  %14678 = vst [vmem:[#allocation54_spill] sm:$0xff] %v13201_v11  ;;  %v13205_v5 = vsub.f32 %v14679_v47, %v12890_v15  ;;  %v13209_v51 = vsub.f32 %v14680_v14, %v12897_v52  ;;  %v14685_v33 = vld [vmem:[#allocation67_spill] sm:$0xff]  ;;  %v14686_v11 = vld [vmem:[#allocation68_spill] sm:$0xff]  ;;  %v13229_v14 = vsub.f32 %v12535_v40, %v12893_v59 }
 0x346   : > { %14675 = vst [vmem:[#allocation45_spill] sm:$0xff] %v13193_v27  ;;  %14682 = vst [vmem:[#allocation55_spill] sm:$0xff] %v13213_v31  ;;  %v14683_v27 = vld [vmem:[#allocation61_spill] sm:$0xff]  ;;  %v13221_v45 = vsub.f32 %v14685_v33, %v12890_v15  ;;  %v13225_v47 = vsub.f32 %v14686_v11, %v12897_v52  ;;  %v14690_v31 = vld [vmem:[#allocation75_spill] sm:$0xff]  ;;  %v13245_v11 = vsub.f32 %v12567_v26, %v12893_v59 }
 0x347   : > { %v13217_v55 = vsub.f32 %v14683_v27, %v12901_v13  ;;  %14688 = vst [vmem:[#allocation62_spill] sm:$0xff] %v13229_v14  ;;  %14689 = vst [vmem:[#allocation64_spill] sm:$0xff] %v13233_v48  ;;  %v13237_v27 = vsub.f32 %v14690_v31, %v12890_v15  ;;  %v14697_v14 = vld [vmem:[#allocation65_spill] sm:$0xff]  ;;  %v14698_v48 = vld [vmem:[#allocation66_spill] sm:$0xff] }
 0x348   : > { %14687 = vst [vmem:[#allocation57_spill] sm:$0xff] %v13225_v47  ;;  %14694 = vst [vmem:[#allocation51_spill] sm:$0xff] %v13245_v11  ;;  %v14695_v47 = vld [vmem:[#allocation69_spill] sm:$0xff]  ;;  %v13253_v43 = vsub.f32 %v14697_v14, %v12890_v15  ;;  %v13257_v31 = vsub.f32 %v14698_v48, %v12897_v52  ;;  %v14701_v11 = vld [vmem:[#allocation74_spill] sm:$0xff]  ;;  %v13277_v48 = vsub.f32 %v12595_v32, %v12893_v59 }
 0x349   : > { %14684 = vst [vmem:[#allocation56_spill] sm:$0xff] %v13217_v55  ;;  %14691 = vst [vmem:[#allocation63_spill] sm:$0xff] %v13237_v27  ;;  %v14692_v55 = vld [vmem:[#allocation73_spill] sm:$0xff]  ;;  %v13249_v40 = vsub.f32 %v14695_v47, %v12901_v13  ;;  %v14699_v27 = vld [vmem:[#allocation70_spill] sm:$0xff]  ;;  %v13269_v47 = vsub.f32 %v14701_v11, %v12890_v15  ;;  %v13289_v11 = vsub.f32 %v12653_v62, %v12897_v52 }
 0x34a   : > { %v13241_v33 = vsub.f32 %v14692_v55, %v12897_v52  ;;  %v13261_v55 = vsub.f32 %v14699_v27, %v12893_v59  ;;  %v13281_v27 = vsub.f32 %v12598_v35, %v12901_v13  ;;  %v13301_v35 = vsub.f32 %v12674_v1, %v12890_v15 }
 0x34b   : > { %14696 = vst [vmem:[#allocation52_spill] sm:$0xff] %v13249_v40  ;;  %v14702_v40 = vld [vmem:[#allocation72_spill] sm:$0xff]  ;;  %14706 = vst [vmem:[#allocation59_spill] sm:$0xff] %v13289_v11  ;;  %v14714_v11 = vld [vmem:[#allocation78_spill] sm:$0xff] }
 0x34c   : > { %14693 = vst [vmem:[#allocation50_spill] sm:$0xff] %v13241_v33  ;;  %v14700_v33 = vld [vmem:[#allocation71_spill] sm:$0xff]  ;;  %v13273_v14 = vsub.f32 %v14702_v40, %v12897_v52  ;;  %14704 = vst [vmem:[#allocation58_spill] sm:$0xff] %v13281_v27  ;;  %v13293_v40 = vsub.f32 %v12660_v3, %v12893_v59  ;;  %v14711_v27 = vld [vmem:[#allocation76_spill] sm:$0xff]  ;;  %v13313_v3 = vsub.f32 %v14714_v11, %v12901_v13 }
 0x34d   : > { %v13265_v26 = vsub.f32 %v14700_v33, %v12901_v13  ;;  %v13285_v33 = vsub.f32 %v12621_v0, %v12890_v15  ;;  %14710 = vst [vmem:[#allocation68_spill] sm:$0xff] %v13301_v35  ;;  %v13305_v0 = vsub.f32 %v14711_v27, %v12897_v52  ;;  %v14717_v35 = vld [vmem:[#allocation80_spill] sm:$0xff]  ;;  %v13333_v11 = vsub.f32 %v12701_v19, %v12890_v15 }
 0x34e   : > { %14703 = vst [vmem:[#allocation53_spill] sm:$0xff] %v13273_v14  ;;  %14707 = vst [vmem:[#allocation61_spill] sm:$0xff] %v13293_v40  ;;  %v14708_v14 = vld [vmem:[#allocation83_spill] sm:$0xff]  ;;  %v13325_v27 = vsub.f32 %v14717_v35, %v12893_v59  ;;  %v13345_v35 = vsub.f32 %v12715_v50, %v12901_v13  ;;  %v13353_v19 = vsub.f32 %v12774_v34, %v12897_v52 }
 0x34f   : > { %14705 = vst [vmem:[#allocation60_spill] sm:$0xff] %v13285_v33  ;;  %v13297_v32 = vsub.f32 %v14708_v14, %v12901_v13  ;;  %14712 = vst [vmem:[#allocation75_spill] sm:$0xff] %v13305_v0  ;;  %v14713_v33 = vld [vmem:[#allocation77_spill] sm:$0xff]  ;;  %v14715_v40 = vld [vmem:[#allocation79_spill] sm:$0xff]  ;;  %v13365_v50 = vsub.f32 %v12683_v38, %v12890_v15 }
 0x350   : > { %v13309_v62 = vsub.f32 %v14713_v33, %v12893_v59  ;;  %v13317_v14 = vsub.f32 %v14715_v40, %v12890_v15  ;;  %v14718_v0 = vld [vmem:[#allocation82_spill] sm:$0xff]  ;;  %v13337_v40 = vsub.f32 %v12704_v20, %v12897_v52  ;;  %14719 = vst [vmem:[#allocation73_spill] sm:$0xff] %v13345_v35  ;;  %14721 = vst [vmem:[#allocation65_spill] sm:$0xff] %v13353_v19  ;;  %v14724_v35 = vld [vmem:[#allocation84_spill] sm:$0xff] }
 0x351   : > { %14709 = vst [vmem:[#allocation67_spill] sm:$0xff] %v13297_v32  ;;  %v14716_v32 = vld [vmem:[#allocation81_spill] sm:$0xff]  ;;  %v13329_v33 = vsub.f32 %v14718_v0, %v12901_v13  ;;  %v13349_v0 = vsub.f32 %v12771_v2, %v12890_v15  ;;  %v13357_v20 = vsub.f32 %v12783_v18, %v12893_v59  ;;  %v13369_v2 = vsub.f32 %v14724_v35, %v12897_v52  ;;  %v14726_v19 = vld [vmem:[#allocation86_spill] sm:$0xff] }
 0x352   : > { %v13321_v1 = vsub.f32 %v14716_v32, %v12897_v52  ;;  %v13341_v32 = vsub.f32 %v12712_v4, %v12893_v59  ;;  %v13361_v4 = vsub.f32 %v12778_v30, %v12901_v13  ;;  %v13377_v18 = vsub.f32 %v14726_v19, %v12901_v13 }
 0x353   : > { %14720 = vst [vmem:[#allocation69_spill] sm:$0xff] %v13349_v0  ;;  %14722 = vst [vmem:[#allocation66_spill] sm:$0xff] %v13357_v20  ;;  %v14725_v0 = vld [vmem:[#allocation85_spill] sm:$0xff]  ;;  %v14728_v20 = vld [vmem:[#allocation88_spill] sm:$0xff]  ;;  %v13389_v35 = vsub.f32 %v12812_v46, %v12897_v52  ;;  %v13397_v19 = vsub.f32 %v12822_v44, %v12901_v13  ;;  %v13409_v46 = vsub.f32 %v12827_v60, %v12893_v59 }
 0x354   : > { %14723 = vst [vmem:[#allocation70_spill] sm:$0xff] %v13361_v4  ;;  %v13373_v34 = vsub.f32 %v14725_v0, %v12893_v59  ;;  %14727 = vst [vmem:[#allocation71_spill] sm:$0xff] %v13377_v18  ;;  %v13381_v30 = vsub.f32 %v14728_v20, %v12890_v15  ;;  %v14730_v4 = vld [vmem:[#allocation87_spill] sm:$0xff]  ;;  %v13393_v0 = vsub.f32 %v12793_v24, %v12893_v59  ;;  %v14732_v18 = vld [vmem:[#allocation89_spill] sm:$0xff] }
 0x355   : > { %v13385_v38 = vsub.f32 %v14730_v4, %v12897_v52  ;;  %14731 = vst [vmem:[#allocation72_spill] sm:$0xff] %v13389_v35  ;;  %v13401_v20 = vsub.f32 %v14732_v18, %v12890_v15  ;;  %v14734_v35 = vld [vmem:[#allocation91_spill] sm:$0xff]  ;;  %v13417_v44 = vmul.f32 %v12905_v37, %v12905_v37  ;;  %v13421_v15 = vmul.f32 %v12917_v42, %v12917_v42 }
 0x356   : > { %14729 = vst [vmem:[#allocation74_spill] sm:$0xff] %v13381_v30  ;;  %v14733_v30 = vld [vmem:[#allocation90_spill] sm:$0xff]  ;;  %v13413_v24 = vsub.f32 %v14734_v35, %v12901_v13  ;;  %v13429_v60 = vmul.f32 %v12949_v23, %v12949_v23  ;;  %v13433_v59 = vmul.f32 %v12909_v6, %v12909_v6  ;;  %v13437_v13 = vmul.f32 %v12937_v10, %v12937_v10  ;;  %v14740_v18 = vld [vmem:[#allocation3_spill] sm:$0xff]  ;;  %v14744_v35 = vld [vmem:[#allocation4_spill] sm:$0xff] }
 0x357   : > { %v13405_v4 = vsub.f32 %v14733_v30, %v12897_v52  ;;  %v13425_v52 = vmul.f32 %v12933_v41, %v12933_v41  ;;  %v13441_v37 = vmul.f32 %v12941_v7, %v12941_v7  ;;  %v13445_v42 = vmul.f32 %v12953_v28, %v12953_v28  ;;  %v14742_v30 = vld [vmem:[#allocation8_spill] sm:$0xff] }
 0x358   : > { %14735 = vst [vmem:[#allocation83_spill] sm:$0xff] %v13413_v24  ;;  %v13449_v41 = vmul.f32 %v12913_v56, %v12913_v56  ;;  %v13453_v6 = vmul.f32 %v12945_v61, %v12945_v61  ;;  %v13457_v10 = vmul.f32 %v12957_v12, %v12957_v12  ;;  %v13461_v7 = vmul.f32 %v12965_v63, %v12965_v63  ;;  %v14745_v24 = vld [vmem:[#allocation7_spill] sm:$0xff] }
 0x359   : > { %v13465_v23 = vmul.f32 %v12921_v57, %v12921_v57  ;;  %v13469_v56 = vmul.f32 %v12961_v29, %v12961_v29  ;;  %v13473_v61 = vmul.f32 %v12969_v17, %v12969_v17  ;;  %v13477_v28 = vmul.f32 %v12973_v25, %v12973_v25  ;;  %v14738_v17 = vld [vmem:[#allocation92_spill] sm:$0xff] }
 0x35a   : > { %v13481_v12 = vmul.f32 %v12925_v21, %v12925_v21  ;;  %v13485_v57 = vmul.f32 %v12977_v16, %v12977_v16  ;;  %v13489_v29 = vmul.f32 %v12981_v9, %v12981_v9  ;;  %v13493_v63 = vmul.f32 %v12985_v22, %v12985_v22 }
 0x35b   : > { %v13497_v25 = vmul.f32 %v14738_v17, %v14738_v17  ;;  %v13501_v21 = vmul.f32 %v14740_v18, %v14740_v18  ;;  %v13505_v16 = vmul.f32 %v14742_v30, %v14742_v30  ;;  %v13509_v9 = vmul.f32 %v14744_v35, %v14744_v35 }
 0x35c   : > { %14736 = vst [vmem:[#allocation76_spill] sm:$0xff] %v13481_v12  ;;  %14737 = vst [vmem:[#allocation77_spill] sm:$0xff] %v13485_v57  ;;  %v13513_v22 = vmul.f32 %v14745_v24, %v14745_v24  ;;  %v14747_v12 = vld [vmem:[#allocation5_spill] sm:$0xff]  ;;  %v14753_v57 = vld [vmem:[#allocation15_spill] sm:$0xff] }
 0x35d   : > { %14739 = vst [vmem:[#allocation78_spill] sm:$0xff] %v13497_v25  ;;  %14741 = vst [vmem:[#allocation79_spill] sm:$0xff] %v13501_v21  ;;  %v13517_v17 = vmul.f32 %v14747_v12, %v14747_v12  ;;  %v14749_v25 = vld [vmem:[#allocation9_spill] sm:$0xff]  ;;  %v13529_v35 = vmul.f32 %v14753_v57, %v14753_v57 }
 0x35e   : > { %14743 = vst [vmem:[#allocation81_spill] sm:$0xff] %v13505_v16  ;;  %14746 = vst [vmem:[#allocation80_spill] sm:$0xff] %v13513_v22  ;;  %v13521_v18 = vmul.f32 %v14749_v25, %v14749_v25  ;;  %v14751_v21 = vld [vmem:[#allocation13_spill] sm:$0xff]  ;;  %v14755_v16 = vld [vmem:[#allocation18_spill] sm:$0xff] }
 0x35f   : > { %14748 = vst [vmem:[#allocation82_spill] sm:$0xff] %v13517_v17  ;;  %v13525_v30 = vmul.f32 %v14751_v21, %v14751_v21  ;;  %14754 = vst [vmem:[#allocation86_spill] sm:$0xff] %v13529_v35  ;;  %v13533_v24 = vmul.f32 %v14755_v16, %v14755_v16  ;;  %v14757_v22 = vld [vmem:[#allocation19_spill] sm:$0xff]  ;;  %v14759_v17 = vld [vmem:[#allocation20_spill] sm:$0xff] }
 0x360   : > { %14750 = vst [vmem:[#allocation84_spill] sm:$0xff] %v13521_v18  ;;  %v13537_v12 = vmul.f32 %v14757_v22, %v14757_v22  ;;  %v13541_v25 = vmul.f32 %v14759_v17, %v14759_v17  ;;  %v14761_v18 = vld [vmem:[#allocation10_spill] sm:$0xff]  ;;  %v14765_v35 = vld [vmem:[#allocation12_spill] sm:$0xff] }
 0x361   : > { %14752 = vst [vmem:[#allocation85_spill] sm:$0xff] %v13525_v30  ;;  %14756 = vst [vmem:[#allocation88_spill] sm:$0xff] %v13533_v24  ;;  %v13545_v21 = vmul.f32 %v14761_v18, %v14761_v18  ;;  %v14763_v30 = vld [vmem:[#allocation11_spill] sm:$0xff]  ;;  %v13553_v16 = vmul.f32 %v14765_v35, %v14765_v35  ;;  %v14767_v24 = vld [vmem:[#allocation14_spill] sm:$0xff] }
 0x362   : > { %14758 = vst [vmem:[#allocation87_spill] sm:$0xff] %v13537_v12  ;;  %14760 = vst [vmem:[#allocation89_spill] sm:$0xff] %v13541_v25  ;;  %v13549_v57 = vmul.f32 %v14763_v30, %v14763_v30  ;;  %v13557_v22 = vmul.f32 %v14767_v24, %v14767_v24  ;;  %v14769_v12 = vld [vmem:[#allocation16_spill] sm:$0xff]  ;;  %v14771_v25 = vld [vmem:[#allocation17_spill] sm:$0xff] }
 0x363   : > { %14762 = vst [vmem:[#allocation90_spill] sm:$0xff] %v13545_v21  ;;  %14766 = vst [vmem:[#allocation92_spill] sm:$0xff] %v13553_v16  ;;  %v13561_v17 = vmul.f32 %v14769_v12, %v14769_v12  ;;  %v13565_v18 = vmul.f32 %v14771_v25, %v14771_v25  ;;  %v14773_v21 = vld [vmem:[#allocation25_spill] sm:$0xff]  ;;  %v14777_v16 = vld [vmem:[#allocation28_spill] sm:$0xff] }
 0x364   : > { %14764 = vst [vmem:[#allocation91_spill] sm:$0xff] %v13549_v57  ;;  %14768 = vst [vmem:[#allocation3_spill] sm:$0xff] %v13557_v22  ;;  %v13569_v30 = vmul.f32 %v14773_v21, %v14773_v21  ;;  %v14775_v57 = vld [vmem:[#allocation26_spill] sm:$0xff]  ;;  %v13577_v24 = vmul.f32 %v14777_v16, %v14777_v16  ;;  %v14779_v22 = vld [vmem:[#allocation27_spill] sm:$0xff] }
 0x365   : > { %14770 = vst [vmem:[#allocation8_spill] sm:$0xff] %v13561_v17  ;;  %14772 = vst [vmem:[#allocation4_spill] sm:$0xff] %v13565_v18  ;;  %v13573_v35 = vmul.f32 %v14775_v57, %v14775_v57  ;;  %v13581_v12 = vmul.f32 %v14779_v22, %v14779_v22  ;;  %v14781_v17 = vld [vmem:[#allocation31_spill] sm:$0xff]  ;;  %v14783_v18 = vld [vmem:[#allocation32_spill] sm:$0xff] }
 0x366   : > { %14774 = vst [vmem:[#allocation7_spill] sm:$0xff] %v13569_v30  ;;  %14778 = vst [vmem:[#allocation9_spill] sm:$0xff] %v13577_v24  ;;  %v13585_v25 = vmul.f32 %v14781_v17, %v14781_v17  ;;  %v13589_v21 = vmul.f32 %v14783_v18, %v14783_v18  ;;  %v14785_v30 = vld [vmem:[#allocation33_spill] sm:$0xff] }
 0x367   : > { %14776 = vst [vmem:[#allocation5_spill] sm:$0xff] %v13573_v35  ;;  %14780 = vst [vmem:[#allocation13_spill] sm:$0xff] %v13581_v12  ;;  %v13593_v57 = vmul.f32 %v14785_v30, %v14785_v30  ;;  %v14787_v35 = vld [vmem:[#allocation34_spill] sm:$0xff]  ;;  %v14789_v24 = vld [vmem:[#allocation21_spill] sm:$0xff] }
 0x368   : > { %14782 = vst [vmem:[#allocation15_spill] sm:$0xff] %v13585_v25  ;;  %14784 = vst [vmem:[#allocation18_spill] sm:$0xff] %v13589_v21  ;;  %v13597_v16 = vmul.f32 %v14787_v35, %v14787_v35  ;;  %v13601_v22 = vmul.f32 %v14789_v24, %v14789_v24  ;;  %v14791_v12 = vld [vmem:[#allocation22_spill] sm:$0xff]  ;;  %v14793_v25 = vld [vmem:[#allocation23_spill] sm:$0xff] }
 0x369   : > { %14786 = vst [vmem:[#allocation19_spill] sm:$0xff] %v13593_v57  ;;  %v13605_v17 = vmul.f32 %v14791_v12, %v14791_v12  ;;  %v13609_v18 = vmul.f32 %v14793_v25, %v14793_v25  ;;  %v14795_v21 = vld [vmem:[#allocation24_spill] sm:$0xff]  ;;  %v14797_v57 = vld [vmem:[#allocation30_spill] sm:$0xff] }
 0x36a   : > { %14788 = vst [vmem:[#allocation20_spill] sm:$0xff] %v13597_v16  ;;  %14790 = vst [vmem:[#allocation10_spill] sm:$0xff] %v13601_v22  ;;  %v13613_v30 = vmul.f32 %v14795_v21, %v14795_v21  ;;  %v13617_v35 = vmul.f32 %v14797_v57, %v14797_v57  ;;  %v14799_v16 = vld [vmem:[#allocation29_spill] sm:$0xff]  ;;  %v14801_v22 = vld [vmem:[#allocation38_spill] sm:$0xff] }
 0x36b   : > { %14792 = vst [vmem:[#allocation11_spill] sm:$0xff] %v13605_v17  ;;  %14794 = vst [vmem:[#allocation12_spill] sm:$0xff] %v13609_v18  ;;  %v13621_v24 = vmul.f32 %v14799_v16, %v14799_v16  ;;  %v13625_v12 = vmul.f32 %v14801_v22, %v14801_v22  ;;  %v14803_v17 = vld [vmem:[#allocation40_spill] sm:$0xff]  ;;  %v14804_v18 = vld [vmem:[#allocation41_spill] sm:$0xff] }
 0x36c   : > { %14796 = vst [vmem:[#allocation14_spill] sm:$0xff] %v13613_v30  ;;  %14798 = vst [vmem:[#allocation16_spill] sm:$0xff] %v13617_v35  ;;  %v13629_v25 = vmul.f32 %v14803_v17, %v14803_v17  ;;  %v13633_v21 = vmul.f32 %v14804_v18, %v14804_v18  ;;  %v14805_v30 = vld [vmem:[#allocation42_spill] sm:$0xff]  ;;  %v14806_v35 = vld [vmem:[#allocation43_spill] sm:$0xff]  ;;  %v13649_v17 = vmul.f32 %v13137_v8, %v13137_v8 }
 0x36d   : > { %14800 = vst [vmem:[#allocation17_spill] sm:$0xff] %v13621_v24  ;;  %14802 = vst [vmem:[#allocation25_spill] sm:$0xff] %v13625_v12  ;;  %v13637_v57 = vmul.f32 %v14805_v30, %v14805_v30  ;;  %v13641_v16 = vmul.f32 %v14806_v35, %v14806_v35  ;;  %v14807_v24 = vld [vmem:[#allocation46_spill] sm:$0xff]  ;;  %v13653_v18 = vmul.f32 %v13141_v49, %v13141_v49  ;;  %v14809_v12 = vld [vmem:[#allocation47_spill] sm:$0xff] }
 0x36e   : > { %v13645_v22 = vmul.f32 %v14807_v24, %v14807_v24  ;;  %v13657_v30 = vmul.f32 %v13145_v53, %v13145_v53  ;;  %v13661_v35 = vmul.f32 %v14809_v12, %v14809_v12  ;;  %v13665_v24 = vmul.f32 %v13153_v58, %v13153_v58 }
 0x36f   : > { %v13669_v8 = vmul.f32 %v13157_v54, %v13157_v54  ;;  %v13673_v49 = vmul.f32 %v13173_v39, %v13173_v39  ;;  %v13677_v53 = vmul.f32 %v13189_v36, %v13189_v36  ;;  %v13689_v54 = vmul.f32 %v13205_v5, %v13205_v5 }
 0x370   : > { %14808 = vst [vmem:[#allocation26_spill] sm:$0xff] %v13657_v30  ;;  %14810 = vst [vmem:[#allocation28_spill] sm:$0xff] %v13661_v35  ;;  %v14813_v30 = vld [vmem:[#allocation45_spill] sm:$0xff]  ;;  %v13693_v39 = vmul.f32 %v13209_v51, %v13209_v51 }
 0x371   : > { %14811 = vst [vmem:[#allocation27_spill] sm:$0xff] %v13673_v49  ;;  %14812 = vst [vmem:[#allocation31_spill] sm:$0xff] %v13677_v53  ;;  %v13681_v12 = vmul.f32 %v14813_v30, %v14813_v30  ;;  %v14815_v35 = vld [vmem:[#allocation49_spill] sm:$0xff]  ;;  %v14818_v49 = vld [vmem:[#allocation55_spill] sm:$0xff] }
 0x372   : > { %v13685_v58 = vmul.f32 %v14815_v35, %v14815_v35  ;;  %14816 = vst [vmem:[#allocation33_spill] sm:$0xff] %v13689_v54  ;;  %14817 = vst [vmem:[#allocation34_spill] sm:$0xff] %v13693_v39  ;;  %v13697_v36 = vmul.f32 %v14818_v49, %v14818_v49  ;;  %v14820_v53 = vld [vmem:[#allocation56_spill] sm:$0xff]  ;;  %v13705_v35 = vmul.f32 %v13221_v45, %v13221_v45  ;;  %v14825_v54 = vld [vmem:[#allocation62_spill] sm:$0xff] }
 0x373   : > { %14814 = vst [vmem:[#allocation32_spill] sm:$0xff] %v13681_v12  ;;  %v13701_v30 = vmul.f32 %v14820_v53, %v14820_v53  ;;  %v14823_v12 = vld [vmem:[#allocation57_spill] sm:$0xff]  ;;  %v13713_v51 = vmul.f32 %v14825_v54, %v14825_v54  ;;  %v14826_v39 = vld [vmem:[#allocation64_spill] sm:$0xff] }
 0x374   : > { %14819 = vst [vmem:[#allocation21_spill] sm:$0xff] %v13697_v36  ;;  %14822 = vst [vmem:[#allocation23_spill] sm:$0xff] %v13705_v35  ;;  %v13709_v5 = vmul.f32 %v14823_v12, %v14823_v12  ;;  %v13717_v49 = vmul.f32 %v14826_v39, %v14826_v39  ;;  %v14827_v36 = vld [vmem:[#allocation63_spill] sm:$0xff]  ;;  %v13737_v39 = vmul.f32 %v13253_v43, %v13253_v43 }
 0x375   : > { %14821 = vst [vmem:[#allocation22_spill] sm:$0xff] %v13701_v30  ;;  %v13721_v53 = vmul.f32 %v14827_v36, %v14827_v36  ;;  %v14828_v30 = vld [vmem:[#allocation50_spill] sm:$0xff]  ;;  %v14829_v35 = vld [vmem:[#allocation51_spill] sm:$0xff]  ;;  %v13741_v36 = vmul.f32 %v13257_v31, %v13257_v31  ;;  %v13761_v31 = vmul.f32 %v13277_v48, %v13277_v48 }
 0x376   : > { %14824 = vst [vmem:[#allocation24_spill] sm:$0xff] %v13709_v5  ;;  %v13725_v45 = vmul.f32 %v14828_v30, %v14828_v30  ;;  %v13729_v12 = vmul.f32 %v14829_v35, %v14829_v35  ;;  %v14831_v5 = vld [vmem:[#allocation52_spill] sm:$0xff]  ;;  %14832 = vst [vmem:[#allocation29_spill] sm:$0xff] %v13737_v39  ;;  %v13745_v30 = vmul.f32 %v13261_v55, %v13261_v55  ;;  %v14839_v39 = vld [vmem:[#allocation58_spill] sm:$0xff] }
 0x377   : > { %v13733_v54 = vmul.f32 %v14831_v5, %v14831_v5  ;;  %14833 = vst [vmem:[#allocation38_spill] sm:$0xff] %v13741_v36  ;;  %v13749_v35 = vmul.f32 %v13265_v26, %v13265_v26  ;;  %v13753_v5 = vmul.f32 %v13269_v47, %v13269_v47  ;;  %14838 = vst [vmem:[#allocation43_spill] sm:$0xff] %v13761_v31  ;;  %v14841_v36 = vld [vmem:[#allocation60_spill] sm:$0xff] }
 0x378   : > { %14830 = vst [vmem:[#allocation30_spill] sm:$0xff] %v13729_v12  ;;  %14834 = vst [vmem:[#allocation40_spill] sm:$0xff] %v13745_v30  ;;  %v14836_v12 = vld [vmem:[#allocation53_spill] sm:$0xff]  ;;  %v13765_v55 = vmul.f32 %v14839_v39, %v14839_v39  ;;  %v13769_v26 = vmul.f32 %v14841_v36, %v14841_v36  ;;  %v14843_v30 = vld [vmem:[#allocation59_spill] sm:$0xff] }
 0x379   : > { %14835 = vst [vmem:[#allocation41_spill] sm:$0xff] %v13753_v5  ;;  %v13757_v43 = vmul.f32 %v14836_v12, %v14836_v12  ;;  %v13773_v47 = vmul.f32 %v14843_v30, %v14843_v30  ;;  %v14845_v5 = vld [vmem:[#allocation61_spill] sm:$0xff]  ;;  %v14849_v31 = vld [vmem:[#allocation68_spill] sm:$0xff]  ;;  %v13793_v30 = vmul.f32 %v13309_v62, %v13309_v62  ;;  %v13813_v62 = vmul.f32 %v13329_v33, %v13329_v33 }
 0x37a   : > { %14840 = vst [vmem:[#allocation46_spill] sm:$0xff] %v13765_v55  ;;  %14842 = vst [vmem:[#allocation47_spill] sm:$0xff] %v13769_v26  ;;  %v13777_v12 = vmul.f32 %v14845_v5, %v14845_v5  ;;  %v13785_v39 = vmul.f32 %v14849_v31, %v14849_v31  ;;  %v14851_v55 = vld [vmem:[#allocation75_spill] sm:$0xff]  ;;  %v13797_v5 = vmul.f32 %v13313_v3, %v13313_v3  ;;  %v14919_v26 = vld [vmem:[#allocation17_spill] sm:$0xff] }
 0x37b   : > { %14837 = vst [vmem:[#allocation42_spill] sm:$0xff] %v13757_v43  ;;  %14844 = vst [vmem:[#allocation45_spill] sm:$0xff] %v13773_v47  ;;  %v14847_v43 = vld [vmem:[#allocation67_spill] sm:$0xff]  ;;  %v13789_v36 = vmul.f32 %v14851_v55, %v14851_v55  ;;  %v13805_v31 = vmul.f32 %v13321_v1, %v13321_v1  ;;  %v13809_v55 = vmul.f32 %v13325_v27, %v13325_v27 }
 0x37c   : > { %14846 = vst [vmem:[#allocation49_spill] sm:$0xff] %v13777_v12  ;;  %v13781_v48 = vmul.f32 %v14847_v43, %v14847_v43  ;;  %14850 = vst [vmem:[#allocation56_spill] sm:$0xff] %v13785_v39  ;;  %v13801_v43 = vmul.f32 %v13317_v14, %v13317_v14  ;;  %v13817_v3 = vmul.f32 %v13333_v11, %v13333_v11  ;;  %v14918_v12 = vld [vmem:[#allocation10_spill] sm:$0xff] }
 0x37d   : > { %14852 = vst [vmem:[#allocation57_spill] sm:$0xff] %v13789_v36  ;;  %14853 = vst [vmem:[#allocation62_spill] sm:$0xff] %v13793_v30  ;;  %v13821_v14 = vmul.f32 %v13337_v40, %v13337_v40  ;;  %v13825_v1 = vmul.f32 %v13341_v32, %v13341_v32  ;;  %v14866_v30 = vld [vmem:[#allocation65_spill] sm:$0xff]  ;;  %v13915_v39 = vmul.f32 %v13393_v0, %v13393_v0  ;;  %v14907_v36 = vld [vmem:[#allocation90_spill] sm:$0xff] }
 0x37e   : > { %14848 = vst [vmem:[#allocation55_spill] sm:$0xff] %v13781_v48  ;;  %14854 = vst [vmem:[#allocation64_spill] sm:$0xff] %v13797_v5  ;;  %v13837_v11 = vmul.f32 %v14866_v30, %v14866_v30  ;;  %v13857_v30 = vmul.f32 %v13373_v34, %v13373_v34  ;;  %v13935_v0 = vmul.f32 %v13409_v46, %v13409_v46 }
 0x37f   : > { %14855 = vst [vmem:[#allocation63_spill] sm:$0xff] %v13801_v43  ;;  %14856 = vst [vmem:[#allocation50_spill] sm:$0xff] %v13805_v31  ;;  %v14862_v43 = vld [vmem:[#allocation73_spill] sm:$0xff] }
 0x380   : > { %14857 = vst [vmem:[#allocation51_spill] sm:$0xff] %v13809_v55  ;;  %14858 = vst [vmem:[#allocation52_spill] sm:$0xff] %v13813_v62  ;;  %v13829_v27 = vmul.f32 %v14862_v43, %v14862_v43  ;;  %v14864_v31 = vld [vmem:[#allocation69_spill] sm:$0xff]  ;;  %v13849_v43 = vmul.f32 %v13365_v50, %v13365_v50  ;;  %v13869_v50 = vmul.f32 %v13385_v38, %v13385_v38  ;;  %v14908_v62 = vld [vmem:[#allocation83_spill] sm:$0xff] }
 0x381   : > { %14859 = vst [vmem:[#allocation53_spill] sm:$0xff] %v13817_v3  ;;  %14860 = vst [vmem:[#allocation58_spill] sm:$0xff] %v13821_v14  ;;  %v13833_v33 = vmul.f32 %v14864_v31, %v14864_v31  ;;  %v14868_v3 = vld [vmem:[#allocation66_spill] sm:$0xff]  ;;  %v13853_v31 = vmul.f32 %v13369_v2, %v13369_v2 }
 0x382   : > { %14861 = vst [vmem:[#allocation60_spill] sm:$0xff] %v13825_v1  ;;  %14863 = vst [vmem:[#allocation59_spill] sm:$0xff] %v13829_v27  ;;  %v13841_v40 = vmul.f32 %v14868_v3, %v14868_v3  ;;  %v14870_v14 = vld [vmem:[#allocation70_spill] sm:$0xff]  ;;  %v14875_v1 = vld [vmem:[#allocation71_spill] sm:$0xff] }
 0x383   : > { %14865 = vst [vmem:[#allocation61_spill] sm:$0xff] %v13833_v33  ;;  %14867 = vst [vmem:[#allocation67_spill] sm:$0xff] %v13837_v11  ;;  %v13845_v32 = vmul.f32 %v14870_v14, %v14870_v14  ;;  %v13861_v3 = vmul.f32 %v14875_v1, %v14875_v1  ;;  %v14877_v27 = vld [vmem:[#allocation74_spill] sm:$0xff]  ;;  %v14882_v33 = vld [vmem:[#allocation37_spill] sm:$0xff] }
 0x384   : > { %14869 = vst [vmem:[#allocation68_spill] sm:$0xff] %v13841_v40  ;;  %14872 = vst [vmem:[#allocation73_spill] sm:$0xff] %v13849_v43  ;;  %v13865_v14 = vmul.f32 %v14877_v27, %v14877_v27  ;;  %v14878_v43 = vld [vmem:[#allocation48_spill] sm:$0xff]  ;;  %v13889_v38 = vmul.f32 %v14882_v33, %v14882_v33  ;;  %v14883_v11 = vld [vmem:[#allocation39_spill] sm:$0xff]  ;;  %v8284_v33 = vcombine.low %v13433_v59, %v13437_v13 }
 0x385   : > { %14871 = vst [vmem:[#allocation75_spill] sm:$0xff] %v13845_v32  ;;  %14873 = vst [vmem:[#allocation69_spill] sm:$0xff] %v13853_v31  ;;  %v13873_v2 = vmul.f32 %v14878_v43, %v14878_v43  ;;  %v14879_v31 = vld [vmem:[#allocation35_spill] sm:$0xff]  ;;  %v13893_v43 = vmul.f32 %v14883_v11, %v14883_v11  ;;  %v14884_v40 = vld [vmem:[#allocation44_spill] sm:$0xff]  ;;  %v8268_v32 = vcombine.low %v13425_v52, %v13429_v60 }
 0x386   : > { %14874 = vst [vmem:[#allocation65_spill] sm:$0xff] %v13857_v30  ;;  %14876 = vst [vmem:[#allocation66_spill] sm:$0xff] %v13861_v3  ;;  %v13877_v34 = vmul.f32 %v14879_v31, %v14879_v31  ;;  %v14880_v30 = vld [vmem:[#allocation36_spill] sm:$0xff]  ;;  %v13897_v31 = vmul.f32 %v14884_v40, %v14884_v40  ;;  %v8285_v11 = vcombine.low %v13441_v37, %v13445_v42  ;;  %v14889_v13 = vld [vmem:[#allocation6_spill] sm:$0xff] }
 0x387   : > { %v13881_v1 = vmul.f32 %v14880_v30, %v14880_v30  ;;  %v14881_v3 = vld [vmem:[#allocation72_spill] sm:$0xff]  ;;  %v8267_v30 = vcombine.low %v13417_v44, %v13421_v15  ;;  %v8301_v40 = vcombine.low %v13449_v41, %v13453_v6  ;;  %v13919_v44 = vmul.f32 %v13397_v19, %v13397_v19  ;;  %14888 = vst [vmem:[#allocation74_spill] sm:$0xff] %v13935_v0  ;;  %v14890_v41 = vld [vmem:[#allocation81_spill] sm:$0xff] }
 0x388   : > { %v13885_v27 = vmul.f32 %v14881_v3, %v14881_v3  ;;  %v14885_v3 = vld [vmem:[#allocation54_spill] sm:$0xff]  ;;  %v8302_v15 = vcombine.low %v13457_v10, %v13461_v7  ;;  %v8319_v52 = vcombine.low %v13473_v61, %v13477_v28  ;;  %v13927_v60 = vmul.f32 %v13401_v20, %v13401_v20  ;;  %v14891_v7 = vld [vmem:[#allocation77_spill] sm:$0xff]  ;;  %v14892_v61 = vld [vmem:[#allocation76_spill] sm:$0xff] }
 0x389   : > { %v13905_v5 = vmul.f32 %v14885_v3, %v14885_v3  ;;  %v13931_v59 = vmul.f32 %v13405_v4, %v13405_v4  ;;  %v8336_v19 = vcombine.low %v13489_v29, %v13493_v63  ;;  %v13940_v37 = vrot.slane %v8267_v30, %v14889_v13  ;;  %v14894_v63 = vld [vmem:[#allocation78_spill] sm:$0xff]  ;;  %v14896_v30 = vld [vmem:[#allocation84_spill] sm:$0xff] }
 0x38a   : > { %14886 = vst [vmem:[#allocation70_spill] sm:$0xff] %v13927_v60  ;;  %v13943_v42 = vrot.slane %v8268_v32, %v14889_v13  ;;  %v8318_v20 = vcombine.low %v13465_v23, %v13469_v56  ;;  %v8353_v4 = vcombine.low %v14890_v41, %v13509_v9  ;;  %v13950_v6 = vrot.slane %v8284_v33, %v14889_v13  ;;  %v14893_v56 = vld [vmem:[#allocation79_spill] sm:$0xff]  ;;  %v14895_v32 = vld [vmem:[#allocation85_spill] sm:$0xff] }
 0x38b   : > { %14887 = vst [vmem:[#allocation71_spill] sm:$0xff] %v13931_v59  ;;  %v13953_v46 = vrot.slane %v8285_v11, %v14889_v13  ;;  %v13956_v10 = vrot.slane %v8301_v40, %v14889_v13  ;;  %v8335_v28 = vcombine.low %v14892_v61, %v14891_v7  ;;  %v13961_v29 = vrot.slane %v8302_v15, %v14889_v13  ;;  %v14897_v11 = vld [vmem:[#allocation82_spill] sm:$0xff]  ;;  %v14898_v40 = vld [vmem:[#allocation80_spill] sm:$0xff]  ;;  %v14899_v60 = vld [vmem:[#allocation89_spill] sm:$0xff] }
 0x38c   : > { %v13964_v23 = vrot.slane %v8319_v52, %v14889_v13  ;;  %v8352_v9 = vcombine.low %v14894_v63, %v14893_v56  ;;  %v8370_v3 = vcombine.low %v14896_v30, %v14895_v32  ;;  %v13971_v33 = vrot.slane %v8336_v19, %v14889_v13  ;;  %v14900_v7 = vld [vmem:[#allocation87_spill] sm:$0xff]  ;;  %v14902_v59 = vld [vmem:[#allocation92_spill] sm:$0xff]  ;;  %v14905_v32 = vld [vmem:[#allocation86_spill] sm:$0xff] }
 0x38d   : > { %v8369_v41 = vcombine.low %v14898_v40, %v14897_v11  ;;  %v8387_v61 = vcombine.low %v14900_v7, %v14899_v60  ;;  %v14901_v15 = vld [vmem:[#allocation3_spill] sm:$0xff]  ;;  %v13980_v52 = vrot.slane %v8318_v20, %v14889_v13  ;;  %v13983_v56 = vrot.slane %v8353_v4, %v14889_v13  ;;  %v14904_v63 = vld [vmem:[#allocation88_spill] sm:$0xff] }
 0x38e   : > { %v8404_v0 = vcombine.low %v14902_v59, %v14901_v15  ;;  %v8386_v30 = vcombine.low %v14905_v32, %v14904_v63  ;;  %v14906_v19 = vld [vmem:[#allocation91_spill] sm:$0xff]  ;;  %v13991_v11 = vmul.f32 %v14908_v62, %v14908_v62  ;;  %v13998_v20 = vrot.slane %v8335_v28, %v14889_v13  ;;  %v14914_v7 = vld [vmem:[#allocation8_spill] sm:$0xff] }
 0x38f   : > { %14903 = vst [vmem:[#allocation48_spill] sm:$0xff] %v13983_v56  ;;  %v8403_v55 = vcombine.low %v14907_v36, %v14906_v19  ;;  %v14005_v36 = vrot.slane %v8352_v9, %v14889_v13  ;;  %v14008_v62 = vrot.slane %v8370_v3, %v14889_v13  ;;  %v14013_v15 = vrot.slane %v8369_v41, %v14889_v13  ;;  %v14911_v19 = vld [vmem:[#allocation5_spill] sm:$0xff]  ;;  %v14912_v40 = vld [vmem:[#allocation7_spill] sm:$0xff]  ;;  %v14913_v41 = vld [vmem:[#allocation4_spill] sm:$0xff] }
 0x390   : > { %14909 = vst [vmem:[#allocation35_spill] sm:$0xff] %v13991_v11  ;;  %v14016_v28 = vrot.slane %v8387_v61, %v14889_v13  ;;  %v14019_v63 = vrot.slane %v8404_v0, %v14889_v13  ;;  %v14024_v9 = vrot.slane %v8386_v30, %v14889_v13  ;;  %v8421_v59 = vcombine.low %v14912_v40, %v14911_v19  ;;  %v14915_v61 = vld [vmem:[#allocation18_spill] sm:$0xff]  ;;  %v14916_v60 = vld [vmem:[#allocation15_spill] sm:$0xff]  ;;  %v14920_v32 = vld [vmem:[#allocation16_spill] sm:$0xff] }
 0x391   : > { %14910 = vst [vmem:[#allocation36_spill] sm:$0xff] %v14005_v36  ;;  %v14027_v3 = vrot.slane %v8403_v55, %v14889_v13  ;;  %v8420_v4 = vcombine.low %v14914_v7, %v14913_v41  ;;  %v8438_v11 = vcombine.low %v14916_v60, %v14915_v61  ;;  %v14917_v0 = vld [vmem:[#allocation11_spill] sm:$0xff]  ;;  %v8472_v56 = vcombine.low %v14920_v32, %v14919_v26  ;;  %v14921_v55 = vld [vmem:[#allocation13_spill] sm:$0xff]  ;;  %v14923_v19 = vld [vmem:[#allocation20_spill] sm:$0xff] }
 0x392   : > { %v8455_v48 = vcombine.low %v14918_v12, %v14917_v0  ;;  %v8385_v30 = vcombine.low %v14013_v15, %v14008_v62  ;;  %v14922_v36 = vld [vmem:[#allocation9_spill] sm:$0xff]  ;;  %v8489_v40 = vcombine.low %v13633_v21, %v13637_v57  ;;  %v8506_v7 = vcombine.low %v13649_v17, %v13653_v18  ;;  %v14924_v26 = vld [vmem:[#allocation19_spill] sm:$0xff]  ;;  %v14925_v41 = vld [vmem:[#allocation14_spill] sm:$0xff] }
 0x393   : > { %v8437_v47 = vcombine.low %v14922_v36, %v14921_v55  ;;  %v8419_v12 = vcombine.low %v14027_v3, %v14019_v63  ;;  %v8454_v32 = vcombine.low %v14924_v26, %v14923_v19  ;;  %v14926_v61 = vld [vmem:[#allocation12_spill] sm:$0xff]  ;;  %v14056_v36 = vrot.slane %v8421_v59, %v14889_v13  ;;  %v14927_v21 = vld [vmem:[#allocation25_spill] sm:$0xff] }
 0x394   : > { %v8471_v0 = vcombine.low %v14926_v61, %v14925_v41  ;;  %v8488_v57 = vcombine.low %v14927_v21, %v13629_v25  ;;  %v8505_v17 = vcombine.low %v13641_v16, %v13645_v22  ;;  %v8523_v18 = vcombine.low %v13665_v24, %v13669_v8  ;;  %v14928_v24 = vld [vmem:[#allocation28_spill] sm:$0xff]  ;;  %v14929_v8 = vld [vmem:[#allocation26_spill] sm:$0xff]  ;;  %v14931_v41 = vld [vmem:[#allocation27_spill] sm:$0xff] }
 0x395   : > { %v14065_v55 = vrot.slane %v8420_v4, %v14889_v13  ;;  %v14068_v19 = vrot.slane %v8438_v11, %v14889_v13  ;;  %v14071_v26 = vrot.slane %v8455_v48, %v14889_v13  ;;  %v14074_v59 = vrot.slane %v8472_v56, %v14889_v13  ;;  %v14930_v56 = vld [vmem:[#allocation31_spill] sm:$0xff] }
 0x396   : > { %v14077_v25 = vrot.slane %v8437_v47, %v14889_v13  ;;  %v14080_v16 = vrot.slane %v8489_v40, %v14889_v13  ;;  %v14083_v22 = vrot.slane %v8506_v7, %v14889_v13  ;;  %v8522_v4 = vcombine.low %v14929_v8, %v14928_v24  ;;  %v14932_v47 = vld [vmem:[#allocation32_spill] sm:$0xff]  ;;  %v14935_v40 = vld [vmem:[#allocation34_spill] sm:$0xff] }
 0x397   : > { %v14088_v11 = vrot.slane %v8454_v32, %v14889_v13  ;;  %v14091_v48 = vrot.slane %v8471_v0, %v14889_v13  ;;  %v8539_v61 = vcombine.low %v14931_v41, %v14930_v56  ;;  %v8540_v21 = vcombine.low %v14932_v47, %v13685_v58  ;;  %v14933_v56 = vld [vmem:[#allocation22_spill] sm:$0xff]  ;;  %v14934_v41 = vld [vmem:[#allocation21_spill] sm:$0xff] }
 0x398   : > { %v14100_v7 = vrot.slane %v8488_v57, %v14889_v13  ;;  %v14103_v24 = vrot.slane %v8505_v17, %v14889_v13  ;;  %v14106_v32 = vrot.slane %v8523_v18, %v14889_v13  ;;  %v8453_v0 = vcombine.low %v14077_v25, %v14068_v19  ;;  %v14936_v19 = vld [vmem:[#allocation33_spill] sm:$0xff]  ;;  %v14938_v17 = vld [vmem:[#allocation23_spill] sm:$0xff] }
 0x399   : > { %v8557_v47 = vcombine.low %v14934_v41, %v14933_v56  ;;  %v14121_v18 = vrot.slane %v8522_v4, %v14889_v13  ;;  %v8556_v25 = vcombine.low %v14936_v19, %v14935_v40  ;;  %v14126_v8 = vrot.slane %v8539_v61, %v14889_v13  ;;  %v14937_v4 = vld [vmem:[#allocation24_spill] sm:$0xff] }
 0x39a   : > { %v14129_v60 = vrot.slane %v8540_v21, %v14889_v13  ;;  %v8743_v56 = vcombine.low %v13865_v14, %v13869_v50  ;;  %v8744_v41 = vcombine.low %v13873_v2, %v13877_v34  ;;  %v8573_v58 = vcombine.low %v14938_v17, %v14937_v4 }
 0x39b   : > { %v8538_v57 = vcombine.low %v14121_v18, %v14106_v32  ;;  %v8574_v40 = vcombine.low %v13713_v51, %v13717_v49  ;;  %v8760_v61 = vcombine.low %v13881_v1, %v13885_v27  ;;  %v14144_v21 = vrot.slane %v8557_v47, %v14889_v13  ;;  %v14939_v51 = vld [vmem:[#allocation30_spill] sm:$0xff]  ;;  %v14940_v47 = vld [vmem:[#allocation40_spill] sm:$0xff] }
 0x39c   : > { %v14147_v14 = vrot.slane %v8743_v56, %v14889_v13  ;;  %v14150_v50 = vrot.slane %v8744_v41, %v14889_v13  ;;  %v8761_v2 = vcombine.low %v13889_v38, %v13893_v43  ;;  %v8590_v34 = vcombine.low %v13721_v53, %v13725_v45  ;;  %v14944_v56 = vld [vmem:[#allocation29_spill] sm:$0xff] }
 0x39d   : > { %v8591_v49 = vcombine.low %v14939_v51, %v13733_v54  ;;  %v8777_v1 = vcombine.low %v13897_v31, %v13905_v5  ;;  %v8778_v27 = vcombine.low %v13915_v39, %v13919_v44  ;;  %v8608_v17 = vcombine.low %v14940_v47, %v13749_v35  ;;  %v14943_v44 = vld [vmem:[#allocation38_spill] sm:$0xff] }
 0x39e   : > { %v8759_v19 = vcombine.low %v14147_v14, %v14150_v50  ;;  %v14167_v38 = vrot.slane %v8760_v61, %v14889_v13  ;;  %v14170_v53 = vrot.slane %v8761_v2, %v14889_v13  ;;  %v14941_v39 = vcombine.low %v13940_v37, %v13943_v42 }
 0x39f   : > { %v14173_v45 = vrot.slane %v8777_v1, %v14889_v13  ;;  %v14176_v54 = vrot.slane %v8778_v27, %v14889_v13  ;;  %v14942_v5 = vcombine.low %v13956_v10, %v13961_v29  ;;  %v14187_v31 = vrot.slane %v8574_v40, %v14889_v13  ;;  %v14946_v1 = vld [vmem:[#allocation42_spill] sm:$0xff]  ;;  %v14947_v27 = vld [vmem:[#allocation41_spill] sm:$0xff] }
 0x3a0   : > { %v8843_v35 = vsel %vm2995_vm8, %v14941_v39, 0.0  ;;  %v8607_v41 = vcombine.low %v14944_v56, %v14943_v44  ;;  %v8776_v4 = vcombine.low %v14167_v38, %v14170_v53  ;;  %v14194_v2 = vrot.slane %v8556_v25, %v14889_v13  ;;  %v14952_v56 = vld [vmem:[#allocation45_spill] sm:$0xff] }
 0x3a1   : > { %v8844_v43 = vsel %vm2995_vm8, %v14942_v5, 0.0  ;;  %v14197_v37 = vrot.slane %v8591_v49, %v14889_v13  ;;  %v8793_v42 = vcombine.low %v14173_v45, %v14176_v54  ;;  %v14945_v10 = vcombine.low %v13998_v20, %v13971_v33 }
 0x3a2   : > { %v8845_v61 = vadd.f32 %v8844_v43, %v8843_v35  ;;  %v8555_v40 = vcombine.low %v14126_v8, %v14129_v60  ;;  %v8581_v51 = vrot.slane %v8573_v58, %v14889_v13  ;;  %v8624_v25 = vcombine.low %v14947_v27, %v14946_v1  ;;  %v14948_v8 = vld [vmem:[#allocation46_spill] sm:$0xff]  ;;  %v14949_v58 = vld [vmem:[#allocation43_spill] sm:$0xff]  ;;  %v14957_v1 = vld [vmem:[#allocation48_spill] sm:$0xff] }
 0x3a3   : > { %v8846_v29 = vsel %vm2995_vm8, %v14945_v10, 0.0  ;;  %v8572_v49 = vcombine.low %v14194_v2, %v14144_v21  ;;  %v14213_v39 = vrot.slane %v8590_v34, %v14889_v13  ;;  %v8622_v35 = vrot.slane %v8608_v17, %v14889_v13 }
 0x3a4   : > { %v8847_v47 = vadd.f32 %v8846_v29, %v8845_v61  ;;  %v8848_v33 = vsel %vm2995_vm8, %v8385_v30, 0.0  ;;  %v8589_v20 = vcombine.low %v8581_v51, %v14187_v31  ;;  %v8615_v60 = vrot.slane %v8607_v41, %v14889_v13  ;;  %v14953_v41 = vld [vmem:[#allocation47_spill] sm:$0xff]  ;;  %v14955_v29 = vld [vmem:[#allocation49_spill] sm:$0xff] }
 0x3a5   : > { %v8625_v5 = vcombine.low %v14949_v58, %v14948_v8  ;;  %v8606_v44 = vcombine.low %v14213_v39, %v14197_v37  ;;  %v8850_v34 = vsel %vm2995_vm8, %v8419_v12, 0.0  ;;  %v14950_v62 = vcombine.low %v13950_v6, %v13953_v46  ;;  %v14954_v12 = vld [vmem:[#allocation55_spill] sm:$0xff]  ;;  %v14956_v46 = vld [vmem:[#allocation36_spill] sm:$0xff] }
 0x3a6   : > { %v8849_v43 = vadd.f32 %v8848_v33, %v8847_v47  ;;  %v14951_v30 = vcombine.low %v13980_v52, %v13964_v23  ;;  %v14239_v31 = vrot.slane %v8624_v25, %v14889_v13  ;;  %v8641_v61 = vcombine.low %v14953_v41, %v14952_v56  ;;  %v14959_v25 = vld [vmem:[#allocation52_spill] sm:$0xff]  ;;  %v14960_v47 = vld [vmem:[#allocation51_spill] sm:$0xff]  ;;  %v14967_v41 = vld [vmem:[#allocation50_spill] sm:$0xff] }
 0x3a7   : > { %v8874_v15 = vsel %vm2995_vm8, %v14950_v62, 0.0  ;;  %v8623_v3 = vcombine.low %v8615_v60, %v8622_v35  ;;  %v8642_v51 = vcombine.low %v14955_v29, %v14954_v12  ;;  %v8852_v6 = vsel %vm2995_vm8, %v8453_v0, 0.0  ;;  %v14962_v35 = vld [vmem:[#allocation56_spill] sm:$0xff]  ;;  %v14964_v62 = vld [vmem:[#allocation62_spill] sm:$0xff] }
 0x3a8   : > { %v8875_v17 = vsel %vm2995_vm8, %v14951_v30, 0.0  ;;  %v8851_v10 = vadd.f32 %v8850_v34, %v8849_v43  ;;  %v14958_v27 = vcombine.low %v14956_v46, %v14957_v1  ;;  %v14251_v52 = vrot.slane %v8625_v5, %v14889_v13  ;;  %v14961_v43 = vld [vmem:[#allocation57_spill] sm:$0xff]  ;;  %v14963_v34 = vld [vmem:[#allocation64_spill] sm:$0xff]  ;;  %v14969_v46 = vld [vmem:[#allocation75_spill] sm:$0xff] }
 0x3a9   : > { %v8876_v63 = vadd.f32 %v8875_v17, %v8874_v15  ;;  %v8676_v33 = vcombine.low %v14960_v47, %v14959_v25  ;;  %v8658_v60 = vcombine.low %v14962_v35, %v14961_v43  ;;  %v8659_v15 = vcombine.low %v14964_v62, %v14963_v34  ;;  %v14970_v1 = vld [vmem:[#allocation68_spill] sm:$0xff]  ;;  %v14976_v35 = vld [vmem:[#allocation59_spill] sm:$0xff] }
 0x3aa   : > { %v8877_v23 = vsel %vm2995_vm8, %v14958_v27, 0.0  ;;  %v8853_v8 = vadd.f32 %v8852_v6, %v8851_v10  ;;  %v14965_v0 = vcombine.low %v14091_v48, %v14074_v59  ;;  %v14966_v5 = vcombine.low %v14024_v9, %v14016_v28  ;;  %v14968_v10 = vld [vmem:[#allocation63_spill] sm:$0xff] }
 0x3ab   : > { %v8878_v58 = vadd.f32 %v8877_v23, %v8876_v63  ;;  %v8649_v56 = vrot.slane %v8641_v61, %v14889_v13  ;;  %v8675_v63 = vcombine.low %v14968_v10, %v14967_v41  ;;  %v8656_v6 = vrot.slane %v8642_v51, %v14889_v13 }
 0x3ac   : > { %v8854_v30 = vsel %vm2995_vm8, %v14965_v0, 0.0  ;;  %v8879_v17 = vsel %vm2995_vm8, %v14966_v5, 0.0  ;;  %v8710_v27 = vcombine.low %v14970_v1, %v14969_v46  ;;  %v14971_v59 = vcombine.low %v14103_v24, %v14083_v22  ;;  %v14980_v5 = vld [vmem:[#allocation53_spill] sm:$0xff] }
 0x3ad   : > { %v8855_v12 = vadd.f32 %v8854_v30, %v8853_v8  ;;  %v8880_v29 = vadd.f32 %v8879_v17, %v8878_v58  ;;  %v14972_v28 = vcombine.low %v14065_v55, %v14056_v36  ;;  %v8640_v61 = vcombine.low %v14239_v31, %v14251_v52  ;;  %v14973_v8 = vld [vmem:[#allocation67_spill] sm:$0xff]  ;;  %v14974_v58 = vld [vmem:[#allocation61_spill] sm:$0xff]  ;;  %v14977_v31 = vld [vmem:[#allocation60_spill] sm:$0xff] }
 0x3ae   : > { %v8856_v48 = vsel %vm2995_vm8, %v14971_v59, 0.0  ;;  %v8690_v23 = vrot.slane %v8676_v33, %v14889_v13  ;;  %v8673_v47 = vrot.slane %v8659_v15, %v14889_v13  ;;  %v8709_v43 = vcombine.low %v14974_v58, %v14973_v8  ;;  %v14983_v59 = vld [vmem:[#allocation69_spill] sm:$0xff] }
 0x3af   : > { %v8881_v9 = vsel %vm2995_vm8, %v14972_v28, 0.0  ;;  %v8857_v25 = vadd.f32 %v8856_v48, %v8855_v12  ;;  %v8858_v22 = vsel %vm2995_vm8, %v8555_v40, 0.0  ;;  %v14975_v24 = vcombine.low %v14088_v11, %v14071_v26  ;;  %v14979_v11 = vld [vmem:[#allocation58_spill] sm:$0xff]  ;;  %v14984_v48 = vld [vmem:[#allocation73_spill] sm:$0xff] }
 0x3b0   : > { %v8882_v51 = vadd.f32 %v8881_v9, %v8880_v29  ;;  %v8683_v55 = vrot.slane %v8675_v63, %v14889_v13  ;;  %v8693_v52 = vcombine.low %v14977_v31, %v14976_v35  ;;  %v8657_v62 = vcombine.low %v8649_v56, %v8656_v6  ;;  %v14981_v12 = vld [vmem:[#allocation66_spill] sm:$0xff]  ;;  %v14982_v29 = vld [vmem:[#allocation65_spill] sm:$0xff] }
 0x3b1   : > { %v8883_v36 = vsel %vm2995_vm8, %v14975_v24, 0.0  ;;  %v8859_v33 = vadd.f32 %v8858_v22, %v8857_v25  ;;  %v8724_v15 = vrot.slane %v8710_v27, %v14889_v13  ;;  %v8860_v0 = vsel %vm2995_vm8, %v8589_v20, 0.0  ;;  %v14985_v25 = vld [vmem:[#allocation35_spill] sm:$0xff]  ;;  %v14988_v24 = vld [vmem:[#allocation70_spill] sm:$0xff] }
 0x3b2   : > { %v8884_v34 = vadd.f32 %v8883_v36, %v8882_v51  ;;  %v14978_v40 = vcombine.low %v14100_v7, %v14080_v16  ;;  %v8691_v26 = vcombine.low %v8683_v55, %v8690_v23  ;;  %v8692_v17 = vcombine.low %v14980_v5, %v14979_v11  ;;  %v14986_v51 = vld [vmem:[#allocation74_spill] sm:$0xff]  ;;  %v14987_v22 = vld [vmem:[#allocation71_spill] sm:$0xff] }
 0x3b3   : > { %v8861_v41 = vadd.f32 %v8860_v0, %v8859_v33  ;;  %v8717_v63 = vrot.slane %v8709_v43, %v14889_v13  ;;  %v8727_v56 = vcombine.low %v14982_v29, %v14981_v12  ;;  %v8862_v6 = vsel %vm2995_vm8, %v8623_v3, 0.0 }
 0x3b4   : > { %v8885_v30 = vsel %vm2995_vm8, %v14978_v40, 0.0  ;;  %v8887_v16 = vsel %vm2995_vm8, %v8538_v57, 0.0  ;;  %v8666_v7 = vrot.slane %v8658_v60, %v14889_v13  ;;  %v8707_v20 = vrot.slane %v8693_v52, %v14889_v13 }
 0x3b5   : > { %v8886_v10 = vadd.f32 %v8885_v30, %v8884_v34  ;;  %v8863_v46 = vadd.f32 %v8862_v6, %v8861_v41  ;;  %v8725_v27 = vcombine.low %v8717_v63, %v8724_v15  ;;  %v8726_v28 = vcombine.low %v14984_v48, %v14983_v59 }
 0x3b6   : > { %v8864_v9 = vsel %vm2995_vm8, %v8657_v62, 0.0  ;;  %v8889_v3 = vsel %vm2995_vm8, %v8572_v49, 0.0  ;;  %v8674_v32 = vcombine.low %v8666_v7, %v8673_v47  ;;  %v8700_v57 = vrot.slane %v8692_v17, %v14889_v13 }
 0x3b7   : > { %v8888_v1 = vadd.f32 %v8887_v16, %v8886_v10  ;;  %v8865_v18 = vadd.f32 %v8864_v9, %v8863_v46  ;;  %v8741_v23 = vrot.slane %v8727_v56, %v14889_v13  ;;  %v8795_v8 = vcombine.low %v14986_v51, %v14985_v25 }
 0x3b8   : > { %v8866_v58 = vsel %vm2995_vm8, %v8691_v26, 0.0  ;;  %v8891_v43 = vsel %vm2995_vm8, %v8606_v44, 0.0  ;;  %v8708_v21 = vcombine.low %v8700_v57, %v8707_v20  ;;  %v8734_v47 = vrot.slane %v8726_v28, %v14889_v13 }
 0x3b9   : > { %v8890_v60 = vadd.f32 %v8889_v3, %v8888_v1  ;;  %v8867_v2 = vadd.f32 %v8866_v58, %v8865_v18  ;;  %v8794_v36 = vcombine.low %v14988_v24, %v14987_v22  ;;  %v8868_v55 = vsel %vm2995_vm8, %v8725_v27, 0.0 }
 0x3ba   : > { %v8893_v35 = vsel %vm2995_vm8, %v8640_v61, 0.0  ;;  %v8742_v33 = vcombine.low %v8734_v47, %v8741_v23  ;;  %v8809_v34 = vrot.slane %v8795_v8, %v14889_v13  ;;  %v8870_v37 = vsel %vm2995_vm8, %v8759_v19, 0.0 }
 0x3bb   : > { %v8892_v49 = vadd.f32 %v8891_v43, %v8890_v60  ;;  %v8869_v31 = vadd.f32 %v8868_v55, %v8867_v2  ;;  %v8895_v39 = vsel %vm2995_vm8, %v8674_v32, 0.0  ;;  %v8802_v15 = vrot.slane %v8794_v36, %v14889_v13 }
 0x3bc   : > { %v8872_v61 = vsel %vm2995_vm8, %v8793_v42, 0.0  ;;  %v8897_v0 = vsel %vm2995_vm8, %v8708_v21, 0.0  ;;  %v8899_v14 = vsel %vm2995_vm8, %v8742_v33, 0.0  ;;  %v8901_v19 = vsel %vm2995_vm8, %v8776_v4, 0.0 }
 0x3bd   : > { %v8894_v52 = vadd.f32 %v8893_v35, %v8892_v49  ;;  %v8871_v44 = vadd.f32 %v8870_v37, %v8869_v31  ;;  %v8810_v26 = vcombine.low %v8802_v15, %v8809_v34 }
 0x3bf   : > { %v8896_v62 = vadd.f32 %v8895_v39, %v8894_v52  ;;  %v8873_v40 = vadd.f32 %v8872_v61, %v8871_v44  ;;  %v8903_v11 = vsel %vm2995_vm8, %v8810_v26, 0.0 }
 0x3c1   : > { %v8898_v30 = vadd.f32 %v8897_v0, %v8896_v62  ;;  %v8905_v54 = vsel %vm2995_vm8, %v8873_v40, 0.0 }
 0x3c3   : > { %v8900_v50 = vadd.f32 %v8899_v14, %v8898_v30 }
 0x3c5   : > { %v8902_v13 = vadd.f32 %v8901_v19, %v8900_v50 }
 0x3c7   : > { %v8904_v45 = vadd.f32 %v8903_v11, %v8902_v13 }
 0x3c9   : > { %v8906_v42 = vsel %vm2995_vm8, %v8904_v45, 0.0 }
 0x3ca   : > { %v8907_v5 = vadd.f32 %v8906_v42, %v8905_v54 }
 0x3cc   : > { %v8908_v17 = vrot.slane %v8907_v5, 4 }
 0x3ce   : > { %v8909_v41 = vadd.f32 %v8908_v17, %v8907_v5 }
 0x3d0   : > { %v8910_v10 = vrot.slane %v8909_v41, 2 }
 0x3d2   : > { %v8911_v63 = vadd.f32 %v8910_v10, %v8909_v41 }
 0x3d4   : > { %v8912_v12 = vrot.slane %v8911_v63, 1 }
 0x3d6   : > { %v8913_v38 = vadd.f32 %v8912_v12, %v8911_v63 }
 0x3d8   : > { %8915 = vst.msk [vmem:[%s366_s13] sm:$0xff] %vm2995_vm8, %v8913_v38 }
 0x3d9 PF: > { %s18_s26 = sadd.s32 1, %s10532_s26   ;;  %s14989_s24 = smov %s10528_s25 }
 0x3da   : > { %p15_p5 = scmp.ge.s32.totalorder %s18_s26, 4   ;;  %s14990_s25 = smov %s14992_s27 }
 0x3dc   :  { %17 = sbr.rel (!%p15_p5) target bundleno = 2 (0x2), region = 112 }

</bundles_post_ra>
